<compile_context>
chip_gen: v5e
topology: v5e:2x2
jax: 0.10.0
libtpu: 0.0.40
codegen_flags: <defaults>
</compile_context>

<pallas_src>
import functools

import jax
import jax.numpy as jnp
from jax.experimental import pallas as pl
from jax.experimental.pallas import tpu as pltpu


# Set to jnp.bfloat16 on v6e/v7x for full-rate MXU input (f32 accumulation is kept via
# preferred_element_type); float32 preserves the reference numerics exactly.
MXU_INPUT_DTYPE = jnp.float32


def _mm(a, b):
    """MXU matmul with f32 accumulation (operand dtype selectable for v6e/v7x bf16 feed)."""
    return jnp.dot(a.astype(MXU_INPUT_DTYPE), b.astype(MXU_INPUT_DTYPE),
                   preferred_element_type=jnp.float32)


def _softmax_cols(x):
    """Softmax over axis 0 (rows / sublanes); reciprocal on the EUP."""
    x = x - jnp.max(x, axis=0, keepdims=True)
    e = jnp.exp(x)
    return e * pl.reciprocal(jnp.sum(e, axis=0, keepdims=True), approx=True)


def _softmax_rows(x):
    """Softmax over axis 1 (lanes); reciprocal on the EUP."""
    x = x - jnp.max(x, axis=1, keepdims=True)
    e = jnp.exp(x)
    return e * pl.reciprocal(jnp.sum(e, axis=1, keepdims=True), approx=True)


def _conv3x3_im2col(xp, H, W, w, b):
    """3x3 conv (stride 1) as ONE im2col matmul.

    xp: (M, H+2, W+2, Cin) zero-padded NHWC value.
    w : (9*Cin, Cout) tap-major ((dy*3+dx)*Cin + cin) im2col weights.
    b : (1, Cout).
    Returns (M*H*W, Cout) float32 rows ordered (m, h, w).
    """
    M = xp.shape[0]
    Cin = xp.shape[-1]
    cols = [xp[:, dy:dy + H, dx:dx + W, :].reshape(M * H * W, Cin)
            for dy in range(3) for dx in range(3)]
    slab = jnp.concatenate(cols, axis=-1)            # (M*H*W, 9*Cin)
    return _mm(slab, w) + b


# ---------------------------------------------------------------------------
# Kernel 1: conv_first + LeakyReLU + ResidualBlock_noBN stack (fully fused)
# ---------------------------------------------------------------------------

def _features_kernel(x_ref, wcf_ref, bcf_ref, w1_ref, b1_ref, w2_ref, b2_ref,
                     o_ref, pad_in_ref, pad_f_ref, *, H, W, nf, n_rb):
    Nb = x_ref.shape[0]                              # frames in this block
    HW = H * W

    # conv_first + LeakyReLU(0.1); padding done in VMEM scratch, never in HBM.
    pad_in_ref[...] = jnp.zeros_like(pad_in_ref)
    pad_in_ref[:, 1:H + 1, 1:W + 1, :] = x_ref[...]
    y = _conv3x3_im2col(pad_in_ref[...], H, W, wcf_ref[...], bcf_ref[...])   # (Nb*HW, nf)
    feat = jnp.where(y >= 0.0, y, 0.1 * y)

    # ResidualBlock_noBN x n_rb : feat = feat + conv2(relu(conv1(feat)))
    pad_f_ref[...] = jnp.zeros_like(pad_f_ref)
    for r in range(n_rb):
        pad_f_ref[:, 1:H + 1, 1:W + 1, :] = feat.reshape(Nb, H, W, nf)
        hid = _conv3x3_im2col(pad_f_ref[...], H, W, w1_ref[r], b1_ref[r])
        hid = jnp.maximum(hid, 0.0)
        pad_f_ref[:, 1:H + 1, 1:W + 1, :] = hid.reshape(Nb, H, W, nf)
        feat = feat + _conv3x3_im2col(pad_f_ref[...], H, W, w2_ref[r], b2_ref[r])

    # Row-major (length, channels) output: (frames, HW, nf) — consumed as-is by kernel 2.
    o_ref[...] = feat.reshape(Nb, HW, nf).astype(o_ref.dtype)


def extract_features(x_nhwc, p, *, B, N, H, W, nf):
    """x_nhwc: (B*N, H, W, Cin)  ->  feat: (B*N, H*W, nf)."""
    Cin = x_nhwc.shape[-1]
    n_rb = p["w1"].shape[0]
    kern = functools.partial(_features_kernel, H=H, W=W, nf=nf, n_rb=n_rb)

    def cspec(a):
        return pl.BlockSpec(a.shape, lambda b: (0,) * a.ndim)

    return pl.pallas_call(
        kern,
        out_shape=jax.ShapeDtypeStruct((B * N, H * W, nf), jnp.float32),
        grid=(B,),
        in_specs=[
            pl.BlockSpec((N, H, W, Cin), lambda b: (b, 0, 0, 0)),
            cspec(p["wcf"]), cspec(p["bcf"]),
            cspec(p["w1"]), cspec(p["b1"]), cspec(p["w2"]), cspec(p["b2"]),
        ],
        out_specs=pl.BlockSpec((N, H * W, nf), lambda b: (b, 0, 0)),
        scratch_shapes=[
            pltpu.VMEM((N, H + 2, W + 2, Cin), jnp.float32),
            pltpu.VMEM((N, H + 2, W + 2, nf), jnp.float32),
        ],
        compiler_params=pltpu.CompilerParams(dimension_semantics=("parallel",)),
    )(x_nhwc, p["wcf"], p["bcf"], p["w1"], p["b1"], p["w2"], p["b2"])


# ---------------------------------------------------------------------------
# Kernel 2: StaticTokenizer -> StaticTransformers -> StaticProjector -> conv3x3_1
# (fully fused; tokens never touch HBM)
# ---------------------------------------------------------------------------

def _token_path_kernel(feat_b_ref, feat_all_ref,
                       wtc_ref, btc_ref, wtv_ref, btv_ref, wp_ref, bp_ref,
                       wf1_ref, wf2_ref, bf_ref,
                       wfa_ref, bfa_ref, wk_ref, bk_ref, wq_ref, bq_ref,
                       wvt_ref, bvt_ref, wl_ref, bl_ref,
                       pk_ref, pbk_ref, pq_ref, pbq_ref, pv_ref, pbv_ref,
                       w31_ref, b31_ref,
                       o_ref, pad_ref, *, B, N, G, H, W):
    HW = H * W
    nf = feat_b_ref.shape[-1]
    b = pl.program_id(0)

    # ------------------- StaticTokenizer (batched over the N frames) --------------------
    X = feat_b_ref[...].reshape(N * HW, nf)                       # (N*HW, nf)
    A = _mm(X, wtc_ref[...]) + btc_ref[...]                       # (N*HW, L)
    V = _mm(X, wtv_ref[...]) + btv_ref[...]                       # (N*HW, nf)

    toks = []                                                     # per frame: (L, CT)
    for n in range(N):
        An = _softmax_cols(A[n * HW:(n + 1) * HW, :])             # softmax over HW
        At = An.T                                                 # (L, HW)
        tok_t = _mm(At, V[n * HW:(n + 1) * HW, :])                # (L, nf)
        pos_t = _mm(At, wp_ref[...]) + bp_ref[...]                # (L, Cp)  (PosEncoder, identity resize)
        toks.append(_mm(tok_t, wf1_ref[...]) + _mm(pos_t, wf2_ref[...]) + bf_ref[...])

    center_T = toks[N // 2]                                       # (L, CT)
    tot_T = jnp.concatenate(toks, axis=0)                         # (N*L, CT), n-major rows

    # --------------- StaticTransformer (per group) + StaticProjector --------------------
    pad_ref[...] = jnp.zeros_like(pad_ref)
    for g in range(G):
        coef = _mm(center_T, wfa_ref[g]) + bfa_ref[g]             # (L, N*L)
        coef = _softmax_rows(coef)                                # softmax over N*L
        inter = center_T + _mm(coef, tot_T)                       # (L, CT), single dot fusion

        kT = _mm(inter, wk_ref[g]) + bk_ref[g]                    # (L, CT//2)
        qT = _mm(inter, wq_ref[g]) + bq_ref[g]                    # (L, CT//2)
        vT = _mm(inter, wvt_ref[g]) + bvt_ref[g]                  # (L, CT)
        kq = _mm(kT, qT.T)                                        # (L, L)
        kq = _softmax_cols(kq)                                    # softmax over dim=1 of (B,L,L)
        kqvT = _mm(kq.T, vT) + center_T                           # (L, CT)
        gtokT = center_T + _mm(kqvT, wl_ref[g]) + bl_ref[g]       # (L, CT)

        # Projector: feature batch index follows PyTorch's .repeat() pairing exactly.
        fb = (b * G + g) % B
        Xc = feat_all_ref[fb * N + N // 2]                        # (HW, nf), dynamic VMEM index
        k_p = _mm(gtokT, pk_ref[...]) + pbk_ref[...]              # (L, nf)
        q_p = _mm(Xc, pq_ref[...]) + pbq_ref[...]                 # (HW, nf)
        kq_p = _softmax_rows(_mm(q_p, k_p.T))                     # (HW, L), softmax over L
        v_p = _mm(gtokT, pv_ref[...]) + pbv_ref[...]              # (L, nf)
        proj = Xc + _mm(kq_p, v_p)                                # (HW, nf)

        pad_ref[g, 1:H + 1, 1:W + 1, :] = proj.reshape(H, W, nf)

    # ------------------------------- conv3x3_1 (batched over G) -------------------------
    out = _conv3x3_im2col(pad_ref[...], H, W, w31_ref[...], b31_ref[...])   # (G*HW, nf)
    o_ref[...] = out.reshape(G, HW, nf).astype(o_ref.dtype)


def token_path(feat, p_tok, p_tr, p_proj, w31, b31, *, B, N, G, H, W, nf):
    """feat: (B*N, HW, nf)  ->  state1 rows (B*G, HW, nf) (index = b*G + g)."""
    HW = H * W
    kern = functools.partial(_token_path_kernel, B=B, N=N, G=G, H=H, W=W)

    def cspec(a):
        return pl.BlockSpec(a.shape, lambda b: (0,) * a.ndim)

    consts = [p_tok["wtc"], p_tok["btc"], p_tok["wv"], p_tok["bv"],
              p_tok["wp"], p_tok["bp"], p_tok["wf1"], p_tok["wf2"], p_tok["bf"],
              p_tr["wfa"], p_tr["bfa"], p_tr["wk"], p_tr["bk"], p_tr["wq"], p_tr["bq"],
              p_tr["wv"], p_tr["bv"], p_tr["wl"], p_tr["bl"],
              p_proj["wk"], p_proj["bk"], p_proj["wq"], p_proj["bq"],
              p_proj["wv"], p_proj["bv"], w31, b31]

    return pl.pallas_call(
        kern,
        out_shape=jax.ShapeDtypeStruct((B * G, HW, nf), jnp.float32),
        grid=(B,),
        in_specs=[pl.BlockSpec((N, HW, nf), lambda b: (b, 0, 0)),   # frames of batch b
                  cspec(feat)] + [cspec(a) for a in consts],        # full feat for projector pairing
        out_specs=pl.BlockSpec((G, HW, nf), lambda b: (b, 0, 0)),
        scratch_shapes=[pltpu.VMEM((G, H + 2, W + 2, nf), jnp.float32)],
        compiler_params=pltpu.CompilerParams(dimension_semantics=("parallel",)),
    )(feat, feat, *consts)


# ---------------------------------------------------------------------------
# Parameter init (deterministic, synthetic; stored directly in kernel layouts)
# ---------------------------------------------------------------------------

def _rand(key, shape, scale=0.1):
    return (scale * jax.random.normal(key, shape)).astype(jnp.float32)


def init_params(key, *, nf, nframes, groups, front_RBs, L, Cp, CT, H, W):
    keys = iter(jax.random.split(key, 64))
    nxt = lambda: next(keys)
    HW = H * W
    NL = nframes * L
    CTh = CT // 2
    p = {}
    # 3x3 convs in im2col layout (9*Cin, Cout); 1x1 convs / Conv1d transposed to (Cin, Cout).
    p["feat"] = {
        "wcf": _rand(nxt(), (9 * 3, nf)), "bcf": _rand(nxt(), (1, nf), 0.01),
        "w1": _rand(nxt(), (front_RBs, 9 * nf, nf)), "b1": _rand(nxt(), (front_RBs, 1, nf), 0.01),
        "w2": _rand(nxt(), (front_RBs, 9 * nf, nf)), "b2": _rand(nxt(), (front_RBs, 1, nf), 0.01),
    }
    p["tok"] = {
        "wtc": _rand(nxt(), (nf, L)), "btc": _rand(nxt(), (1, L), 0.01),
        "wv": _rand(nxt(), (nf, nf)), "bv": _rand(nxt(), (1, nf), 0.01),
        "wp": _rand(nxt(), (HW, Cp)), "bp": _rand(nxt(), (1, Cp), 0.01),
        "wf1": _rand(nxt(), (nf, CT)), "wf2": _rand(nxt(), (Cp, CT)),
        "bf": _rand(nxt(), (1, CT), 0.01),
    }
    p["trans"] = {
        "wfa": _rand(nxt(), (groups, CT, NL)), "bfa": _rand(nxt(), (groups, 1, NL), 0.01),
        "wk": _rand(nxt(), (groups, CT, CTh)), "bk": _rand(nxt(), (groups, 1, CTh), 0.01),
        "wq": _rand(nxt(), (groups, CT, CTh)), "bq": _rand(nxt(), (groups, 1, CTh), 0.01),
        "wv": _rand(nxt(), (groups, CT, CT)), "bv": _rand(nxt(), (groups, 1, CT), 0.01),
        "wl": _rand(nxt(), (groups, CT, CT)), "bl": _rand(nxt(), (groups, 1, CT), 0.01),
    }
    p["proj"] = {
        "wk": _rand(nxt(), (CT, nf)), "bk": _rand(nxt(), (1, nf), 0.01),
        "wq": _rand(nxt(), (nf, nf)), "bq": _rand(nxt(), (1, nf), 0.01),
        "wv": _rand(nxt(), (CT, nf)), "bv": _rand(nxt(), (1, nf), 0.01),
    }
    p["conv31_w"] = _rand(nxt(), (9 * nf, nf))
    p["conv31_b"] = _rand(nxt(), (1, nf), 0.01)
    return p


# ---------------------------------------------------------------------------
# Full forward pass (two fused Pallas kernels + boundary layout plumbing)
# ---------------------------------------------------------------------------

def transformer_v0_forward(x, params, *, nf, groups):
    B, N, C, H, W = x.shape

    # NCHW -> channels-last once at the model boundary (tiny input).
    x_nhwc = jnp.transpose(x.reshape(B * N, C, H, W), (0, 2, 3, 1))

    # conv_first + lrelu + feature_extraction (one fused kernel, grid over B).
    feat = extract_features(x_nhwc, params["feat"], B=B, N=N, H=H, W=W, nf=nf)

    # tokenizer -> transformers -> projector -> conv3x3_1 (one fused kernel, grid over B).
    state1 = token_path(feat, params["tok"], params["trans"], params["proj"],
                        params["conv31_w"], params["conv31_b"],
                        B=B, N=N, G=groups, H=H, W=W, nf=nf)

    # (B*G, HW, nf) row-major -> (B, G, nf, H, W) at the model boundary.
    return jnp.transpose(state1.reshape(B, groups, H, W, nf), (0, 1, 4, 2, 3))


# ---------------------------------------------------------------------------
# Main
# ---------------------------------------------------------------------------

if __name__ == "__main__":
    # Small, consistent hyperparameters (center frame = N // 2).
    B, N = 2, 3
    Cin, H, W = 3, 8, 8
    nf, groups, front_RBs = 8, 2, 1
    L, Cp, CT = 4, 8, 16
    # input_size == (H, W) so PosEncoder's bilinear interpolate is the identity.

    key = jax.random.PRNGKey(0)
    k_x, k_p = jax.random.split(key)
    x = jax.random.normal(k_x, (B, N, Cin, H, W), jnp.float32)
    params = init_params(k_p, nf=nf, nframes=N, groups=groups, front_RBs=front_RBs,
                         L=L, Cp=Cp, CT=CT, H=H, W=W)

    fwd = jax.jit(functools.partial(transformer_v0_forward, nf=nf, groups=groups))
    out = jax.block_until_ready(fwd(x, params))
    assert out.shape == (B, groups, nf, H, W)
    assert bool(jnp.all(jnp.isfinite(out)))
    print("KERNEL_OK")
</pallas_src>

<mosaic_0001>
module attributes {stable_mosaic.version = 11 : i64} {
  func.func @_features_kernel(%arg0: i32, %arg1: memref<3x8x8x3xf32, #tpu.memory_space<vmem>>, %arg2: memref<27x8xf32, #tpu.memory_space<vmem>>, %arg3: memref<1x8xf32, #tpu.memory_space<vmem>>, %arg4: memref<1x72x8xf32, #tpu.memory_space<vmem>>, %arg5: memref<1x1x8xf32, #tpu.memory_space<vmem>>, %arg6: memref<1x72x8xf32, #tpu.memory_space<vmem>>, %arg7: memref<1x1x8xf32, #tpu.memory_space<vmem>>, %arg8: memref<3x64x8xf32, #tpu.memory_space<vmem>>, %arg9: memref<3x10x10x3xf32, #tpu.memory_space<vmem>>, %arg10: memref<3x10x10x8xf32, #tpu.memory_space<vmem>>) attributes {dimension_semantics = [#tpu.dimension_semantics<parallel>], iteration_bounds = array<i64: 2>, scalar_prefetch = 0 : i64, scratch_operands = 2 : i64, tpu.core_type = #tpu.core_type<tc>, window_params = [{transform_indices = @transform_0, window_bounds = array<i64: 3, 8, 8, 3>}, {pipeline_mode = #tpu.pipeline_mode<synchronous>, transform_indices = @transform_1, window_bounds = array<i64: 27, 8>}, {pipeline_mode = #tpu.pipeline_mode<synchronous>, transform_indices = @transform_2, window_bounds = array<i64: 1, 8>}, {pipeline_mode = #tpu.pipeline_mode<synchronous>, transform_indices = @transform_3, window_bounds = array<i64: 1, 72, 8>}, {pipeline_mode = #tpu.pipeline_mode<synchronous>, transform_indices = @transform_4, window_bounds = array<i64: 1, 1, 8>}, {pipeline_mode = #tpu.pipeline_mode<synchronous>, transform_indices = @transform_5, window_bounds = array<i64: 1, 72, 8>}, {pipeline_mode = #tpu.pipeline_mode<synchronous>, transform_indices = @transform_6, window_bounds = array<i64: 1, 1, 8>}, {transform_indices = @transform_7, window_bounds = array<i64: 3, 64, 8>}]} {
    %cst = arith.constant 0.000000e+00 : f32
    %0 = vector.broadcast %cst : f32 to vector<3x10x10x3xf32>
    %c0 = arith.constant 0 : index
    %c0_0 = arith.constant 0 : index
    %c0_1 = arith.constant 0 : index
    %c0_2 = arith.constant 0 : index
    %1 = vector.load %arg9[%c0, %c0_0, %c0_1, %c0_2] : memref<3x10x10x3xf32, #tpu.memory_space<vmem>>, vector<3x10x10x3xf32>
    tpu.vector_store %arg9[%c0, %c0_0, %c0_1, %c0_2], %0 {strides = array<i32>} : memref<3x10x10x3xf32, #tpu.memory_space<vmem>>, vector<3x10x10x3xf32>,
    %c0_3 = arith.constant 0 : index
    %c0_4 = arith.constant 0 : index
    %c0_5 = arith.constant 0 : index
    %c0_6 = arith.constant 0 : index
    %2 = vector.load %arg1[%c0_3, %c0_4, %c0_5, %c0_6] : memref<3x8x8x3xf32, #tpu.memory_space<vmem>>, vector<3x8x8x3xf32>
    %c0_7 = arith.constant 0 : index
    %c1 = arith.constant 1 : index
    %c1_8 = arith.constant 1 : index
    %c0_9 = arith.constant 0 : index
    %3 = vector.load %arg9[%c0_7, %c1, %c1_8, %c0_9] : memref<3x10x10x3xf32, #tpu.memory_space<vmem>>, vector<3x8x8x3xf32>
    tpu.vector_store %arg9[%c0_7, %c1, %c1_8, %c0_9], %2 {strides = array<i32>} : memref<3x10x10x3xf32, #tpu.memory_space<vmem>>, vector<3x8x8x3xf32>,
    %c0_10 = arith.constant 0 : index
    %c0_11 = arith.constant 0 : index
    %c0_12 = arith.constant 0 : index
    %c0_13 = arith.constant 0 : index
    %4 = vector.load %arg9[%c0_10, %c0_11, %c0_12, %c0_13] : memref<3x10x10x3xf32, #tpu.memory_space<vmem>>, vector<3x10x10x3xf32>
    %c0_14 = arith.constant 0 : index
    %c0_15 = arith.constant 0 : index
    %5 = vector.load %arg2[%c0_14, %c0_15] : memref<27x8xf32, #tpu.memory_space<vmem>>, vector<27x8xf32>
    %c0_16 = arith.constant 0 : index
    %c0_17 = arith.constant 0 : index
    %6 = vector.load %arg3[%c0_16, %c0_17] : memref<1x8xf32, #tpu.memory_space<vmem>>, vector<1x8xf32>
    %7 = vector.extract_strided_slice %4 {offsets = [0, 0, 0, 0], sizes = [3, 8, 8, 3], strides = [1, 1, 1, 1]} : vector<3x10x10x3xf32> to vector<3x8x8x3xf32>
    %8 = vector.shape_cast %7 : vector<3x8x8x3xf32> to vector<192x3xf32>
    %9 = vector.extract_strided_slice %4 {offsets = [0, 0, 1, 0], sizes = [3, 8, 8, 3], strides = [1, 1, 1, 1]} : vector<3x10x10x3xf32> to vector<3x8x8x3xf32>
    %10 = vector.shape_cast %9 : vector<3x8x8x3xf32> to vector<192x3xf32>
    %11 = vector.extract_strided_slice %4 {offsets = [0, 0, 2, 0], sizes = [3, 8, 8, 3], strides = [1, 1, 1, 1]} : vector<3x10x10x3xf32> to vector<3x8x8x3xf32>
    %12 = vector.shape_cast %11 : vector<3x8x8x3xf32> to vector<192x3xf32>
    %13 = vector.extract_strided_slice %4 {offsets = [0, 1, 0, 0], sizes = [3, 8, 8, 3], strides = [1, 1, 1, 1]} : vector<3x10x10x3xf32> to vector<3x8x8x3xf32>
    %14 = vector.shape_cast %13 : vector<3x8x8x3xf32> to vector<192x3xf32>
    %15 = vector.extract_strided_slice %4 {offsets = [0, 1, 1, 0], sizes = [3, 8, 8, 3], strides = [1, 1, 1, 1]} : vector<3x10x10x3xf32> to vector<3x8x8x3xf32>
    %16 = vector.shape_cast %15 : vector<3x8x8x3xf32> to vector<192x3xf32>
    %17 = vector.extract_strided_slice %4 {offsets = [0, 1, 2, 0], sizes = [3, 8, 8, 3], strides = [1, 1, 1, 1]} : vector<3x10x10x3xf32> to vector<3x8x8x3xf32>
    %18 = vector.shape_cast %17 : vector<3x8x8x3xf32> to vector<192x3xf32>
    %19 = vector.extract_strided_slice %4 {offsets = [0, 2, 0, 0], sizes = [3, 8, 8, 3], strides = [1, 1, 1, 1]} : vector<3x10x10x3xf32> to vector<3x8x8x3xf32>
    %20 = vector.shape_cast %19 : vector<3x8x8x3xf32> to vector<192x3xf32>
    %21 = vector.extract_strided_slice %4 {offsets = [0, 2, 1, 0], sizes = [3, 8, 8, 3], strides = [1, 1, 1, 1]} : vector<3x10x10x3xf32> to vector<3x8x8x3xf32>
    %22 = vector.shape_cast %21 : vector<3x8x8x3xf32> to vector<192x3xf32>
    %23 = vector.extract_strided_slice %4 {offsets = [0, 2, 2, 0], sizes = [3, 8, 8, 3], strides = [1, 1, 1, 1]} : vector<3x10x10x3xf32> to vector<3x8x8x3xf32>
    %24 = vector.shape_cast %23 : vector<3x8x8x3xf32> to vector<192x3xf32>
    %25 = tpu.concatenate %8, %10, %12, %14, %16, %18, %20, %22, %24 in 1 : vector<192x3xf32>, vector<192x3xf32>, vector<192x3xf32>, vector<192x3xf32>, vector<192x3xf32>, vector<192x3xf32>, vector<192x3xf32>, vector<192x3xf32>, vector<192x3xf32> -> vector<192x27xf32>
    %cst_18 = arith.constant dense<0.000000e+00> : vector<192x8xf32>
    %26 = tpu.matmul %25, %5, %cst_18 {dimension_numbers = #tpu.dot_dimension_numbers<[1], [0], [0], [1], [0, 0, 1, 1], [], []>} : vector<192x27xf32>, vector<27x8xf32>, vector<192x8xf32> -> vector<192x8xf32>
    %27 = vector.broadcast %6 : vector<1x8xf32> to vector<192x8xf32>
    %28 = arith.addf %26, %27 : vector<192x8xf32>
    %cst_19 = arith.constant 0.000000e+00 : f32
    %29 = vector.broadcast %cst_19 : f32 to vector<192x8xf32>
    %30 = arith.cmpf oge, %28, %29 : vector<192x8xf32>
    %cst_20 = arith.constant 1.000000e-01 : f32
    %31 = vector.broadcast %cst_20 : f32 to vector<192x8xf32>
    %32 = arith.mulf %31, %28 : vector<192x8xf32>
    %33 = arith.select %30, %28, %32 : vector<192x8xi1>, vector<192x8xf32>
    %cst_21 = arith.constant 0.000000e+00 : f32
    %34 = vector.broadcast %cst_21 : f32 to vector<3x10x10x8xf32>
    %c0_22 = arith.constant 0 : index
    %c0_23 = arith.constant 0 : index
    %c0_24 = arith.constant 0 : index
    %c0_25 = arith.constant 0 : index
    %35 = vector.load %arg10[%c0_22, %c0_23, %c0_24, %c0_25] : memref<3x10x10x8xf32, #tpu.memory_space<vmem>>, vector<3x10x10x8xf32>
    tpu.vector_store %arg10[%c0_22, %c0_23, %c0_24, %c0_25], %34 {strides = array<i32>} : memref<3x10x10x8xf32, #tpu.memory_space<vmem>>, vector<3x10x10x8xf32>,
    %36 = vector.shape_cast %33 : vector<192x8xf32> to vector<3x8x8x8xf32>
    %c0_26 = arith.constant 0 : index
    %c1_27 = arith.constant 1 : index
    %c1_28 = arith.constant 1 : index
    %c0_29 = arith.constant 0 : index
    %37 = vector.load %arg10[%c0_26, %c1_27, %c1_28, %c0_29] : memref<3x10x10x8xf32, #tpu.memory_space<vmem>>, vector<3x8x8x8xf32>
    tpu.vector_store %arg10[%c0_26, %c1_27, %c1_28, %c0_29], %36 {strides = array<i32>} : memref<3x10x10x8xf32, #tpu.memory_space<vmem>>, vector<3x8x8x8xf32>,
    %c0_30 = arith.constant 0 : index
    %c0_31 = arith.constant 0 : index
    %c0_32 = arith.constant 0 : index
    %c0_33 = arith.constant 0 : index
    %38 = vector.load %arg10[%c0_30, %c0_31, %c0_32, %c0_33] : memref<3x10x10x8xf32, #tpu.memory_space<vmem>>, vector<3x10x10x8xf32>
    %c0_34 = arith.constant 0 : index
    %c0_35 = arith.constant 0 : index
    %c0_36 = arith.constant 0 : index
    %39 = vector.load %arg4[%c0_34, %c0_35, %c0_36] : memref<1x72x8xf32, #tpu.memory_space<vmem>>, vector<1x72x8xf32>
    %40 = vector.shape_cast %39 : vector<1x72x8xf32> to vector<72x8xf32>
    %c0_37 = arith.constant 0 : index
    %c0_38 = arith.constant 0 : index
    %c0_39 = arith.constant 0 : index
    %41 = vector.load %arg5[%c0_37, %c0_38, %c0_39] : memref<1x1x8xf32, #tpu.memory_space<vmem>>, vector<1x1x8xf32>
    %42 = vector.shape_cast %41 : vector<1x1x8xf32> to vector<1x8xf32>
    %43 = vector.extract_strided_slice %38 {offsets = [0, 0, 0, 0], sizes = [3, 8, 8, 8], strides = [1, 1, 1, 1]} : vector<3x10x10x8xf32> to vector<3x8x8x8xf32>
    %44 = vector.shape_cast %43 : vector<3x8x8x8xf32> to vector<192x8xf32>
    %45 = vector.extract_strided_slice %38 {offsets = [0, 0, 1, 0], sizes = [3, 8, 8, 8], strides = [1, 1, 1, 1]} : vector<3x10x10x8xf32> to vector<3x8x8x8xf32>
    %46 = vector.shape_cast %45 : vector<3x8x8x8xf32> to vector<192x8xf32>
    %47 = vector.extract_strided_slice %38 {offsets = [0, 0, 2, 0], sizes = [3, 8, 8, 8], strides = [1, 1, 1, 1]} : vector<3x10x10x8xf32> to vector<3x8x8x8xf32>
    %48 = vector.shape_cast %47 : vector<3x8x8x8xf32> to vector<192x8xf32>
    %49 = vector.extract_strided_slice %38 {offsets = [0, 1, 0, 0], sizes = [3, 8, 8, 8], strides = [1, 1, 1, 1]} : vector<3x10x10x8xf32> to vector<3x8x8x8xf32>
    %50 = vector.shape_cast %49 : vector<3x8x8x8xf32> to vector<192x8xf32>
    %51 = vector.extract_strided_slice %38 {offsets = [0, 1, 1, 0], sizes = [3, 8, 8, 8], strides = [1, 1, 1, 1]} : vector<3x10x10x8xf32> to vector<3x8x8x8xf32>
    %52 = vector.shape_cast %51 : vector<3x8x8x8xf32> to vector<192x8xf32>
    %53 = vector.extract_strided_slice %38 {offsets = [0, 1, 2, 0], sizes = [3, 8, 8, 8], strides = [1, 1, 1, 1]} : vector<3x10x10x8xf32> to vector<3x8x8x8xf32>
    %54 = vector.shape_cast %53 : vector<3x8x8x8xf32> to vector<192x8xf32>
    %55 = vector.extract_strided_slice %38 {offsets = [0, 2, 0, 0], sizes = [3, 8, 8, 8], strides = [1, 1, 1, 1]} : vector<3x10x10x8xf32> to vector<3x8x8x8xf32>
    %56 = vector.shape_cast %55 : vector<3x8x8x8xf32> to vector<192x8xf32>
    %57 = vector.extract_strided_slice %38 {offsets = [0, 2, 1, 0], sizes = [3, 8, 8, 8], strides = [1, 1, 1, 1]} : vector<3x10x10x8xf32> to vector<3x8x8x8xf32>
    %58 = vector.shape_cast %57 : vector<3x8x8x8xf32> to vector<192x8xf32>
    %59 = vector.extract_strided_slice %38 {offsets = [0, 2, 2, 0], sizes = [3, 8, 8, 8], strides = [1, 1, 1, 1]} : vector<3x10x10x8xf32> to vector<3x8x8x8xf32>
    %60 = vector.shape_cast %59 : vector<3x8x8x8xf32> to vector<192x8xf32>
    %61 = tpu.concatenate %44, %46, %48, %50, %52, %54, %56, %58, %60 in 1 : vector<192x8xf32>, vector<192x8xf32>, vector<192x8xf32>, vector<192x8xf32>, vector<192x8xf32>, vector<192x8xf32>, vector<192x8xf32>, vector<192x8xf32>, vector<192x8xf32> -> vector<192x72xf32>
    %cst_40 = arith.constant dense<0.000000e+00> : vector<192x8xf32>
    %62 = tpu.matmul %61, %40, %cst_40 {dimension_numbers = #tpu.dot_dimension_numbers<[1], [0], [0], [1], [0, 0, 1, 1], [], []>} : vector<192x72xf32>, vector<72x8xf32>, vector<192x8xf32> -> vector<192x8xf32>
    %63 = vector.broadcast %42 : vector<1x8xf32> to vector<192x8xf32>
    %64 = arith.addf %62, %63 : vector<192x8xf32>
    %cst_41 = arith.constant 0.000000e+00 : f32
    %65 = vector.broadcast %cst_41 : f32 to vector<192x8xf32>
    %66 = arith.maximumf %64, %65 : vector<192x8xf32>
    %67 = vector.shape_cast %66 : vector<192x8xf32> to vector<3x8x8x8xf32>
    %c0_42 = arith.constant 0 : index
    %c1_43 = arith.constant 1 : index
    %c1_44 = arith.constant 1 : index
    %c0_45 = arith.constant 0 : index
    %68 = vector.load %arg10[%c0_42, %c1_43, %c1_44, %c0_45] : memref<3x10x10x8xf32, #tpu.memory_space<vmem>>, vector<3x8x8x8xf32>
    tpu.vector_store %arg10[%c0_42, %c1_43, %c1_44, %c0_45], %67 {strides = array<i32>} : memref<3x10x10x8xf32, #tpu.memory_space<vmem>>, vector<3x8x8x8xf32>,
    %c0_46 = arith.constant 0 : index
    %c0_47 = arith.constant 0 : index
    %c0_48 = arith.constant 0 : index
    %c0_49 = arith.constant 0 : index
    %69 = vector.load %arg10[%c0_46, %c0_47, %c0_48, %c0_49] : memref<3x10x10x8xf32, #tpu.memory_space<vmem>>, vector<3x10x10x8xf32>
    %c0_50 = arith.constant 0 : index
    %c0_51 = arith.constant 0 : index
    %c0_52 = arith.constant 0 : index
    %70 = vector.load %arg6[%c0_50, %c0_51, %c0_52] : memref<1x72x8xf32, #tpu.memory_space<vmem>>, vector<1x72x8xf32>
    %71 = vector.shape_cast %70 : vector<1x72x8xf32> to vector<72x8xf32>
    %c0_53 = arith.constant 0 : index
    %c0_54 = arith.constant 0 : index
    %c0_55 = arith.constant 0 : index
    %72 = vector.load %arg7[%c0_53, %c0_54, %c0_55] : memref<1x1x8xf32, #tpu.memory_space<vmem>>, vector<1x1x8xf32>
    %73 = vector.shape_cast %72 : vector<1x1x8xf32> to vector<1x8xf32>
    %74 = vector.extract_strided_slice %69 {offsets = [0, 0, 0, 0], sizes = [3, 8, 8, 8], strides = [1, 1, 1, 1]} : vector<3x10x10x8xf32> to vector<3x8x8x8xf32>
    %75 = vector.shape_cast %74 : vector<3x8x8x8xf32> to vector<192x8xf32>
    %76 = vector.extract_strided_slice %69 {offsets = [0, 0, 1, 0], sizes = [3, 8, 8, 8], strides = [1, 1, 1, 1]} : vector<3x10x10x8xf32> to vector<3x8x8x8xf32>
    %77 = vector.shape_cast %76 : vector<3x8x8x8xf32> to vector<192x8xf32>
    %78 = vector.extract_strided_slice %69 {offsets = [0, 0, 2, 0], sizes = [3, 8, 8, 8], strides = [1, 1, 1, 1]} : vector<3x10x10x8xf32> to vector<3x8x8x8xf32>
    %79 = vector.shape_cast %78 : vector<3x8x8x8xf32> to vector<192x8xf32>
    %80 = vector.extract_strided_slice %69 {offsets = [0, 1, 0, 0], sizes = [3, 8, 8, 8], strides = [1, 1, 1, 1]} : vector<3x10x10x8xf32> to vector<3x8x8x8xf32>
    %81 = vector.shape_cast %80 : vector<3x8x8x8xf32> to vector<192x8xf32>
    %82 = vector.extract_strided_slice %69 {offsets = [0, 1, 1, 0], sizes = [3, 8, 8, 8], strides = [1, 1, 1, 1]} : vector<3x10x10x8xf32> to vector<3x8x8x8xf32>
    %83 = vector.shape_cast %82 : vector<3x8x8x8xf32> to vector<192x8xf32>
    %84 = vector.extract_strided_slice %69 {offsets = [0, 1, 2, 0], sizes = [3, 8, 8, 8], strides = [1, 1, 1, 1]} : vector<3x10x10x8xf32> to vector<3x8x8x8xf32>
    %85 = vector.shape_cast %84 : vector<3x8x8x8xf32> to vector<192x8xf32>
    %86 = vector.extract_strided_slice %69 {offsets = [0, 2, 0, 0], sizes = [3, 8, 8, 8], strides = [1, 1, 1, 1]} : vector<3x10x10x8xf32> to vector<3x8x8x8xf32>
    %87 = vector.shape_cast %86 : vector<3x8x8x8xf32> to vector<192x8xf32>
    %88 = vector.extract_strided_slice %69 {offsets = [0, 2, 1, 0], sizes = [3, 8, 8, 8], strides = [1, 1, 1, 1]} : vector<3x10x10x8xf32> to vector<3x8x8x8xf32>
    %89 = vector.shape_cast %88 : vector<3x8x8x8xf32> to vector<192x8xf32>
    %90 = vector.extract_strided_slice %69 {offsets = [0, 2, 2, 0], sizes = [3, 8, 8, 8], strides = [1, 1, 1, 1]} : vector<3x10x10x8xf32> to vector<3x8x8x8xf32>
    %91 = vector.shape_cast %90 : vector<3x8x8x8xf32> to vector<192x8xf32>
    %92 = tpu.concatenate %75, %77, %79, %81, %83, %85, %87, %89, %91 in 1 : vector<192x8xf32>, vector<192x8xf32>, vector<192x8xf32>, vector<192x8xf32>, vector<192x8xf32>, vector<192x8xf32>, vector<192x8xf32>, vector<192x8xf32>, vector<192x8xf32> -> vector<192x72xf32>
    %cst_56 = arith.constant dense<0.000000e+00> : vector<192x8xf32>
    %93 = tpu.matmul %92, %71, %cst_56 {dimension_numbers = #tpu.dot_dimension_numbers<[1], [0], [0], [1], [0, 0, 1, 1], [], []>} : vector<192x72xf32>, vector<72x8xf32>, vector<192x8xf32> -> vector<192x8xf32>
    %94 = vector.broadcast %73 : vector<1x8xf32> to vector<192x8xf32>
    %95 = arith.addf %93, %94 : vector<192x8xf32>
    %96 = arith.addf %33, %95 : vector<192x8xf32>
    %97 = vector.shape_cast %96 : vector<192x8xf32> to vector<3x64x8xf32>
    %c0_57 = arith.constant 0 : index
    %c0_58 = arith.constant 0 : index
    %c0_59 = arith.constant 0 : index
    %98 = vector.load %arg8[%c0_57, %c0_58, %c0_59] : memref<3x64x8xf32, #tpu.memory_space<vmem>>, vector<3x64x8xf32>
    tpu.vector_store %arg8[%c0_57, %c0_58, %c0_59], %97 {strides = array<i32>} : memref<3x64x8xf32, #tpu.memory_space<vmem>>, vector<3x64x8xf32>,
    return
  }
  func.func @transform_0(%arg0: i32) -> (i32, i32, i32, i32) {
    %c0_i32 = arith.constant 0 : i32
    %c0_i32_0 = arith.constant 0 : i32
    %c0_i32_1 = arith.constant 0 : i32
    %c0_i32_2 = arith.constant 0 : i32
    return %arg0, %c0_i32, %c0_i32_0, %c0_i32_1 : i32, i32, i32, i32
  }
  func.func @transform_1(%arg0: i32) -> (i32, i32) {
    %c0_i32 = arith.constant 0 : i32
    %c0_i32_0 = arith.constant 0 : i32
    %c0_i32_1 = arith.constant 0 : i32
    return %c0_i32, %c0_i32_0 : i32, i32
  }
  func.func @transform_2(%arg0: i32) -> (i32, i32) {
    %c0_i32 = arith.constant 0 : i32
    %c0_i32_0 = arith.constant 0 : i32
    %c0_i32_1 = arith.constant 0 : i32
    return %c0_i32, %c0_i32_0 : i32, i32
  }
  func.func @transform_3(%arg0: i32) -> (i32, i32, i32) {
    %c0_i32 = arith.constant 0 : i32
    %c0_i32_0 = arith.constant 0 : i32
    %c0_i32_1 = arith.constant 0 : i32
    %c0_i32_2 = arith.constant 0 : i32
    return %c0_i32, %c0_i32_0, %c0_i32_1 : i32, i32, i32
  }
  func.func @transform_4(%arg0: i32) -> (i32, i32, i32) {
    %c0_i32 = arith.constant 0 : i32
    %c0_i32_0 = arith.constant 0 : i32
    %c0_i32_1 = arith.constant 0 : i32
    %c0_i32_2 = arith.constant 0 : i32
    return %c0_i32, %c0_i32_0, %c0_i32_1 : i32, i32, i32
  }
  func.func @transform_5(%arg0: i32) -> (i32, i32, i32) {
    %c0_i32 = arith.constant 0 : i32
    %c0_i32_0 = arith.constant 0 : i32
    %c0_i32_1 = arith.constant 0 : i32
    %c0_i32_2 = arith.constant 0 : i32
    return %c0_i32, %c0_i32_0, %c0_i32_1 : i32, i32, i32
  }
  func.func @transform_6(%arg0: i32) -> (i32, i32, i32) {
    %c0_i32 = arith.constant 0 : i32
    %c0_i32_0 = arith.constant 0 : i32
    %c0_i32_1 = arith.constant 0 : i32
    %c0_i32_2 = arith.constant 0 : i32
    return %c0_i32, %c0_i32_0, %c0_i32_1 : i32, i32, i32
  }
  func.func @transform_7(%arg0: i32) -> (i32, i32, i32) {
    %c0_i32 = arith.constant 0 : i32
    %c0_i32_0 = arith.constant 0 : i32
    %c0_i32_1 = arith.constant 0 : i32
    return %arg0, %c0_i32, %c0_i32_0 : i32, i32, i32
  }
}

module attributes {stable_mosaic.version = 11 : i64} {
  func.func @_token_path_kernel(%arg0: i32, %arg1: memref<3x64x8xf32, #tpu.memory_space<vmem>>, %arg2: memref<6x64x8xf32, #tpu.memory_space<vmem>>, %arg3: memref<8x4xf32, #tpu.memory_space<vmem>>, %arg4: memref<1x4xf32, #tpu.memory_space<vmem>>, %arg5: memref<8x8xf32, #tpu.memory_space<vmem>>, %arg6: memref<1x8xf32, #tpu.memory_space<vmem>>, %arg7: memref<64x8xf32, #tpu.memory_space<vmem>>, %arg8: memref<1x8xf32, #tpu.memory_space<vmem>>, %arg9: memref<8x16xf32, #tpu.memory_space<vmem>>, %arg10: memref<8x16xf32, #tpu.memory_space<vmem>>, %arg11: memref<1x16xf32, #tpu.memory_space<vmem>>, %arg12: memref<2x16x12xf32, #tpu.memory_space<vmem>>, %arg13: memref<2x1x12xf32, #tpu.memory_space<vmem>>, %arg14: memref<2x16x8xf32, #tpu.memory_space<vmem>>, %arg15: memref<2x1x8xf32, #tpu.memory_space<vmem>>, %arg16: memref<2x16x8xf32, #tpu.memory_space<vmem>>, %arg17: memref<2x1x8xf32, #tpu.memory_space<vmem>>, %arg18: memref<2x16x16xf32, #tpu.memory_space<vmem>>, %arg19: memref<2x1x16xf32, #tpu.memory_space<vmem>>, %arg20: memref<2x16x16xf32, #tpu.memory_space<vmem>>, %arg21: memref<2x1x16xf32, #tpu.memory_space<vmem>>, %arg22: memref<16x8xf32, #tpu.memory_space<vmem>>, %arg23: memref<1x8xf32, #tpu.memory_space<vmem>>, %arg24: memref<8x8xf32, #tpu.memory_space<vmem>>, %arg25: memref<1x8xf32, #tpu.memory_space<vmem>>, %arg26: memref<16x8xf32, #tpu.memory_space<vmem>>, %arg27: memref<1x8xf32, #tpu.memory_space<vmem>>, %arg28: memref<72x8xf32, #tpu.memory_space<vmem>>, %arg29: memref<1x8xf32, #tpu.memory_space<vmem>>, %arg30: memref<2x64x8xf32, #tpu.memory_space<vmem>>, %arg31: memref<2x10x10x8xf32, #tpu.memory_space<vmem>>) attributes {dimension_semantics = [#tpu.dimension_semantics<parallel>], iteration_bounds = array<i64: 2>, scalar_prefetch = 0 : i64, scratch_operands = 1 : i64, tpu.core_type = #tpu.core_type<tc>, window_params = [{transform_indices = @transform_0, window_bounds = array<i64: 3, 64, 8>}, {pipeline_mode = #tpu.pipeline_mode<synchronous>, transform_indices = @transform_1, window_bounds = array<i64: 6, 64, 8>}, {pipeline_mode = #tpu.pipeline_mode<synchronous>, transform_indices = @transform_2, window_bounds = array<i64: 8, 4>}, {pipeline_mode = #tpu.pipeline_mode<synchronous>, transform_indices = @transform_3, window_bounds = array<i64: 1, 4>}, {pipeline_mode = #tpu.pipeline_mode<synchronous>, transform_indices = @transform_4, window_bounds = array<i64: 8, 8>}, {pipeline_mode = #tpu.pipeline_mode<synchronous>, transform_indices = @transform_5, window_bounds = array<i64: 1, 8>}, {pipeline_mode = #tpu.pipeline_mode<synchronous>, transform_indices = @transform_6, window_bounds = array<i64: 64, 8>}, {pipeline_mode = #tpu.pipeline_mode<synchronous>, transform_indices = @transform_7, window_bounds = array<i64: 1, 8>}, {pipeline_mode = #tpu.pipeline_mode<synchronous>, transform_indices = @transform_8, window_bounds = array<i64: 8, 16>}, {pipeline_mode = #tpu.pipeline_mode<synchronous>, transform_indices = @transform_9, window_bounds = array<i64: 8, 16>}, {pipeline_mode = #tpu.pipeline_mode<synchronous>, transform_indices = @transform_10, window_bounds = array<i64: 1, 16>}, {pipeline_mode = #tpu.pipeline_mode<synchronous>, transform_indices = @transform_11, window_bounds = array<i64: 2, 16, 12>}, {pipeline_mode = #tpu.pipeline_mode<synchronous>, transform_indices = @transform_12, window_bounds = array<i64: 2, 1, 12>}, {pipeline_mode = #tpu.pipeline_mode<synchronous>, transform_indices = @transform_13, window_bounds = array<i64: 2, 16, 8>}, {pipeline_mode = #tpu.pipeline_mode<synchronous>, transform_indices = @transform_14, window_bounds = array<i64: 2, 1, 8>}, {pipeline_mode = #tpu.pipeline_mode<synchronous>, transform_indices = @transform_15, window_bounds = array<i64: 2, 16, 8>}, {pipeline_mode = #tpu.pipeline_mode<synchronous>, transform_indices = @transform_16, window_bounds = array<i64: 2, 1, 8>}, {pipeline_mode = #tpu.pipeline_mode<synchronous>, transform_indices = @transform_17, window_bounds = array<i64: 2, 16, 16>}, {pipeline_mode = #tpu.pipeline_mode<synchronous>, transform_indices = @transform_18, window_bounds = array<i64: 2, 1, 16>}, {pipeline_mode = #tpu.pipeline_mode<synchronous>, transform_indices = @transform_19, window_bounds = array<i64: 2, 16, 16>}, {pipeline_mode = #tpu.pipeline_mode<synchronous>, transform_indices = @transform_20, window_bounds = array<i64: 2, 1, 16>}, {pipeline_mode = #tpu.pipeline_mode<synchronous>, transform_indices = @transform_21, window_bounds = array<i64: 16, 8>}, {pipeline_mode = #tpu.pipeline_mode<synchronous>, transform_indices = @transform_22, window_bounds = array<i64: 1, 8>}, {pipeline_mode = #tpu.pipeline_mode<synchronous>, transform_indices = @transform_23, window_bounds = array<i64: 8, 8>}, {pipeline_mode = #tpu.pipeline_mode<synchronous>, transform_indices = @transform_24, window_bounds = array<i64: 1, 8>}, {pipeline_mode = #tpu.pipeline_mode<synchronous>, transform_indices = @transform_25, window_bounds = array<i64: 16, 8>}, {pipeline_mode = #tpu.pipeline_mode<synchronous>, transform_indices = @transform_26, window_bounds = array<i64: 1, 8>}, {pipeline_mode = #tpu.pipeline_mode<synchronous>, transform_indices = @transform_27, window_bounds = array<i64: 72, 8>}, {pipeline_mode = #tpu.pipeline_mode<synchronous>, transform_indices = @transform_28, window_bounds = array<i64: 1, 8>}, {transform_indices = @transform_29, window_bounds = array<i64: 2, 64, 8>}]} {
    %c0 = arith.constant 0 : index
    %c0_0 = arith.constant 0 : index
    %c0_1 = arith.constant 0 : index
    %0 = vector.load %arg1[%c0, %c0_0, %c0_1] : memref<3x64x8xf32, #tpu.memory_space<vmem>>, vector<3x64x8xf32>
    %1 = vector.shape_cast %0 : vector<3x64x8xf32> to vector<192x8xf32>
    %c0_2 = arith.constant 0 : index
    %c0_3 = arith.constant 0 : index
    %2 = vector.load %arg3[%c0_2, %c0_3] : memref<8x4xf32, #tpu.memory_space<vmem>>, vector<8x4xf32>
    %cst = arith.constant dense<0.000000e+00> : vector<192x4xf32>
    %3 = tpu.matmul %1, %2, %cst {dimension_numbers = #tpu.dot_dimension_numbers<[1], [0], [0], [1], [0, 0, 1, 1], [], []>} : vector<192x8xf32>, vector<8x4xf32>, vector<192x4xf32> -> vector<192x4xf32>
    %c0_4 = arith.constant 0 : index
    %c0_5 = arith.constant 0 : index
    %4 = vector.load %arg4[%c0_4, %c0_5] : memref<1x4xf32, #tpu.memory_space<vmem>>, vector<1x4xf32>
    %5 = vector.broadcast %4 : vector<1x4xf32> to vector<192x4xf32>
    %6 = arith.addf %3, %5 : vector<192x4xf32>
    %c0_6 = arith.constant 0 : index
    %c0_7 = arith.constant 0 : index
    %7 = vector.load %arg5[%c0_6, %c0_7] : memref<8x8xf32, #tpu.memory_space<vmem>>, vector<8x8xf32>
    %cst_8 = arith.constant dense<0.000000e+00> : vector<192x8xf32>
    %8 = tpu.matmul %1, %7, %cst_8 {dimension_numbers = #tpu.dot_dimension_numbers<[1], [0], [0], [1], [0, 0, 1, 1], [], []>} : vector<192x8xf32>, vector<8x8xf32>, vector<192x8xf32> -> vector<192x8xf32>
    %c0_9 = arith.constant 0 : index
    %c0_10 = arith.constant 0 : index
    %9 = vector.load %arg6[%c0_9, %c0_10] : memref<1x8xf32, #tpu.memory_space<vmem>>, vector<1x8xf32>
    %10 = vector.broadcast %9 : vector<1x8xf32> to vector<192x8xf32>
    %11 = arith.addf %8, %10 : vector<192x8xf32>
    %12 = vector.extract_strided_slice %6 {offsets = [0, 0], sizes = [64, 4], strides = [1, 1]} : vector<192x4xf32> to vector<64x4xf32>
    %cst_11 = arith.constant dense<0xFF800000> : vector<4xf32>
    %13 = vector.multi_reduction <maximumf>, %12, %cst_11 [0] : vector<64x4xf32> to vector<4xf32>
    %14 = vector.shape_cast %13 : vector<4xf32> to vector<1x4xf32>
    %15 = vector.broadcast %14 : vector<1x4xf32> to vector<64x4xf32>
    %16 = arith.subf %12, %15 : vector<64x4xf32>
    %17 = math.exp %16 : vector<64x4xf32>
    %cst_12 = arith.constant dense<0.000000e+00> : vector<4xf32>
    %18 = vector.multi_reduction <add>, %17, %cst_12 [0] : vector<64x4xf32> to vector<4xf32>
    %19 = vector.shape_cast %18 : vector<4xf32> to vector<1x4xf32>
    %20 = tpu.reciprocal %19 {approx = true} : vector<1x4xf32> -> vector<1x4xf32>
    %21 = vector.broadcast %20 : vector<1x4xf32> to vector<64x4xf32>
    %22 = arith.mulf %17, %21 : vector<64x4xf32>
    %23 = tpu.transpose %22, [1, 0] : vector<64x4xf32> -> vector<4x64xf32>
    %24 = vector.extract_strided_slice %11 {offsets = [0, 0], sizes = [64, 8], strides = [1, 1]} : vector<192x8xf32> to vector<64x8xf32>
    %cst_13 = arith.constant dense<0.000000e+00> : vector<4x8xf32>
    %25 = tpu.matmul %23, %24, %cst_13 {dimension_numbers = #tpu.dot_dimension_numbers<[1], [0], [0], [1], [0, 0, 1, 1], [], []>} : vector<4x64xf32>, vector<64x8xf32>, vector<4x8xf32> -> vector<4x8xf32>
    %c0_14 = arith.constant 0 : index
    %c0_15 = arith.constant 0 : index
    %26 = vector.load %arg7[%c0_14, %c0_15] : memref<64x8xf32, #tpu.memory_space<vmem>>, vector<64x8xf32>
    %cst_16 = arith.constant dense<0.000000e+00> : vector<4x8xf32>
    %27 = tpu.matmul %23, %26, %cst_16 {dimension_numbers = #tpu.dot_dimension_numbers<[1], [0], [0], [1], [0, 0, 1, 1], [], []>} : vector<4x64xf32>, vector<64x8xf32>, vector<4x8xf32> -> vector<4x8xf32>
    %c0_17 = arith.constant 0 : index
    %c0_18 = arith.constant 0 : index
    %28 = vector.load %arg8[%c0_17, %c0_18] : memref<1x8xf32, #tpu.memory_space<vmem>>, vector<1x8xf32>
    %29 = vector.broadcast %28 : vector<1x8xf32> to vector<4x8xf32>
    %30 = arith.addf %27, %29 : vector<4x8xf32>
    %c0_19 = arith.constant 0 : index
    %c0_20 = arith.constant 0 : index
    %31 = vector.load %arg9[%c0_19, %c0_20] : memref<8x16xf32, #tpu.memory_space<vmem>>, vector<8x16xf32>
    %cst_21 = arith.constant dense<0.000000e+00> : vector<4x16xf32>
    %32 = tpu.matmul %25, %31, %cst_21 {dimension_numbers = #tpu.dot_dimension_numbers<[1], [0], [0], [1], [0, 0, 1, 1], [], []>} : vector<4x8xf32>, vector<8x16xf32>, vector<4x16xf32> -> vector<4x16xf32>
    %c0_22 = arith.constant 0 : index
    %c0_23 = arith.constant 0 : index
    %33 = vector.load %arg10[%c0_22, %c0_23] : memref<8x16xf32, #tpu.memory_space<vmem>>, vector<8x16xf32>
    %cst_24 = arith.constant dense<0.000000e+00> : vector<4x16xf32>
    %34 = tpu.matmul %30, %33, %cst_24 {dimension_numbers = #tpu.dot_dimension_numbers<[1], [0], [0], [1], [0, 0, 1, 1], [], []>} : vector<4x8xf32>, vector<8x16xf32>, vector<4x16xf32> -> vector<4x16xf32>
    %35 = arith.addf %32, %34 : vector<4x16xf32>
    %c0_25 = arith.constant 0 : index
    %c0_26 = arith.constant 0 : index
    %36 = vector.load %arg11[%c0_25, %c0_26] : memref<1x16xf32, #tpu.memory_space<vmem>>, vector<1x16xf32>
    %37 = vector.broadcast %36 : vector<1x16xf32> to vector<4x16xf32>
    %38 = arith.addf %35, %37 : vector<4x16xf32>
    %39 = vector.extract_strided_slice %6 {offsets = [64, 0], sizes = [64, 4], strides = [1, 1]} : vector<192x4xf32> to vector<64x4xf32>
    %cst_27 = arith.constant dense<0xFF800000> : vector<4xf32>
    %40 = vector.multi_reduction <maximumf>, %39, %cst_27 [0] : vector<64x4xf32> to vector<4xf32>
    %41 = vector.shape_cast %40 : vector<4xf32> to vector<1x4xf32>
    %42 = vector.broadcast %41 : vector<1x4xf32> to vector<64x4xf32>
    %43 = arith.subf %39, %42 : vector<64x4xf32>
    %44 = math.exp %43 : vector<64x4xf32>
    %cst_28 = arith.constant dense<0.000000e+00> : vector<4xf32>
    %45 = vector.multi_reduction <add>, %44, %cst_28 [0] : vector<64x4xf32> to vector<4xf32>
    %46 = vector.shape_cast %45 : vector<4xf32> to vector<1x4xf32>
    %47 = tpu.reciprocal %46 {approx = true} : vector<1x4xf32> -> vector<1x4xf32>
    %48 = vector.broadcast %47 : vector<1x4xf32> to vector<64x4xf32>
    %49 = arith.mulf %44, %48 : vector<64x4xf32>
    %50 = tpu.transpose %49, [1, 0] : vector<64x4xf32> -> vector<4x64xf32>
    %51 = vector.extract_strided_slice %11 {offsets = [64, 0], sizes = [64, 8], strides = [1, 1]} : vector<192x8xf32> to vector<64x8xf32>
    %cst_29 = arith.constant dense<0.000000e+00> : vector<4x8xf32>
    %52 = tpu.matmul %50, %51, %cst_29 {dimension_numbers = #tpu.dot_dimension_numbers<[1], [0], [0], [1], [0, 0, 1, 1], [], []>} : vector<4x64xf32>, vector<64x8xf32>, vector<4x8xf32> -> vector<4x8xf32>
    %c0_30 = arith.constant 0 : index
    %c0_31 = arith.constant 0 : index
    %53 = vector.load %arg7[%c0_30, %c0_31] : memref<64x8xf32, #tpu.memory_space<vmem>>, vector<64x8xf32>
    %cst_32 = arith.constant dense<0.000000e+00> : vector<4x8xf32>
    %54 = tpu.matmul %50, %53, %cst_32 {dimension_numbers = #tpu.dot_dimension_numbers<[1], [0], [0], [1], [0, 0, 1, 1], [], []>} : vector<4x64xf32>, vector<64x8xf32>, vector<4x8xf32> -> vector<4x8xf32>
    %c0_33 = arith.constant 0 : index
    %c0_34 = arith.constant 0 : index
    %55 = vector.load %arg8[%c0_33, %c0_34] : memref<1x8xf32, #tpu.memory_space<vmem>>, vector<1x8xf32>
    %56 = vector.broadcast %55 : vector<1x8xf32> to vector<4x8xf32>
    %57 = arith.addf %54, %56 : vector<4x8xf32>
    %c0_35 = arith.constant 0 : index
    %c0_36 = arith.constant 0 : index
    %58 = vector.load %arg9[%c0_35, %c0_36] : memref<8x16xf32, #tpu.memory_space<vmem>>, vector<8x16xf32>
    %cst_37 = arith.constant dense<0.000000e+00> : vector<4x16xf32>
    %59 = tpu.matmul %52, %58, %cst_37 {dimension_numbers = #tpu.dot_dimension_numbers<[1], [0], [0], [1], [0, 0, 1, 1], [], []>} : vector<4x8xf32>, vector<8x16xf32>, vector<4x16xf32> -> vector<4x16xf32>
    %c0_38 = arith.constant 0 : index
    %c0_39 = arith.constant 0 : index
    %60 = vector.load %arg10[%c0_38, %c0_39] : memref<8x16xf32, #tpu.memory_space<vmem>>, vector<8x16xf32>
    %cst_40 = arith.constant dense<0.000000e+00> : vector<4x16xf32>
    %61 = tpu.matmul %57, %60, %cst_40 {dimension_numbers = #tpu.dot_dimension_numbers<[1], [0], [0], [1], [0, 0, 1, 1], [], []>} : vector<4x8xf32>, vector<8x16xf32>, vector<4x16xf32> -> vector<4x16xf32>
    %62 = arith.addf %59, %61 : vector<4x16xf32>
    %c0_41 = arith.constant 0 : index
    %c0_42 = arith.constant 0 : index
    %63 = vector.load %arg11[%c0_41, %c0_42] : memref<1x16xf32, #tpu.memory_space<vmem>>, vector<1x16xf32>
    %64 = vector.broadcast %63 : vector<1x16xf32> to vector<4x16xf32>
    %65 = arith.addf %62, %64 : vector<4x16xf32>
    %66 = vector.extract_strided_slice %6 {offsets = [128, 0], sizes = [64, 4], strides = [1, 1]} : vector<192x4xf32> to vector<64x4xf32>
    %cst_43 = arith.constant dense<0xFF800000> : vector<4xf32>
    %67 = vector.multi_reduction <maximumf>, %66, %cst_43 [0] : vector<64x4xf32> to vector<4xf32>
    %68 = vector.shape_cast %67 : vector<4xf32> to vector<1x4xf32>
    %69 = vector.broadcast %68 : vector<1x4xf32> to vector<64x4xf32>
    %70 = arith.subf %66, %69 : vector<64x4xf32>
    %71 = math.exp %70 : vector<64x4xf32>
    %cst_44 = arith.constant dense<0.000000e+00> : vector<4xf32>
    %72 = vector.multi_reduction <add>, %71, %cst_44 [0] : vector<64x4xf32> to vector<4xf32>
    %73 = vector.shape_cast %72 : vector<4xf32> to vector<1x4xf32>
    %74 = tpu.reciprocal %73 {approx = true} : vector<1x4xf32> -> vector<1x4xf32>
    %75 = vector.broadcast %74 : vector<1x4xf32> to vector<64x4xf32>
    %76 = arith.mulf %71, %75 : vector<64x4xf32>
    %77 = tpu.transpose %76, [1, 0] : vector<64x4xf32> -> vector<4x64xf32>
    %78 = vector.extract_strided_slice %11 {offsets = [128, 0], sizes = [64, 8], strides = [1, 1]} : vector<192x8xf32> to vector<64x8xf32>
    %cst_45 = arith.constant dense<0.000000e+00> : vector<4x8xf32>
    %79 = tpu.matmul %77, %78, %cst_45 {dimension_numbers = #tpu.dot_dimension_numbers<[1], [0], [0], [1], [0, 0, 1, 1], [], []>} : vector<4x64xf32>, vector<64x8xf32>, vector<4x8xf32> -> vector<4x8xf32>
    %c0_46 = arith.constant 0 : index
    %c0_47 = arith.constant 0 : index
    %80 = vector.load %arg7[%c0_46, %c0_47] : memref<64x8xf32, #tpu.memory_space<vmem>>, vector<64x8xf32>
    %cst_48 = arith.constant dense<0.000000e+00> : vector<4x8xf32>
    %81 = tpu.matmul %77, %80, %cst_48 {dimension_numbers = #tpu.dot_dimension_numbers<[1], [0], [0], [1], [0, 0, 1, 1], [], []>} : vector<4x64xf32>, vector<64x8xf32>, vector<4x8xf32> -> vector<4x8xf32>
    %c0_49 = arith.constant 0 : index
    %c0_50 = arith.constant 0 : index
    %82 = vector.load %arg8[%c0_49, %c0_50] : memref<1x8xf32, #tpu.memory_space<vmem>>, vector<1x8xf32>
    %83 = vector.broadcast %82 : vector<1x8xf32> to vector<4x8xf32>
    %84 = arith.addf %81, %83 : vector<4x8xf32>
    %c0_51 = arith.constant 0 : index
    %c0_52 = arith.constant 0 : index
    %85 = vector.load %arg9[%c0_51, %c0_52] : memref<8x16xf32, #tpu.memory_space<vmem>>, vector<8x16xf32>
    %cst_53 = arith.constant dense<0.000000e+00> : vector<4x16xf32>
    %86 = tpu.matmul %79, %85, %cst_53 {dimension_numbers = #tpu.dot_dimension_numbers<[1], [0], [0], [1], [0, 0, 1, 1], [], []>} : vector<4x8xf32>, vector<8x16xf32>, vector<4x16xf32> -> vector<4x16xf32>
    %c0_54 = arith.constant 0 : index
    %c0_55 = arith.constant 0 : index
    %87 = vector.load %arg10[%c0_54, %c0_55] : memref<8x16xf32, #tpu.memory_space<vmem>>, vector<8x16xf32>
    %cst_56 = arith.constant dense<0.000000e+00> : vector<4x16xf32>
    %88 = tpu.matmul %84, %87, %cst_56 {dimension_numbers = #tpu.dot_dimension_numbers<[1], [0], [0], [1], [0, 0, 1, 1], [], []>} : vector<4x8xf32>, vector<8x16xf32>, vector<4x16xf32> -> vector<4x16xf32>
    %89 = arith.addf %86, %88 : vector<4x16xf32>
    %c0_57 = arith.constant 0 : index
    %c0_58 = arith.constant 0 : index
    %90 = vector.load %arg11[%c0_57, %c0_58] : memref<1x16xf32, #tpu.memory_space<vmem>>, vector<1x16xf32>
    %91 = vector.broadcast %90 : vector<1x16xf32> to vector<4x16xf32>
    %92 = arith.addf %89, %91 : vector<4x16xf32>
    %93 = tpu.concatenate %38, %65, %92 in 0 : vector<4x16xf32>, vector<4x16xf32>, vector<4x16xf32> -> vector<12x16xf32>
    %cst_59 = arith.constant 0.000000e+00 : f32
    %94 = vector.broadcast %cst_59 : f32 to vector<2x10x10x8xf32>
    %c0_60 = arith.constant 0 : index
    %c0_61 = arith.constant 0 : index
    %c0_62 = arith.constant 0 : index
    %c0_63 = arith.constant 0 : index
    %95 = vector.load %arg31[%c0_60, %c0_61, %c0_62, %c0_63] : memref<2x10x10x8xf32, #tpu.memory_space<vmem>>, vector<2x10x10x8xf32>
    tpu.vector_store %arg31[%c0_60, %c0_61, %c0_62, %c0_63], %94 {strides = array<i32>} : memref<2x10x10x8xf32, #tpu.memory_space<vmem>>, vector<2x10x10x8xf32>,
    %c0_64 = arith.constant 0 : index
    %c0_65 = arith.constant 0 : index
    %c0_66 = arith.constant 0 : index
    %96 = vector.load %arg12[%c0_64, %c0_65, %c0_66] : memref<2x16x12xf32, #tpu.memory_space<vmem>>, vector<1x16x12xf32>
    %97 = vector.shape_cast %96 : vector<1x16x12xf32> to vector<16x12xf32>
    %cst_67 = arith.constant dense<0.000000e+00> : vector<4x12xf32>
    %98 = tpu.matmul %65, %97, %cst_67 {dimension_numbers = #tpu.dot_dimension_numbers<[1], [0], [0], [1], [0, 0, 1, 1], [], []>} : vector<4x16xf32>, vector<16x12xf32>, vector<4x12xf32> -> vector<4x12xf32>
    %c0_68 = arith.constant 0 : index
    %c0_69 = arith.constant 0 : index
    %c0_70 = arith.constant 0 : index
    %99 = vector.load %arg13[%c0_68, %c0_69, %c0_70] : memref<2x1x12xf32, #tpu.memory_space<vmem>>, vector<1x1x12xf32>
    %100 = vector.shape_cast %99 : vector<1x1x12xf32> to vector<1x12xf32>
    %101 = vector.broadcast %100 : vector<1x12xf32> to vector<4x12xf32>
    %102 = arith.addf %98, %101 : vector<4x12xf32>
    %cst_71 = arith.constant dense<0xFF800000> : vector<4xf32>
    %103 = vector.multi_reduction <maximumf>, %102, %cst_71 [1] : vector<4x12xf32> to vector<4xf32>
    %104 = vector.shape_cast %103 : vector<4xf32> to vector<4x1xf32>
    %105 = vector.broadcast %104 : vector<4x1xf32> to vector<4x12xf32>
    %106 = arith.subf %102, %105 : vector<4x12xf32>
    %107 = math.exp %106 : vector<4x12xf32>
    %cst_72 = arith.constant dense<0.000000e+00> : vector<4xf32>
    %108 = vector.multi_reduction <add>, %107, %cst_72 [1] : vector<4x12xf32> to vector<4xf32>
    %109 = vector.shape_cast %108 : vector<4xf32> to vector<4x1xf32>
    %110 = tpu.reciprocal %109 {approx = true} : vector<4x1xf32> -> vector<4x1xf32>
    %111 = vector.broadcast %110 : vector<4x1xf32> to vector<4x12xf32>
    %112 = arith.mulf %107, %111 : vector<4x12xf32>
    %cst_73 = arith.constant dense<0.000000e+00> : vector<4x16xf32>
    %113 = tpu.matmul %112, %93, %cst_73 {dimension_numbers = #tpu.dot_dimension_numbers<[1], [0], [0], [1], [0, 0, 1, 1], [], []>} : vector<4x12xf32>, vector<12x16xf32>, vector<4x16xf32> -> vector<4x16xf32>
    %114 = arith.addf %65, %113 : vector<4x16xf32>
    %c0_74 = arith.constant 0 : index
    %c0_75 = arith.constant 0 : index
    %c0_76 = arith.constant 0 : index
    %115 = vector.load %arg14[%c0_74, %c0_75, %c0_76] : memref<2x16x8xf32, #tpu.memory_space<vmem>>, vector<1x16x8xf32>
    %116 = vector.shape_cast %115 : vector<1x16x8xf32> to vector<16x8xf32>
    %cst_77 = arith.constant dense<0.000000e+00> : vector<4x8xf32>
    %117 = tpu.matmul %114, %116, %cst_77 {dimension_numbers = #tpu.dot_dimension_numbers<[1], [0], [0], [1], [0, 0, 1, 1], [], []>} : vector<4x16xf32>, vector<16x8xf32>, vector<4x8xf32> -> vector<4x8xf32>
    %c0_78 = arith.constant 0 : index
    %c0_79 = arith.constant 0 : index
    %c0_80 = arith.constant 0 : index
    %118 = vector.load %arg15[%c0_78, %c0_79, %c0_80] : memref<2x1x8xf32, #tpu.memory_space<vmem>>, vector<1x1x8xf32>
    %119 = vector.shape_cast %118 : vector<1x1x8xf32> to vector<1x8xf32>
    %120 = vector.broadcast %119 : vector<1x8xf32> to vector<4x8xf32>
    %121 = arith.addf %117, %120 : vector<4x8xf32>
    %c0_81 = arith.constant 0 : index
    %c0_82 = arith.constant 0 : index
    %c0_83 = arith.constant 0 : index
    %122 = vector.load %arg16[%c0_81, %c0_82, %c0_83] : memref<2x16x8xf32, #tpu.memory_space<vmem>>, vector<1x16x8xf32>
    %123 = vector.shape_cast %122 : vector<1x16x8xf32> to vector<16x8xf32>
    %cst_84 = arith.constant dense<0.000000e+00> : vector<4x8xf32>
    %124 = tpu.matmul %114, %123, %cst_84 {dimension_numbers = #tpu.dot_dimension_numbers<[1], [0], [0], [1], [0, 0, 1, 1], [], []>} : vector<4x16xf32>, vector<16x8xf32>, vector<4x8xf32> -> vector<4x8xf32>
    %c0_85 = arith.constant 0 : index
    %c0_86 = arith.constant 0 : index
    %c0_87 = arith.constant 0 : index
    %125 = vector.load %arg17[%c0_85, %c0_86, %c0_87] : memref<2x1x8xf32, #tpu.memory_space<vmem>>, vector<1x1x8xf32>
    %126 = vector.shape_cast %125 : vector<1x1x8xf32> to vector<1x8xf32>
    %127 = vector.broadcast %126 : vector<1x8xf32> to vector<4x8xf32>
    %128 = arith.addf %124, %127 : vector<4x8xf32>
    %c0_88 = arith.constant 0 : index
    %c0_89 = arith.constant 0 : index
    %c0_90 = arith.constant 0 : index
    %129 = vector.load %arg18[%c0_88, %c0_89, %c0_90] : memref<2x16x16xf32, #tpu.memory_space<vmem>>, vector<1x16x16xf32>
    %130 = vector.shape_cast %129 : vector<1x16x16xf32> to vector<16x16xf32>
    %cst_91 = arith.constant dense<0.000000e+00> : vector<4x16xf32>
    %131 = tpu.matmul %114, %130, %cst_91 {dimension_numbers = #tpu.dot_dimension_numbers<[1], [0], [0], [1], [0, 0, 1, 1], [], []>} : vector<4x16xf32>, vector<16x16xf32>, vector<4x16xf32> -> vector<4x16xf32>
    %c0_92 = arith.constant 0 : index
    %c0_93 = arith.constant 0 : index
    %c0_94 = arith.constant 0 : index
    %132 = vector.load %arg19[%c0_92, %c0_93, %c0_94] : memref<2x1x16xf32, #tpu.memory_space<vmem>>, vector<1x1x16xf32>
    %133 = vector.shape_cast %132 : vector<1x1x16xf32> to vector<1x16xf32>
    %134 = vector.broadcast %133 : vector<1x16xf32> to vector<4x16xf32>
    %135 = arith.addf %131, %134 : vector<4x16xf32>
    %136 = tpu.transpose %128, [1, 0] : vector<4x8xf32> -> vector<8x4xf32>
    %cst_95 = arith.constant dense<0.000000e+00> : vector<4x4xf32>
    %137 = tpu.matmul %121, %136, %cst_95 {dimension_numbers = #tpu.dot_dimension_numbers<[1], [0], [0], [1], [0, 0, 1, 1], [], []>} : vector<4x8xf32>, vector<8x4xf32>, vector<4x4xf32> -> vector<4x4xf32>
    %cst_96 = arith.constant dense<0xFF800000> : vector<4xf32>
    %138 = vector.multi_reduction <maximumf>, %137, %cst_96 [0] : vector<4x4xf32> to vector<4xf32>
    %139 = vector.shape_cast %138 : vector<4xf32> to vector<1x4xf32>
    %140 = vector.broadcast %139 : vector<1x4xf32> to vector<4x4xf32>
    %141 = arith.subf %137, %140 : vector<4x4xf32>
    %142 = math.exp %141 : vector<4x4xf32>
    %cst_97 = arith.constant dense<0.000000e+00> : vector<4xf32>
    %143 = vector.multi_reduction <add>, %142, %cst_97 [0] : vector<4x4xf32> to vector<4xf32>
    %144 = vector.shape_cast %143 : vector<4xf32> to vector<1x4xf32>
    %145 = tpu.reciprocal %144 {approx = true} : vector<1x4xf32> -> vector<1x4xf32>
    %146 = vector.broadcast %145 : vector<1x4xf32> to vector<4x4xf32>
    %147 = arith.mulf %142, %146 : vector<4x4xf32>
    %148 = tpu.transpose %147, [1, 0] : vector<4x4xf32> -> vector<4x4xf32>
    %cst_98 = arith.constant dense<0.000000e+00> : vector<4x16xf32>
    %149 = tpu.matmul %148, %135, %cst_98 {dimension_numbers = #tpu.dot_dimension_numbers<[1], [0], [0], [1], [0, 0, 1, 1], [], []>} : vector<4x4xf32>, vector<4x16xf32>, vector<4x16xf32> -> vector<4x16xf32>
    %150 = arith.addf %149, %65 : vector<4x16xf32>
    %c0_99 = arith.constant 0 : index
    %c0_100 = arith.constant 0 : index
    %c0_101 = arith.constant 0 : index
    %151 = vector.load %arg20[%c0_99, %c0_100, %c0_101] : memref<2x16x16xf32, #tpu.memory_space<vmem>>, vector<1x16x16xf32>
    %152 = vector.shape_cast %151 : vector<1x16x16xf32> to vector<16x16xf32>
    %cst_102 = arith.constant dense<0.000000e+00> : vector<4x16xf32>
    %153 = tpu.matmul %150, %152, %cst_102 {dimension_numbers = #tpu.dot_dimension_numbers<[1], [0], [0], [1], [0, 0, 1, 1], [], []>} : vector<4x16xf32>, vector<16x16xf32>, vector<4x16xf32> -> vector<4x16xf32>
    %154 = arith.addf %65, %153 : vector<4x16xf32>
    %c0_103 = arith.constant 0 : index
    %c0_104 = arith.constant 0 : index
    %c0_105 = arith.constant 0 : index
    %155 = vector.load %arg21[%c0_103, %c0_104, %c0_105] : memref<2x1x16xf32, #tpu.memory_space<vmem>>, vector<1x1x16xf32>
    %156 = vector.shape_cast %155 : vector<1x1x16xf32> to vector<1x16xf32>
    %157 = vector.broadcast %156 : vector<1x16xf32> to vector<4x16xf32>
    %158 = arith.addf %154, %157 : vector<4x16xf32>
    %c2_i32 = arith.constant 2 : i32
    %159 = arith.muli %arg0, %c2_i32 : i32
    %c0_i32 = arith.constant 0 : i32
    %160 = arith.addi %159, %c0_i32 : i32
    %c2_i32_106 = arith.constant 2 : i32
    %c0_i32_107 = arith.constant 0 : i32
    %161 = arith.cmpi eq, %c2_i32_106, %c0_i32_107 : i32
    %c1_i32 = arith.constant 1 : i32
    %162 = arith.select %161, %c1_i32, %c2_i32_106 : i32
    %163 = arith.remsi %160, %162 : i32
    %c0_i32_108 = arith.constant 0 : i32
    %164 = arith.cmpi ne, %163, %c0_i32_108 : i32
    %c0_i32_109 = arith.constant 0 : i32
    %165 = arith.cmpi slt, %163, %c0_i32_109 : i32
    %c0_i32_110 = arith.constant 0 : i32
    %166 = arith.cmpi slt, %162, %c0_i32_110 : i32
    %167 = arith.xori %165, %166 : i1
    %168 = arith.andi %167, %164 : i1
    %169 = arith.addi %163, %162 : i32
    %170 = arith.select %168, %169, %163 : i32
    %c3_i32 = arith.constant 3 : i32
    %171 = arith.muli %170, %c3_i32 : i32
    %c1_i32_111 = arith.constant 1 : i32
    %172 = arith.addi %171, %c1_i32_111 : i32
    %173 = arith.index_cast %172 : i32 to index
    %c0_112 = arith.constant 0 : index
    %c0_113 = arith.constant 0 : index
    %174 = vector.load %arg2[%173, %c0_112, %c0_113] : memref<6x64x8xf32, #tpu.memory_space<vmem>>, vector<1x64x8xf32>
    %175 = vector.shape_cast %174 : vector<1x64x8xf32> to vector<64x8xf32>
    %c0_114 = arith.constant 0 : index
    %c0_115 = arith.constant 0 : index
    %176 = vector.load %arg22[%c0_114, %c0_115] : memref<16x8xf32, #tpu.memory_space<vmem>>, vector<16x8xf32>
    %cst_116 = arith.constant dense<0.000000e+00> : vector<4x8xf32>
    %177 = tpu.matmul %158, %176, %cst_116 {dimension_numbers = #tpu.dot_dimension_numbers<[1], [0], [0], [1], [0, 0, 1, 1], [], []>} : vector<4x16xf32>, vector<16x8xf32>, vector<4x8xf32> -> vector<4x8xf32>
    %c0_117 = arith.constant 0 : index
    %c0_118 = arith.constant 0 : index
    %178 = vector.load %arg23[%c0_117, %c0_118] : memref<1x8xf32, #tpu.memory_space<vmem>>, vector<1x8xf32>
    %179 = vector.broadcast %178 : vector<1x8xf32> to vector<4x8xf32>
    %180 = arith.addf %177, %179 : vector<4x8xf32>
    %c0_119 = arith.constant 0 : index
    %c0_120 = arith.constant 0 : index
    %181 = vector.load %arg24[%c0_119, %c0_120] : memref<8x8xf32, #tpu.memory_space<vmem>>, vector<8x8xf32>
    %cst_121 = arith.constant dense<0.000000e+00> : vector<64x8xf32>
    %182 = tpu.matmul %175, %181, %cst_121 {dimension_numbers = #tpu.dot_dimension_numbers<[1], [0], [0], [1], [0, 0, 1, 1], [], []>} : vector<64x8xf32>, vector<8x8xf32>, vector<64x8xf32> -> vector<64x8xf32>
    %c0_122 = arith.constant 0 : index
    %c0_123 = arith.constant 0 : index
    %183 = vector.load %arg25[%c0_122, %c0_123] : memref<1x8xf32, #tpu.memory_space<vmem>>, vector<1x8xf32>
    %184 = vector.broadcast %183 : vector<1x8xf32> to vector<64x8xf32>
    %185 = arith.addf %182, %184 : vector<64x8xf32>
    %186 = tpu.transpose %180, [1, 0] : vector<4x8xf32> -> vector<8x4xf32>
    %cst_124 = arith.constant dense<0.000000e+00> : vector<64x4xf32>
    %187 = tpu.matmul %185, %186, %cst_124 {dimension_numbers = #tpu.dot_dimension_numbers<[1], [0], [0], [1], [0, 0, 1, 1], [], []>} : vector<64x8xf32>, vector<8x4xf32>, vector<64x4xf32> -> vector<64x4xf32>
    %cst_125 = arith.constant dense<0xFF800000> : vector<64xf32>
    %188 = vector.multi_reduction <maximumf>, %187, %cst_125 [1] : vector<64x4xf32> to vector<64xf32>
    %189 = vector.shape_cast %188 : vector<64xf32> to vector<64x1xf32>
    %190 = vector.broadcast %189 : vector<64x1xf32> to vector<64x4xf32>
    %191 = arith.subf %187, %190 : vector<64x4xf32>
    %192 = math.exp %191 : vector<64x4xf32>
    %cst_126 = arith.constant dense<0.000000e+00> : vector<64xf32>
    %193 = vector.multi_reduction <add>, %192, %cst_126 [1] : vector<64x4xf32> to vector<64xf32>
    %194 = vector.shape_cast %193 : vector<64xf32> to vector<64x1xf32>
    %195 = tpu.reciprocal %194 {approx = true} : vector<64x1xf32> -> vector<64x1xf32>
    %196 = vector.broadcast %195 : vector<64x1xf32> to vector<64x4xf32>
    %197 = arith.mulf %192, %196 : vector<64x4xf32>
    %c0_127 = arith.constant 0 : index
    %c0_128 = arith.constant 0 : index
    %198 = vector.load %arg26[%c0_127, %c0_128] : memref<16x8xf32, #tpu.memory_space<vmem>>, vector<16x8xf32>
    %cst_129 = arith.constant dense<0.000000e+00> : vector<4x8xf32>
    %199 = tpu.matmul %158, %198, %cst_129 {dimension_numbers = #tpu.dot_dimension_numbers<[1], [0], [0], [1], [0, 0, 1, 1], [], []>} : vector<4x16xf32>, vector<16x8xf32>, vector<4x8xf32> -> vector<4x8xf32>
    %c0_130 = arith.constant 0 : index
    %c0_131 = arith.constant 0 : index
    %200 = vector.load %arg27[%c0_130, %c0_131] : memref<1x8xf32, #tpu.memory_space<vmem>>, vector<1x8xf32>
    %201 = vector.broadcast %200 : vector<1x8xf32> to vector<4x8xf32>
    %202 = arith.addf %199, %201 : vector<4x8xf32>
    %cst_132 = arith.constant dense<0.000000e+00> : vector<64x8xf32>
    %203 = tpu.matmul %197, %202, %cst_132 {dimension_numbers = #tpu.dot_dimension_numbers<[1], [0], [0], [1], [0, 0, 1, 1], [], []>} : vector<64x4xf32>, vector<4x8xf32>, vector<64x8xf32> -> vector<64x8xf32>
    %204 = arith.addf %175, %203 : vector<64x8xf32>
    %205 = vector.shape_cast %204 : vector<64x8xf32> to vector<8x8x8xf32>
    %c0_133 = arith.constant 0 : index
    %c1 = arith.constant 1 : index
    %c1_134 = arith.constant 1 : index
    %c0_135 = arith.constant 0 : index
    %206 = vector.load %arg31[%c0_133, %c1, %c1_134, %c0_135] : memref<2x10x10x8xf32, #tpu.memory_space<vmem>>, vector<1x8x8x8xf32>
    %207 = vector.shape_cast %206 : vector<1x8x8x8xf32> to vector<8x8x8xf32>
    %208 = vector.shape_cast %205 : vector<8x8x8xf32> to vector<1x8x8x8xf32>
    tpu.vector_store %arg31[%c0_133, %c1, %c1_134, %c0_135], %208 {strides = array<i32>} : memref<2x10x10x8xf32, #tpu.memory_space<vmem>>, vector<1x8x8x8xf32>,
    %c1_136 = arith.constant 1 : index
    %c0_137 = arith.constant 0 : index
    %c0_138 = arith.constant 0 : index
    %209 = vector.load %arg12[%c1_136, %c0_137, %c0_138] : memref<2x16x12xf32, #tpu.memory_space<vmem>>, vector<1x16x12xf32>
    %210 = vector.shape_cast %209 : vector<1x16x12xf32> to vector<16x12xf32>
    %cst_139 = arith.constant dense<0.000000e+00> : vector<4x12xf32>
    %211 = tpu.matmul %65, %210, %cst_139 {dimension_numbers = #tpu.dot_dimension_numbers<[1], [0], [0], [1], [0, 0, 1, 1], [], []>} : vector<4x16xf32>, vector<16x12xf32>, vector<4x12xf32> -> vector<4x12xf32>
    %c1_140 = arith.constant 1 : index
    %c0_141 = arith.constant 0 : index
    %c0_142 = arith.constant 0 : index
    %212 = vector.load %arg13[%c1_140, %c0_141, %c0_142] : memref<2x1x12xf32, #tpu.memory_space<vmem>>, vector<1x1x12xf32>
    %213 = vector.shape_cast %212 : vector<1x1x12xf32> to vector<1x12xf32>
    %214 = vector.broadcast %213 : vector<1x12xf32> to vector<4x12xf32>
    %215 = arith.addf %211, %214 : vector<4x12xf32>
    %cst_143 = arith.constant dense<0xFF800000> : vector<4xf32>
    %216 = vector.multi_reduction <maximumf>, %215, %cst_143 [1] : vector<4x12xf32> to vector<4xf32>
    %217 = vector.shape_cast %216 : vector<4xf32> to vector<4x1xf32>
    %218 = vector.broadcast %217 : vector<4x1xf32> to vector<4x12xf32>
    %219 = arith.subf %215, %218 : vector<4x12xf32>
    %220 = math.exp %219 : vector<4x12xf32>
    %cst_144 = arith.constant dense<0.000000e+00> : vector<4xf32>
    %221 = vector.multi_reduction <add>, %220, %cst_144 [1] : vector<4x12xf32> to vector<4xf32>
    %222 = vector.shape_cast %221 : vector<4xf32> to vector<4x1xf32>
    %223 = tpu.reciprocal %222 {approx = true} : vector<4x1xf32> -> vector<4x1xf32>
    %224 = vector.broadcast %223 : vector<4x1xf32> to vector<4x12xf32>
    %225 = arith.mulf %220, %224 : vector<4x12xf32>
    %cst_145 = arith.constant dense<0.000000e+00> : vector<4x16xf32>
    %226 = tpu.matmul %225, %93, %cst_145 {dimension_numbers = #tpu.dot_dimension_numbers<[1], [0], [0], [1], [0, 0, 1, 1], [], []>} : vector<4x12xf32>, vector<12x16xf32>, vector<4x16xf32> -> vector<4x16xf32>
    %227 = arith.addf %65, %226 : vector<4x16xf32>
    %c1_146 = arith.constant 1 : index
    %c0_147 = arith.constant 0 : index
    %c0_148 = arith.constant 0 : index
    %228 = vector.load %arg14[%c1_146, %c0_147, %c0_148] : memref<2x16x8xf32, #tpu.memory_space<vmem>>, vector<1x16x8xf32>
    %229 = vector.shape_cast %228 : vector<1x16x8xf32> to vector<16x8xf32>
    %cst_149 = arith.constant dense<0.000000e+00> : vector<4x8xf32>
    %230 = tpu.matmul %227, %229, %cst_149 {dimension_numbers = #tpu.dot_dimension_numbers<[1], [0], [0], [1], [0, 0, 1, 1], [], []>} : vector<4x16xf32>, vector<16x8xf32>, vector<4x8xf32> -> vector<4x8xf32>
    %c1_150 = arith.constant 1 : index
    %c0_151 = arith.constant 0 : index
    %c0_152 = arith.constant 0 : index
    %231 = vector.load %arg15[%c1_150, %c0_151, %c0_152] : memref<2x1x8xf32, #tpu.memory_space<vmem>>, vector<1x1x8xf32>
    %232 = vector.shape_cast %231 : vector<1x1x8xf32> to vector<1x8xf32>
    %233 = vector.broadcast %232 : vector<1x8xf32> to vector<4x8xf32>
    %234 = arith.addf %230, %233 : vector<4x8xf32>
    %c1_153 = arith.constant 1 : index
    %c0_154 = arith.constant 0 : index
    %c0_155 = arith.constant 0 : index
    %235 = vector.load %arg16[%c1_153, %c0_154, %c0_155] : memref<2x16x8xf32, #tpu.memory_space<vmem>>, vector<1x16x8xf32>
    %236 = vector.shape_cast %235 : vector<1x16x8xf32> to vector<16x8xf32>
    %cst_156 = arith.constant dense<0.000000e+00> : vector<4x8xf32>
    %237 = tpu.matmul %227, %236, %cst_156 {dimension_numbers = #tpu.dot_dimension_numbers<[1], [0], [0], [1], [0, 0, 1, 1], [], []>} : vector<4x16xf32>, vector<16x8xf32>, vector<4x8xf32> -> vector<4x8xf32>
    %c1_157 = arith.constant 1 : index
    %c0_158 = arith.constant 0 : index
    %c0_159 = arith.constant 0 : index
    %238 = vector.load %arg17[%c1_157, %c0_158, %c0_159] : memref<2x1x8xf32, #tpu.memory_space<vmem>>, vector<1x1x8xf32>
    %239 = vector.shape_cast %238 : vector<1x1x8xf32> to vector<1x8xf32>
    %240 = vector.broadcast %239 : vector<1x8xf32> to vector<4x8xf32>
    %241 = arith.addf %237, %240 : vector<4x8xf32>
    %c1_160 = arith.constant 1 : index
    %c0_161 = arith.constant 0 : index
    %c0_162 = arith.constant 0 : index
    %242 = vector.load %arg18[%c1_160, %c0_161, %c0_162] : memref<2x16x16xf32, #tpu.memory_space<vmem>>, vector<1x16x16xf32>
    %243 = vector.shape_cast %242 : vector<1x16x16xf32> to vector<16x16xf32>
    %cst_163 = arith.constant dense<0.000000e+00> : vector<4x16xf32>
    %244 = tpu.matmul %227, %243, %cst_163 {dimension_numbers = #tpu.dot_dimension_numbers<[1], [0], [0], [1], [0, 0, 1, 1], [], []>} : vector<4x16xf32>, vector<16x16xf32>, vector<4x16xf32> -> vector<4x16xf32>
    %c1_164 = arith.constant 1 : index
    %c0_165 = arith.constant 0 : index
    %c0_166 = arith.constant 0 : index
    %245 = vector.load %arg19[%c1_164, %c0_165, %c0_166] : memref<2x1x16xf32, #tpu.memory_space<vmem>>, vector<1x1x16xf32>
    %246 = vector.shape_cast %245 : vector<1x1x16xf32> to vector<1x16xf32>
    %247 = vector.broadcast %246 : vector<1x16xf32> to vector<4x16xf32>
    %248 = arith.addf %244, %247 : vector<4x16xf32>
    %249 = tpu.transpose %241, [1, 0] : vector<4x8xf32> -> vector<8x4xf32>
    %cst_167 = arith.constant dense<0.000000e+00> : vector<4x4xf32>
    %250 = tpu.matmul %234, %249, %cst_167 {dimension_numbers = #tpu.dot_dimension_numbers<[1], [0], [0], [1], [0, 0, 1, 1], [], []>} : vector<4x8xf32>, vector<8x4xf32>, vector<4x4xf32> -> vector<4x4xf32>
    %cst_168 = arith.constant dense<0xFF800000> : vector<4xf32>
    %251 = vector.multi_reduction <maximumf>, %250, %cst_168 [0] : vector<4x4xf32> to vector<4xf32>
    %252 = vector.shape_cast %251 : vector<4xf32> to vector<1x4xf32>
    %253 = vector.broadcast %252 : vector<1x4xf32> to vector<4x4xf32>
    %254 = arith.subf %250, %253 : vector<4x4xf32>
    %255 = math.exp %254 : vector<4x4xf32>
    %cst_169 = arith.constant dense<0.000000e+00> : vector<4xf32>
    %256 = vector.multi_reduction <add>, %255, %cst_169 [0] : vector<4x4xf32> to vector<4xf32>
    %257 = vector.shape_cast %256 : vector<4xf32> to vector<1x4xf32>
    %258 = tpu.reciprocal %257 {approx = true} : vector<1x4xf32> -> vector<1x4xf32>
    %259 = vector.broadcast %258 : vector<1x4xf32> to vector<4x4xf32>
    %260 = arith.mulf %255, %259 : vector<4x4xf32>
    %261 = tpu.transpose %260, [1, 0] : vector<4x4xf32> -> vector<4x4xf32>
    %cst_170 = arith.constant dense<0.000000e+00> : vector<4x16xf32>
    %262 = tpu.matmul %261, %248, %cst_170 {dimension_numbers = #tpu.dot_dimension_numbers<[1], [0], [0], [1], [0, 0, 1, 1], [], []>} : vector<4x4xf32>, vector<4x16xf32>, vector<4x16xf32> -> vector<4x16xf32>
    %263 = arith.addf %262, %65 : vector<4x16xf32>
    %c1_171 = arith.constant 1 : index
    %c0_172 = arith.constant 0 : index
    %c0_173 = arith.constant 0 : index
    %264 = vector.load %arg20[%c1_171, %c0_172, %c0_173] : memref<2x16x16xf32, #tpu.memory_space<vmem>>, vector<1x16x16xf32>
    %265 = vector.shape_cast %264 : vector<1x16x16xf32> to vector<16x16xf32>
    %cst_174 = arith.constant dense<0.000000e+00> : vector<4x16xf32>
    %266 = tpu.matmul %263, %265, %cst_174 {dimension_numbers = #tpu.dot_dimension_numbers<[1], [0], [0], [1], [0, 0, 1, 1], [], []>} : vector<4x16xf32>, vector<16x16xf32>, vector<4x16xf32> -> vector<4x16xf32>
    %267 = arith.addf %65, %266 : vector<4x16xf32>
    %c1_175 = arith.constant 1 : index
    %c0_176 = arith.constant 0 : index
    %c0_177 = arith.constant 0 : index
    %268 = vector.load %arg21[%c1_175, %c0_176, %c0_177] : memref<2x1x16xf32, #tpu.memory_space<vmem>>, vector<1x1x16xf32>
    %269 = vector.shape_cast %268 : vector<1x1x16xf32> to vector<1x16xf32>
    %270 = vector.broadcast %269 : vector<1x16xf32> to vector<4x16xf32>
    %271 = arith.addf %267, %270 : vector<4x16xf32>
    %c2_i32_178 = arith.constant 2 : i32
    %272 = arith.muli %arg0, %c2_i32_178 : i32
    %c1_i32_179 = arith.constant 1 : i32
    %273 = arith.addi %272, %c1_i32_179 : i32
    %c2_i32_180 = arith.constant 2 : i32
    %c0_i32_181 = arith.constant 0 : i32
    %274 = arith.cmpi eq, %c2_i32_180, %c0_i32_181 : i32
    %c1_i32_182 = arith.constant 1 : i32
    %275 = arith.select %274, %c1_i32_182, %c2_i32_180 : i32
    %276 = arith.remsi %273, %275 : i32
    %c0_i32_183 = arith.constant 0 : i32
    %277 = arith.cmpi ne, %276, %c0_i32_183 : i32
    %c0_i32_184 = arith.constant 0 : i32
    %278 = arith.cmpi slt, %276, %c0_i32_184 : i32
    %c0_i32_185 = arith.constant 0 : i32
    %279 = arith.cmpi slt, %275, %c0_i32_185 : i32
    %280 = arith.xori %278, %279 : i1
    %281 = arith.andi %280, %277 : i1
    %282 = arith.addi %276, %275 : i32
    %283 = arith.select %281, %282, %276 : i32
    %c3_i32_186 = arith.constant 3 : i32
    %284 = arith.muli %283, %c3_i32_186 : i32
    %c1_i32_187 = arith.constant 1 : i32
    %285 = arith.addi %284, %c1_i32_187 : i32
    %286 = arith.index_cast %285 : i32 to index
    %c0_188 = arith.constant 0 : index
    %c0_189 = arith.constant 0 : index
    %287 = vector.load %arg2[%286, %c0_188, %c0_189] : memref<6x64x8xf32, #tpu.memory_space<vmem>>, vector<1x64x8xf32>
    %288 = vector.shape_cast %287 : vector<1x64x8xf32> to vector<64x8xf32>
    %c0_190 = arith.constant 0 : index
    %c0_191 = arith.constant 0 : index
    %289 = vector.load %arg22[%c0_190, %c0_191] : memref<16x8xf32, #tpu.memory_space<vmem>>, vector<16x8xf32>
    %cst_192 = arith.constant dense<0.000000e+00> : vector<4x8xf32>
    %290 = tpu.matmul %271, %289, %cst_192 {dimension_numbers = #tpu.dot_dimension_numbers<[1], [0], [0], [1], [0, 0, 1, 1], [], []>} : vector<4x16xf32>, vector<16x8xf32>, vector<4x8xf32> -> vector<4x8xf32>
    %c0_193 = arith.constant 0 : index
    %c0_194 = arith.constant 0 : index
    %291 = vector.load %arg23[%c0_193, %c0_194] : memref<1x8xf32, #tpu.memory_space<vmem>>, vector<1x8xf32>
    %292 = vector.broadcast %291 : vector<1x8xf32> to vector<4x8xf32>
    %293 = arith.addf %290, %292 : vector<4x8xf32>
    %c0_195 = arith.constant 0 : index
    %c0_196 = arith.constant 0 : index
    %294 = vector.load %arg24[%c0_195, %c0_196] : memref<8x8xf32, #tpu.memory_space<vmem>>, vector<8x8xf32>
    %cst_197 = arith.constant dense<0.000000e+00> : vector<64x8xf32>
    %295 = tpu.matmul %288, %294, %cst_197 {dimension_numbers = #tpu.dot_dimension_numbers<[1], [0], [0], [1], [0, 0, 1, 1], [], []>} : vector<64x8xf32>, vector<8x8xf32>, vector<64x8xf32> -> vector<64x8xf32>
    %c0_198 = arith.constant 0 : index
    %c0_199 = arith.constant 0 : index
    %296 = vector.load %arg25[%c0_198, %c0_199] : memref<1x8xf32, #tpu.memory_space<vmem>>, vector<1x8xf32>
    %297 = vector.broadcast %296 : vector<1x8xf32> to vector<64x8xf32>
    %298 = arith.addf %295, %297 : vector<64x8xf32>
    %299 = tpu.transpose %293, [1, 0] : vector<4x8xf32> -> vector<8x4xf32>
    %cst_200 = arith.constant dense<0.000000e+00> : vector<64x4xf32>
    %300 = tpu.matmul %298, %299, %cst_200 {dimension_numbers = #tpu.dot_dimension_numbers<[1], [0], [0], [1], [0, 0, 1, 1], [], []>} : vector<64x8xf32>, vector<8x4xf32>, vector<64x4xf32> -> vector<64x4xf32>
    %cst_201 = arith.constant dense<0xFF800000> : vector<64xf32>
    %301 = vector.multi_reduction <maximumf>, %300, %cst_201 [1] : vector<64x4xf32> to vector<64xf32>
    %302 = vector.shape_cast %301 : vector<64xf32> to vector<64x1xf32>
    %303 = vector.broadcast %302 : vector<64x1xf32> to vector<64x4xf32>
    %304 = arith.subf %300, %303 : vector<64x4xf32>
    %305 = math.exp %304 : vector<64x4xf32>
    %cst_202 = arith.constant dense<0.000000e+00> : vector<64xf32>
    %306 = vector.multi_reduction <add>, %305, %cst_202 [1] : vector<64x4xf32> to vector<64xf32>
    %307 = vector.shape_cast %306 : vector<64xf32> to vector<64x1xf32>
    %308 = tpu.reciprocal %307 {approx = true} : vector<64x1xf32> -> vector<64x1xf32>
    %309 = vector.broadcast %308 : vector<64x1xf32> to vector<64x4xf32>
    %310 = arith.mulf %305, %309 : vector<64x4xf32>
    %c0_203 = arith.constant 0 : index
    %c0_204 = arith.constant 0 : index
    %311 = vector.load %arg26[%c0_203, %c0_204] : memref<16x8xf32, #tpu.memory_space<vmem>>, vector<16x8xf32>
    %cst_205 = arith.constant dense<0.000000e+00> : vector<4x8xf32>
    %312 = tpu.matmul %271, %311, %cst_205 {dimension_numbers = #tpu.dot_dimension_numbers<[1], [0], [0], [1], [0, 0, 1, 1], [], []>} : vector<4x16xf32>, vector<16x8xf32>, vector<4x8xf32> -> vector<4x8xf32>
    %c0_206 = arith.constant 0 : index
    %c0_207 = arith.constant 0 : index
    %313 = vector.load %arg27[%c0_206, %c0_207] : memref<1x8xf32, #tpu.memory_space<vmem>>, vector<1x8xf32>
    %314 = vector.broadcast %313 : vector<1x8xf32> to vector<4x8xf32>
    %315 = arith.addf %312, %314 : vector<4x8xf32>
    %cst_208 = arith.constant dense<0.000000e+00> : vector<64x8xf32>
    %316 = tpu.matmul %310, %315, %cst_208 {dimension_numbers = #tpu.dot_dimension_numbers<[1], [0], [0], [1], [0, 0, 1, 1], [], []>} : vector<64x4xf32>, vector<4x8xf32>, vector<64x8xf32> -> vector<64x8xf32>
    %317 = arith.addf %288, %316 : vector<64x8xf32>
    %318 = vector.shape_cast %317 : vector<64x8xf32> to vector<8x8x8xf32>
    %c1_209 = arith.constant 1 : index
    %c1_210 = arith.constant 1 : index
    %c1_211 = arith.constant 1 : index
    %c0_212 = arith.constant 0 : index
    %319 = vector.load %arg31[%c1_209, %c1_210, %c1_211, %c0_212] : memref<2x10x10x8xf32, #tpu.memory_space<vmem>>, vector<1x8x8x8xf32>
    %320 = vector.shape_cast %319 : vector<1x8x8x8xf32> to vector<8x8x8xf32>
    %321 = vector.shape_cast %318 : vector<8x8x8xf32> to vector<1x8x8x8xf32>
    tpu.vector_store %arg31[%c1_209, %c1_210, %c1_211, %c0_212], %321 {strides = array<i32>} : memref<2x10x10x8xf32, #tpu.memory_space<vmem>>, vector<1x8x8x8xf32>,
    %c0_213 = arith.constant 0 : index
    %c0_214 = arith.constant 0 : index
    %c0_215 = arith.constant 0 : index
    %c0_216 = arith.constant 0 : index
    %322 = vector.load %arg31[%c0_213, %c0_214, %c0_215, %c0_216] : memref<2x10x10x8xf32, #tpu.memory_space<vmem>>, vector<2x10x10x8xf32>
    %c0_217 = arith.constant 0 : index
    %c0_218 = arith.constant 0 : index
    %323 = vector.load %arg28[%c0_217, %c0_218] : memref<72x8xf32, #tpu.memory_space<vmem>>, vector<72x8xf32>
    %c0_219 = arith.constant 0 : index
    %c0_220 = arith.constant 0 : index
    %324 = vector.load %arg29[%c0_219, %c0_220] : memref<1x8xf32, #tpu.memory_space<vmem>>, vector<1x8xf32>
    %325 = vector.extract_strided_slice %322 {offsets = [0, 0, 0, 0], sizes = [2, 8, 8, 8], strides = [1, 1, 1, 1]} : vector<2x10x10x8xf32> to vector<2x8x8x8xf32>
    %326 = vector.shape_cast %325 : vector<2x8x8x8xf32> to vector<128x8xf32>
    %327 = vector.extract_strided_slice %322 {offsets = [0, 0, 1, 0], sizes = [2, 8, 8, 8], strides = [1, 1, 1, 1]} : vector<2x10x10x8xf32> to vector<2x8x8x8xf32>
    %328 = vector.shape_cast %327 : vector<2x8x8x8xf32> to vector<128x8xf32>
    %329 = vector.extract_strided_slice %322 {offsets = [0, 0, 2, 0], sizes = [2, 8, 8, 8], strides = [1, 1, 1, 1]} : vector<2x10x10x8xf32> to vector<2x8x8x8xf32>
    %330 = vector.shape_cast %329 : vector<2x8x8x8xf32> to vector<128x8xf32>
    %331 = vector.extract_strided_slice %322 {offsets = [0, 1, 0, 0], sizes = [2, 8, 8, 8], strides = [1, 1, 1, 1]} : vector<2x10x10x8xf32> to vector<2x8x8x8xf32>
    %332 = vector.shape_cast %331 : vector<2x8x8x8xf32> to vector<128x8xf32>
    %333 = vector.extract_strided_slice %322 {offsets = [0, 1, 1, 0], sizes = [2, 8, 8, 8], strides = [1, 1, 1, 1]} : vector<2x10x10x8xf32> to vector<2x8x8x8xf32>
    %334 = vector.shape_cast %333 : vector<2x8x8x8xf32> to vector<128x8xf32>
    %335 = vector.extract_strided_slice %322 {offsets = [0, 1, 2, 0], sizes = [2, 8, 8, 8], strides = [1, 1, 1, 1]} : vector<2x10x10x8xf32> to vector<2x8x8x8xf32>
    %336 = vector.shape_cast %335 : vector<2x8x8x8xf32> to vector<128x8xf32>
    %337 = vector.extract_strided_slice %322 {offsets = [0, 2, 0, 0], sizes = [2, 8, 8, 8], strides = [1, 1, 1, 1]} : vector<2x10x10x8xf32> to vector<2x8x8x8xf32>
    %338 = vector.shape_cast %337 : vector<2x8x8x8xf32> to vector<128x8xf32>
    %339 = vector.extract_strided_slice %322 {offsets = [0, 2, 1, 0], sizes = [2, 8, 8, 8], strides = [1, 1, 1, 1]} : vector<2x10x10x8xf32> to vector<2x8x8x8xf32>
    %340 = vector.shape_cast %339 : vector<2x8x8x8xf32> to vector<128x8xf32>
    %341 = vector.extract_strided_slice %322 {offsets = [0, 2, 2, 0], sizes = [2, 8, 8, 8], strides = [1, 1, 1, 1]} : vector<2x10x10x8xf32> to vector<2x8x8x8xf32>
    %342 = vector.shape_cast %341 : vector<2x8x8x8xf32> to vector<128x8xf32>
    %343 = tpu.concatenate %326, %328, %330, %332, %334, %336, %338, %340, %342 in 1 : vector<128x8xf32>, vector<128x8xf32>, vector<128x8xf32>, vector<128x8xf32>, vector<128x8xf32>, vector<128x8xf32>, vector<128x8xf32>, vector<128x8xf32>, vector<128x8xf32> -> vector<128x72xf32>
    %cst_221 = arith.constant dense<0.000000e+00> : vector<128x8xf32>
    %344 = tpu.matmul %343, %323, %cst_221 {dimension_numbers = #tpu.dot_dimension_numbers<[1], [0], [0], [1], [0, 0, 1, 1], [], []>} : vector<128x72xf32>, vector<72x8xf32>, vector<128x8xf32> -> vector<128x8xf32>
    %345 = vector.broadcast %324 : vector<1x8xf32> to vector<128x8xf32>
    %346 = arith.addf %344, %345 : vector<128x8xf32>
    %347 = vector.shape_cast %346 : vector<128x8xf32> to vector<2x64x8xf32>
    %c0_222 = arith.constant 0 : index
    %c0_223 = arith.constant 0 : index
    %c0_224 = arith.constant 0 : index
    %348 = vector.load %arg30[%c0_222, %c0_223, %c0_224] : memref<2x64x8xf32, #tpu.memory_space<vmem>>, vector<2x64x8xf32>
    tpu.vector_store %arg30[%c0_222, %c0_223, %c0_224], %347 {strides = array<i32>} : memref<2x64x8xf32, #tpu.memory_space<vmem>>, vector<2x64x8xf32>,
    return
  }
  func.func @transform_0(%arg0: i32) -> (i32, i32, i32) {
    %c0_i32 = arith.constant 0 : i32
    %c0_i32_0 = arith.constant 0 : i32
    %c0_i32_1 = arith.constant 0 : i32
    return %arg0, %c0_i32, %c0_i32_0 : i32, i32, i32
  }
  func.func @transform_1(%arg0: i32) -> (i32, i32, i32) {
    %c0_i32 = arith.constant 0 : i32
    %c0_i32_0 = arith.constant 0 : i32
    %c0_i32_1 = arith.constant 0 : i32
    %c0_i32_2 = arith.constant 0 : i32
    return %c0_i32, %c0_i32_0, %c0_i32_1 : i32, i32, i32
  }
  func.func @transform_2(%arg0: i32) -> (i32, i32) {
    %c0_i32 = arith.constant 0 : i32
    %c0_i32_0 = arith.constant 0 : i32
    %c0_i32_1 = arith.constant 0 : i32
    return %c0_i32, %c0_i32_0 : i32, i32
  }
  func.func @transform_3(%arg0: i32) -> (i32, i32) {
    %c0_i32 = arith.constant 0 : i32
    %c0_i32_0 = arith.constant 0 : i32
    %c0_i32_1 = arith.constant 0 : i32
    return %c0_i32, %c0_i32_0 : i32, i32
  }
  func.func @transform_4(%arg0: i32) -> (i32, i32) {
    %c0_i32 = arith.constant 0 : i32
    %c0_i32_0 = arith.constant 0 : i32
    %c0_i32_1 = arith.constant 0 : i32
    return %c0_i32, %c0_i32_0 : i32, i32
  }
  func.func @transform_5(%arg0: i32) -> (i32, i32) {
    %c0_i32 = arith.constant 0 : i32
    %c0_i32_0 = arith.constant 0 : i32
    %c0_i32_1 = arith.constant 0 : i32
    return %c0_i32, %c0_i32_0 : i32, i32
  }
  func.func @transform_6(%arg0: i32) -> (i32, i32) {
    %c0_i32 = arith.constant 0 : i32
    %c0_i32_0 = arith.constant 0 : i32
    %c0_i32_1 = arith.constant 0 : i32
    return %c0_i32, %c0_i32_0 : i32, i32
  }
  func.func @transform_7(%arg0: i32) -> (i32, i32) {
    %c0_i32 = arith.constant 0 : i32
    %c0_i32_0 = arith.constant 0 : i32
    %c0_i32_1 = arith.constant 0 : i32
    return %c0_i32, %c0_i32_0 : i32, i32
  }
  func.func @transform_8(%arg0: i32) -> (i32, i32) {
    %c0_i32 = arith.constant 0 : i32
    %c0_i32_0 = arith.constant 0 : i32
    %c0_i32_1 = arith.constant 0 : i32
    return %c0_i32, %c0_i32_0 : i32, i32
  }
  func.func @transform_9(%arg0: i32) -> (i32, i32) {
    %c0_i32 = arith.constant 0 : i32
    %c0_i32_0 = arith.constant 0 : i32
    %c0_i32_1 = arith.constant 0 : i32
    return %c0_i32, %c0_i32_0 : i32, i32
  }
  func.func @transform_10(%arg0: i32) -> (i32, i32) {
    %c0_i32 = arith.constant 0 : i32
    %c0_i32_0 = arith.constant 0 : i32
    %c0_i32_1 = arith.constant 0 : i32
    return %c0_i32, %c0_i32_0 : i32, i32
  }
  func.func @transform_11(%arg0: i32) -> (i32, i32, i32) {
    %c0_i32 = arith.constant 0 : i32
    %c0_i32_0 = arith.constant 0 : i32
    %c0_i32_1 = arith.constant 0 : i32
    %c0_i32_2 = arith.constant 0 : i32
    return %c0_i32, %c0_i32_0, %c0_i32_1 : i32, i32, i32
  }
  func.func @transform_12(%arg0: i32) -> (i32, i32, i32) {
    %c0_i32 = arith.constant 0 : i32
    %c0_i32_0 = arith.constant 0 : i32
    %c0_i32_1 = arith.constant 0 : i32
    %c0_i32_2 = arith.constant 0 : i32
    return %c0_i32, %c0_i32_0, %c0_i32_1 : i32, i32, i32
  }
  func.func @transform_13(%arg0: i32) -> (i32, i32, i32) {
    %c0_i32 = arith.constant 0 : i32
    %c0_i32_0 = arith.constant 0 : i32
    %c0_i32_1 = arith.constant 0 : i32
    %c0_i32_2 = arith.constant 0 : i32
    return %c0_i32, %c0_i32_0, %c0_i32_1 : i32, i32, i32
  }
  func.func @transform_14(%arg0: i32) -> (i32, i32, i32) {
    %c0_i32 = arith.constant 0 : i32
    %c0_i32_0 = arith.constant 0 : i32
    %c0_i32_1 = arith.constant 0 : i32
    %c0_i32_2 = arith.constant 0 : i32
    return %c0_i32, %c0_i32_0, %c0_i32_1 : i32, i32, i32
  }
  func.func @transform_15(%arg0: i32) -> (i32, i32, i32) {
    %c0_i32 = arith.constant 0 : i32
    %c0_i32_0 = arith.constant 0 : i32
    %c0_i32_1 = arith.constant 0 : i32
    %c0_i32_2 = arith.constant 0 : i32
    return %c0_i32, %c0_i32_0, %c0_i32_1 : i32, i32, i32
  }
  func.func @transform_16(%arg0: i32) -> (i32, i32, i32) {
    %c0_i32 = arith.constant 0 : i32
    %c0_i32_0 = arith.constant 0 : i32
    %c0_i32_1 = arith.constant 0 : i32
    %c0_i32_2 = arith.constant 0 : i32
    return %c0_i32, %c0_i32_0, %c0_i32_1 : i32, i32, i32
  }
  func.func @transform_17(%arg0: i32) -> (i32, i32, i32) {
    %c0_i32 = arith.constant 0 : i32
    %c0_i32_0 = arith.constant 0 : i32
    %c0_i32_1 = arith.constant 0 : i32
    %c0_i32_2 = arith.constant 0 : i32
    return %c0_i32, %c0_i32_0, %c0_i32_1 : i32, i32, i32
  }
  func.func @transform_18(%arg0: i32) -> (i32, i32, i32) {
    %c0_i32 = arith.constant 0 : i32
    %c0_i32_0 = arith.constant 0 : i32
    %c0_i32_1 = arith.constant 0 : i32
    %c0_i32_2 = arith.constant 0 : i32
    return %c0_i32, %c0_i32_0, %c0_i32_1 : i32, i32, i32
  }
  func.func @transform_19(%arg0: i32) -> (i32, i32, i32) {
    %c0_i32 = arith.constant 0 : i32
    %c0_i32_0 = arith.constant 0 : i32
    %c0_i32_1 = arith.constant 0 : i32
    %c0_i32_2 = arith.constant 0 : i32
    return %c0_i32, %c0_i32_0, %c0_i32_1 : i32, i32, i32
  }
  func.func @transform_20(%arg0: i32) -> (i32, i32, i32) {
    %c0_i32 = arith.constant 0 : i32
    %c0_i32_0 = arith.constant 0 : i32
    %c0_i32_1 = arith.constant 0 : i32
    %c0_i32_2 = arith.constant 0 : i32
    return %c0_i32, %c0_i32_0, %c0_i32_1 : i32, i32, i32
  }
  func.func @transform_21(%arg0: i32) -> (i32, i32) {
    %c0_i32 = arith.constant 0 : i32
    %c0_i32_0 = arith.constant 0 : i32
    %c0_i32_1 = arith.constant 0 : i32
    return %c0_i32, %c0_i32_0 : i32, i32
  }
  func.func @transform_22(%arg0: i32) -> (i32, i32) {
    %c0_i32 = arith.constant 0 : i32
    %c0_i32_0 = arith.constant 0 : i32
    %c0_i32_1 = arith.constant 0 : i32
    return %c0_i32, %c0_i32_0 : i32, i32
  }
  func.func @transform_23(%arg0: i32) -> (i32, i32) {
    %c0_i32 = arith.constant 0 : i32
    %c0_i32_0 = arith.constant 0 : i32
    %c0_i32_1 = arith.constant 0 : i32
    return %c0_i32, %c0_i32_0 : i32, i32
  }
  func.func @transform_24(%arg0: i32) -> (i32, i32) {
    %c0_i32 = arith.constant 0 : i32
    %c0_i32_0 = arith.constant 0 : i32
    %c0_i32_1 = arith.constant 0 : i32
    return %c0_i32, %c0_i32_0 : i32, i32
  }
  func.func @transform_25(%arg0: i32) -> (i32, i32) {
    %c0_i32 = arith.constant 0 : i32
    %c0_i32_0 = arith.constant 0 : i32
    %c0_i32_1 = arith.constant 0 : i32
    return %c0_i32, %c0_i32_0 : i32, i32
  }
  func.func @transform_26(%arg0: i32) -> (i32, i32) {
    %c0_i32 = arith.constant 0 : i32
    %c0_i32_0 = arith.constant 0 : i32
    %c0_i32_1 = arith.constant 0 : i32
    return %c0_i32, %c0_i32_0 : i32, i32
  }
  func.func @transform_27(%arg0: i32) -> (i32, i32) {
    %c0_i32 = arith.constant 0 : i32
    %c0_i32_0 = arith.constant 0 : i32
    %c0_i32_1 = arith.constant 0 : i32
    return %c0_i32, %c0_i32_0 : i32, i32
  }
  func.func @transform_28(%arg0: i32) -> (i32, i32) {
    %c0_i32 = arith.constant 0 : i32
    %c0_i32_0 = arith.constant 0 : i32
    %c0_i32_1 = arith.constant 0 : i32
    return %c0_i32, %c0_i32_0 : i32, i32
  }
  func.func @transform_29(%arg0: i32) -> (i32, i32, i32) {
    %c0_i32 = arith.constant 0 : i32
    %c0_i32_0 = arith.constant 0 : i32
    %c0_i32_1 = arith.constant 0 : i32
    return %arg0, %c0_i32, %c0_i32_0 : i32, i32, i32
  }
}

</mosaic_0001>

<bundles_post_ra>
// kernel: transformer_v0_forward.3
= control target key start
LH: loop header
LB: loop body
LE: loop exit
PB: predicated region body
PF: predicated region fallthrough
CT: control target
= control target key end

     0   :  { %s4584_s6 = smov 1   ;;  %s4585_s10 = smov 2   ;;  %s6210_s0 = inlined_call_operand.smem [shape: u32[30], index: -1, kind: input, shape index: {}] }
   0x1   :  { %s4630_s5 = sld [smem:[%s6210_s0]]   ;;  %s4586_s14 = smov 3  }
   0x2   :  { %s4635_s9 = sld [smem:[%s6210_s0 + %s4584_s6]]   ;;  %s4587_s18 = smov 4  }
   0x3   :  { %s4640_s13 = sld [smem:[%s6210_s0 + %s4585_s10]]   ;;  %s4588_s22 = smov 5  }
   0x4   :  { %s4645_s17 = sld [smem:[%s6210_s0 + %s4586_s14]]   ;;  %s4589_s26 = smov 6  }
   0x5   :  { %s4650_s21 = sld [smem:[%s6210_s0 + %s4587_s18]]   ;;  %s4590_s30 = smov 7  }
   0x6   :  { %s4655_s25 = sld [smem:[%s6210_s0 + %s4588_s22]]   ;;  %s4591_s4 = smov 8  }
   0x7   :  { %6244 = sst [smem:[#allocation3_spill]] %s4630_s5  ;;  %s4592_s10 = smov 9  }
   0x8   :  { %6245 = sst [smem:[#allocation4_spill]] %s4635_s9  ;;  %s4593_s15 = smov 10  }
   0x9   :  { %6246 = sst [smem:[#allocation5_spill]] %s4640_s13  ;;  %s4594_s20 = smov 11  }
   0xa   :  { %6247 = sst [smem:[#allocation6_spill]] %s4645_s17  ;;  %s4596_s1 = smov 13  }
   0xb   :  { %s4660_s29 = sld [smem:[%s6210_s0 + %s4589_s26]]   ;;  %s4595_s26 = smov 12  }
   0xc   :  { %s4665_s3 = sld [smem:[%s6210_s0 + %s4590_s30]]   ;;  %s4597_s7 = smov 14  }
   0xd   :  { %s4670_s8 = sld [smem:[%s6210_s0 + %s4591_s4]]   ;;  %s4599_s22 = smov 16  }
   0xe   :  { %s4675_s14 = sld [smem:[%s6210_s0 + %s4592_s10]]   ;;  %s4600_s28 = smov 17  }
   0xf   :  { %s4680_s19 = sld [smem:[%s6210_s0 + %s4593_s15]]   ;;  %s4598_s15 = smov 15  }
  0x10   :  { %s4685_s24 = sld [smem:[%s6210_s0 + %s4594_s20]]  }
  0x11   :  { %s4690_s30 = sld [smem:[%s6210_s0 + %s4595_s26]]  }
  0x12   :  { %6248 = sst [smem:[#allocation7_spill]] %s4665_s3 }
  0x13   :  { %6249 = sst [smem:[#allocation8_spill]] %s4670_s8 }
  0x14   :  { %6250 = sst [smem:[#allocation9_spill]] %s4675_s14 }
  0x15   :  { %6251 = sst [smem:[#allocation10_spill]] %s4680_s19 }
  0x16   :  { %s4695_s6 = sld [smem:[%s6210_s0 + %s4596_s1]]  }
  0x17   :  { %s4700_s12 = sld [smem:[%s6210_s0 + %s4597_s7]]   ;;  %s4601_s7 = smov 18  }
  0x18   :  { %s4705_s20 = sld [smem:[%s6210_s0 + %s4598_s15]]   ;;  %s4602_s15 = smov 19  }
  0x19   :  { %s4710_s27 = sld [smem:[%s6210_s0 + %s4599_s22]]   ;;  %s4603_s22 = smov 20  }
  0x1a   :  { %s4715_s4 = sld [smem:[%s6210_s0 + %s4600_s28]]   ;;  %s4604_s28 = smov 21  }
  0x1b   :  { %s4720_s9 = sld [smem:[%s6210_s0 + %s4601_s7]]   ;;  %s4605_s7 = smov 22  }
  0x1c   :  { %6252 = sst [smem:[#allocation11_spill]] %s4695_s6 }
  0x1d   :  { %6253 = sst [smem:[#allocation12_spill]] %s4700_s12 }
  0x1e   :  { %6254 = sst [smem:[#allocation13_spill]] %s4705_s20 }
  0x1f   :  { %6255 = sst [smem:[#allocation14_spill]] %s4710_s27 }
  0x20   :  { %6256 = sst [smem:[#allocation15_spill]] %s4715_s4 }
  0x21   :  { %6257 = sst [smem:[#allocation16_spill]] %s4720_s9 }
  0x22   :  { %s4725_s12 = sld [smem:[%s6210_s0 + %s4602_s15]]   ;;  %s4606_s15 = smov 23  }
  0x23   :  { %s4730_s27 = sld [smem:[%s6210_s0 + %s4603_s22]]   ;;  %s4607_s22 = smov 24  }
  0x24   :  { %s4735_s4 = sld [smem:[%s6210_s0 + %s4604_s28]]   ;;  %s4608_s28 = smov 25  }
  0x25   :  { %s4740_s9 = sld [smem:[%s6210_s0 + %s4605_s7]]   ;;  %s4609_s7 = smov 26  }
  0x28   :  { %6258 = sst [smem:[#allocation17_spill]] %s4725_s12 }
  0x29   :  { %6259 = sst [smem:[#allocation18_spill]] %s4730_s27 }
  0x2a   :  { %6260 = sst [smem:[#allocation19_spill]] %s4735_s4 }
  0x2b   :  { %6261 = sst [smem:[#allocation20_spill]] %s4740_s9 }
  0x2c   :  { %s4745_s12 = sld [smem:[%s6210_s0 + %s4606_s15]]   ;;  %s4610_s15 = smov 27  }
  0x2d   :  { %s4750_s27 = sld [smem:[%s6210_s0 + %s4607_s22]]   ;;  %s4611_s22 = smov 28  }
  0x2e   :  { %s4755_s4 = sld [smem:[%s6210_s0 + %s4608_s28]]   ;;  %s4612_s28 = smov 29  }
  0x2f   :  { %s4760_s9 = sld [smem:[%s6210_s0 + %s4609_s7]]   ;;  %s4777_s7 = smov 0  }
  0x32   :  { %6262 = sst [smem:[#allocation21_spill]] %s4745_s12 }
  0x33   :  { %6263 = sst [smem:[#allocation22_spill]] %s4750_s27 }
  0x34   :  { %6264 = sst [smem:[#allocation23_spill]] %s4755_s4 }
  0x35   :  { %s4765_s12 = sld [smem:[%s6210_s0 + %s4610_s15]]  }
  0x36   :  { %s4770_s27 = sld [smem:[%s6210_s0 + %s4611_s22]]  }
  0x37   :  { %s4775_s4 = sld [smem:[%s6210_s0 + %s4612_s28]]  }
  0x3b   :  { %6265 = sst [smem:[#allocation24_spill]] %s4765_s12 }
  0x3c LB: > { %s6266_s20 = sld [smem:[#allocation13_spill]]  ;;  %s4163_s10 = sadd.s32 4294967295, %s4582_s7   ;;  %s4582_s7 = sphi %s4777_s7, %s69_s7  }
  0x3d   : > { %s6267_s12 = sld [smem:[#allocation24_spill]]  ;;  %p4167_p0 = scmp.ge.s32.totalorder %s4582_s7, 1 }
  0x3e   : > { %s6268_s6 = sld [smem:[#allocation11_spill]]  ;;  %p819_p1 = scmp.lt.s32.totalorder %s4582_s7, 3 }
  0x40   : > { %p820_p2 = pnand %p4167_p0, %p819_p1 }
  0x41   : > { %s6269_s13 = sld [smem:[#allocation5_spill]] (!%p820_p2)  ;;  %s897_s0 = smul.u32 (!%p820_p2), 3, %s4163_s10 }
  0x42   : > { %823 = sbr.rel (%p820_p2) target bundleno = 4663 (0x1237), region = 136  ;;  %s6270_s5 = sld [smem:[#allocation3_spill]] (!%p820_p2) }
  0x43   : > { %p898_p3 = scmp.lt.s32.totalorder (!%p820_p2), %s897_s0, 5  ;;  %s6271_s17 = sld [smem:[#allocation6_spill]] (!%p820_p2) }
  0x44   : > { %s6272_s14 = sld [smem:[#allocation9_spill]] (!%p820_p2)  ;;  %s5213_s2 = sshll.u32 (!%p820_p2), %s4163_s10, 1 }
  0x45   : > { %s6273_s8 = sld [smem:[#allocation8_spill]] (!%p820_p2)  ;;  %p2139_p4 = scmp.lt.s32.totalorder (!%p820_p2), %s5213_s2, 0 }
  0x46   : > { %s6274_s3 = sld [smem:[#allocation7_spill]] (!%p820_p2)  ;;  %p905_p6 = scmp.lt.s32.totalorder (!%p820_p2), %s5213_s2, 3 }
  0x47   : > { %v935_v0 = vld [vmem:[%s6269_s13] sm:$0xff]  ;;  %s6297_s0 = smov (!%p898_p3, %s897_s0), 5  ;;  %vm940_vm0 = vcmask 64512   ;;  %vm1196_vm1 = vcmask 31744   ;;  %vm1304_vm2 = vcmask 523264   ;;  %s6275_s19 = sld [smem:[#allocation10_spill]] }
  0x48   : > { %1028 = vmatpush.msra.mxu0 %v935_v0  ;;  %s4369_s11 = sshll.u32 %s6297_s0, 6  ;;  %v1102_v4 = vld [vmem:[%s4650_s21] sm:$0xff]  ;;  %vm1859_vm3 = vcmask 130048   ;;  %vm1810_vm4 = vcmask 1043456   ;;  %vm1882_vm5 = vcmask 93184   ;;  %s6276_s16 = sld [smem:[#allocation15_spill]] }
  0x49   : > { %s4789_s15 = scalar_lea.vmem %s6270_s5, %s4369_s11  ;;  %1122 = vmatpush.msra.mxu1 %v1102_v4  ;;  %4371 = vmatpush.msra.mxu3 %v1102_v4  ;;  %v4864_v34 = vld [vmem:[%s6271_s17] ss:$0 sm:$0xff]  ;;  %vm1894_vm6 = vcmask 97280   ;;  %s6277_s18 = sld [smem:[#allocation14_spill]]  ;;  %vm2029_vm7 = vcmask 27648   ;;  %vm1813_vm8 = vcmask 58368  }
  0x4a   : > { %v911_v1 = vld [vmem:[%s4789_s15] sm:$0xff]  ;;  %v912_v2 = vld [vmem:[%s4789_s15 + $0x8] sm:$0xff]  ;;  %v913_v3 = vld [vmem:[%s4789_s15 + $0x10] sm:$0xff]  ;;  %s6278_s22 = sld [smem:[#allocation12_spill]]  ;;  %s2140_s0 = ssub.s32 0, %s5213_s2  ;;  %vm3288_vm9 = vcmask 1046528  }
  0x4b   : > { %4173 = vmatmul.msk.f32.vlgmr.msra.gmra.mxu0 %vm940_vm0, %v911_v1  ;;  %4197 = vmatmul.msk.f32.vlgmr.msra.gmra.mxu1 %vm940_vm0, %v911_v1  ;;  %v914_v5 = vld [vmem:[%s4789_s15 + $0x18] sm:$0xff]  ;;  %v915_v6 = vld [vmem:[%s4789_s15 + $0x20] sm:$0xff]  ;;  %v916_v7 = vld [vmem:[%s4789_s15 + $0x28] sm:$0xff]  ;;  %s6279_s23 = sld [smem:[#allocation16_spill]]  ;;  %s4245_s11 = smin.u32 %s5213_s2, %s2140_s0  ;;  %vm3337_vm10 = vcmask 1045504   ;;  %vm3834_vm11 = vcmask 195584  }
  0x4c   : > { %v917_v8 = vld [vmem:[%s4789_s15 + $0x30] sm:$0xff]  ;;  %v918_v9 = vld [vmem:[%s4789_s15 + $0x38] sm:$0xff]  ;;  %v919_v10 = vld [vmem:[%s4789_s15 + $0x40] sm:$0xff]  ;;  %s6280_s26 = sld [smem:[#allocation17_spill]]  ;;  %vm3851_vm12 = vcmask 261120   ;;  %vm3868_vm13 = vcmask 326656  }
  0x4d   : > { %v920_v11 = vld [vmem:[%s4789_s15 + $0x48] sm:$0xff]  ;;  %v921_v12 = vld [vmem:[%s4789_s15 + $0x50] sm:$0xff]  ;;  %v922_v13 = vld [vmem:[%s4789_s15 + $0x58] sm:$0xff]  ;;  %s6281_s28 = sld [smem:[#allocation21_spill]]  ;;  %vm3885_vm14 = vcmask 392192   ;;  %vm3902_vm15 = vcmask 457728  }
  0x4e   : > { %v923_v14 = vld [vmem:[%s4789_s15 + $0x60] sm:$0xff]  ;;  %v924_v15 = vld [vmem:[%s4789_s15 + $0x68] sm:$0xff]  ;;  %v925_v16 = vld [vmem:[%s4789_s15 + $0x70] sm:$0xff]  ;;  %s6282_s1 = sld [smem:[#allocation4_spill]] }
  0x4f   : > { %v926_v17 = vld [vmem:[%s4789_s15 + $0x78] sm:$0xff]  ;;  %v927_v19 = vld [vmem:[%s4789_s15 + $0x80] sm:$0xff]  ;;  %v928_v21 = vld [vmem:[%s4789_s15 + $0x88] sm:$0xff]  ;;  %s6283_s13 = sld [smem:[#allocation19_spill]] }
  0x50   : > { %v929_v23 = vld [vmem:[%s4789_s15 + $0x90] sm:$0xff]  ;;  %v932_v24 = vld [vmem:[%s4789_s15 + $0xa8] sm:$0xff]  ;;  %v930_v26 = vld [vmem:[%s4789_s15 + $0x98] sm:$0xff]  ;;  %s6287_s0 = sld [smem:[#allocation23_spill]] }
  0x51   : > { %4218 = vmatmul.msk.f32.vlgmr.msra.gmra.mxu3 %vm940_vm0, %v932_v24  ;;  %v933_v27 = vld [vmem:[%s4789_s15 + $0xb0] sm:$0xff]  ;;  %v931_v29 = vld [vmem:[%s4789_s15 + $0xa0] sm:$0xff]  ;;  %v934_v30 = vld [vmem:[%s4789_s15 + $0xb8] sm:$0xff]  ;;  %s2142_s15 = sand.u32 1, %s4245_s11   ;;  %s6223_s11 = smov 8  }
  0x53   : > { %4174 = vmatmul.msk.f32.gmra.mxu0 %vm940_vm0, %v912_v2  ;;  %4198 = vmatmul.msk.f32.gmra.mxu1 %vm940_vm0, %v912_v2 }
  0x59   : > { %4219 = vmatmul.msk.f32.gmra.mxu3 %vm940_vm0, %v933_v27 }
  0x5b   : > { %4175 = vmatmul.msk.f32.gmra.mxu0 %vm940_vm0, %v913_v3  ;;  %4199 = vmatmul.msk.f32.gmra.mxu1 %vm940_vm0, %v913_v3 }
  0x61   : > { %4220 = vmatmul.msk.f32.gmra.mxu3 %vm940_vm0, %v934_v30 }
  0x63   : > { %4176 = vmatmul.msk.f32.gmra.mxu0 %vm940_vm0, %v914_v5  ;;  %4200 = vmatmul.msk.f32.gmra.mxu1 %vm940_vm0, %v914_v5 }
  0x6b   : > { %4177 = vmatmul.msk.f32.gmra.mxu0 %vm940_vm0, %v915_v6  ;;  %4201 = vmatmul.msk.f32.gmra.mxu1 %vm940_vm0, %v915_v6 }
  0x73   : > { %4178 = vmatmul.msk.f32.gmra.mxu0 %vm940_vm0, %v916_v7  ;;  %4202 = vmatmul.msk.f32.gmra.mxu1 %vm940_vm0, %v916_v7 }
  0x7b   : > { %4179 = vmatmul.msk.f32.gmra.mxu0 %vm940_vm0, %v917_v8  ;;  %4203 = vmatmul.msk.f32.gmra.mxu1 %vm940_vm0, %v917_v8 }
  0x83   : > { %4180 = vmatmul.msk.f32.gmra.mxu0 %vm940_vm0, %v918_v9  ;;  %4204 = vmatmul.msk.f32.gmra.mxu1 %vm940_vm0, %v918_v9 }
  0x8b   : > { %4181 = vmatmul.msk.f32.gmra.mxu0 %vm940_vm0, %v919_v10  ;;  %4205 = vmatmul.msk.f32.gmra.mxu1 %vm940_vm0, %v919_v10 }
  0x93   : > { %4182 = vmatmul.msk.f32.gmra.mxu0 %vm940_vm0, %v920_v11  ;;  %4206 = vmatmul.msk.f32.gmra.mxu1 %vm940_vm0, %v920_v11 }
  0x9b   : > { %4183 = vmatmul.msk.f32.gmra.mxu0 %vm940_vm0, %v921_v12  ;;  %4207 = vmatmul.msk.f32.gmra.mxu1 %vm940_vm0, %v921_v12 }
  0xa3   : > { %4184 = vmatmul.msk.f32.gmra.mxu0 %vm940_vm0, %v922_v13  ;;  %4208 = vmatmul.msk.f32.gmra.mxu1 %vm940_vm0, %v922_v13 }
  0xab   : > { %4185 = vmatmul.msk.f32.gmra.mxu0 %vm940_vm0, %v923_v14  ;;  %4209 = vmatmul.msk.f32.gmra.mxu1 %vm940_vm0, %v923_v14 }
  0xb3   : > { %4186 = vmatmul.msk.f32.gmra.mxu0 %vm940_vm0, %v924_v15  ;;  %4210 = vmatmul.msk.f32.gmra.mxu1 %vm940_vm0, %v924_v15 }
  0xbb   : > { %4187 = vmatmul.msk.f32.gmra.mxu0 %vm940_vm0, %v925_v16  ;;  %4211 = vmatmul.msk.f32.gmra.mxu1 %vm940_vm0, %v925_v16 }
  0xc3   : > { %4188 = vmatmul.msk.f32.gmra.mxu0 %vm940_vm0, %v926_v17  ;;  %4212 = vmatmul.msk.f32.gmra.mxu1 %vm940_vm0, %v926_v17 }
  0xc8   : > { %v1030_v18 = vpop.f32.mrf.mxu0  ;;  %v4861_v32 = vpop.f32.mrf.mxu1 }
  0xc9   : > { %v1031_v39 = vadd.f32 %v4864_v34, %v1030_v18 }
  0xcb   : > { %4189 = vmatmul.msk.f32.gmra.mxu0 %vm940_vm0, %v927_v19  ;;  %4213 = vmatmul.msk.f32.gmra.mxu1 %vm940_vm0, %v927_v19  ;;  %v1197_v50 = vsel %vm1196_vm1, %v1031_v39, -inf }
  0xd0   : > { %v1033_v20 = vpop.f32.mrf.mxu0  ;;  %v4880_v48 = vpop.f32.mrf.mxu1 }
  0xd1   : > { %v1034_v36 = vadd.f32 %v4864_v34, %v1033_v20 }
  0xd3   : > { %4190 = vmatmul.msk.f32.gmra.mxu0 %vm940_vm0, %v928_v21  ;;  %4214 = vmatmul.msk.f32.gmra.mxu1 %vm940_vm0, %v928_v21  ;;  %v1198_v44 = vsel %vm1196_vm1, %v1034_v36, -inf }
  0xd8   : > { %v1036_v22 = vpop.f32.mrf.mxu0  ;;  %v4889_v61 = vpop.f32.mrf.mxu1 }
  0xd9   : > { %v1037_v40 = vadd.f32 %v4864_v34, %v1036_v22 }
  0xdb   : > { %4191 = vmatmul.msk.f32.gmra.mxu0 %vm940_vm0, %v929_v23  ;;  %4215 = vmatmul.msk.f32.gmra.mxu1 %vm940_vm0, %v929_v23  ;;  %v1199_v51 = vsel %vm1196_vm1, %v1037_v40, -inf }
  0xe0   : > { %v1039_v25 = vpop.f32.mrf.mxu0  ;;  %v4893_v3 = vpop.f32.mrf.mxu1 }
  0xe1   : > { %v1040_v41 = vadd.f32 %v4864_v34, %v1039_v25 }
  0xe3   : > { %4192 = vmatmul.msk.f32.gmra.mxu0 %vm940_vm0, %v930_v26  ;;  %4216 = vmatmul.msk.f32.gmra.mxu1 %vm940_vm0, %v930_v26  ;;  %v1200_v52 = vsel %vm1196_vm1, %v1040_v41, -inf }
  0xe8   : > { %v1042_v28 = vpop.f32.mrf.mxu0  ;;  %v1136_v14 = vpop.f32.mrf.mxu1 }
  0xe9   : > { %v1043_v37 = vadd.f32 %v4864_v34, %v1042_v28 }
  0xeb   : > { %4193 = vmatmul.msk.f32.gmra.mxu0 %vm940_vm0, %v931_v29  ;;  %4217 = vmatmul.msk.f32.gmra.mxu1 %vm940_vm0, %v931_v29  ;;  %v1201_v45 = vsel %vm1196_vm1, %v1043_v37, -inf }
  0xec   : > { %v1202_v54 = vmax.f32 %v1197_v50, %v1201_v45 }
  0xf0   : > { %v1045_v31 = vpop.f32.mrf.mxu0  ;;  %v1139_v25 = vpop.f32.mrf.mxu1 }
  0xf1   : > { %v1046_v35 = vadd.f32 %v4864_v34, %v1045_v31 }
  0xf3   : > { %4194 = vmatmul.msk.f32.gmra.mxu0 %vm940_vm0, %v932_v24  ;;  %v1203_v42 = vsel %vm1196_vm1, %v1046_v35, -inf }
  0xf4   : > { %v1204_v49 = vmax.f32 %v1198_v44, %v1203_v42 }
  0xf6   : > { %v1209_v57 = vmax.f32 %v1202_v54, %v1204_v49 }
  0xf8   : > { %v1048_v33 = vpop.f32.mrf.mxu0  ;;  %v1142_v42 = vpop.f32.mrf.mxu1 }
  0xf9   : > { %v1049_v38 = vadd.f32 %v4864_v34, %v1048_v33 }
  0xfb   : > { %4195 = vmatmul.msk.f32.gmra.mxu0 %vm940_vm0, %v933_v27  ;;  %v1205_v46 = vsel %vm1196_vm1, %v1049_v38, -inf }
  0xfc   : > { %v1206_v55 = vmax.f32 %v1199_v51, %v1205_v46  ;;  %v4928_v51 = vld [vmem:[%s4655_s25] ss:$0 sm:$0xff] }
 0x100   : > { %v1051_v43 = vpop.f32.mrf.mxu0 }
 0x101   : > { %v1052_v47 = vadd.f32 %v4864_v34, %v1051_v43 }
 0x103   : > { %v1207_v53 = vsel %vm1196_vm1, %v1052_v47, -inf  ;;  %4196 = vmatmul.msk.f32.gmra.mxu0 %vm940_vm0, %v934_v30 }
 0x104   : > { %v1208_v56 = vmax.f32 %v1200_v52, %v1207_v53 }
 0x106   : > { %v1210_v58 = vmax.f32 %v1206_v55, %v1208_v56  ;;  %v1145_v56 = vpop.f32.mrf.mxu1 }
 0x108   : > { %v1211_v59 = vmax.f32 %v1209_v57, %v1210_v58  ;;  %v4887_v60 = vpop.f32.mrf.mxu0  ;;  %v1146_v57 = vadd.f32 %v4928_v51, %v1145_v56  ;;  %v1143_v58 = vadd.f32 %v4928_v51, %v1142_v42 }
 0x10a   : > { %v1212_v62 = vrot.slane %v1211_v59, 4  ;;  %1316 = vmatpush.msrb.mxu0 %v1146_v57 }
 0x10c   : > { %v1213_v63 = vmax.f32 %v1211_v59, %v1212_v62  ;;  %v1140_v62 = vadd.f32 %v4928_v51, %v1139_v25  ;;  %1317 = vmatpush.msrb.mxu0 %v1143_v58 }
 0x10e   : > { %v1214_v0 = vrot.slane %v1213_v63, 2  ;;  %1318 = vmatpush.msrb.mxu0 %v1140_v62 }
 0x110   : > { %v1215_v1 = vmax.f32 %v1213_v63, %v1214_v0  ;;  %v4891_v2 = vpop.f32.mrf.mxu0  ;;  %v1137_v0 = vadd.f32 %v4928_v51, %v1136_v14 }
 0x112   : > { %v1216_v4 = vrot.slane %v1215_v1, 1  ;;  %1319 = vmatpush.msrb.mxu0 %v1137_v0 }
 0x114   : > { %v1217_v5 = vmax.f32 %v1215_v1, %v1216_v4  ;;  %v1055_v4 = vadd.f32 %v4864_v34, %v4887_v60 }
 0x116   : > { %v1218_v6 = vsub.f32 %v1031_v39, %v1217_v5  ;;  %v1219_v7 = vsub.f32 %v1034_v36, %v1217_v5  ;;  %v1220_v8 = vsub.f32 %v1037_v40, %v1217_v5  ;;  %v1221_v9 = vsub.f32 %v1040_v41, %v1217_v5 }
 0x117   : > { %v1222_v11 = vsub.f32 %v1043_v37, %v1217_v5  ;;  %v1223_v16 = vsub.f32 %v1046_v35, %v1217_v5  ;;  %v1224_v18 = vsub.f32 %v1049_v38, %v1217_v5  ;;  %v1225_v20 = vsub.f32 %v1052_v47, %v1217_v5 }
 0x118   : > { %v4895_v10 = vpop.f32.mrf.mxu0  ;;  %v1226_v12 = vmul.f32 1.442695, %v1218_v6  ;;  %v1228_v13 = vmul.f32 1.442695, %v1219_v7  ;;  %v1230_v15 = vmul.f32 1.442695, %v1220_v8  ;;  %v1134_v6 = vadd.f32 %v4928_v51, %v4893_v3 }
 0x119   : > { %v1232_v17 = vmul.f32 1.442695, %v1221_v9  ;;  %v1234_v19 = vmul.f32 1.442695, %v1222_v11  ;;  %v1236_v21 = vmul.f32 1.442695, %v1223_v16  ;;  %v1058_v8 = vadd.f32 %v4864_v34, %v4891_v2 }
 0x11a   : > { %4441 = vpow2.f32 %v1226_v12  ;;  %v1238_v23 = vmul.f32 1.442695, %v1224_v18  ;;  %v1240_v27 = vmul.f32 1.442695, %v1225_v20  ;;  %v1131_v12 = vadd.f32 %v4928_v51, %v4889_v61  ;;  %1320 = vmatpush.msrb.mxu0 %v1134_v6 }
 0x11b   : > { %4443 = vpow2.f32 %v1228_v13  ;;  %v1061_v60 = vadd.f32 %v4864_v34, %v4895_v10  ;;  %v1413_v3 = vsel %vm1196_vm1, %v1055_v4, -inf  ;;  %v1414_v2 = vsel %vm1196_vm1, %v1058_v8, -inf }
 0x11c   : > { %4445 = vpow2.f32 %v1230_v15  ;;  %1321 = vmatpush.msrb.mxu0 %v1131_v12 }
 0x11d   : > { %4447 = vpow2.f32 %v1232_v17  ;;  %v1415_v61 = vsel %vm1196_vm1, %v1061_v60, -inf }
 0x11e   : > { %4449 = vpow2.f32 %v1234_v19 }
 0x11f   : > { %4451 = vpow2.f32 %v1236_v21 }
 0x120   : > { %v1063_v22 = vpop.f32.mrf.mxu0  ;;  %v4897_v24 = vpop.eup %4441  ;;  %4453 = vpow2.f32 %v1238_v23 }
 0x121   : > { %v4899_v26 = vpop.eup %4443  ;;  %v1242_v28 = vsel %vm1196_vm1, %v4897_v24, 0.0  ;;  %4455 = vpow2.f32 %v1240_v27  ;;  %v1064_v16 = vadd.f32 %v4864_v34, %v1063_v22  ;;  %v1128_v22 = vadd.f32 %v4928_v51, %v4880_v48 }
 0x122   : > { %v4903_v29 = vpop.eup %4445  ;;  %v1243_v30 = vsel %vm1196_vm1, %v4899_v26, 0.0  ;;  %v1125_v27 = vadd.f32 %v4928_v51, %v4861_v32 }
 0x123   : > { %v4907_v31 = vpop.eup %4447  ;;  %v1244_v33 = vadd.f32 %v1243_v30, %v1242_v28  ;;  %v1245_v35 = vsel %vm1196_vm1, %v4903_v29, 0.0  ;;  %v1416_v23 = vsel %vm1196_vm1, %v1064_v16, -inf  ;;  %1322 = vmatpush.msrb.mxu0 %v1128_v22 }
 0x124   : > { %v4911_v36 = vpop.eup %4449  ;;  %v1247_v38 = vsel %vm1196_vm1, %v4907_v31, 0.0 }
 0x125   : > { %v1246_v37 = vadd.f32 %v1245_v35, %v1244_v33  ;;  %v4915_v39 = vpop.eup %4451  ;;  %v1249_v43 = vsel %vm1196_vm1, %v4911_v36, 0.0  ;;  %1323 = vmatpush.msrb.mxu0 %v1125_v27 }
 0x126   : > { %v4919_v44 = vpop.eup %4453  ;;  %v1251_v46 = vsel %vm1196_vm1, %v4915_v39, 0.0 }
 0x127   : > { %v1248_v41 = vadd.f32 %v1247_v38, %v1246_v37  ;;  %v4923_v47 = vpop.eup %4455  ;;  %v1253_v50 = vsel %vm1196_vm1, %v4919_v44, 0.0 }
 0x128   : > { %v1066_v40 = vpop.f32.mrf.mxu0  ;;  %v1255_v53 = vsel %vm1196_vm1, %v4923_v47, 0.0 }
 0x129   : > { %v1250_v45 = vadd.f32 %v1249_v43, %v1248_v41  ;;  %v1067_v9 = vadd.f32 %v4864_v34, %v1066_v40 }
 0x12b   : > { %v1252_v49 = vadd.f32 %v1251_v46, %v1250_v45  ;;  %v1417_v17 = vsel %vm1196_vm1, %v1067_v9, -inf }
 0x12c   : > { %v1418_v19 = vmax.f32 %v1413_v3, %v1417_v17 }
 0x12d   : > { %v1254_v52 = vadd.f32 %v1253_v50, %v1252_v49 }
 0x12f   : > { %v1256_v55 = vadd.f32 %v1255_v53, %v1254_v52 }
 0x130   : > { %v1069_v54 = vpop.f32.mrf.mxu0 }
 0x131   : > { %v1257_v59 = vrot.slane %v1256_v55, 4  ;;  %v4944_v11 = vadd.f32 %v4864_v34, %v1069_v54 }
 0x133   : > { %v1258_v63 = vadd.f32 %v1257_v59, %v1256_v55  ;;  %v1419_v18 = vsel %vm1196_vm1, %v4944_v11, -inf }
 0x134   : > { %v1420_v20 = vmax.f32 %v1414_v2, %v1419_v18 }
 0x135   : > { %v1259_v1 = vrot.slane %v1258_v63, 2 }
 0x136   : > { %v1425_v35 = vmax.f32 %v1418_v19, %v1420_v20 }
 0x137   : > { %v1260_v7 = vadd.f32 %v1259_v1, %v1258_v63 }
 0x138   : > { %v1072_v5 = vpop.f32.mrf.mxu0 }
 0x139   : > { %v1261_v13 = vrot.slane %v1260_v7, 1  ;;  %v1073_v14 = vadd.f32 %v4864_v34, %v1072_v5 }
 0x13b   : > { %v1262_v15 = vadd.f32 %v1261_v13, %v1260_v7  ;;  %v1421_v10 = vsel %vm1196_vm1, %v1073_v14, -inf }
 0x13c   : > { %v1422_v28 = vmax.f32 %v1415_v61, %v1421_v10 }
 0x13d   : > { %4457 = vrcp.f32 %v1262_v15 }
 0x140   : > { %v1075_v21 = vpop.f32.mrf.mxu0 }
 0x141   : > { %v1076_v25 = vadd.f32 %v4864_v34, %v1075_v21 }
 0x143   : > { %v1423_v30 = vsel %vm1196_vm1, %v1076_v25, -inf  ;;  %v4966_v33 = vpop.eup %4457 }
 0x144   : > { %v1424_v37 = vmax.f32 %v1416_v23, %v1423_v30  ;;  %v1264_v38 = vmul.f32 %v4966_v33, %v4897_v24  ;;  %v1265_v32 = vmul.f32 %v4966_v33, %v4899_v26  ;;  %v1266_v24 = vmul.f32 %v4966_v33, %v4903_v29 }
 0x145   : > { %v1269_v30 = vmul.f32 %v4966_v33, %v4915_v39 }
 0x146   : > { %v1426_v40 = vmax.f32 %v1422_v28, %v1424_v37  ;;  %1272 = vxpose.xlu0.b32.start [1/8] (short) (narrow) %v1264_v38, 8 }
 0x148   : > { %v1427_v41 = vmax.f32 %v1425_v35, %v1426_v40  ;;  %v4970_v42 = vpop.f32.mrf.mxu0 }
 0x14a   : > { %v1428_v48 = vrot.slane %v1427_v41, 4 }
 0x14c   : > { %v1429_v43 = vmax.f32 %v1427_v41, %v1428_v48  ;;  %v1270_v48 = vmul.f32 %v4966_v33, %v4919_v44 }
 0x14e   : > { %v1430_v45 = vrot.slane %v1429_v43, 2  ;;  %1273 = vxpose.xlu0.b32.cont [2/8] (short) (narrow) %v1265_v32, 8  ;;  %v1079_v32 = vadd.f32 %v4864_v34, %v4970_v42  ;;  %v1271_v42 = vmul.f32 %v4966_v33, %v4923_v47 }
 0x150   : > { %v1431_v46 = vmax.f32 %v1429_v43, %v1430_v45  ;;  %v4974_v49 = vpop.f32.mrf.mxu0 }
 0x152   : > { %v1432_v50 = vrot.slane %v1431_v46, 1 }
 0x154   : > { %v1433_v52 = vmax.f32 %v1431_v46, %v1432_v50  ;;  %v1082_v50 = vadd.f32 %v4864_v34, %v4974_v49 }
 0x156   : > { %v1434_v53 = vsub.f32 %v1055_v4, %v1433_v52  ;;  %v1435_v54 = vsub.f32 %v1058_v8, %v1433_v52  ;;  %v1436_v55 = vsub.f32 %v1061_v60, %v1433_v52  ;;  %1274 = vxpose.xlu0.b32.cont [3/8] (short) (narrow) %v1266_v24, 8  ;;  %v1437_v56 = vsub.f32 %v1064_v16, %v1433_v52 }
 0x157   : > { %v1438_v57 = vsub.f32 %v1067_v9, %v1433_v52  ;;  %v1439_v26 = vsub.f32 %v4944_v11, %v1433_v52  ;;  %v1440_v0 = vsub.f32 %v1073_v14, %v1433_v52  ;;  %v1441_v6 = vsub.f32 %v1076_v25, %v1433_v52 }
 0x158   : > { %v4978_v58 = vpop.f32.mrf.mxu0  ;;  %v1442_v59 = vmul.f32 1.442695, %v1434_v53  ;;  %v1444_v62 = vmul.f32 1.442695, %v1435_v54  ;;  %v1446_v63 = vmul.f32 1.442695, %v1436_v55  ;;  %v1267_v4 = vmul.f32 %v4966_v33, %v4907_v31 }
 0x159   : > { %v1448_v1 = vmul.f32 1.442695, %v1437_v56  ;;  %v1450_v5 = vmul.f32 1.442695, %v1438_v57  ;;  %v1452_v29 = vmul.f32 1.442695, %v1439_v26  ;;  %v1268_v16 = vmul.f32 %v4966_v33, %v4911_v36 }
 0x15a   : > { %4459 = vpow2.f32 %v1442_v59  ;;  %v1454_v7 = vmul.f32 1.442695, %v1440_v0  ;;  %v1456_v8 = vmul.f32 1.442695, %v1441_v6  ;;  %v1085_v53 = vadd.f32 %v4864_v34, %v4978_v58 }
 0x15b   : > { %4461 = vpow2.f32 %v1444_v62  ;;  %v1610_v54 = vsel %vm1196_vm1, %v1079_v32, -inf  ;;  %v1611_v56 = vsel %vm1196_vm1, %v1082_v50, -inf }
 0x15c   : > { %4463 = vpow2.f32 %v1446_v63  ;;  %v1612_v59 = vsel %vm1196_vm1, %v1085_v53, -inf }
 0x15d   : > { %4465 = vpow2.f32 %v1448_v1 }
 0x15e   : > { %1275 = vxpose.xlu0.b32.cont [4/8] (short) (narrow) %v1267_v4, 8  ;;  %4467 = vpow2.f32 %v1450_v5 }
 0x15f   : > { %4469 = vpow2.f32 %v1452_v29 }
 0x160   : > { %v1087_v9 = vpop.f32.mrf.mxu0  ;;  %v4983_v11 = vpop.eup %4459  ;;  %4471 = vpow2.f32 %v1454_v7 }
 0x161   : > { %v4985_v12 = vpop.eup %4461  ;;  %v1458_v13 = vsel %vm1196_vm1, %v4983_v11, 0.0  ;;  %4473 = vpow2.f32 %v1456_v8  ;;  %v1088_v49 = vadd.f32 %v4864_v34, %v1087_v9 }
 0x162   : > { %v4989_v60 = vpop.eup %4463  ;;  %v1459_v31 = vsel %vm1196_vm1, %v4985_v12, 0.0 }
 0x163   : > { %v4993_v14 = vpop.eup %4465  ;;  %v1460_v3 = vadd.f32 %v1459_v31, %v1458_v13  ;;  %v1461_v15 = vsel %vm1196_vm1, %v4989_v60, 0.0  ;;  %v1613_v47 = vsel %vm1196_vm1, %v1088_v49, -inf }
 0x164   : > { %v4997_v2 = vpop.eup %4467  ;;  %v1463_v17 = vsel %vm1196_vm1, %v4993_v14, 0.0 }
 0x165   : > { %v5003_v18 = vpop.eup %4469  ;;  %v1462_v61 = vadd.f32 %v1461_v15, %v1460_v3  ;;  %v1465_v10 = vsel %vm1196_vm1, %v4997_v2, 0.0 }
 0x166   : > { %1276 = vxpose.xlu0.b32.cont [5/8] (short) (narrow) %v1268_v16, 8  ;;  %v5007_v19 = vpop.eup %4471  ;;  %v1467_v23 = vsel %vm1196_vm1, %v5003_v18, 0.0 }
 0x167   : > { %v1464_v21 = vadd.f32 %v1463_v17, %v1462_v61  ;;  %v5011_v25 = vpop.eup %4473  ;;  %v1469_v22 = vsel %vm1196_vm1, %v5007_v19, 0.0 }
 0x168   : > { %v1090_v20 = vpop.f32.mrf.mxu0  ;;  %v1471_v28 = vsel %vm1196_vm1, %v5011_v25, 0.0 }
 0x169   : > { %v1466_v36 = vadd.f32 %v1465_v10, %v1464_v21  ;;  %v1091_v39 = vadd.f32 %v4864_v34, %v1090_v20 }
 0x16b   : > { %v1468_v27 = vadd.f32 %v1467_v23, %v1466_v36  ;;  %v1614_v57 = vsel %vm1196_vm1, %v1091_v39, -inf }
 0x16c   : > { %v1615_v62 = vmax.f32 %v1610_v54, %v1614_v57 }
 0x16d   : > { %v1470_v35 = vadd.f32 %v1469_v22, %v1468_v27 }
 0x16e   : > { %1277 = vxpose.xlu0.b32.cont [6/8] (short) (narrow) %v1269_v30, 8 }
 0x16f   : > { %v1472_v38 = vadd.f32 %v1471_v28, %v1470_v35 }
 0x170   : > { %v1093_v37 = vpop.f32.mrf.mxu0 }
 0x171   : > { %v1473_v40 = vrot.slane %v1472_v38, 4  ;;  %v1094_v52 = vadd.f32 %v4864_v34, %v1093_v37 }
 0x173   : > { %v1474_v41 = vadd.f32 %v1473_v40, %v1472_v38  ;;  %v1616_v26 = vsel %vm1196_vm1, %v1094_v52, -inf }
 0x174   : > { %v1617_v63 = vmax.f32 %v1611_v56, %v1616_v26 }
 0x175   : > { %v1475_v43 = vrot.slane %v1474_v41, 2 }
 0x176   : > { %1278 = vxpose.xlu0.b32.cont [7/8] (short) (narrow) %v1270_v48, 8  ;;  %v1622_v29 = vmax.f32 %v1615_v62, %v1617_v63 }
 0x177   : > { %v1476_v46 = vadd.f32 %v1475_v43, %v1474_v41 }
 0x178   : > { %v1096_v45 = vpop.f32.mrf.mxu0 }
 0x179   : > { %v1477_v24 = vrot.slane %v1476_v46, 1  ;;  %v1097_v44 = vadd.f32 %v4864_v34, %v1096_v45 }
 0x17b   : > { %v1478_v55 = vadd.f32 %v1477_v24, %v1476_v46  ;;  %v1618_v58 = vsel %vm1196_vm1, %v1097_v44, -inf }
 0x17c   : > { %v1619_v1 = vmax.f32 %v1612_v59, %v1618_v58 }
 0x17d   : > { %4475 = vrcp.f32 %v1478_v55 }
 0x17e   : > { %1279 = vxpose.xlu0.b32.end [8/8] (short) (narrow) %v1271_v42, 8 }
 0x180   : > { %v1099_v0 = vpop.f32.mrf.mxu0 }
 0x181   : > { %v1100_v33 = vadd.f32 %v4864_v34, %v1099_v0  ;;  %v5074_v0 = vld [vmem:[%s4660_s29 + $0x38] sm:$0xff] }
 0x182   : > { %1348 = vmatpush.msrb.mxu3 %v5074_v0 }
 0x183   : > { %v1620_v5 = vsel %vm1196_vm1, %v1100_v33, -inf  ;;  %v5042_v6 = vpop.eup %4475 }
 0x184   : > { %v1621_v4 = vmax.f32 %v1613_v47, %v1620_v5  ;;  %v1480_v7 = vmul.f32 %v5042_v6, %v4983_v11  ;;  %v1481_v3 = vmul.f32 %v5042_v6, %v4985_v12  ;;  %v1482_v61 = vmul.f32 %v5042_v6, %v4989_v60  ;;  %v5077_v47 = vld [vmem:[%s4660_s29 + $0x30] sm:$0xff] }
 0x185   : > { %v1483_v60 = vmul.f32 %v5042_v6, %v4993_v14  ;;  %v1484_v24 = vmul.f32 %v5042_v6, %v4997_v2  ;;  %v1485_v62 = vmul.f32 %v5042_v6, %v5003_v18  ;;  %1349 = vmatpush.msrb.mxu3 %v5077_v47 }
 0x186   : > { %v1623_v8 = vmax.f32 %v1619_v1, %v1621_v4  ;;  %1488 = vxpose.xlu1.b32.start [1/8] (short) (narrow) %v1480_v7, 8  ;;  %v5081_v1 = vld [vmem:[%s4660_s29 + $0x28] sm:$0xff]  ;;  %v1486_v4 = vmul.f32 %v5042_v6, %v5007_v19  ;;  %v1487_v19 = vmul.f32 %v5042_v6, %v5011_v25  ;;  %v5110_v25 = vld [vmem:[%s6272_s14] sm:$0xff]  ;;  %s6239_s14 = smov 32  }
 0x187   : > { %1350 = vmatpush.msrb.mxu3 %v5081_v1  ;;  %1380 = vmatpush.msra.mxu2 %v5110_v25 }
 0x188   : > { %v1624_v9 = vmax.f32 %v1622_v29, %v1623_v8  ;;  %v5085_v29 = vld [vmem:[%s4660_s29 + $0x20] sm:$0xff]  ;;  %v5092_v8 = vld [vmem:[%s4660_s29 + $0x18] sm:$0xff] }
 0x189   : > { %1351 = vmatpush.msrb.mxu3 %v5085_v29 }
 0x18a   : > { %v1625_v13 = vrot.slane %v1624_v9, 4 }
 0x18b   : > { %1352 = vmatpush.msrb.mxu3 %v5092_v8 }
 0x18c   : > { %v1626_v31 = vmax.f32 %v1624_v9, %v1625_v13  ;;  %v5095_v9 = vld [vmem:[%s4660_s29 + $0x10] sm:$0xff] }
 0x18d   : > { %1353 = vmatpush.msrb.mxu3 %v5095_v9 }
 0x18e   : > { %v1627_v15 = vrot.slane %v1626_v31, 2  ;;  %1489 = vxpose.xlu1.b32.cont [2/8] (short) (narrow) %v1481_v3, 8 }
 0x190   : > { %v1628_v34 = vmax.f32 %v1626_v31, %v1627_v15  ;;  %v5099_v31 = vld [vmem:[%s4660_s29 + $0x8] sm:$0xff]  ;;  %v5103_v15 = vld [vmem:[%s4660_s29] sm:$0xff] }
 0x191   : > { %1354 = vmatpush.msrb.mxu3 %v5099_v31 }
 0x192   : > { %v1629_v16 = vrot.slane %v1628_v34, 1 }
 0x193   : > { %1355 = vmatpush.msrb.mxu3 %v5103_v15 }
 0x194   : > { %v1630_v17 = vmax.f32 %v1628_v34, %v1629_v16  ;;  %v1148_v16 = vpop.f32.mrf.mxu1 }
 0x196   : > { %v1631_v10 = vsub.f32 %v1079_v32, %v1630_v17  ;;  %v1632_v20 = vsub.f32 %v1082_v50, %v1630_v17  ;;  %v1633_v21 = vsub.f32 %v1085_v53, %v1630_v17  ;;  %1490 = vxpose.xlu1.b32.cont [3/8] (short) (narrow) %v1482_v61, 8  ;;  %v1634_v11 = vsub.f32 %v1088_v49, %v1630_v17 }
 0x197   : > { %v1635_v23 = vsub.f32 %v1091_v39, %v1630_v17  ;;  %v1636_v36 = vsub.f32 %v1094_v52, %v1630_v17  ;;  %v1637_v30 = vsub.f32 %v1097_v44, %v1630_v17  ;;  %v1638_v37 = vsub.f32 %v1100_v33, %v1630_v17 }
 0x198   : > { %v1639_v22 = vmul.f32 1.442695, %v1631_v10  ;;  %v1641_v27 = vmul.f32 1.442695, %v1632_v20  ;;  %v1643_v28 = vmul.f32 1.442695, %v1633_v21 }
 0x199   : > { %v1645_v12 = vmul.f32 1.442695, %v1634_v11  ;;  %v1647_v35 = vmul.f32 1.442695, %v1635_v23  ;;  %v1649_v38 = vmul.f32 1.442695, %v1636_v36 }
 0x19a   : > { %4477 = vpow2.f32 %v1639_v22  ;;  %v1651_v40 = vmul.f32 1.442695, %v1637_v30  ;;  %v1653_v41 = vmul.f32 1.442695, %v1638_v37 }
 0x19b   : > { %4479 = vpow2.f32 %v1641_v27 }
 0x19c   : > { %4481 = vpow2.f32 %v1643_v28  ;;  %v1151_v20 = vpop.f32.mrf.mxu1 }
 0x19d   : > { %4483 = vpow2.f32 %v1645_v12  ;;  %v5117_v12 = vld [vmem:[%s6273_s8] sm:$0xff] }
 0x19e   : > { %1491 = vxpose.xlu1.b32.cont [4/8] (short) (narrow) %v1483_v60, 8  ;;  %4485 = vpow2.f32 %v1647_v35  ;;  %1403 = vmatpush.msra.mxu3 %v5117_v12 }
 0x19f   : > { %4487 = vpow2.f32 %v1649_v38 }
 0x1a0   : > { %v4478_v48 = vpop.eup %4477  ;;  %4489 = vpow2.f32 %v1651_v40 }
 0x1a1   : > { %v4480_v43 = vpop.eup %4479  ;;  %v1655_v32 = vsel %vm1196_vm1, %v4478_v48, 0.0  ;;  %4491 = vpow2.f32 %v1653_v41 }
 0x1a2   : > { %v4482_v45 = vpop.eup %4481  ;;  %v1656_v46 = vsel %vm1196_vm1, %v4480_v43, 0.0 }
 0x1a3   : > { %v4484_v50 = vpop.eup %4483  ;;  %v1657_v39 = vadd.f32 %v1656_v46, %v1655_v32  ;;  %v1658_v14 = vsel %vm1196_vm1, %v4482_v45, 0.0  ;;  %v1152_v46 = vadd.f32 %v4928_v51, %v1151_v20 }
 0x1a4   : > { %v4486_v52 = vpop.eup %4485  ;;  %v1660_v53 = vsel %vm1196_vm1, %v4484_v50, 0.0  ;;  %v1154_v11 = vpop.f32.mrf.mxu1 }
 0x1a5   : > { %v5058_v44 = vpop.eup %4487  ;;  %v1659_v54 = vadd.f32 %v1658_v14, %v1657_v39  ;;  %v1662_v42 = vsel %vm1196_vm1, %v4486_v52, 0.0  ;;  %v1187_v39 = vpop.f32.mrf.mxu3 }
 0x1a6   : > { %1492 = vxpose.xlu1.b32.cont [5/8] (short) (narrow) %v1484_v24, 8  ;;  %v5061_v55 = vpop.eup %4489  ;;  %v1664_v49 = vsel %vm1196_vm1, %v5058_v44, 0.0 }
 0x1a7   : > { %v1661_v56 = vadd.f32 %v1660_v53, %v1659_v54  ;;  %v5065_v57 = vpop.eup %4491  ;;  %v1666_v26 = vsel %vm1196_vm1, %v5061_v55, 0.0  ;;  %v4422_v53 = vld [vmem:[%s6274_s3] ss:$0 sm:$0xff]  ;;  %s2143_s3 = ssub.s32 0, %s2142_s15 }
 0x1a8   : > { %v1668_v58 = vsel %vm1196_vm1, %v5065_v57, 0.0  ;;  %s6299_s3 = smov (!%p2139_p4, %s2143_s3), %s2142_s15  ;;  %s6225_s15 = smov 16  }
 0x1a9   : > { %v1663_v2 = vadd.f32 %v1662_v42, %v1661_v56  ;;  %p4247_p5 = scmp.lt.s32.totalorder %s6299_s3, 0  ;;  %s2149_s5 = sadd.s32 2, %s6299_s3 }
 0x1ab   : > { %v1665_v59 = vadd.f32 %v1664_v49, %v1663_v2  ;;  %v1188_v49 = vadd.f32 %v4928_v51, %v1187_v39  ;;  %s6301_s5 = smov (!%p4247_p5, %s2149_s5), %s6299_s3  ;;  %s6285_s3 = sld [smem:[#allocation20_spill]] }
 0x1ac   : > { %v1157_v36 = vpop.f32.mrf.mxu1  ;;  %s4248_s8 = smul.u32 192, %s6301_s5  ;;  %s6284_s5 = sld [smem:[#allocation18_spill]] }
 0x1ad   : > { %v1667_v63 = vadd.f32 %v1666_v26, %v1665_v59  ;;  %v1158_v32 = vadd.f32 %v4928_v51, %v1157_v36  ;;  %v1190_v14 = vpop.f32.mrf.mxu3  ;;  %v4424_v36 = vld [vmem:[%s4690_s30] ss:$0 sm:$0xff] }
 0x1ae   : > { %1493 = vxpose.xlu1.b32.cont [6/8] (short) (narrow) %v1485_v62, 8  ;;  %v1191_v56 = vadd.f32 %v4928_v51, %v1190_v14  ;;  %v4426_v14 = vld [vmem:[%s6277_s18] ss:$0 sm:$0xff]  ;;  %s4104_s10 = scalar_lea.vmem %s6282_s1, %s4248_s8  ;;  %s6286_s8 = sld [smem:[#allocation22_spill]] }
 0x1af   : > { %v1669_v33 = vadd.f32 %v1668_v58, %v1667_v63 }
 0x1b1   : > { %v1670_v5 = vrot.slane %v1669_v33, 4 }
 0x1b3   : > { %v1671_v18 = vadd.f32 %v1670_v5, %v1669_v33 }
 0x1b4   : > { %v1160_v22 = vpop.f32.mrf.mxu1 }
 0x1b5   : > { %v1672_v7 = vrot.slane %v1671_v18, 2 }
 0x1b6   : > { %1494 = vxpose.xlu1.b32.cont [7/8] (short) (narrow) %v1486_v4, 8 }
 0x1b7   : > { %v1673_v13 = vadd.f32 %v1672_v7, %v1671_v18 }
 0x1b9   : > { %v1674_v3 = vrot.slane %v1673_v13, 1 }
 0x1bb   : > { %v1675_v34 = vadd.f32 %v1674_v3, %v1673_v13 }
 0x1bc   : > { %v1163_v30 = vpop.f32.mrf.mxu1 }
 0x1bd   : > { %4493 = vrcp.f32 %v1675_v34 }
 0x1be   : > { %1495 = vxpose.xlu1.b32.end [8/8] (short) (narrow) %v1487_v19, 8  ;;  %v4423_v19 = vld [vmem:[%s6275_s19] ss:$0 sm:$0xff] }
 0x1c3   : > { %v4494_v17 = vpop.eup %4493 }
 0x1c4   : > { %v1677_v61 = vmul.f32 %v4494_v17, %v4478_v48  ;;  %v1678_v10 = vmul.f32 %v4494_v17, %v4480_v43  ;;  %v1679_v21 = vmul.f32 %v4494_v17, %v4482_v45  ;;  %v1680_v23 = vmul.f32 %v4494_v17, %v4484_v50  ;;  %v1166_v37 = vpop.f32.mrf.mxu1 }
 0x1c5   : > { %v1681_v6 = vmul.f32 %v4494_v17, %v4486_v52  ;;  %v1682_v28 = vmul.f32 %v4494_v17, %v5058_v44  ;;  %v1683_v35 = vmul.f32 %v4494_v17, %v5061_v55  ;;  %v1684_v38 = vmul.f32 %v4494_v17, %v5065_v57  ;;  %v1193_v52 = vpop.f32.mrf.mxu3 }
 0x1c6   : > { %1685 = vxpose.xlu2.b32.start [1/8] (short) (narrow) %v1677_v61, 8  ;;  %v1167_v40 = vadd.f32 %v4928_v51, %v1166_v37  ;;  %v1164_v48 = vadd.f32 %v4928_v51, %v1163_v30  ;;  %v1161_v43 = vadd.f32 %v4928_v51, %v1160_v22  ;;  %v1155_v45 = vadd.f32 %v4928_v51, %v1154_v11 }
 0x1c7   : > { %v1149_v50 = vadd.f32 %v4928_v51, %v1148_v16  ;;  %v1194_v55 = vadd.f32 %v4928_v51, %v1193_v52  ;;  %v4425_v52 = vld [vmem:[%s6278_s22] ss:$0 sm:$0xff] }
 0x1cc   : > { %v1169_v60 = vpop.f32.mrf.mxu1 }
 0x1cd   : > { %v1170_v41 = vadd.f32 %v4928_v51, %v1169_v60 }
 0x1ce   : > { %1686 = vxpose.xlu2.b32.cont [2/8] (short) (narrow) %v1678_v10, 8 }
 0x1cf   : > { %1531 = vmatpush.msrb.mxu2 %v1170_v41  ;;  %v1923_v41 = vld [vmem:[%s6268_s6 + $0x8] sm:$0xff] }
 0x1d1   : > { %1532 = vmatpush.msrb.mxu2 %v1167_v40 }
 0x1d3   : > { %1533 = vmatpush.msrb.mxu2 %v1164_v48  ;;  %v1952_v48 = vld [vmem:[%s6266_s20 + $0x8] sm:$0xff] }
 0x1d4   : > { %v1172_v57 = vpop.f32.mrf.mxu1 }
 0x1d5   : > { %1534 = vmatpush.msrb.mxu2 %v1161_v43  ;;  %v1173_v33 = vadd.f32 %v4928_v51, %v1172_v57  ;;  %v1922_v43 = vld [vmem:[%s6268_s6] sm:$0xff] }
 0x1d6   : > { %1687 = vxpose.xlu2.b32.cont [3/8] (short) (narrow) %v1679_v21, 8 }
 0x1d7   : > { %1535 = vmatpush.msrb.mxu2 %v1158_v32  ;;  %v1951_v32 = vld [vmem:[%s6266_s20] sm:$0xff] }
 0x1d9   : > { %1536 = vmatpush.msrb.mxu2 %v1155_v45  ;;  %v1978_v45 = vld [vmem:[%s6276_s16 + $0x8] sm:$0xff] }
 0x1db   : > { %1537 = vmatpush.msrb.mxu2 %v1152_v46  ;;  %v1977_v46 = vld [vmem:[%s6276_s16] sm:$0xff] }
 0x1dc   : > { %v1175_v2 = vpop.f32.mrf.mxu1 }
 0x1dd   : > { %1538 = vmatpush.msrb.mxu2 %v1149_v50 }
 0x1de   : > { %1688 = vxpose.xlu2.b32.cont [4/8] (short) (narrow) %v1680_v23, 8 }
 0x1e4   : > { %v1178_v26 = vpop.f32.mrf.mxu1 }
 0x1e6   : > { %1689 = vxpose.xlu2.b32.cont [5/8] (short) (narrow) %v1681_v6, 8 }
 0x1ea   : > { %v1288_v27 = vpop.trf.xlu0 }
 0x1eb   : > { %4221 = vmatmul.msk.f32.vlgmr.msrb.gmra.mxu0 %vm1304_vm2, %v1288_v27  ;;  %4222 = vmatmul.msk.f32.vlgmr.msrb.gmra.mxu3 %vm1304_vm2, %v1288_v27 }
 0x1ec   : > { %1551 = vmatpush.msrb.mxu3 %v5074_v0  ;;  %v1181_v59 = vpop.f32.mrf.mxu1 }
 0x1ed   : > { %v1182_v62 = vadd.f32 %v4928_v51, %v1181_v59 }
 0x1ee   : > { %1690 = vxpose.xlu2.b32.cont [6/8] (short) (narrow) %v1682_v28, 8  ;;  %1552 = vmatpush.msrb.mxu3 %v5077_v47 }
 0x1f0   : > { %1553 = vmatpush.msrb.mxu3 %v5081_v1 }
 0x1f2   : > { %1554 = vmatpush.msrb.mxu3 %v5085_v29 }
 0x1f4   : > { %1555 = vmatpush.msrb.mxu3 %v5092_v8  ;;  %v1184_v58 = vpop.f32.mrf.mxu1 }
 0x1f5   : > { %v1185_v63 = vadd.f32 %v4928_v51, %v1184_v58 }
 0x1f6   : > { %1691 = vxpose.xlu2.b32.cont [7/8] (short) (narrow) %v1683_v35, 8  ;;  %1556 = vmatpush.msrb.mxu3 %v5095_v9 }
 0x1f8   : > { %1557 = vmatpush.msrb.mxu3 %v5099_v31 }
 0x1fa   : > { %1558 = vmatpush.msrb.mxu3 %v5103_v15 }
 0x1fe   : > { %1692 = vxpose.xlu2.b32.end [8/8] (short) (narrow) %v1684_v38, 8 }
 0x22a   : > { %v1504_v54 = vpop.trf.xlu1 }
 0x25f   : > { %v1701_v7 = vpop.trf.xlu2 }
 0x268   : > { %v1325_v24 = vpop.f32.mrf.mxu0 }
 0x269   : > { %4224 = vmatmul.msk.f32.vlgmr.msra.gmra.mxu3 %vm940_vm0, %v1325_v24 }
 0x26a   : > { %1604 = vmatpush.msra.mxu3 %v5117_v12 }
 0x26e   : > { %v1357_v44 = vpop.f32.mrf.mxu3 }
 0x26f   : > { %v1358_v42 = vadd.f32 %v4422_v53, %v1357_v44 }
 0x271   : > { %4223 = vmatmul.msk.f32.vlgmr.msra.gmra.mxu2 %vm940_vm0, %v1358_v42  ;;  %4226 = vmatmul.msk.f32.vlgmr.msrb.gmra.mxu3 %vm1304_vm2, %v1504_v54  ;;  %v4427_v42 = vld [vmem:[%s6279_s23] ss:$0 sm:$0xff] }
 0x272   : > { %1581 = vmatpush.msra.mxu2 %v5110_v25  ;;  %1748 = vmatpush.msrb.mxu3 %v5074_v0  ;;  %v1179_v0 = vadd.f32 %v4928_v51, %v1178_v26 }
 0x274   : > { %1749 = vmatpush.msrb.mxu3 %v5077_v47  ;;  %v1176_v47 = vadd.f32 %v4928_v51, %v1175_v2  ;;  %v1854_v51 = vld [vmem:[%s4685_s24 + $0x8] sm:$0xff] }
 0x276   : > { %1750 = vmatpush.msrb.mxu3 %v5081_v1 }
 0x278   : > { %1751 = vmatpush.msrb.mxu3 %v5085_v29 }
 0x279   : > { %4225 = vmatmul.msk.f32.vlgmr.msrb.gmra.mxu2 %vm1304_vm2, %v1504_v54 }
 0x27a   : > { %1728 = vmatpush.msrb.mxu2 %v1194_v55  ;;  %1752 = vmatpush.msrb.mxu3 %v5092_v8  ;;  %v1853_v8 = vld [vmem:[%s4685_s24] sm:$0xff] }
 0x27c   : > { %1729 = vmatpush.msrb.mxu2 %v1191_v56  ;;  %1753 = vmatpush.msrb.mxu3 %v5095_v9 }
 0x27e   : > { %1730 = vmatpush.msrb.mxu2 %v1188_v49  ;;  %1754 = vmatpush.msrb.mxu3 %v5099_v31 }
 0x280   : > { %1755 = vmatpush.msrb.mxu3 %v5103_v15  ;;  %1731 = vmatpush.msrb.mxu2 %v1185_v63 }
 0x282   : > { %1732 = vmatpush.msrb.mxu2 %v1182_v62 }
 0x284   : > { %1733 = vmatpush.msrb.mxu2 %v1179_v0 }
 0x286   : > { %1734 = vmatpush.msrb.mxu2 %v1176_v47 }
 0x288   : > { %1735 = vmatpush.msrb.mxu2 %v1173_v33 }
 0x2ec   : > { %v1405_v1 = vpop.f32.mrf.mxu3 }
 0x2f4   : > { %v1382_v5 = vpop.f32.mrf.mxu2  ;;  %v1560_v29 = vpop.f32.mrf.mxu3 }
 0x2f5   : > { %v1561_v18 = vadd.f32 %v4422_v53, %v1560_v29  ;;  %v1406_v17 = vadd.f32 %v1405_v1, %v1382_v5 }
 0x2f7   : > { %4227 = vmatmul.msk.f32.vlgmr.msra.gmra.mxu2 %vm940_vm0, %v1561_v18  ;;  %v1412_v23 = vadd.f32 %v4423_v19, %v1406_v17  ;;  %v5221_v17 = vld [vmem:[%s4104_s10 + $0x40] sm:$0xff] }
 0x2f8   : > { %1778 = vmatpush.msra.mxu2 %v5110_v25 }
 0x2fc   : > { %v1540_v4 = vpop.f32.mrf.mxu2 }
 0x2fd   : > { %4228 = vmatmul.msk.f32.vlgmr.msra.gmra.mxu3 %vm940_vm0, %v1540_v4 }
 0x2fe   : > { %1801 = vmatpush.msra.mxu3 %v5117_v12 }
 0x2ff   : > { %4229 = vmatmul.msk.f32.vlgmr.msrb.gmra.mxu2 %vm1304_vm2, %v1701_v7 }
 0x300   : > { %1876 = vmatpush.msrb.mxu2 %v1854_v51 }
 0x302   : > { %1877 = vmatpush.msrb.mxu2 %v1853_v8 }
 0x305   : > { %4230 = vmatmul.msk.f32.vlgmr.msrb.gmra.mxu3 %vm1304_vm2, %v1701_v7 }
 0x37a   : > { %v1583_v9 = vpop.f32.mrf.mxu2 }
 0x380   : > { %v1606_v13 = vpop.f32.mrf.mxu3 }
 0x381   : > { %v1607_v34 = vadd.f32 %v1606_v13, %v1583_v9 }
 0x382   : > { %v1737_v31 = vpop.f32.mrf.mxu2 }
 0x383   : > { %4232 = vmatmul.msk.f32.vlgmr.msra.gmra.mxu3 %vm940_vm0, %v1737_v31  ;;  %v5172_v16 = vadd.f32 %v4423_v19, %v1607_v34  ;;  %v2108_v31 = vld [vmem:[%s6280_s26 + $0x8] sm:$0xff] }
 0x385   : > { %v1808_v21 = vrot.slane %v5172_v16, 4 }
 0x387   : > { %v5183_v25 = vsel %vm1810_vm4, %v1412_v23, %v1808_v21  ;;  %v5237_v21 = vld [vmem:[%s4104_s10 + $0x60] sm:$0xff]  ;;  %v5241_v23 = vld [vmem:[%s4104_s10 + $0x68] sm:$0xff] }
 0x388   : > { %v1757_v3 = vpop.f32.mrf.mxu3 }
 0x389   : > { %v1758_v15 = vadd.f32 %v4422_v53, %v1757_v3  ;;  %v2107_v3 = vld [vmem:[%s6280_s26] sm:$0xff] }
 0x38b   : > { %4231 = vmatmul.msk.f32.vlgmr.msra.gmra.mxu2 %vm940_vm0, %v1758_v15  ;;  %v2192_v15 = vld [vmem:[%s6281_s28] sm:$0xff] }
 0x38c   : > { %1945 = vmatpush.msra.mxu2 %v1923_v41 }
 0x38e   : > { %1946 = vmatpush.msra.mxu2 %v1922_v43 }
 0x393   : > { %4233 = vmatmul.msk.f32.vlgmr.msrb.gmra.mxu2 %vm1859_vm3, %v5172_v16 }
 0x394   : > { %1997 = vmatpush.msrb.mxu2 %v1978_v45  ;;  %v4429_v45 = vld [vmem:[%s6286_s8] ss:$0 sm:$0xff] }
 0x396   : > { %1998 = vmatpush.msrb.mxu2 %v1977_v46 }
 0x406   : > { %v1803_v61 = vpop.f32.mrf.mxu3 }
 0x40e   : > { %v1780_v10 = vpop.f32.mrf.mxu2 }
 0x40f   : > { %v1804_v20 = vadd.f32 %v1803_v61, %v1780_v10  ;;  %v5225_v61 = vld [vmem:[%s4104_s10 + $0x48] sm:$0xff]  ;;  %v5229_v10 = vld [vmem:[%s4104_s10 + $0x50] sm:$0xff] }
 0x411   : > { %v5177_v11 = vadd.f32 %v4423_v19, %v1804_v20  ;;  %v5233_v20 = vld [vmem:[%s4104_s10 + $0x58] sm:$0xff] }
 0x413   : > { %4234 = vmatpush.msk.msrb.mxu3 %vm1810_vm4, %v5177_v11 }
 0x415   : > { %1916 = vmatpush.msrb.mxu3 %v5183_v25 }
 0x416   : > { %v1879_v6 = vpop.f32.mrf.mxu2 }
 0x417   : > { %v1880_v22 = vadd.f32 %v4424_v36, %v1879_v6  ;;  %1971 = vmatpush.msra.mxu3 %v1952_v48  ;;  %v5245_v36 = vld [vmem:[%s4104_s10 + $0x70] sm:$0xff]  ;;  %v2164_v6 = vld [vmem:[%s6283_s13 + $0x8] sm:$0xff] }
 0x419   : > { %v1883_v27 = vsel %vm1882_vm5, %v1880_v22, -inf  ;;  %1972 = vmatpush.msra.mxu3 %v1951_v32  ;;  %v4430_v32 = vld [vmem:[%s6285_s3] ss:$0 sm:$0xff] }
 0x41a   : > { %1884 = vmax.xlane.f32.xlu0 %v1883_v27  ;;  %v5251_v27 = vld [vmem:[%s4104_s10 + $0x78] sm:$0xff]  ;;  %s6227_s10 = smov 24  }
 0x48d   : > { %v1885_v28 = vpop.xlane.xlu0 %1884 }
 0x48e   : > { %v1886_v30 = vsub.f32 %v1880_v22, %v1885_v28  ;;  %v2163_v22 = vld [vmem:[%s6283_s13] sm:$0xff] }
 0x48f   : > { %v4428_v28 = vld [vmem:[%s6284_s5] ss:$0 sm:$0xff] }
 0x490   : > { %v1887_v12 = vmul.f32 1.442695, %v1886_v30 }
 0x492   : > { %4495 = vpow2.f32 %v1887_v12 }
 0x498   : > { %v4496_v35 = vpop.eup %4495 }
 0x499   : > { %v1889_v37 = vsel %vm1882_vm5, %v4496_v35, 0.0 }
 0x49a   : > { %1890 = vadd.xlane.f32.xlu1 %v1889_v37 }
 0x50d   : > { %v1891_v38 = vpop.xlane.xlu1 %1890 }
 0x50e   : > { %4497 = vrcp.f32 %v1891_v38 }
 0x514   : > { %v4498_v60 = vpop.eup %4497 }
 0x515   : > { %v1893_v40 = vmul.f32 %v4498_v60, %v4496_v35 }
 0x517   : > { %4235 = vmatmul.msk.f32.vlgmr.msrb.gmra.mxu3 %vm1894_vm6, %v1893_v40 }
 0x59a   : > { %v1918_v50 = vpop.f32.mrf.mxu3 }
 0x59b   : > { %v1921_v39 = vadd.f32 %v1918_v50, %v5172_v16 }
 0x59d   : > { %4236 = vmatmul.msk.f32.vlgmr.msra.gmra.mxu2 %vm1859_vm3, %v1921_v39  ;;  %4237 = vmatmul.msk.f32.vlgmr.msra.gmra.mxu3 %vm1859_vm3, %v1921_v39 }
 0x5a5   : > { %4238 = vmatmul.msk.f32.vlgmr.msrb.gmra.mxu2 %vm1859_vm3, %v1921_v39 }
 0x620   : > { %v1948_v24 = vpop.f32.mrf.mxu2  ;;  %v1974_v53 = vpop.f32.mrf.mxu3 }
 0x621   : > { %v1975_v44 = vadd.f32 %v4426_v14, %v1974_v53  ;;  %v1949_v54 = vadd.f32 %v4425_v52, %v1948_v24  ;;  %v2419_v14 = vld [vmem:[%s6287_s0 + $0x8] sm:$0xff] }
 0x623   : > { %4239 = vmatpush.xpose.msk.msrb.mxu3 %vm940_vm0, %v1975_v44  ;;  %v2418_v44 = vld [vmem:[%s6287_s0] sm:$0xff] }
 0x626   : > { %4240 = vmatmul.msk.f32.vlgmr.msrb.gmra.mxu3 %vm940_vm0, %v1949_v54  ;;  %v4286_v54 = vld [vmem:[%s4685_s24 + $0x18] sm:$0xff] }
 0x627   : > { %2126 = vmatpush.msra.mxu3 %v2108_v31 }
 0x628   : > { %v2000_v55 = vpop.f32.mrf.mxu2 }
 0x629   : > { %v2001_v56 = vadd.f32 %v4427_v42, %v2000_v55  ;;  %2127 = vmatpush.msra.mxu3 %v2107_v3  ;;  %v4285_v42 = vld [vmem:[%s4685_s24 + $0x10] sm:$0xff] }
 0x62b   : > { %4241 = vmatpush.msk.msra.mxu2 %vm1810_vm4, %v2001_v56  ;;  %2236 = vmatpush.msrb.mxu3 %v2192_v15 }
 0x62d   : > { %2186 = vmatpush.msrb.mxu2 %v2164_v6 }
 0x62f   : > { %2187 = vmatpush.msrb.mxu2 %v2163_v22 }
 0x6a9   : > { %v2026_v49 = vpop.f32.mrf.mxu3 }
 0x6aa   : > { %v2030_v57 = vsel %vm2029_vm7, %v2026_v49, -inf }
 0x6ab   : > { %v2031_v2 = vrot.slane %v2030_v57, 4 }
 0x6ad   : > { %v2032_v26 = vmax.f32 %v2030_v57, %v2031_v2 }
 0x6af   : > { %v2033_v59 = vrot.slane %v2032_v26, 2 }
 0x6b1   : > { %v2034_v58 = vmax.f32 %v2032_v26, %v2033_v59 }
 0x6b3   : > { %v2035_v62 = vrot.slane %v2034_v58, 1 }
 0x6b5   : > { %v2036_v63 = vmax.f32 %v2034_v58, %v2035_v62  ;;  %v4431_v62 = vld [vmem:[%s4760_s9] ss:$0 sm:$0xff] }
 0x6b7   : > { %v2037_v0 = vsub.f32 %v2026_v49, %v2036_v63 }
 0x6b9   : > { %v2038_v47 = vmul.f32 1.442695, %v2037_v0 }
 0x6bb   : > { %4499 = vpow2.f32 %v2038_v47 }
 0x6c1   : > { %v4500_v33 = vpop.eup %4499 }
 0x6c2   : > { %v2040_v1 = vsel %vm2029_vm7, %v4500_v33, 0.0 }
 0x6c3   : > { %v2041_v5 = vrot.slane %v2040_v1, 4 }
 0x6c5   : > { %v2042_v29 = vadd.f32 %v2041_v5, %v2040_v1 }
 0x6c7   : > { %v2043_v18 = vrot.slane %v2042_v29, 2 }
 0x6c9   : > { %v2044_v4 = vadd.f32 %v2043_v18, %v2042_v29 }
 0x6cb   : > { %v2045_v7 = vrot.slane %v2044_v4, 1 }
 0x6cd   : > { %v2046_v51 = vadd.f32 %v2045_v7, %v2044_v4 }
 0x6cf   : > { %4501 = vrcp.f32 %v2046_v51 }
 0x6d5   : > { %v4502_v8 = vpop.eup %4501 }
 0x6d6   : > { %v2048_v9 = vmul.f32 %v4502_v8, %v4500_v33  ;;  %v4432_v33 = vld [vmem:[%s4690_s30 + $0x1] ss:$0 sm:$0xff] }
 0x6d8   : > { %2049 = vxpose.xlu2.b32.start.end [1/1] (short) (narrow) %v2048_v9, 8 }
 0x771   : > { %v2065_v13 = vpop.trf.xlu2 }
 0x772   : > { %4242 = vmatmul.msk.f32.vlgmr.msra.gmra.mxu2 %vm1196_vm1, %v2065_v13 }
 0x7f5   : > { %v2104_v34 = vpop.f32.mrf.mxu2 }
 0x7f6   : > { %v2105_v19 = vadd.f32 %v2104_v34, %v5172_v16 }
 0x7f8   : > { %4243 = vmatmul.msk.f32.vlgmr.msra.gmra.mxu3 %vm1859_vm3, %v2105_v19 }
 0x800   : > { %4258 = vmatmul.msk.f32.vlgmr.msrb.gmra.mxu3 %vm940_vm0, %v5221_v17 }
 0x808   : > { %4259 = vmatmul.msk.f32.gmra.mxu3 %vm940_vm0, %v5225_v61 }
 0x810   : > { %4260 = vmatmul.msk.f32.gmra.mxu3 %vm940_vm0, %v5229_v10 }
 0x818   : > { %4261 = vmatmul.msk.f32.gmra.mxu3 %vm940_vm0, %v5233_v20 }
 0x820   : > { %4262 = vmatmul.msk.f32.gmra.mxu3 %vm940_vm0, %v5237_v21 }
 0x828   : > { %4263 = vmatmul.msk.f32.gmra.mxu3 %vm940_vm0, %v5241_v23 }
 0x830   : > { %4264 = vmatmul.msk.f32.gmra.mxu3 %vm940_vm0, %v5245_v36 }
 0x838   : > { %4265 = vmatmul.msk.f32.gmra.mxu3 %vm940_vm0, %v5251_v27 }
 0x87b   : > { %v2129_v30 = vpop.f32.mrf.mxu3 }
 0x87c   : > { %v2132_v12 = vadd.f32 %v2129_v30, %v5172_v16 }
 0x87e   : > { %v2137_v35 = vadd.f32 %v4428_v28, %v2132_v12 }
 0x880   : > { %4257 = vmatmul.msk.f32.vlgmr.msrb.gmra.mxu2 %vm1859_vm3, %v2137_v35 }
 0x883   : > { %v2238_v37 = vpop.f32.mrf.mxu3 }
 0x884   : > { %v2239_v24 = vadd.f32 %v4429_v45, %v2238_v37 }
 0x88b   : > { %v2241_v38 = vpop.f32.mrf.mxu3 }
 0x88c   : > { %v2242_v55 = vadd.f32 %v4429_v45, %v2241_v38 }
 0x893   : > { %v2244_v60 = vpop.f32.mrf.mxu3 }
 0x894   : > { %v2245_v56 = vadd.f32 %v4429_v45, %v2244_v60 }
 0x89b   : > { %v2247_v40 = vpop.f32.mrf.mxu3 }
 0x89c   : > { %v2248_v49 = vadd.f32 %v4429_v45, %v2247_v40 }
 0x8a3   : > { %v2250_v41 = vpop.f32.mrf.mxu3 }
 0x8a4   : > { %v2251_v57 = vadd.f32 %v4429_v45, %v2250_v41 }
 0x8ab   : > { %v2253_v48 = vpop.f32.mrf.mxu3 }
 0x8ac   : > { %v2254_v2 = vadd.f32 %v4429_v45, %v2253_v48 }
 0x8b3   : > { %v2256_v43 = vpop.f32.mrf.mxu3 }
 0x8b4   : > { %v2257_v53 = vadd.f32 %v4429_v45, %v2256_v43 }
 0x8bb   : > { %v2259_v50 = vpop.f32.mrf.mxu3 }
 0x8bc   : > { %v2260_v52 = vadd.f32 %v4429_v45, %v2259_v50 }
 0x903   : > { %v2189_v46 = vpop.f32.mrf.mxu2 }
 0x904   : > { %v2190_v39 = vadd.f32 %v4430_v32, %v2189_v46 }
 0x906   : > { %4266 = vmatpush.xpose.msk.msrb.mxu1 %vm940_vm0, %v2190_v39  ;;  %4372 = vmatpush.xpose.msk.msra.mxu2 %vm940_vm0, %v2190_v39 }
 0x907   : > { %4373 = vmatpush.xpose.msk.msra.mxu3 %vm940_vm0, %v2190_v39 }
 0x909   : > { %4267 = vmatmul.msk.f32.vlgmr.msrb.gmra.mxu1 %vm940_vm0, %v2239_v24  ;;  %4273 = vmatmul.msk.f32.vlgmr.msra.gmra.mxu2 %vm940_vm0, %v2257_v53 }
 0x90a   : > { %4274 = vmatmul.msk.f32.vlgmr.msra.gmra.mxu3 %vm940_vm0, %v2260_v52 }
 0x90b   : > { %2438 = vmatpush.msrb.mxu3 %v2419_v14 }
 0x90d   : > { %2439 = vmatpush.msrb.mxu3 %v2418_v44 }
 0x90f   : > { %2551 = vmatpush.msra.mxu3 %v4286_v54 }
 0x911   : > { %2552 = vmatpush.msra.mxu3 %v4285_v42  ;;  %4268 = vmatmul.msk.f32.gmra.mxu1 %vm940_vm0, %v2242_v55 }
 0x912   : > { %4275 = vmatmul.msk.f32.vlgmr.msrb.gmra.mxu3 %vm1859_vm3, %v2137_v35 }
 0x913   : > { %4289 = vmatpush.msk.msrb.mxu3 %vm1810_vm4, %v5177_v11 }
 0x915   : > { %2586 = vmatpush.msrb.mxu3 %v5183_v25 }
 0x919   : > { %4269 = vmatmul.msk.f32.gmra.mxu1 %vm940_vm0, %v2245_v56 }
 0x91a   : > { %4288 = vmatmul.msk.f32.vlgmr.msra.gmra.mxu3 %vm1859_vm3, %v5172_v16 }
 0x921   : > { %4270 = vmatmul.msk.f32.gmra.mxu1 %vm940_vm0, %v2248_v49 }
 0x929   : > { %4271 = vmatmul.msk.f32.gmra.mxu1 %vm940_vm0, %v2251_v57 }
 0x931   : > { %4272 = vmatmul.msk.f32.gmra.mxu1 %vm940_vm0, %v2254_v2 }
 0x986   : > { %v2306_v11 = vpop.f32.mrf.mxu1 }
 0x987   : > { %v2330_v25 = vsel %vm1196_vm1, %v2306_v11, -inf }
 0x988   : > { %2331 = vmax.xlane.f32.xlu0 %v2330_v25 }
 0x98c   : > { %v2324_v31 = vpop.f32.mrf.mxu2 }
 0x98d   : > { %v5282_v26 = vpop.f32.mrf.mxu3  ;;  %v2348_v3 = vsel %vm1196_vm1, %v2324_v31, -inf }
 0x98e   : > { %v2309_v59 = vpop.f32.mrf.mxu1  ;;  %v2351_v15 = vsel %vm1196_vm1, %v5282_v26, -inf }
 0x98f   : > { %v2333_v58 = vsel %vm1196_vm1, %v2309_v59, -inf }
 0x990   : > { %2334 = vmax.xlane.f32.xlu0 %v2333_v58 }
 0x995   : > { %v2441_v63 = vpop.f32.mrf.mxu3 }
 0x996   : > { %v2442_v0 = vadd.f32 %v4431_v62, %v2441_v63  ;;  %v2312_v47 = vpop.f32.mrf.mxu1 }
 0x997   : > { %v2336_v51 = vsel %vm1196_vm1, %v2312_v47, -inf }
 0x998   : > { %4276 = vmatpush.msk.msrb.mxu2 %vm1810_vm4, %v2442_v0 }
 0x99d   : > { %v2554_v1 = vpop.f32.mrf.mxu3 }
 0x99e   : > { %v2555_v5 = vadd.f32 %v4432_v33, %v2554_v1  ;;  %v2315_v29 = vpop.f32.mrf.mxu1 }
 0x99f   : > { %v2339_v18 = vsel %vm1196_vm1, %v2315_v29, -inf }
 0x9a0   : > { %v2557_v4 = vsel %vm1882_vm5, %v2555_v5, -inf  ;;  %2340 = vmax.xlane.f32.xlu0 %v2339_v18 }
 0x9a1   : > { %2558 = vmax.xlane.f32.xlu2 %v2557_v4 }
 0x9a6   : > { %v2318_v7 = vpop.f32.mrf.mxu1 }
 0x9a7   : > { %v2342_v13 = vsel %vm1196_vm1, %v2318_v7, -inf }
 0x9a9   : > { %2337 = vmax.xlane.f32.xlu2 %v2336_v51 }
 0x9ae   : > { %v2321_v8 = vpop.f32.mrf.mxu1 }
 0x9af   : > { %v2345_v9 = vsel %vm1196_vm1, %v2321_v8, -inf }
 0x9b0   : > { %2346 = vmax.xlane.f32.xlu0 %v2345_v9 }
 0x9b1   : > { %2343 = vmax.xlane.f32.xlu2 %v2342_v13 }
 0x9b9   : > { %2349 = vmax.xlane.f32.xlu2 %v2348_v3 }
 0x9c1   : > { %2352 = vmax.xlane.f32.xlu2 %v2351_v15 }
 0x9fb   : > { %v2332_v34 = vpop.xlane.xlu0 %2331 }
 0x9fc   : > { %v2354_v19 = vsub.f32 %v2306_v11, %v2332_v34 }
 0x9fe   : > { %v2362_v6 = vmul.f32 1.442695, %v2354_v19 }
 0xa00   : > { %4503 = vpow2.f32 %v2362_v6 }
 0xa03   : > { %v2335_v22 = vpop.xlane.xlu0 %2334 }
 0xa04   : > { %v2355_v28 = vsub.f32 %v2309_v59, %v2335_v22 }
 0xa06   : > { %v4504_v30 = vpop.eup %4503  ;;  %v2364_v12 = vmul.f32 1.442695, %v2355_v28 }
 0xa07   : > { %v2378_v35 = vsel %vm1196_vm1, %v4504_v30, 0.0 }
 0xa08   : > { %4505 = vpow2.f32 %v2364_v12  ;;  %2379 = vadd.xlane.f32.xlu0 %v2378_v35  ;;  %v4613_v35 = vmov 0.0  }
 0xa09   : > { %1815 = vst.msk [vmem:[#allocation2 + $0x10] sm:$0xff] %vm940_vm0, %v4613_v35 }
 0xa0a   : > { %1816 = vst.msk [vmem:[#allocation2 + $0x18] sm:$0x3] %vm1813_vm8, %v4613_v35 }
 0xa0b   : > { %1812 = vst.msk [vmem:[#allocation2] sm:$0xff] %vm940_vm0, %v4613_v35 }
 0xa0c   : > { %1814 = vst.msk [vmem:[#allocation2 + $0x8] sm:$0x3] %vm1813_vm8, %v4613_v35 }
 0xa0d   : > { %1817 = vst.msk [vmem:[#allocation2 + $0x20] sm:$0xff] %vm940_vm0, %v4613_v35 }
 0xa0e   : > { %v4506_v37 = vpop.eup %4505  ;;  %1818 = vst.msk [vmem:[#allocation2 + $0x28] sm:$0x3] %vm1813_vm8, %v4613_v35 }
 0xa0f   : > { %v2381_v38 = vsel %vm1196_vm1, %v4506_v37, 0.0  ;;  %1819 = vst.msk [vmem:[#allocation2 + $0x30] sm:$0xff] %vm940_vm0, %v4613_v35 }
 0xa10   : > { %2382 = vadd.xlane.f32.xlu0 %v2381_v38  ;;  %1820 = vst.msk [vmem:[#allocation2 + $0x38] sm:$0x3] %vm1813_vm8, %v4613_v35 }
 0xa11   : > { %1821 = vst.msk [vmem:[#allocation2 + $0x40] sm:$0xff] %vm940_vm0, %v4613_v35 }
 0xa12   : > { %1822 = vst.msk [vmem:[#allocation2 + $0x48] sm:$0x3] %vm1813_vm8, %v4613_v35 }
 0xa13   : > { %v2341_v48 = vpop.xlane.xlu0 %2340  ;;  %1823 = vst.msk [vmem:[#allocation2 + $0x50] sm:$0xff] %vm940_vm0, %v4613_v35 }
 0xa14   : > { %v2559_v60 = vpop.xlane.xlu2 %2558  ;;  %v2357_v46 = vsub.f32 %v2315_v29, %v2341_v48  ;;  %1824 = vst.msk [vmem:[#allocation2 + $0x58] sm:$0x3] %vm1813_vm8, %v4613_v35 }
 0xa15   : > { %v2560_v40 = vsub.f32 %v2555_v5, %v2559_v60  ;;  %1825 = vst.msk [vmem:[#allocation2 + $0x60] sm:$0xff] %vm940_vm0, %v4613_v35 }
 0xa16   : > { %v2368_v14 = vmul.f32 1.442695, %v2357_v46  ;;  %1826 = vst.msk [vmem:[#allocation2 + $0x68] sm:$0x3] %vm1813_vm8, %v4613_v35 }
 0xa17   : > { %v2561_v41 = vmul.f32 1.442695, %v2560_v40  ;;  %1827 = vst.msk [vmem:[#allocation2 + $0x70] sm:$0xff] %vm940_vm0, %v4613_v35 }
 0xa18   : > { %1828 = vst.msk [vmem:[#allocation2 + $0x78] sm:$0x3] %vm1813_vm8, %v4613_v35 }
 0xa19   : > { %4507 = vpow2.f32 %v2561_v41  ;;  %1829 = vst.msk [vmem:[#allocation2 + $0x80] sm:$0xff] %vm940_vm0, %v4613_v35 }
 0xa1a   : > { %1830 = vst.msk [vmem:[#allocation2 + $0x88] sm:$0x3] %vm1813_vm8, %v4613_v35 }
 0xa1b   : > { %1831 = vst.msk [vmem:[#allocation2 + $0x90] sm:$0xff] %vm940_vm0, %v4613_v35 }
 0xa1c   : > { %v2338_v43 = vpop.xlane.xlu2 %2337  ;;  %1832 = vst.msk [vmem:[#allocation2 + $0x98] sm:$0x3] %vm1813_vm8, %v4613_v35 }
 0xa1d   : > { %v2356_v32 = vsub.f32 %v2312_v47, %v2338_v43  ;;  %1833 = vst.msk [vmem:[#allocation2 + $0xa0] sm:$0xff] %vm940_vm0, %v4613_v35 }
 0xa1e   : > { %1834 = vst.msk [vmem:[#allocation2 + $0xa8] sm:$0x3] %vm1813_vm8, %v4613_v35 }
 0xa1f   : > { %v4508_v45 = vpop.eup %4507  ;;  %v2366_v50 = vmul.f32 1.442695, %v2356_v32  ;;  %1835 = vst.msk [vmem:[#allocation2 + $0xb0] sm:$0xff] %vm940_vm0, %v4613_v35 }
 0xa20   : > { %v2563_v39 = vsel %vm1882_vm5, %v4508_v45, 0.0  ;;  %1836 = vst.msk [vmem:[#allocation2 + $0xb8] sm:$0x3] %vm1813_vm8, %v4613_v35  ;;  %vm3938_vm5 = vcmask 588800  }
 0xa21   : > { %4509 = vpow2.f32 %v2366_v50  ;;  %2564 = vadd.xlane.f32.xlu1 %v2563_v39  ;;  %1837 = vst.msk [vmem:[#allocation2 + $0xc0] sm:$0xff] %vm940_vm0, %v4613_v35  ;;  %v4292_v50 = vld [vmem:[%s6268_s6 + $0x18] sm:$0xff] }
 0xa22   : > { %4511 = vpow2.f32 %v2368_v14  ;;  %1838 = vst.msk [vmem:[#allocation2 + $0xc8] sm:$0x3] %vm1813_vm8, %v4613_v35  ;;  %v4296_v39 = vld [vmem:[%s6266_s20 + $0x18] sm:$0xff]  ;;  %2617 = vmatpush.msra.mxu0 %v4292_v50 }
 0xa23   : > { %v2347_v24 = vpop.xlane.xlu0 %2346  ;;  %1839 = vst.msk [vmem:[#allocation2 + $0xd0] sm:$0xff] %vm940_vm0, %v4613_v35  ;;  %v4300_v14 = vld [vmem:[%s6276_s16 + $0x18] sm:$0xff]  ;;  %2645 = vmatpush.msra.mxu1 %v4296_v39 }
 0xa24   : > { %v2344_v52 = vpop.xlane.xlu2 %2343  ;;  %v2359_v42 = vsub.f32 %v2321_v8, %v2347_v24  ;;  %1840 = vst.msk [vmem:[#allocation2 + $0xd8] sm:$0x3] %vm1813_vm8, %v4613_v35  ;;  %v4295_v24 = vld [vmem:[%s6266_s20 + $0x10] sm:$0xff]  ;;  %2673 = vmatpush.msra.mxu3 %v4300_v14 }
 0xa25   : > { %v2358_v53 = vsub.f32 %v2318_v7, %v2344_v52  ;;  %1841 = vst.msk [vmem:[#allocation2 + $0xe0] sm:$0xff] %vm940_vm0, %v4613_v35  ;;  %v4291_v52 = vld [vmem:[%s6268_s6 + $0x10] sm:$0xff]  ;;  %2646 = vmatpush.msra.mxu1 %v4295_v24  ;;  %s6289_s6 = smov 40  }
 0xa26   : > { %v2372_v56 = vmul.f32 1.442695, %v2359_v42  ;;  %1842 = vst.msk [vmem:[#allocation2 + $0xe8] sm:$0x3] %vm1813_vm8, %v4613_v35  ;;  %2618 = vmatpush.msra.mxu0 %v4291_v52  ;;  %v5375_v42 = vld [vmem:[#allocation2] sm:$0xff] }
 0xa27   : > { %v4510_v44 = vpop.eup %4509  ;;  %v2370_v54 = vmul.f32 1.442695, %v2358_v53  ;;  %1843 = vst.msk [vmem:[#allocation2 + $0xf0] sm:$0xff] %vm940_vm0, %v4613_v35  ;;  %v4299_v53 = vld [vmem:[%s6276_s16 + $0x10] sm:$0xff]  ;;  %s6237_s16 = smov 56  }
 0xa28   : > { %v2384_v55 = vsel %vm1196_vm1, %v4510_v44, 0.0  ;;  %v4512_v57 = vpop.eup %4511  ;;  %1844 = vst.msk [vmem:[#allocation2 + $0xf8] sm:$0x3] %vm1813_vm8, %v4613_v35  ;;  %2674 = vmatpush.msra.mxu3 %v4299_v53 }
 0xa29   : > { %4513 = vpow2.f32 %v2370_v54  ;;  %2385 = vadd.xlane.f32.xlu2 %v2384_v55  ;;  %v2387_v25 = vsel %vm1196_vm1, %v4512_v57, 0.0  ;;  %1845 = vst.msk [vmem:[#allocation2 + $0x100] sm:$0xff] %vm940_vm0, %v4613_v35  ;;  %v5377_v55 = vld [vmem:[#allocation2 + $0x8] sm:$0x3] }
 0xa2a   : > { %4515 = vpow2.f32 %v2372_v56  ;;  %1846 = vst.msk [vmem:[#allocation2 + $0x108] sm:$0x3] %vm1813_vm8, %v4613_v35  ;;  %v3289_v56 = vrot.slane %v5375_v42, 1  ;;  %v3339_v14 = vrot.slane %v5377_v55, 2 }
 0xa2b   : > { %1847 = vst.msk [vmem:[#allocation2 + $0x110] sm:$0xff] %vm940_vm0, %v4613_v35 }
 0xa2c   : > { %v2350_v49 = vpop.xlane.xlu2 %2349  ;;  %1848 = vst.msk [vmem:[#allocation2 + $0x118] sm:$0x3] %vm1813_vm8, %v4613_v35 }
 0xa2d   : > { %v2360_v11 = vsub.f32 %v2324_v31, %v2350_v49  ;;  %1849 = vst.msk [vmem:[#allocation2 + $0x120] sm:$0xff] %vm940_vm0, %v4613_v35  ;;  %v3290_v49 = vrot.slane %v5377_v55, 1 }
 0xa2e   : > { %1850 = vst.msk [vmem:[#allocation2 + $0x128] sm:$0x3] %vm1813_vm8, %v4613_v35 }
 0xa2f   : > { %v4514_v2 = vpop.eup %4513  ;;  %v2374_v58 = vmul.f32 1.442695, %v2360_v11  ;;  %1851 = vst.msk [vmem:[#allocation2 + $0x130] sm:$0xff] %vm940_vm0, %v4613_v35 }
 0xa30   : > { %v2390_v59 = vsel %vm1196_vm1, %v4514_v2, 0.0  ;;  %v5302_v63 = vpop.eup %4515  ;;  %1852 = vst.msk [vmem:[#allocation2 + $0x138] sm:$0x3] %vm1813_vm8, %v4613_v35 }
 0xa31   : > { %2388 = vadd.xlane.f32.xlu2 %v2387_v25  ;;  %2391 = vadd.xlane.f32.xlu0 %v2390_v59  ;;  %4517 = vpow2.f32 %v2374_v58  ;;  %v2393_v47 = vsel %vm1196_vm1, %v5302_v63, 0.0 }
 0xa34   : > { %v2353_v62 = vpop.xlane.xlu2 %2352 }
 0xa35   : > { %v2361_v0 = vsub.f32 %v5282_v26, %v2353_v62 }
 0xa37   : > { %v2376_v33 = vmul.f32 1.442695, %v2361_v0  ;;  %v5307_v1 = vpop.eup %4517 }
 0xa38   : > { %v2396_v5 = vsel %vm1196_vm1, %v5307_v1, 0.0 }
 0xa39   : > { %2394 = vadd.xlane.f32.xlu0 %v2393_v47  ;;  %4519 = vpow2.f32 %v2376_v33 }
 0xa3f   : > { %v5311_v29 = vpop.eup %4519 }
 0xa40   : > { %v2399_v18 = vsel %vm1196_vm1, %v5311_v29, 0.0 }
 0xa41   : > { %2397 = vadd.xlane.f32.xlu0 %v2396_v5 }
 0xa49   : > { %2400 = vadd.xlane.f32.xlu0 %v2399_v18 }
 0xa7b   : > { %v2380_v4 = vpop.xlane.xlu0 %2379 }
 0xa7c   : > { %4521 = vrcp.f32 %v2380_v4 }
 0xa82   : > { %v4522_v26 = vpop.eup %4521 }
 0xa83   : > { %v2410_v7 = vmul.f32 %v4522_v26, %v4504_v30  ;;  %v2383_v51 = vpop.xlane.xlu0 %2382 }
 0xa84   : > { %4523 = vrcp.f32 %v2383_v51 }
 0xa85   : > { %4277 = vmatmul.msk.f32.vlgmr.msrb.gmra.mxu2 %vm1196_vm1, %v2410_v7 }
 0xa8a   : > { %v4524_v8 = vpop.eup %4523 }
 0xa8b   : > { %v2411_v9 = vmul.f32 %v4524_v8, %v4506_v37 }
 0xa8d   : > { %4278 = vmatmul.msk.f32.gmra.mxu2 %vm1196_vm1, %v2411_v9 }
 0xa94   : > { %v2565_v13 = vpop.xlane.xlu1 %2564 }
 0xa95   : > { %4525 = vrcp.f32 %v2565_v13 }
 0xa9b   : > { %v4526_v31 = vpop.eup %4525 }
 0xa9c   : > { %v2567_v3 = vmul.f32 %v4526_v31, %v4508_v45  ;;  %v2386_v15 = vpop.xlane.xlu2 %2385 }
 0xa9d   : > { %4527 = vrcp.f32 %v2386_v15 }
 0xa9e   : > { %4290 = vmatmul.msk.f32.vlgmr.msrb.gmra.mxu3 %vm1894_vm6, %v2567_v3 }
 0xaa3   : > { %v4528_v34 = vpop.eup %4527 }
 0xaa4   : > { %v2389_v19 = vpop.xlane.xlu2 %2388  ;;  %v2392_v6 = vpop.xlane.xlu0 %2391  ;;  %v2412_v22 = vmul.f32 %v4528_v34, %v4510_v44 }
 0xaa5   : > { %4529 = vrcp.f32 %v2389_v19 }
 0xaa6   : > { %4279 = vmatmul.msk.f32.gmra.mxu2 %vm1196_vm1, %v2412_v22  ;;  %4531 = vrcp.f32 %v2392_v6 }
 0xaab   : > { %v4530_v28 = vpop.eup %4529 }
 0xaac   : > { %v2395_v30 = vpop.xlane.xlu0 %2394  ;;  %v2413_v12 = vmul.f32 %v4530_v28, %v4512_v57  ;;  %v4532_v37 = vpop.eup %4531  ;;  %v3291_v57 = vsel %vm3288_vm9, %v3289_v56, %v3290_v49 }
 0xaad   : > { %4533 = vrcp.f32 %v2395_v30  ;;  %v2414_v38 = vmul.f32 %v4532_v37, %v4514_v2  ;;  %3418 = vrot.lane.b32.xlu0 %v3291_v57, %s6223_s11  ;;  %v5443_v37 = vld [vmem:[#allocation2 + $0xa0] sm:$0xff] }
 0xaae   : > { %4280 = vmatmul.msk.f32.gmra.mxu2 %vm1196_vm1, %v2413_v12 }
 0xab3   : > { %v4534_v40 = vpop.eup %4533 }
 0xab4   : > { %v2398_v60 = vpop.xlane.xlu0 %2397  ;;  %v2415_v41 = vmul.f32 %v4534_v40, %v5302_v63 }
 0xab5   : > { %4535 = vrcp.f32 %v2398_v60 }
 0xab6   : > { %4281 = vmatmul.msk.f32.gmra.mxu2 %vm1196_vm1, %v2414_v38  ;;  %v5445_v38 = vld [vmem:[#allocation2 + $0xa8] sm:$0x3] }
 0xab7   : > { %v3314_v40 = vrot.slane %v5445_v38, 1 }
 0xabb   : > { %v4536_v43 = vpop.eup %4535 }
 0xabc   : > { %v2401_v48 = vpop.xlane.xlu0 %2400  ;;  %v2416_v32 = vmul.f32 %v4536_v43, %v5307_v1 }
 0xabd   : > { %4537 = vrcp.f32 %v2401_v48 }
 0xabe   : > { %4282 = vmatmul.msk.f32.gmra.mxu2 %vm1196_vm1, %v2415_v41 }
 0xac3   : > { %v4538_v45 = vpop.eup %4537 }
 0xac4   : > { %v2417_v46 = vmul.f32 %v4538_v45, %v5311_v29 }
 0xac6   : > { %4283 = vmatmul.msk.f32.gmra.mxu2 %vm1196_vm1, %v2416_v32 }
 0xace   : > { %4284 = vmatmul.msk.f32.gmra.mxu2 %vm1196_vm1, %v2417_v46 }
 0xb08   : > { %v2488_v44 = vpop.f32.mrf.mxu2 }
 0xb09   : > { %v2512_v54 = vadd.f32 %v5221_v17, %v2488_v44 }
 0xb0b   : > { %2521 = vst.msk [vmem:[#allocation2 + $0x11] sm:$0xff] %vm940_vm0, %v2512_v54 }
 0xb10   : > { %v2491_v2 = vpop.f32.mrf.mxu2 }
 0xb11   : > { %v2513_v11 = vadd.f32 %v5225_v61, %v2491_v2 }
 0xb12   : > { %v5384_v17 = vld [vmem:[#allocation2 + $0x10] sm:$0xff]  ;;  %v5386_v25 = vld [vmem:[#allocation2 + $0x18] sm:$0x3] }
 0xb13   : > { %2522 = vst.msk [vmem:[#allocation2 + $0x21] sm:$0xff] %vm940_vm0, %v2513_v11  ;;  %v3292_v59 = vrot.slane %v5384_v17, 1  ;;  %v3293_v58 = vrot.slane %v5386_v25, 1  ;;  %v3341_v52 = vrot.slane %v5384_v17, 2  ;;  %v3342_v24 = vrot.slane %v5386_v25, 2 }
 0xb15   : > { %v5392_v62 = vsel %vm3288_vm9, %v3292_v59, %v3293_v58  ;;  %v3343_v44 = vsel %vm3337_vm10, %v3341_v52, %v3342_v24 }
 0xb16   : > { %3420 = vrot.lane.b32.xlu2 %v5392_v62, %s6223_s11 }
 0xb21   : > { %v2588_v63 = vpop.f32.mrf.mxu3 }
 0xb22   : > { %v2591_v0 = vadd.f32 %v2588_v63, %v5172_v16 }
 0xb24   : > { %4294 = vmatmul.msk.f32.vlgmr.msra.gmra.mxu0 %vm1859_vm3, %v2591_v0  ;;  %4298 = vmatmul.msk.f32.vlgmr.msra.gmra.mxu1 %vm1859_vm3, %v2591_v0 }
 0xb25   : > { %4302 = vmatmul.msk.f32.vlgmr.msra.gmra.mxu3 %vm1859_vm3, %v2591_v0 }
 0xb29   : > { %v2494_v61 = vpop.f32.mrf.mxu2 }
 0xb2a   : > { %v2514_v47 = vadd.f32 %v5229_v10, %v2494_v61  ;;  %v5502_v61 = vld [vmem:[#allocation2 + $0x20] sm:$0xff] }
 0xb2c   : > { %2523 = vst.msk [vmem:[#allocation2 + $0x31] sm:$0xff] %vm940_vm0, %v2514_v47  ;;  %v5504_v47 = vld [vmem:[#allocation2 + $0x28] sm:$0x3] }
 0xb31   : > { %v2497_v33 = vpop.f32.mrf.mxu2 }
 0xb32   : > { %v2515_v1 = vadd.f32 %v5233_v20, %v2497_v33  ;;  %v3344_v33 = vrot.slane %v5502_v61, 2 }
 0xb33   : > { %v5403_v5 = vld [vmem:[#allocation2 + $0x30] sm:$0xff]  ;;  %v5405_v29 = vld [vmem:[#allocation2 + $0x38] sm:$0x3] }
 0xb34   : > { %2524 = vst.msk [vmem:[#allocation2 + $0x41] sm:$0xff] %vm940_vm0, %v2515_v1  ;;  %v3298_v18 = vrot.slane %v5403_v5, 1  ;;  %v3299_v4 = vrot.slane %v5405_v29, 1  ;;  %v3347_v49 = vrot.slane %v5403_v5, 2  ;;  %v3348_v55 = vrot.slane %v5405_v29, 2 }
 0xb35   : > { %v3345_v1 = vrot.slane %v5504_v47, 2 }
 0xb36   : > { %v5411_v26 = vsel %vm3288_vm9, %v3298_v18, %v3299_v4  ;;  %v5481_v2 = vsel %vm3337_vm10, %v3347_v49, %v3348_v55  ;;  %v4434_v4 = vld [vmem:[%s6277_s18 + $0x1] ss:$0 sm:$0xff] }
 0xb37   : > { %3424 = vrot.lane.b32.xlu0 %v5411_v26, %s6223_s11  ;;  %v5509_v29 = vsel %vm3337_vm10, %v3344_v33, %v3345_v1 }
 0xb39   : > { %v2500_v10 = vpop.f32.mrf.mxu2 }
 0xb3a   : > { %v2516_v7 = vadd.f32 %v5237_v21, %v2500_v10 }
 0xb3b   : > { %v5416_v20 = vld [vmem:[#allocation2 + $0x40] sm:$0xff]  ;;  %v3215_v51 = vld [vmem:[#allocation2 + $0x48] sm:$0x3] }
 0xb3c   : > { %2525 = vst.msk [vmem:[#allocation2 + $0x51] sm:$0xff] %vm940_vm0, %v2516_v7  ;;  %v3301_v8 = vrot.slane %v5416_v20, 1  ;;  %v3302_v9 = vrot.slane %v3215_v51, 1  ;;  %v3350_v54 = vrot.slane %v5416_v20, 2  ;;  %v3351_v56 = vrot.slane %v3215_v51, 2 }
 0xb3d   : > { %v4433_v7 = vld [vmem:[%s6278_s22 + $0x1] ss:$0 sm:$0xff] }
 0xb3e   : > { %v5421_v13 = vsel %vm3288_vm9, %v3301_v8, %v3302_v9  ;;  %v5478_v57 = vsel %vm3337_vm10, %v3350_v54, %v3351_v56 }
 0xb3f   : > { %3426 = vrot.lane.b32.xlu2 %v5421_v13, %s6223_s11 }
 0xb41   : > { %v2503_v31 = vpop.f32.mrf.mxu2 }
 0xb42   : > { %v2517_v3 = vadd.f32 %v5241_v23, %v2503_v31 }
 0xb43   : > { %v5426_v15 = vld [vmem:[#allocation2 + $0x50] sm:$0xff]  ;;  %v5428_v21 = vld [vmem:[#allocation2 + $0x58] sm:$0x3] }
 0xb44   : > { %2526 = vst.msk [vmem:[#allocation2 + $0x61] sm:$0xff] %vm940_vm0, %v2517_v3  ;;  %v3304_v34 = vrot.slane %v5426_v15, 1  ;;  %v3305_v19 = vrot.slane %v5428_v21, 1  ;;  %v4435_v3 = vld [vmem:[%s6279_s23 + $0x1] ss:$0 sm:$0xff] }
 0xb46   : > { %v5434_v6 = vsel %vm3288_vm9, %v3304_v34, %v3305_v19 }
 0xb47   : > { %3428 = vrot.lane.b32.xlu0 %v5434_v6, %s6223_s11 }
 0xb49   : > { %v2506_v22 = vpop.f32.mrf.mxu2 }
 0xb4a   : > { %v2518_v28 = vadd.f32 %v5245_v36, %v2506_v22  ;;  %v3313_v36 = vrot.slane %v5443_v37, 1 }
 0xb4b   : > { %v5439_v23 = vld [vmem:[#allocation2 + $0x60] sm:$0xff]  ;;  %v3219_v30 = vld [vmem:[#allocation2 + $0x68] sm:$0x3] }
 0xb4c   : > { %2527 = vst.msk [vmem:[#allocation2 + $0x71] sm:$0xff] %vm940_vm0, %v2518_v28  ;;  %v3307_v12 = vrot.slane %v5439_v23, 1  ;;  %v3308_v35 = vrot.slane %v3219_v30, 1  ;;  %v3315_v45 = vsel %vm3288_vm9, %v3313_v36, %v3314_v40  ;;  %v3356_v59 = vrot.slane %v5439_v23, 2  ;;  %v5537_v28 = vpop.permute.xlu0 %3418 }
 0xb4d   : > { %v3357_v58 = vrot.slane %v3219_v30, 2 }
 0xb4e   : > { %v5448_v60 = vsel %vm3288_vm9, %v3307_v12, %v3308_v35 }
 0xb4f   : > { %3430 = vrot.lane.b32.xlu2 %v5448_v60, %s6223_s11  ;;  %v5493_v0 = vsel %vm3337_vm10, %v3356_v59, %v3357_v58 }
 0xb51   : > { %v2509_v41 = vpop.f32.mrf.mxu2 }
 0xb52   : > { %v2519_v48 = vadd.f32 %v5251_v27, %v2509_v41  ;;  %v3338_v27 = vrot.slane %v5375_v42, 2 }
 0xb53   : > { %v5455_v43 = vld [vmem:[#allocation2 + $0x70] sm:$0xff]  ;;  %v3221_v32 = vld [vmem:[#allocation2 + $0x78] sm:$0x3] }
 0xb54   : > { %2528 = vst.msk [vmem:[#allocation2 + $0x81] sm:$0xff] %vm940_vm0, %v2519_v48  ;;  %v3310_v46 = vrot.slane %v5455_v43, 1  ;;  %v3311_v50 = vrot.slane %v3221_v32, 1  ;;  %v3340_v53 = vsel %vm3337_vm10, %v3338_v27, %v3339_v14  ;;  %v3359_v11 = vrot.slane %v5455_v43, 2 }
 0xb55   : > { %v3360_v25 = vrot.slane %v3221_v32, 2 }
 0xb56   : > { %v5461_v39 = vsel %vm3288_vm9, %v3310_v46, %v3311_v50 }
 0xb57   : > { %3434 = vrot.lane.b32.xlu2 %v3315_v45, %s6223_s11  ;;  %3432 = vrot.lane.b32.xlu0 %v5461_v39, %s6223_s11  ;;  %v5490_v63 = vsel %vm3337_vm10, %v3359_v11, %v3360_v25  ;;  %s6229_s11 = smov 40  }
 0xb5f   : > { %3468 = vrot.lane.b32.xlu2 %v3343_v44, %s6225_s15  ;;  %3466 = vrot.lane.b32.xlu0 %v3340_v53, %s6225_s15  ;;  %v5571_v53 = vld [vmem:[#allocation2 + $0x80] sm:$0xff] }
 0xb67   : > { %3474 = vrot.lane.b32.xlu2 %v5478_v57, %s6225_s15  ;;  %3472 = vrot.lane.b32.xlu0 %v5481_v2, %s6225_s15 }
 0xb6f   : > { %3480 = vrot.lane.b32.xlu2 %v5490_v63, %s6225_s15  ;;  %3478 = vrot.lane.b32.xlu0 %v5493_v0, %s6225_s15  ;;  %s6232_s15 = smov 48  }
 0xb70   : > { %v5525_v18 = vpop.permute.xlu2 %3420 }
 0xb77   : > { %3514 = vrot.lane.b32.xlu2 %v5384_v17, %s6227_s10  ;;  %3610 = vrot.lane.b32.xlu0 %v3343_v44, %s6229_s11  ;;  %s6234_s10 = smov 64   ;;  %s6288_s11 = smov 24  }
 0xb7f   : > { %3658 = vrot.lane.b32.xlu2 %v5502_v61, %s6232_s15  ;;  %3754 = vrot.lane.b32.xlu0 %v5509_v29, %s6234_s10 }
 0xb87   : > { %3516 = vrot.lane.b32.xlu2 %v5502_v61, %s6288_s11  ;;  %3612 = vrot.lane.b32.xlu0 %v5509_v29, %s6289_s6 }
 0xb8f   : > { %3660 = vrot.lane.b32.xlu2 %v5403_v5, %s6232_s15  ;;  %3756 = vrot.lane.b32.xlu0 %v5481_v2, %s6234_s10  ;;  %s6291_s10 = smov 16  }
 0xb97   : > { %3518 = vrot.lane.b32.xlu2 %v5403_v5, %s6288_s11 }
 0xb99   : > { %v3427_v10 = vpop.permute.xlu2 %3426 }
 0xb9a   : > { %v3806_v11 = vsel %vm940_vm0, %v5416_v20, %v3427_v10 }
 0xb9f   : > { %3662 = vrot.lane.b32.xlu2 %v5416_v20, %s6232_s15 }
 0xba1   : > { %v2648_v51 = vpop.f32.mrf.mxu1  ;;  %v2620_v8 = vpop.f32.mrf.mxu0 }
 0xba2   : > { %v2649_v9 = vadd.f32 %v4434_v4, %v2648_v51  ;;  %v2621_v31 = vadd.f32 %v4433_v7, %v2620_v8 }
 0xba4   : > { %4303 = vmatpush.xpose.msk.msrb.mxu0 %vm940_vm0, %v2649_v9 }
 0xba7   : > { %4304 = vmatmul.msk.f32.vlgmr.msrb.gmra.mxu0 %vm940_vm0, %v2621_v31  ;;  %3520 = vrot.lane.b32.xlu2 %v5416_v20, %s6288_s11 }
 0xba8   : > { %v2676_v34 = vpop.f32.mrf.mxu3 }
 0xba9   : > { %v2677_v19 = vadd.f32 %v4435_v3, %v2676_v34  ;;  %v3431_v22 = vpop.permute.xlu2 %3430  ;;  %v3425_v12 = vpop.permute.xlu0 %3424 }
 0xbaa   : > { %v3805_v27 = vsel %vm940_vm0, %v5403_v5, %v3425_v12  ;;  %v3808_v34 = vsel %vm940_vm0, %v5439_v23, %v3431_v22 }
 0xbab   : > { %4305 = vmatpush.msk.msrb.mxu1 %vm1810_vm4, %v2677_v19 }
 0xbaf   : > { %3664 = vrot.lane.b32.xlu2 %v5426_v15, %s6232_s15 }
 0xbb1   : > { %v5541_v30 = vpop.permute.xlu2 %3434 }
 0xbb7   : > { %3522 = vrot.lane.b32.xlu2 %v5426_v15, %s6288_s11 }
 0xbb9   : > { %v5545_v35 = vpop.permute.xlu2 %3468  ;;  %v5549_v36 = vpop.permute.xlu0 %3428 }
 0xbbf   : > { %3666 = vrot.lane.b32.xlu2 %v5439_v23, %s6232_s15 }
 0xbc1   : > { %v3475_v40 = vpop.permute.xlu2 %3474 }
 0xbc2   : > { %v3822_v25 = vsel %vm1859_vm3, %v3806_v11, %v3475_v40 }
 0xbc7   : > { %3524 = vrot.lane.b32.xlu2 %v5439_v23, %s6288_s11 }
 0xbc9   : > { %v3481_v41 = vpop.permute.xlu2 %3480  ;;  %v3433_v48 = vpop.permute.xlu0 %3432 }
 0xbca   : > { %v3809_v32 = vsel %vm940_vm0, %v5455_v43, %v3433_v48 }
 0xbcb   : > { %v5556_v45 = vsel %vm1859_vm3, %v3809_v32, %v3481_v41 }
 0xbcf   : > { %3668 = vrot.lane.b32.xlu2 %v5455_v43, %s6232_s15 }
 0xbd1   : > { %v5560_v46 = vpop.permute.xlu2 %3514  ;;  %v5562_v50 = vpop.permute.xlu0 %3466 }
 0xbd7   : > { %3526 = vrot.lane.b32.xlu2 %v5455_v43, %s6288_s11 }
 0xbd9   : > { %v5568_v14 = vpop.permute.xlu2 %3658  ;;  %v3473_v52 = vpop.permute.xlu0 %3472 }
 0xbda   : > { %v3821_v24 = vsel %vm1859_vm3, %v3805_v27, %v3473_v52 }
 0xbdf   : > { %3670 = vrot.lane.b32.xlu2 %v5571_v53, %s6232_s15  ;;  %s6290_s15 = smov 8  }
 0xbe1   : > { %v5575_v44 = vpop.permute.xlu2 %3516  ;;  %v3479_v20 = vpop.permute.xlu0 %3478 }
 0xbe2   : > { %v3824_v12 = vsel %vm1859_vm3, %v3808_v34, %v3479_v20  ;;  %v3253_v34 = vld [vmem:[%s6267_s12 + $0x38] sm:$0xff] }
 0xbe9   : > { %v5577_v54 = vpop.permute.xlu2 %3660 }
 0xbf1   : > { %v5579_v56 = vpop.permute.xlu2 %3518 }
 0xbf9   : > { %v5581_v43 = vpop.permute.xlu2 %3662 }
 0xc01   : > { %v3521_v5 = vpop.permute.xlu2 %3520 }
 0xc02   : > { %v5584_v49 = vsel %vm3834_vm11, %v3821_v24, %v3521_v5 }
 0xc09   : > { %v5586_v55 = vpop.permute.xlu2 %3664 }
 0xc11   : > { %v3523_v59 = vpop.permute.xlu2 %3522 }
 0xc12   : > { %v5592_v58 = vsel %vm3834_vm11, %v3822_v25, %v3523_v59 }
 0xc19   : > { %v5594_v33 = vpop.permute.xlu2 %3666 }
 0xc21   : > { %v5596_v1 = vpop.permute.xlu2 %3524 }
 0xc24   : > { %v2702_v4 = vpop.f32.mrf.mxu0 }
 0xc25   : > { %v2705_v7 = vsel %vm2029_vm7, %v2702_v4, -inf }
 0xc26   : > { %v2706_v51 = vrot.slane %v2705_v7, 4 }
 0xc28   : > { %v2707_v8 = vmax.f32 %v2705_v7, %v2706_v51  ;;  %v3296_v51 = vrot.slane %v5504_v47, 1  ;;  %v3362_v47 = vrot.slane %v5443_v37, 2 }
 0xc29   : > { %v5599_v9 = vpop.permute.xlu2 %3668 }
 0xc2a   : > { %v2708_v31 = vrot.slane %v2707_v8, 2 }
 0xc2c   : > { %v2709_v3 = vmax.f32 %v2707_v8, %v2708_v31  ;;  %v3353_v31 = vrot.slane %v5426_v15, 2 }
 0xc2e   : > { %v2710_v10 = vrot.slane %v2709_v3, 1 }
 0xc30   : > { %v2711_v19 = vmax.f32 %v2709_v3, %v2710_v10  ;;  %v3354_v3 = vrot.slane %v5428_v21, 2  ;;  %v3363_v10 = vrot.slane %v5445_v38, 2  ;;  %v3254_v38 = vld [vmem:[%s6267_s12 + $0x40] sm:$0xff] }
 0xc31   : > { %v3527_v40 = vpop.permute.xlu2 %3526  ;;  %3994 = vmatpush.msra.mxu2 %v3254_v38 }
 0xc32   : > { %v2712_v41 = vsub.f32 %v2702_v4, %v2711_v19  ;;  %v5605_v48 = vsel %vm3834_vm11, %v3824_v12, %v3527_v40  ;;  %v3295_v4 = vrot.slane %v5502_v61, 1  ;;  %v5617_v20 = vsel %vm3337_vm10, %v3353_v31, %v3354_v3  ;;  %v3252_v19 = vld [vmem:[%s6267_s12 + $0x30] sm:$0xff]  ;;  %v3250_v40 = vld [vmem:[%s6267_s12 + $0x20] sm:$0xff] }
 0xc33   : > { %3995 = vmatpush.msra.mxu2 %v3253_v34  ;;  %v4308_v34 = vld [vmem:[%s6280_s26 + $0x18] sm:$0xff] }
 0xc34   : > { %v2713_v32 = vmul.f32 1.442695, %v2712_v41  ;;  %v3297_v8 = vsel %vm3288_vm9, %v3295_v4, %v3296_v51  ;;  %v3249_v41 = vld [vmem:[%s6267_s12 + $0x18] sm:$0xff]  ;;  %v3802_v4 = vsel %vm940_vm0, %v5375_v42, %v5537_v28  ;;  %v3611_v51 = vpop.permute.xlu0 %3610  ;;  %2802 = vmatpush.msrb.mxu3 %v4308_v34 }
 0xc35   : > { %3996 = vmatpush.msra.mxu2 %v3252_v19  ;;  %v4307_v19 = vld [vmem:[%s6280_s26 + $0x10] sm:$0xff] }
 0xc36   : > { %4539 = vpow2.f32 %v2713_v32  ;;  %v3248_v32 = vld [vmem:[%s6267_s12 + $0x10] sm:$0xff]  ;;  %2803 = vmatpush.msrb.mxu3 %v4307_v19 }
 0xc3c   : > { %v4540_v27 = vpop.eup %4539 }
 0xc3d   : > { %v2715_v52 = vsel %vm2029_vm7, %v4540_v27, 0.0 }
 0xc3e   : > { %v2716_v24 = vrot.slane %v2715_v52, 4 }
 0xc40   : > { %v2717_v5 = vadd.f32 %v2716_v24, %v2715_v52 }
 0xc42   : > { %v2718_v11 = vrot.slane %v2717_v5, 2 }
 0xc44   : > { %v2719_v25 = vadd.f32 %v2718_v11, %v2717_v5  ;;  %v3246_v11 = vld [vmem:[%s6267_s12] sm:$0xff] }
 0xc46   : > { %v2720_v59 = vrot.slane %v2719_v25, 1 }
 0xc48   : > { %v2721_v7 = vadd.f32 %v2720_v59, %v2719_v25  ;;  %v3807_v25 = vsel %vm940_vm0, %v5426_v15, %v5549_v36  ;;  %v3818_v15 = vsel %vm1859_vm3, %v3802_v4, %v5562_v50 }
 0xc4a   : > { %4541 = vrcp.f32 %v2721_v7 }
 0xc50   : > { %v4542_v23 = vpop.eup %4541 }
 0xc51   : > { %v2723_v22 = vmul.f32 %v4542_v23, %v4540_v27  ;;  %v3247_v27 = vld [vmem:[%s6267_s12 + $0x8] sm:$0xff]  ;;  %v3810_v23 = vsel %vm940_vm0, %v5443_v37, %v5541_v30  ;;  %v3755_v30 = vpop.permute.xlu0 %3754 }
 0xc53   : > { %2724 = vxpose.xlu1.b32.start.end [1/1] (short) (narrow) %v2723_v22, 8 }
 0xcad   : > { %3422 = vrot.lane.b32.xlu1 %v3297_v8, %s6290_s15 }
 0xcb5   : > { %3470 = vrot.lane.b32.xlu1 %v5509_v29, %s6291_s10  ;;  %v3364_v29 = vsel %vm3337_vm10, %v3362_v47, %v3363_v10  ;;  %v3613_v47 = vpop.permute.xlu0 %3612 }
 0xcbd   : > { %3476 = vrot.lane.b32.xlu1 %v5617_v20, %s6291_s10 }
 0xcc5   : > { %3482 = vrot.lane.b32.xlu1 %v3364_v29, %s6291_s10 }
 0xccd   : > { %3562 = vrot.lane.b32.xlu1 %v5392_v62, %s6239_s14  ;;  %v3251_v62 = vld [vmem:[%s6267_s12 + $0x28] sm:$0xff] }
 0xcce   : > { %3997 = vmatpush.msra.mxu2 %v3251_v62 }
 0xcd0   : > { %3998 = vmatpush.msra.mxu2 %v3250_v40 }
 0xcd2   : > { %3999 = vmatpush.msra.mxu2 %v3249_v41 }
 0xcd4   : > { %4000 = vmatpush.msra.mxu2 %v3248_v32 }
 0xcd5   : > { %3706 = vrot.lane.b32.xlu1 %v3297_v8, %s6237_s16 }
 0xcd6   : > { %4001 = vmatpush.msra.mxu2 %v3247_v27 }
 0xcd8   : > { %4002 = vmatpush.msra.mxu2 %v3246_v11  ;;  %v2840_v11 = vld [vmem:[%s6283_s13] sm:$0xff] }
 0xcdd   : > { %3564 = vrot.lane.b32.xlu1 %v3297_v8, %s6239_s14  ;;  %v3835_v8 = vsel %vm3834_vm11, %v3818_v15, %v5560_v46  ;;  %v3803_v46 = vsel %vm940_vm0, %v5384_v17, %v5525_v18  ;;  %v3757_v18 = vpop.permute.xlu0 %3756 }
 0xcde   : > { %v3819_v10 = vsel %vm1859_vm3, %v3803_v46, %v5545_v35  ;;  %v4439_v46 = vld [vmem:[%s6286_s8] ss:$0 sm:$0xff] }
 0xce5   : > { %3708 = vrot.lane.b32.xlu1 %v5411_v26, %s6237_s16  ;;  %s2815_s16 = sadd.s32 1, %s5213_s2  ;;  %s6303_s2 = smov (!%p905_p6, %s5213_s2), 3 }
 0xce6   : > { %s2817_s14 = ssub.s32 0, %s2815_s16  ;;  %s4370_s18 = sshll.u32 %s6303_s2, 6 }
 0xce7   : > { %s4311_s12 = smin.u32 %s2817_s14, %s2815_s16  ;;  %p2816_p7 = scmp.lt.s32.totalorder %s2815_s16, 0 }
 0xce8   : > { %s2819_s17 = sand.u32 1, %s4311_s12   ;;  %s5697_s20 = scalar_lea.vmem %s4775_s4, %s4370_s18 }
 0xce9   : > { %s2820_s19 = ssub.s32 0, %s2819_s17  ;;  %s6294_s18 = smov 56  }
 0xcea   : > { %s6305_s19 = smov (!%p2816_p7, %s2820_s19), %s2819_s17  ;;  %s6292_s17 = smov 64  }
 0xceb   : > { %p4313_p8 = scmp.lt.s32.totalorder %s6305_s19, 0  ;;  %s2826_s14 = sadd.s32 2, %s6305_s19 }
 0xcec   : > { %s6295_s2 = smov 48  }
 0xced   : > { %s6307_s14 = smov (!%p4313_p8, %s2826_s14), %s6305_s19  ;;  %s6293_s19 = smov 32  }
 0xcee   : > { %s4314_s12 = smul.u32 192, %s6307_s14 }
 0xcf0   : > { %s5703_s16 = scalar_lea.vmem %s6282_s1, %s4314_s12 }
 0xcf1   : > { %v5719_v4 = vld [vmem:[%s5703_s16 + $0x48] sm:$0xff]  ;;  %v5729_v15 = vld [vmem:[%s5703_s16 + $0x58] sm:$0xff] }
 0xcf7   : > { %v2740_v21 = vpop.trf.xlu1 }
 0xcf8   : > { %4306 = vmatmul.msk.f32.vlgmr.msrb.gmra.mxu1 %vm1196_vm1, %v2740_v21  ;;  %v3836_v21 = vsel %vm3834_vm11, %v3819_v10, %v5575_v44 }
 0xd1f   : > { %v3423_v12 = vpop.permute.xlu1 %3422 }
 0xd20   : > { %v3804_v52 = vsel %vm940_vm0, %v5502_v61, %v3423_v12 }
 0xd27   : > { %v3471_v24 = vpop.permute.xlu1 %3470 }
 0xd28   : > { %v5643_v5 = vsel %vm1859_vm3, %v3804_v52, %v3471_v24  ;;  %v2841_v24 = vld [vmem:[%s6283_s13 + $0x8] sm:$0xff] }
 0xd29   : > { %2863 = vmatpush.msra.mxu0 %v2841_v24 }
 0xd2b   : > { %2864 = vmatpush.msra.mxu0 %v2840_v11 }
 0xd2f   : > { %v3477_v59 = vpop.permute.xlu1 %3476 }
 0xd30   : > { %v5650_v7 = vsel %vm1859_vm3, %v3807_v25, %v3477_v59  ;;  %v2869_v25 = vld [vmem:[%s6281_s28] sm:$0xff] }
 0xd31   : > { %v5712_v59 = vld [vmem:[%s5703_s16 + $0x40] sm:$0xff]  ;;  %2913 = vmatpush.msra.mxu1 %v2869_v25 }
 0xd32   : > { %4324 = vmatmul.msk.f32.vlgmr.msra.gmra.mxu1 %vm940_vm0, %v5712_v59 }
 0xd37   : > { %v3483_v61 = vpop.permute.xlu1 %3482 }
 0xd38   : > { %v5656_v22 = vsel %vm1859_vm3, %v3810_v23, %v3483_v61  ;;  %v3096_v23 = vld [vmem:[%s6287_s0 + $0x8] sm:$0xff]  ;;  %v3095_v61 = vld [vmem:[%s6287_s0] sm:$0xff] }
 0xd39   : > { %3115 = vmatpush.msrb.mxu0 %v3096_v23 }
 0xd3a   : > { %4325 = vmatmul.msk.f32.gmra.mxu1 %vm940_vm0, %v5719_v4 }
 0xd3b   : > { %3116 = vmatpush.msrb.mxu0 %v3095_v61 }
 0xd3f   : > { %v3563_v36 = vpop.permute.xlu1 %3562 }
 0xd40   : > { %v3852_v37 = vsel %vm3851_vm12, %v3835_v8, %v3563_v36  ;;  %v4437_v36 = vld [vmem:[%s6284_s5 + $0x1] ss:$0 sm:$0xff] }
 0xd41   : > { %v3869_v31 = vsel %vm3868_vm13, %v3852_v37, %v3611_v51  ;;  %v5724_v51 = vld [vmem:[%s5703_s16 + $0x50] sm:$0xff] }
 0xd42   : > { %v3886_v28 = vsel %vm3885_vm14, %v3869_v31, %v5568_v14  ;;  %4326 = vmatmul.msk.f32.gmra.mxu1 %vm940_vm0, %v5724_v51  ;;  %v5736_v31 = vld [vmem:[%s5703_s16 + $0x60] sm:$0xff] }
 0xd47   : > { %v3707_v42 = vpop.permute.xlu1 %3706 }
 0xd48   : > { %v3903_v50 = vsel %vm3902_vm15, %v3886_v28, %v3707_v42  ;;  %v5742_v42 = vld [vmem:[%s5703_s16 + $0x68] sm:$0xff]  ;;  %v5748_v28 = vld [vmem:[%s5703_s16 + $0x70] sm:$0xff] }
 0xd49   : > { %v3919_v3 = vsel %vm1304_vm2, %v3903_v50, %v3755_v30 }
 0xd4a   : > { %4351 = vmatmul.msk.f32.vlgmr.msra.gmra.mxu2 %vm3938_vm5, %v3919_v3  ;;  %4327 = vmatmul.msk.f32.gmra.mxu1 %vm940_vm0, %v5729_v15  ;;  %v4438_v3 = vld [vmem:[%s6285_s3] ss:$0 sm:$0xff] }
 0xd4f   : > { %v3565_v29 = vpop.permute.xlu1 %3564 }
 0xd50   : > { %v3853_v14 = vsel %vm3851_vm12, %v3836_v21, %v3565_v29 }
 0xd51   : > { %v3870_v38 = vsel %vm3868_vm13, %v3853_v14, %v3613_v47  ;;  %v4440_v14 = vld [vmem:[%s4760_s9] ss:$0 sm:$0xff] }
 0xd52   : > { %v3887_v17 = vsel %vm3885_vm14, %v3870_v38, %v5577_v54  ;;  %v5694_v54 = vld [vmem:[%s4770_s27] ss:$0 sm:$0xff]  ;;  %4328 = vmatmul.msk.f32.gmra.mxu1 %vm940_vm0, %v5736_v31 }
 0xd57   : > { %v3709_v62 = vpop.permute.xlu1 %3708 }
 0xd58   : > { %v3904_v35 = vsel %vm3902_vm15, %v3887_v17, %v3709_v62 }
 0xd59   : > { %v3920_v44 = vsel %vm1304_vm2, %v3904_v35, %v3757_v18 }
 0xd5a   : > { %4352 = vmatmul.msk.f32.gmra.mxu2 %vm3938_vm5, %v3920_v44  ;;  %4329 = vmatmul.msk.f32.gmra.mxu1 %vm940_vm0, %v5742_v42 }
 0xd62   : > { %4330 = vmatmul.msk.f32.gmra.mxu1 %vm940_vm0, %v5748_v28 }
 0xd75   : > { %v2779_v12 = vpop.f32.mrf.mxu1 }
 0xd76   : > { %v2780_v40 = vadd.f32 %v2779_v12, %v5172_v16 }
 0xd78   : > { %4309 = vmatmul.msk.f32.vlgmr.msrb.gmra.mxu3 %vm1859_vm3, %v2780_v40 }
 0xdaf   : > { %v2915_v50 = vpop.f32.mrf.mxu1 }
 0xdb0   : > { %v2916_v21 = vadd.f32 %v4439_v46, %v2915_v50 }
 0xdb7   : > { %v2918_v47 = vpop.f32.mrf.mxu1 }
 0xdb8   : > { %v2919_v62 = vadd.f32 %v4439_v46, %v2918_v47 }
 0xdbf   : > { %v2921_v19 = vpop.f32.mrf.mxu1 }
 0xdc0   : > { %v2922_v17 = vadd.f32 %v4439_v46, %v2921_v19 }
 0xdc7   : > { %v2924_v18 = vpop.f32.mrf.mxu1 }
 0xdc8   : > { %v2925_v35 = vadd.f32 %v4439_v46, %v2924_v18 }
 0xdcd   : > { %v4004_v41 = vpop.f32.mrf.mxu2 }
 0xdce   : > { %v4005_v32 = vadd.f32 %v5694_v54, %v4004_v41 }
 0xdcf   : > { %v2927_v44 = vpop.f32.mrf.mxu1 }
 0xdd0   : > { %4052 = vst.msk [vmem:[%s5697_s20] sm:$0xff] %vm940_vm0, %v4005_v32  ;;  %v2928_v12 = vadd.f32 %v4439_v46, %v2927_v44 }
 0xdd7   : > { %v2930_v40 = vpop.f32.mrf.mxu1 }
 0xdd8   : > { %v2931_v41 = vadd.f32 %v4439_v46, %v2930_v40 }
 0xddd   : > { %v4007_v27 = vpop.f32.mrf.mxu2 }
 0xdde   : > { %v4008_v52 = vadd.f32 %v5694_v54, %v4007_v27 }
 0xddf   : > { %v2933_v32 = vpop.f32.mrf.mxu1 }
 0xde0   : > { %4053 = vst.msk [vmem:[%s5697_s20 + $0x8] sm:$0xff] %vm940_vm0, %v4008_v52  ;;  %v2934_v27 = vadd.f32 %v4439_v46, %v2933_v32 }
 0xdfb   : > { %v2805_v8 = vpop.f32.mrf.mxu3 }
 0xdfc   : > { %v2808_v37 = vadd.f32 %v2805_v8, %v5172_v16  ;;  %v5753_v16 = vld [vmem:[%s5703_s16 + $0x78] sm:$0xff] }
 0xdfd   : > { %4331 = vmatmul.msk.f32.gmra.mxu1 %vm940_vm0, %v5753_v16 }
 0xdfe   : > { %v2814_v30 = vadd.f32 %v4437_v36, %v2808_v37 }
 0xe00   : > { %4323 = vmatmul.msk.f32.vlgmr.msra.gmra.mxu0 %vm1859_vm3, %v2814_v30 }
 0xe08   : > { %4341 = vmatmul.msk.f32.vlgmr.msrb.gmra.mxu0 %vm1859_vm3, %v2814_v30 }
 0xe7a   : > { %v2936_v52 = vpop.f32.mrf.mxu1 }
 0xe7b   : > { %v2937_v24 = vadd.f32 %v4439_v46, %v2936_v52 }
 0xe7d   : > { %v2866_v10 = vpop.f32.mrf.mxu0 }
 0xe7e   : > { %v2867_v29 = vadd.f32 %v4438_v3, %v2866_v10 }
 0xe80   : > { %4332 = vmatpush.xpose.msk.msra.mxu3 %vm940_vm0, %v2867_v29  ;;  %v5831_v29 = vpop.permute.xlu2 %3670 }
 0xe83   : > { %4333 = vmatmul.msk.f32.vlgmr.msra.gmra.mxu3 %vm940_vm0, %v2916_v21 }
 0xe85   : > { %v3118_v38 = vpop.f32.mrf.mxu0 }
 0xe86   : > { %v3119_v34 = vadd.f32 %v4440_v14, %v3118_v38 }
 0xe88   : > { %4342 = vmatpush.msk.msra.mxu0 %vm1810_vm4, %v3119_v34 }
 0xe8b   : > { %4334 = vmatmul.msk.f32.gmra.mxu3 %vm940_vm0, %v2919_v62 }
 0xe93   : > { %4335 = vmatmul.msk.f32.gmra.mxu3 %vm940_vm0, %v2922_v17 }
 0xe9b   : > { %4336 = vmatmul.msk.f32.gmra.mxu3 %vm940_vm0, %v2925_v35 }
 0xea3   : > { %4337 = vmatmul.msk.f32.gmra.mxu3 %vm940_vm0, %v2928_v12 }
 0xeab   : > { %4338 = vmatmul.msk.f32.gmra.mxu3 %vm940_vm0, %v2931_v41 }
 0xeb3   : > { %4339 = vmatmul.msk.f32.gmra.mxu3 %vm940_vm0, %v2934_v27 }
 0xebb   : > { %4340 = vmatmul.msk.f32.gmra.mxu3 %vm940_vm0, %v2937_v24 }
 0xf06   : > { %v2983_v11 = vpop.f32.mrf.mxu3 }
 0xf07   : > { %v3007_v25 = vsel %vm1196_vm1, %v2983_v11, -inf }
 0xf08   : > { %3008 = vmax.xlane.f32.xlu0 %v3007_v25 }
 0xf0e   : > { %v2986_v23 = vpop.f32.mrf.mxu3 }
 0xf0f   : > { %v3010_v61 = vsel %vm1196_vm1, %v2986_v23, -inf }
 0xf10   : > { %3011 = vmax.xlane.f32.xlu1 %v3010_v61 }
 0xf16   : > { %v2989_v36 = vpop.f32.mrf.mxu3 }
 0xf17   : > { %v3013_v8 = vsel %vm1196_vm1, %v2989_v36, -inf }
 0xf18   : > { %3014 = vmax.xlane.f32.xlu2 %v3013_v8 }
 0xf1c   : > { %3614 = vrot.lane.b32.xlu0 %v5481_v2, %s6289_s6 }
 0xf1e   : > { %v5775_v37 = vpop.f32.mrf.mxu3 }
 0xf1f   : > { %v3016_v30 = vsel %vm1196_vm1, %v5775_v37, -inf }
 0xf20   : > { %3017 = vmax.xlane.f32.xlu2 %v3016_v30 }
 0xf24   : > { %3758 = vrot.lane.b32.xlu0 %v5478_v57, %s6292_s17 }
 0xf26   : > { %v5781_v50 = vpop.f32.mrf.mxu3 }
 0xf27   : > { %v3019_v3 = vsel %vm1196_vm1, %v5781_v50, -inf }
 0xf28   : > { %3020 = vmax.xlane.f32.xlu2 %v3019_v3 }
 0xf29   : > { %3566 = vrot.lane.b32.xlu1 %v5411_v26, %s6293_s19  ;;  %v3223_v26 = vld [vmem:[#allocation2 + $0x88] sm:$0x3] }
 0xf2c   : > { %3616 = vrot.lane.b32.xlu0 %v5478_v57, %s6289_s6  ;;  %v3397_v57 = vrot.slane %v3223_v26, 2 }
 0xf2e   : > { %v5789_v2 = vpop.f32.mrf.mxu3 }
 0xf2f   : > { %v3022_v46 = vsel %vm1196_vm1, %v5789_v2, -inf }
 0xf30   : > { %3023 = vmax.xlane.f32.xlu2 %v3022_v46 }
 0xf31   : > { %3710 = vrot.lane.b32.xlu1 %v5421_v13, %s6294_s18 }
 0xf34   : > { %3760 = vrot.lane.b32.xlu0 %v5617_v20, %s6292_s17 }
 0xf36   : > { %v5835_v34 = vpop.f32.mrf.mxu3 }
 0xf37   : > { %v3025_v17 = vsel %vm1196_vm1, %v5835_v34, -inf }
 0xf39   : > { %3568 = vrot.lane.b32.xlu1 %v5421_v13, %s6293_s19  ;;  %v3396_v13 = vrot.slane %v5571_v53, 2 }
 0xf3c   : > { %3618 = vrot.lane.b32.xlu0 %v5617_v20, %s6289_s6 }
 0xf3e   : > { %v5845_v41 = vpop.f32.mrf.mxu3 }
 0xf3f   : > { %v3028_v27 = vsel %vm1196_vm1, %v5845_v41, -inf }
 0xf41   : > { %3712 = vrot.lane.b32.xlu1 %v5434_v6, %s6294_s18 }
 0xf44   : > { %3762 = vrot.lane.b32.xlu0 %v5493_v0, %s6292_s17 }
 0xf49   : > { %3570 = vrot.lane.b32.xlu1 %v5434_v6, %s6293_s19  ;;  %v5821_v6 = vsel %vm3337_vm10, %v3396_v13, %v3397_v57 }
 0xf4c   : > { %3620 = vrot.lane.b32.xlu0 %v5493_v0, %s6289_s6  ;;  %v3391_v0 = vrot.slane %v3223_v26, 1 }
 0xf51   : > { %3714 = vrot.lane.b32.xlu1 %v5448_v60, %s6294_s18 }
 0xf54   : > { %3764 = vrot.lane.b32.xlu0 %v5490_v63, %s6292_s17 }
 0xf59   : > { %3572 = vrot.lane.b32.xlu1 %v5448_v60, %s6293_s19  ;;  %v3390_v60 = vrot.slane %v5571_v53, 1 }
 0xf5c   : > { %3622 = vrot.lane.b32.xlu0 %v5490_v63, %s6289_s6  ;;  %v3392_v63 = vsel %vm3288_vm9, %v3390_v60, %v3391_v0 }
 0xf61   : > { %3716 = vrot.lane.b32.xlu1 %v5461_v39, %s6294_s18 }
 0xf64   : > { %3766 = vrot.lane.b32.xlu0 %v5821_v6, %s6292_s17 }
 0xf69   : > { %3574 = vrot.lane.b32.xlu1 %v5461_v39, %s6293_s19 }
 0xf71   : > { %3718 = vrot.lane.b32.xlu1 %v3392_v63, %s6294_s18 }
 0xf79   : > { %3576 = vrot.lane.b32.xlu1 %v3392_v63, %s6293_s19 }
 0xf7b   : > { %v3009_v20 = vpop.xlane.xlu0 %3008 }
 0xf7c   : > { %v3031_v47 = vsub.f32 %v2983_v11, %v3009_v20 }
 0xf7e   : > { %v3039_v10 = vmul.f32 1.442695, %v3031_v47 }
 0xf80   : > { %4543 = vpow2.f32 %v3039_v10 }
 0xf83   : > { %v3012_v21 = vpop.xlane.xlu1 %3011 }
 0xf84   : > { %v3032_v14 = vsub.f32 %v2986_v23, %v3012_v21 }
 0xf86   : > { %v5833_v38 = vpop.eup %4543  ;;  %v3041_v39 = vmul.f32 1.442695, %v3032_v14 }
 0xf87   : > { %v3055_v19 = vsel %vm1196_vm1, %v5833_v38, 0.0 }
 0xf88   : > { %4545 = vpow2.f32 %v3041_v39  ;;  %3056 = vadd.xlane.f32.xlu2 %v3055_v19 }
 0xf8b   : > { %v3015_v62 = vpop.xlane.xlu2 %3014 }
 0xf8c   : > { %v3033_v18 = vsub.f32 %v2989_v36, %v3015_v62  ;;  %v3837_v36 = vsel %vm3834_vm11, %v5643_v5, %v5579_v56 }
 0xf8e   : > { %v5841_v35 = vpop.eup %4545  ;;  %3026 = vmax.xlane.f32.xlu0 %v3025_v17  ;;  %v3615_v44 = vpop.permute.xlu0 %3614  ;;  %v3043_v40 = vmul.f32 1.442695, %v3033_v18 }
 0xf8f   : > { %v3058_v12 = vsel %vm1196_vm1, %v5841_v35, 0.0 }
 0xf90   : > { %3059 = vadd.xlane.f32.xlu2 %v3058_v12  ;;  %4547 = vpow2.f32 %v3043_v40 }
 0xf93   : > { %v3018_v32 = vpop.xlane.xlu2 %3017 }
 0xf94   : > { %v3034_v52 = vsub.f32 %v5775_v37, %v3018_v32 }
 0xf96   : > { %v3045_v24 = vmul.f32 1.442695, %v3034_v52  ;;  %3029 = vmax.xlane.f32.xlu0 %v3028_v27  ;;  %v3759_v11 = vpop.permute.xlu0 %3758  ;;  %v5850_v25 = vpop.eup %4547 }
 0xf97   : > { %v3061_v3 = vsel %vm1196_vm1, %v5850_v25, 0.0 }
 0xf98   : > { %4549 = vpow2.f32 %v3045_v24 }
 0xf9b   : > { %v3567_v23 = vpop.permute.xlu1 %3566  ;;  %v3021_v61 = vpop.xlane.xlu2 %3020 }
 0xf9c   : > { %v3035_v8 = vsub.f32 %v5781_v50, %v3021_v61  ;;  %v3854_v30 = vsel %vm3851_vm12, %v3837_v36, %v3567_v23 }
 0xf9d   : > { %v3871_v57 = vsel %vm3868_vm13, %v3854_v30, %v3615_v44 }
 0xf9e   : > { %v5859_v37 = vpop.eup %4549  ;;  %v3047_v46 = vmul.f32 1.442695, %v3035_v8  ;;  %3062 = vadd.xlane.f32.xlu0 %v3061_v3  ;;  %v3617_v26 = vpop.permute.xlu0 %3616  ;;  %v3888_v5 = vsel %vm3885_vm14, %v3871_v57, %v5581_v43 }
 0xf9f   : > { %v3064_v13 = vsel %vm1196_vm1, %v5859_v37, 0.0 }
 0xfa0   : > { %4551 = vpow2.f32 %v3047_v46  ;;  %3065 = vadd.xlane.f32.xlu2 %v3064_v13 }
 0xfa3   : > { %v3711_v56 = vpop.permute.xlu1 %3710  ;;  %v3024_v50 = vpop.xlane.xlu2 %3023 }
 0xfa4   : > { %v3905_v60 = vsel %vm3902_vm15, %v3888_v5, %v3711_v56  ;;  %v3036_v0 = vsub.f32 %v5789_v2, %v3024_v50 }
 0xfa5   : > { %v3921_v63 = vsel %vm1304_vm2, %v3905_v60, %v3759_v11  ;;  %v3224_v60 = vld [vmem:[#allocation2 + $0x90] sm:$0xff] }
 0xfa6   : > { %v5869_v20 = vpop.eup %4551  ;;  %v3049_v47 = vmul.f32 1.442695, %v3036_v0  ;;  %4353 = vmatmul.msk.f32.gmra.mxu2 %vm3938_vm5, %v3921_v63  ;;  %v3761_v21 = vpop.permute.xlu0 %3760  ;;  %v3225_v0 = vld [vmem:[#allocation2 + $0x98] sm:$0x3]  ;;  %v3406_v63 = vrot.slane %v3224_v60, 1 }
 0xfa7   : > { %v3067_v10 = vsel %vm1196_vm1, %v5869_v20, 0.0 }
 0xfa8   : > { %4553 = vpow2.f32 %v3049_v47  ;;  %3068 = vadd.xlane.f32.xlu0 %v3067_v10  ;;  %v3407_v47 = vrot.slane %v3225_v0, 1 }
 0xfab   : > { %v3569_v14 = vpop.permute.xlu1 %3568 }
 0xfac   : > { %v3855_v43 = vsel %vm3851_vm12, %v5584_v49, %v3569_v14 }
 0xfad   : > { %v3872_v19 = vsel %vm3868_vm13, %v3855_v43, %v3617_v26 }
 0xfae   : > { %v5876_v39 = vpop.eup %4553  ;;  %v3619_v62 = vpop.permute.xlu0 %3618  ;;  %v3889_v18 = vsel %vm3885_vm14, %v3872_v19, %v5586_v55 }
 0xfaf   : > { %v3070_v2 = vsel %vm1196_vm1, %v5876_v39, 0.0 }
 0xfb0   : > { %3071 = vadd.xlane.f32.xlu2 %v3070_v2 }
 0xfb3   : > { %v3713_v17 = vpop.permute.xlu1 %3712 }
 0xfb4   : > { %v3906_v44 = vsel %vm3902_vm15, %v3889_v18, %v3713_v17 }
 0xfb5   : > { %v3922_v12 = vsel %vm1304_vm2, %v3906_v44, %v3761_v21 }
 0xfb6   : > { %4354 = vmatmul.msk.f32.gmra.mxu2 %vm3938_vm5, %v3922_v12  ;;  %v3763_v40 = vpop.permute.xlu0 %3762 }
 0xfbb   : > { %v3571_v49 = vpop.permute.xlu1 %3570 }
 0xfbc   : > { %3624 = vrot.lane.b32.xlu0 %v5821_v6, %s6289_s6  ;;  %v3856_v32 = vsel %vm3851_vm12, %v5592_v58, %v3571_v49  ;;  %v3840_v58 = vsel %vm3834_vm11, %v5650_v7, %v5596_v1 }
 0xfbd   : > { %v3873_v27 = vsel %vm3868_vm13, %v3856_v32, %v3619_v62 }
 0xfbe   : > { %v3890_v55 = vsel %vm3885_vm14, %v3873_v27, %v5594_v33  ;;  %v3621_v23 = vpop.permute.xlu0 %3620  ;;  %v3412_v27 = vrot.slane %v3224_v60, 2 }
 0xfc3   : > { %v3715_v52 = vpop.permute.xlu1 %3714 }
 0xfc4   : > { %v3907_v24 = vsel %vm3902_vm15, %v3890_v55, %v3715_v52  ;;  %v3413_v52 = vrot.slane %v3225_v0, 2 }
 0xfc5   : > { %v3923_v11 = vsel %vm1304_vm2, %v3907_v24, %v3763_v40 }
 0xfc6   : > { %4355 = vmatmul.msk.f32.gmra.mxu2 %vm3938_vm5, %v3923_v11  ;;  %v3765_v36 = vpop.permute.xlu0 %3764  ;;  %v3414_v11 = vsel %vm3337_vm10, %v3412_v27, %v3413_v52 }
 0xfc8   : > { %3528 = vrot.lane.b32.xlu2 %v5571_v53, %s6288_s11 }
 0xfcb   : > { %v3573_v6 = vpop.permute.xlu1 %3572 }
 0xfcc   : > { %v3857_v61 = vsel %vm3851_vm12, %v3840_v58, %v3573_v6 }
 0xfcd   : > { %v3874_v33 = vsel %vm3868_vm13, %v3857_v61, %v3621_v23 }
 0xfce   : > { %v3891_v30 = vsel %vm3885_vm14, %v3874_v33, %v5599_v9  ;;  %v3623_v53 = vpop.permute.xlu0 %3622 }
 0xfd3   : > { %v3717_v8 = vpop.permute.xlu1 %3716 }
 0xfd4   : > { %v3908_v3 = vsel %vm3902_vm15, %v3891_v30, %v3717_v8 }
 0xfd5   : > { %v3924_v46 = vsel %vm1304_vm2, %v3908_v3, %v3765_v36 }
 0xfd6   : > { %4356 = vmatmul.msk.f32.gmra.mxu2 %vm3938_vm5, %v3924_v46  ;;  %v3767_v56 = vpop.permute.xlu0 %3766 }
 0xfdb   : > { %v3575_v26 = vpop.permute.xlu1 %3574 }
 0xfdc   : > { %v3858_v1 = vsel %vm3851_vm12, %v5605_v48, %v3575_v26  ;;  %v3408_v48 = vsel %vm3288_vm9, %v3406_v63, %v3407_v47 }
 0xfdd   : > { %v3875_v7 = vsel %vm3868_vm13, %v3858_v1, %v3623_v53  ;;  %3720 = vrot.lane.b32.xlu1 %v3408_v48, %s6294_s18 }
 0xfde   : > { %v3892_v57 = vsel %vm3885_vm14, %v3875_v7, %v5831_v29 }
 0xfe3   : > { %v3719_v13 = vpop.permute.xlu1 %3718 }
 0xfe4   : > { %v3909_v9 = vsel %vm3902_vm15, %v3892_v57, %v3719_v13 }
 0xfe5   : > { %v3925_v5 = vsel %vm1304_vm2, %v3909_v9, %v3767_v56 }
 0xfe6   : > { %4357 = vmatmul.msk.f32.gmra.mxu2 %vm3938_vm5, %v3925_v5 }
 0xfeb   : > { %v3577_v5 = vpop.permute.xlu1 %3576 }
 0xffb   : > { %v3057_v50 = vpop.xlane.xlu2 %3056 }
 0xffc   : > { %4555 = vrcp.f32 %v3057_v50 }
0x1001   : > { %v3027_v10 = vpop.xlane.xlu0 %3026 }
0x1002   : > { %v4556_v21 = vpop.eup %4555  ;;  %v3037_v29 = vsub.f32 %v5835_v34, %v3027_v10 }
0x1003   : > { %v3087_v14 = vmul.f32 %v4556_v21, %v5833_v38  ;;  %v3060_v43 = vpop.xlane.xlu2 %3059 }
0x1004   : > { %v3051_v2 = vmul.f32 1.442695, %v3037_v29  ;;  %4557 = vrcp.f32 %v3060_v43 }
0x1005   : > { %4343 = vmatmul.msk.f32.vlgmr.msra.gmra.mxu0 %vm1196_vm1, %v3087_v14 }
0x1006   : > { %4559 = vpow2.f32 %v3051_v2 }
0x1009   : > { %v3030_v19 = vpop.xlane.xlu0 %3029 }
0x100a   : > { %v4558_v62 = vpop.eup %4557  ;;  %v3038_v17 = vsub.f32 %v5845_v41, %v3030_v19 }
0x100b   : > { %v3088_v18 = vmul.f32 %v4558_v62, %v5841_v35 }
0x100c   : > { %v4560_v44 = vpop.eup %4559  ;;  %v3053_v12 = vmul.f32 1.442695, %v3038_v17 }
0x100d   : > { %4344 = vmatmul.msk.f32.gmra.mxu0 %vm1196_vm1, %v3088_v18  ;;  %v3073_v34 = vsel %vm1196_vm1, %v4560_v44, 0.0 }
0x100e   : > { %4561 = vpow2.f32 %v3053_v12  ;;  %3074 = vadd.xlane.f32.xlu0 %v3073_v34 }
0x1011   : > { %v3063_v38 = vpop.xlane.xlu0 %3062 }
0x1012   : > { %4563 = vrcp.f32 %v3063_v38 }
0x1013   : > { %v3066_v40 = vpop.xlane.xlu2 %3065 }
0x1014   : > { %v5925_v49 = vpop.eup %4561  ;;  %4565 = vrcp.f32 %v3066_v40 }
0x1015   : > { %v3076_v32 = vsel %vm1196_vm1, %v5925_v49, 0.0 }
0x1016   : > { %3077 = vadd.xlane.f32.xlu2 %v3076_v32 }
0x1018   : > { %v4564_v41 = vpop.eup %4563 }
0x1019   : > { %v3089_v35 = vmul.f32 %v4564_v41, %v5850_v25 }
0x101a   : > { %v4566_v24 = vpop.eup %4565 }
0x101b   : > { %4345 = vmatmul.msk.f32.gmra.mxu0 %vm1196_vm1, %v3089_v35  ;;  %v3069_v55 = vpop.xlane.xlu0 %3068  ;;  %v3090_v23 = vmul.f32 %v4566_v24, %v5859_v37 }
0x101c   : > { %4567 = vrcp.f32 %v3069_v55 }
0x1022   : > { %3768 = vrot.lane.b32.xlu0 %v3414_v11, %s6292_s17  ;;  %v4568_v58 = vpop.eup %4567 }
0x1023   : > { %4346 = vmatmul.msk.f32.gmra.mxu0 %vm1196_vm1, %v3090_v23  ;;  %v3072_v6 = vpop.xlane.xlu2 %3071  ;;  %v3091_v61 = vmul.f32 %v4568_v58, %v5869_v20 }
0x1024   : > { %4569 = vrcp.f32 %v3072_v6 }
0x1029   : > { %v4010_v25 = vpop.f32.mrf.mxu2 }
0x102a   : > { %v4011_v36 = vadd.f32 %v5694_v54, %v4010_v25  ;;  %v4570_v37 = vpop.eup %4569 }
0x102b   : > { %4347 = vmatmul.msk.f32.gmra.mxu0 %vm1196_vm1, %v3091_v61  ;;  %v3092_v33 = vmul.f32 %v4570_v37, %v5876_v39  ;;  %v3529_v7 = vpop.permute.xlu2 %3528 }
0x102c   : > { %4054 = vst.msk [vmem:[%s5697_s20 + $0x10] sm:$0xff] %vm940_vm0, %v4011_v36  ;;  %v3842_v63 = vsel %vm3834_vm11, %v5556_v45, %v3529_v7 }
0x102d   : > { %v3859_v45 = vsel %vm3851_vm12, %v3842_v63, %v3577_v5 }
0x102e   : > { %3672 = vrot.lane.b32.xlu2 %v3224_v60, %s6295_s2  ;;  %v3625_v1 = vpop.permute.xlu0 %3624 }
0x102f   : > { %v3876_v62 = vsel %vm3868_vm13, %v3859_v45, %v3625_v1 }
0x1033   : > { %4348 = vmatmul.msk.f32.gmra.mxu0 %vm1196_vm1, %v3092_v33 }
0x1039   : > { %v4013_v8 = vpop.f32.mrf.mxu2 }
0x103a   : > { %v4014_v30 = vadd.f32 %v5694_v54, %v4013_v8 }
0x103c   : > { %4055 = vst.msk [vmem:[%s5697_s20 + $0x18] sm:$0xff] %vm940_vm0, %v4014_v30 }
0x1049   : > { %v4016_v20 = vpop.f32.mrf.mxu2 }
0x104a   : > { %v4017_v3 = vadd.f32 %v5694_v54, %v4016_v20 }
0x104c   : > { %4056 = vst.msk [vmem:[%s5697_s20 + $0x20] sm:$0xff] %vm940_vm0, %v4017_v3 }
0x104f   : > { %v3721_v19 = vpop.permute.xlu1 %3720 }
0x1059   : > { %v4019_v46 = vpop.f32.mrf.mxu2 }
0x105a   : > { %v4020_v53 = vadd.f32 %v5694_v54, %v4019_v46 }
0x105c   : > { %4057 = vst.msk [vmem:[%s5697_s20 + $0x28] sm:$0xff] %vm940_vm0, %v4020_v53 }
0x1069   : > { %v4022_v26 = vpop.f32.mrf.mxu2 }
0x106a   : > { %v4023_v39 = vadd.f32 %v5694_v54, %v4022_v26 }
0x106c   : > { %4058 = vst.msk [vmem:[%s5697_s20 + $0x30] sm:$0xff] %vm940_vm0, %v4023_v39 }
0x1081   : > { %v3075_v13 = vpop.xlane.xlu0 %3074 }
0x1082   : > { %4571 = vrcp.f32 %v3075_v13  ;;  %v3165_v57 = vpop.f32.mrf.mxu0 }
0x1083   : > { %v3189_v56 = vadd.f32 %v5712_v59, %v3165_v57 }
0x1085   : > { %3198 = vst.msk [vmem:[#allocation2 + $0xb1] sm:$0xff] %vm940_vm0, %v3189_v56 }
0x1088   : > { %v4572_v9 = vpop.eup %4571 }
0x1089   : > { %v3078_v50 = vpop.xlane.xlu2 %3077  ;;  %v3093_v60 = vmul.f32 %v4572_v9, %v4560_v44 }
0x108a   : > { %4573 = vrcp.f32 %v3078_v50  ;;  %v3168_v0 = vpop.f32.mrf.mxu0 }
0x108b   : > { %v3190_v47 = vadd.f32 %v5719_v4, %v3168_v0  ;;  %4349 = vmatmul.msk.f32.gmra.mxu0 %vm1196_vm1, %v3093_v60 }
0x108c   : > { %v5961_v48 = vld [vmem:[#allocation2 + $0xb0] sm:$0xff]  ;;  %v3229_v10 = vld [vmem:[#allocation2 + $0xb8] sm:$0x3] }
0x108d   : > { %3199 = vst.msk [vmem:[#allocation2 + $0xc1] sm:$0xff] %vm940_vm0, %v3190_v47  ;;  %3530 = vrot.lane.b32.xlu2 %v5961_v48, %s6288_s11  ;;  %v3316_v59 = vrot.slane %v5961_v48, 1  ;;  %v3317_v21 = vrot.slane %v3229_v10, 1  ;;  %v3365_v29 = vrot.slane %v5961_v48, 2  ;;  %v3366_v14 = vrot.slane %v3229_v10, 2 }
0x108f   : > { %v3318_v4 = vsel %vm3288_vm9, %v3316_v59, %v3317_v21  ;;  %v3367_v43 = vsel %vm3337_vm10, %v3365_v29, %v3366_v14 }
0x1090   : > { %v4574_v2 = vpop.eup %4573  ;;  %3436 = vrot.lane.b32.xlu1 %v3318_v4, %s6290_s15  ;;  %3484 = vrot.lane.b32.xlu0 %v3367_v43, %s6291_s10 }
0x1091   : > { %v3673_v17 = vpop.permute.xlu2 %3672  ;;  %v3094_v18 = vmul.f32 %v4574_v2, %v5925_v49 }
0x1092   : > { %v3893_v44 = vsel %vm3885_vm14, %v3876_v62, %v3673_v17 }
0x1093   : > { %v3910_v12 = vsel %vm3902_vm15, %v3893_v44, %v3721_v19  ;;  %4350 = vmatmul.msk.f32.gmra.mxu0 %vm1196_vm1, %v3094_v18 }
0x1094   : > { %v3769_v34 = vpop.permute.xlu0 %3768  ;;  %v5978_v38 = vld [vmem:[#allocation2 + $0xc0] sm:$0xff]  ;;  %v3231_v32 = vld [vmem:[#allocation2 + $0xc8] sm:$0x3] }
0x1095   : > { %v3926_v40 = vsel %vm1304_vm2, %v3910_v12, %v3769_v34  ;;  %3674 = vrot.lane.b32.xlu2 %v5978_v38, %s6295_s2  ;;  %v3319_v35 = vrot.slane %v5978_v38, 1  ;;  %v3320_v27 = vrot.slane %v3231_v32, 1  ;;  %v3368_v24 = vrot.slane %v5978_v38, 2 }
0x1096   : > { %4358 = vmatmul.msk.f32.gmra.mxu2 %vm3938_vm5, %v3926_v40  ;;  %v3369_v11 = vrot.slane %v3231_v32, 2 }
0x1097   : > { %v3321_v52 = vsel %vm3288_vm9, %v3319_v35, %v3320_v27 }
0x1098   : > { %3578 = vrot.lane.b32.xlu1 %v3318_v4, %s6293_s19  ;;  %3626 = vrot.lane.b32.xlu0 %v3367_v43, %s6289_s6  ;;  %v3171_v49 = vpop.f32.mrf.mxu0  ;;  %v3370_v23 = vsel %vm3337_vm10, %v3368_v24, %v3369_v11 }
0x1099   : > { %v3191_v41 = vadd.f32 %v5724_v51, %v3171_v49 }
0x109b   : > { %3200 = vst.msk [vmem:[#allocation2 + $0xd1] sm:$0xff] %vm940_vm0, %v3191_v41 }
0x109d   : > { %3532 = vrot.lane.b32.xlu2 %v5978_v38, %s6288_s11 }
0x10a0   : > { %3722 = vrot.lane.b32.xlu1 %v3321_v52, %s6294_s18  ;;  %3438 = vrot.lane.b32.xlu0 %v3321_v52, %s6290_s15  ;;  %v3174_v55 = vpop.f32.mrf.mxu0 }
0x10a1   : > { %v3192_v51 = vadd.f32 %v5729_v15, %v3174_v55 }
0x10a2   : > { %v6001_v58 = vld [vmem:[#allocation2 + $0xd0] sm:$0xff]  ;;  %v3233_v25 = vld [vmem:[#allocation2 + $0xd8] sm:$0x3] }
0x10a3   : > { %3201 = vst.msk [vmem:[#allocation2 + $0xe1] sm:$0xff] %vm940_vm0, %v3192_v51  ;;  %v3371_v15 = vrot.slane %v6001_v58, 2  ;;  %v3372_v36 = vrot.slane %v3233_v25, 2  ;;  %v3323_v30 = vrot.slane %v3233_v25, 1 }
0x10a5   : > { %3486 = vrot.lane.b32.xlu2 %v3370_v23, %s6291_s10  ;;  %v3373_v37 = vsel %vm3337_vm10, %v3371_v15, %v3372_v36 }
0x10a8   : > { %3580 = vrot.lane.b32.xlu1 %v3321_v52, %s6293_s19  ;;  %3770 = vrot.lane.b32.xlu0 %v3370_v23, %s6292_s17  ;;  %v3177_v6 = vpop.f32.mrf.mxu0 }
0x10a9   : > { %v3193_v61 = vadd.f32 %v5736_v31, %v3177_v6  ;;  %v3322_v31 = vrot.slane %v6001_v58, 1 }
0x10aa   : > { %v3235_v3 = vld [vmem:[#allocation2 + $0xe8] sm:$0x3] }
0x10ab   : > { %3202 = vst.msk [vmem:[#allocation2 + $0xf1] sm:$0xff] %vm940_vm0, %v3193_v61  ;;  %v3324_v20 = vsel %vm3288_vm9, %v3322_v31, %v3323_v30  ;;  %v3375_v53 = vrot.slane %v3235_v3, 2  ;;  %v3326_v39 = vrot.slane %v3235_v3, 1 }
0x10ad   : > { %3676 = vrot.lane.b32.xlu2 %v6001_v58, %s6295_s2 }
0x10b0   : > { %3628 = vrot.lane.b32.xlu0 %v3370_v23, %s6289_s6  ;;  %3488 = vrot.lane.b32.xlu1 %v3373_v37, %s6291_s10  ;;  %v3180_v33 = vpop.f32.mrf.mxu0 }
0x10b1   : > { %v3194_v8 = vadd.f32 %v5742_v42, %v3180_v33  ;;  %v6022_v42 = vld [vmem:[#allocation2 + $0xe0] sm:$0xff] }
0x10b2   : > { %v3374_v46 = vrot.slane %v6022_v42, 2  ;;  %v3325_v26 = vrot.slane %v6022_v42, 1  ;;  %v6036_v13 = vld [vmem:[#allocation2 + $0xf0] sm:$0xff]  ;;  %v3237_v57 = vld [vmem:[#allocation2 + $0xf8] sm:$0x3] }
0x10b3   : > { %3203 = vst.msk [vmem:[#allocation2 + $0x101] sm:$0xff] %vm940_vm0, %v3194_v8  ;;  %v3328_v56 = vrot.slane %v6036_v13, 1  ;;  %v3329_v9 = vrot.slane %v3237_v57, 1  ;;  %v3377_v50 = vrot.slane %v6036_v13, 2  ;;  %v3378_v60 = vrot.slane %v3237_v57, 2 }
0x10b4   : > { %v3376_v1 = vsel %vm3337_vm10, %v3374_v46, %v3375_v53  ;;  %v3327_v7 = vsel %vm3288_vm9, %v3325_v26, %v3326_v39 }
0x10b5   : > { %3534 = vrot.lane.b32.xlu2 %v6001_v58, %s6288_s11  ;;  %v3330_v5 = vsel %vm3288_vm9, %v3328_v56, %v3329_v9  ;;  %v3379_v0 = vsel %vm3337_vm10, %v3377_v50, %v3378_v60 }
0x10b8   : > { %3772 = vrot.lane.b32.xlu0 %v3373_v37, %s6292_s17  ;;  %3724 = vrot.lane.b32.xlu1 %v3324_v20, %s6294_s18 }
0x10ba   : > { %v6053_v47 = vld [vmem:[#allocation2 + $0x100] sm:$0xff]  ;;  %v3239_v10 = vld [vmem:[#allocation2 + $0x108] sm:$0x3] }
0x10bb   : > { %v3331_v59 = vrot.slane %v6053_v47, 1  ;;  %v3332_v21 = vrot.slane %v3239_v10, 1  ;;  %v3380_v29 = vrot.slane %v6053_v47, 2  ;;  %v3381_v14 = vrot.slane %v3239_v10, 2 }
0x10bd   : > { %3440 = vrot.lane.b32.xlu2 %v3324_v20, %s6290_s15  ;;  %v3333_v45 = vsel %vm3288_vm9, %v3331_v59, %v3332_v21  ;;  %v3382_v43 = vsel %vm3337_vm10, %v3380_v29, %v3381_v14  ;;  %v3244_v29 = vld [vmem:[#allocation2 + $0x130] sm:$0xff]  ;;  %v3245_v14 = vld [vmem:[#allocation2 + $0x138] sm:$0x3] }
0x10c0   : > { %3630 = vrot.lane.b32.xlu0 %v3373_v37, %s6289_s6  ;;  %3582 = vrot.lane.b32.xlu1 %v3324_v20, %s6293_s19 }
0x10c5   : > { %3678 = vrot.lane.b32.xlu2 %v6022_v42, %s6295_s2 }
0x10c8   : > { %3490 = vrot.lane.b32.xlu0 %v3376_v1, %s6291_s10  ;;  %3442 = vrot.lane.b32.xlu1 %v3327_v7, %s6290_s15 }
0x10cd   : > { %3536 = vrot.lane.b32.xlu2 %v6022_v42, %s6288_s11 }
0x10d0   : > { %3774 = vrot.lane.b32.xlu0 %v3376_v1, %s6292_s17  ;;  %3726 = vrot.lane.b32.xlu1 %v3327_v7, %s6294_s18 }
0x10d5   : > { %3680 = vrot.lane.b32.xlu2 %v6036_v13, %s6295_s2 }
0x10d8   : > { %3632 = vrot.lane.b32.xlu0 %v3376_v1, %s6289_s6  ;;  %3584 = vrot.lane.b32.xlu1 %v3327_v7, %s6293_s19 }
0x10dd   : > { %3538 = vrot.lane.b32.xlu2 %v6036_v13, %s6288_s11 }
0x10e0   : > { %3728 = vrot.lane.b32.xlu1 %v3330_v5, %s6294_s18  ;;  %3444 = vrot.lane.b32.xlu0 %v3330_v5, %s6290_s15 }
0x10e5   : > { %3492 = vrot.lane.b32.xlu2 %v3379_v0, %s6291_s10 }
0x10e7   : > { %v3531_v63 = vpop.permute.xlu2 %3530 }
0x10e8   : > { %3586 = vrot.lane.b32.xlu1 %v3330_v5, %s6293_s19  ;;  %3776 = vrot.lane.b32.xlu0 %v3379_v0, %s6292_s17  ;;  %v3843_v32 = vsel %vm3834_vm11, %v5656_v22, %v3531_v63 }
0x10ed   : > { %3682 = vrot.lane.b32.xlu2 %v6053_v47, %s6295_s2 }
0x10ef   : > { %v3675_v4 = vpop.permute.xlu2 %3674 }
0x10f0   : > { %3634 = vrot.lane.b32.xlu0 %v3379_v0, %s6289_s6  ;;  %3540 = vrot.lane.b32.xlu1 %v6053_v47, %s6288_s11 }
0x10f5   : > { %3446 = vrot.lane.b32.xlu2 %v3333_v45, %s6290_s15 }
0x10f7   : > { %v3533_v2 = vpop.permute.xlu2 %3532 }
0x10f8   : > { %3778 = vrot.lane.b32.xlu0 %v3382_v43, %s6292_s17  ;;  %3730 = vrot.lane.b32.xlu1 %v3333_v45, %s6294_s18 }
0x10fd   : > { %3636 = vrot.lane.b32.xlu2 %v3382_v43, %s6289_s6 }
0x10ff   : > { %v6070_v18 = vpop.permute.xlu2 %3486 }
0x1100   : > { %3588 = vrot.lane.b32.xlu0 %v3333_v45, %s6293_s19  ;;  %3494 = vrot.lane.b32.xlu1 %v3382_v43, %s6291_s10  ;;  %v3409_v43 = vrot.slane %v3244_v29, 1 }
0x1102   : > { %v3437_v19 = vpop.permute.xlu1 %3436  ;;  %v3485_v62 = vpop.permute.xlu0 %3484 }
0x1107   : > { %v3677_v55 = vpop.permute.xlu2 %3676 }
0x1108   : > { %v3183_v17 = vpop.f32.mrf.mxu0 }
0x1109   : > { %v3195_v44 = vadd.f32 %v5748_v28, %v3183_v17 }
0x110a   : > { %v3579_v12 = vpop.permute.xlu1 %3578  ;;  %v3627_v34 = vpop.permute.xlu0 %3626 }
0x110b   : > { %3204 = vst.msk [vmem:[#allocation2 + $0x111] sm:$0xff] %vm940_vm0, %v3195_v44  ;;  %v3860_v24 = vsel %vm3851_vm12, %v3843_v32, %v3579_v12 }
0x110c   : > { %v3877_v11 = vsel %vm3868_vm13, %v3860_v24, %v3627_v34 }
0x110d   : > { %v3894_v6 = vsel %vm3885_vm14, %v3877_v11, %v3675_v4 }
0x110f   : > { %v3535_v31 = vpop.permute.xlu2 %3534 }
0x1110   : > { %v3186_v40 = vpop.f32.mrf.mxu0 }
0x1111   : > { %v3196_v49 = vadd.f32 %v5753_v16, %v3186_v40 }
0x1112   : > { %v3723_v41 = vpop.permute.xlu1 %3722  ;;  %v6077_v35 = vpop.permute.xlu0 %3438  ;;  %v6079_v27 = vld [vmem:[#allocation2 + $0x110] sm:$0xff]  ;;  %v3241_v52 = vld [vmem:[#allocation2 + $0x118] sm:$0x3] }
0x1113   : > { %3205 = vst.msk [vmem:[#allocation2 + $0x121] sm:$0xff] %vm940_vm0, %v3196_v49  ;;  %3542 = vrot.lane.b32.xlu0 %v6079_v27, %s6288_s11  ;;  %3684 = vrot.lane.b32.xlu1 %v6079_v27, %s6295_s2  ;;  %v3383_v28 = vrot.slane %v6079_v27, 2  ;;  %v3384_v22 = vrot.slane %v3241_v52, 2  ;;  %v3334_v51 = vrot.slane %v6079_v27, 1  ;;  %v3335_v23 = vrot.slane %v3241_v52, 1 }
0x1114   : > { %v3911_v61 = vsel %vm3902_vm15, %v3894_v6, %v3723_v41  ;;  %v3812_v17 = vsel %vm940_vm0, %v5978_v38, %v6077_v35 }
0x1115   : > { %v3385_v16 = vsel %vm3337_vm10, %v3383_v28, %v3384_v22  ;;  %v3336_v33 = vsel %vm3288_vm9, %v3334_v51, %v3335_v23  ;;  %v3828_v44 = vsel %vm1859_vm3, %v3812_v17, %v6070_v18 }
0x1116   : > { %3780 = vrot.lane.b32.xlu2 %v3385_v16, %s6292_s17  ;;  %v3845_v41 = vsel %vm3834_vm11, %v3828_v44, %v3535_v31 }
0x1117   : > { %v3441_v57 = vpop.permute.xlu2 %3440 }
0x1118   : > { %v3813_v23 = vsel %vm940_vm0, %v6001_v58, %v3441_v57 }
0x1119   : > { %v4025_v25 = vpop.f32.mrf.mxu2 }
0x111a   : > { %v4026_v15 = vadd.f32 %v5694_v54, %v4025_v25  ;;  %v3581_v36 = vpop.permute.xlu1 %3580  ;;  %v3771_v37 = vpop.permute.xlu0 %3770  ;;  %v3811_v54 = vsel %vm940_vm0, %v5961_v48, %v3437_v19  ;;  %v3242_v46 = vld [vmem:[#allocation2 + $0x120] sm:$0xff]  ;;  %v3243_v53 = vld [vmem:[#allocation2 + $0x128] sm:$0x3]  ;;  %v3415_v19 = vrot.slane %v3244_v29, 2 }
0x111b   : > { %v3927_v8 = vsel %vm1304_vm2, %v3911_v61, %v3771_v37  ;;  %3732 = vrot.lane.b32.xlu0 %v3336_v33, %s6294_s18  ;;  %3448 = vrot.lane.b32.xlu1 %v3336_v33, %s6290_s15  ;;  %v3827_v30 = vsel %vm1859_vm3, %v3811_v54, %v3485_v62  ;;  %v3399_v1 = vrot.slane %v3242_v46, 2  ;;  %v3400_v7 = vrot.slane %v3243_v53, 2 }
0x111c   : > { %4059 = vst.msk [vmem:[%s5697_s20 + $0x38] sm:$0xff] %vm940_vm0, %v4026_v15  ;;  %4359 = vmatmul.msk.f32.gmra.mxu2 %vm3938_vm5, %v3927_v8  ;;  %v3844_v26 = vsel %vm3834_vm11, %v3827_v30, %v3533_v2  ;;  %v3393_v56 = vrot.slane %v3242_v46, 1  ;;  %v3394_v9 = vrot.slane %v3243_v53, 1  ;;  %v3410_v2 = vrot.slane %v3245_v14, 1 }
0x111d   : > { %v3861_v39 = vsel %vm3851_vm12, %v3844_v26, %v3581_v36  ;;  %v3401_v0 = vsel %vm3337_vm10, %v3399_v1, %v3400_v7  ;;  %v3416_v62 = vrot.slane %v3245_v14, 2 }
0x111e   : > { %3590 = vrot.lane.b32.xlu2 %v3336_v33, %s6293_s19  ;;  %v3395_v59 = vsel %vm3288_vm9, %v3393_v56, %v3394_v9  ;;  %v3411_v12 = vsel %vm3288_vm9, %v3409_v43, %v3410_v2 }
0x111f   : > { %v3679_v21 = vpop.permute.xlu2 %3678  ;;  %v3417_v34 = vsel %vm3337_vm10, %v3415_v19, %v3416_v62 }
0x1122   : > { %v3489_v20 = vpop.permute.xlu1 %3488  ;;  %v3629_v3 = vpop.permute.xlu0 %3628 }
0x1123   : > { %3496 = vrot.lane.b32.xlu0 %v3385_v16, %s6291_s10  ;;  %3638 = vrot.lane.b32.xlu1 %v3385_v16, %s6289_s6  ;;  %v3878_v48 = vsel %vm3868_vm13, %v3861_v39, %v3629_v3  ;;  %v3829_v6 = vsel %vm1859_vm3, %v3813_v23, %v3489_v20 }
0x1124   : > { %v3895_v50 = vsel %vm3885_vm14, %v3878_v48, %v3677_v55 }
0x1126   : > { %3544 = vrot.lane.b32.xlu2 %v3242_v46, %s6288_s11 }
0x1127   : > { %v3537_v32 = vpop.permute.xlu2 %3536 }
0x1128   : > { %v3846_v25 = vsel %vm3834_vm11, %v3829_v6, %v3537_v32 }
0x112a   : > { %v3725_v5 = vpop.permute.xlu1 %3724  ;;  %v3773_v60 = vpop.permute.xlu0 %3772 }
0x112b   : > { %v3912_v63 = vsel %vm3902_vm15, %v3895_v50, %v3725_v5  ;;  %3686 = vrot.lane.b32.xlu0 %v3242_v46, %s6295_s2  ;;  %3782 = vrot.lane.b32.xlu1 %v3401_v0, %s6292_s17 }
0x112c   : > { %v3928_v10 = vsel %vm1304_vm2, %v3912_v63, %v3773_v60 }
0x112d   : > { %4360 = vmatmul.msk.f32.gmra.mxu2 %vm3938_vm5, %v3928_v10 }
0x112e   : > { %3734 = vrot.lane.b32.xlu2 %v3395_v59, %s6294_s18 }
0x112f   : > { %v3681_v22 = vpop.permute.xlu2 %3680 }
0x1132   : > { %v3583_v45 = vpop.permute.xlu1 %3582  ;;  %v3631_v4 = vpop.permute.xlu0 %3630 }
0x1133   : > { %3640 = vrot.lane.b32.xlu0 %v3401_v0, %s6289_s6  ;;  %3592 = vrot.lane.b32.xlu1 %v3395_v59, %s6293_s19  ;;  %v3862_v38 = vsel %vm3851_vm12, %v3845_v41, %v3583_v45 }
0x1134   : > { %v3879_v35 = vsel %vm3868_vm13, %v3862_v38, %v3631_v4 }
0x1135   : > { %v3896_v18 = vsel %vm3885_vm14, %v3879_v35, %v3679_v21 }
0x1136   : > { %3688 = vrot.lane.b32.xlu2 %v3244_v29, %s6295_s2 }
0x1137   : > { %v3539_v51 = vpop.permute.xlu2 %3538 }
0x113a   : > { %v3443_v40 = vpop.permute.xlu1 %3442  ;;  %v3491_v49 = vpop.permute.xlu0 %3490 }
0x113b   : > { %3736 = vrot.lane.b32.xlu1 %v3411_v12, %s6294_s18  ;;  %3784 = vrot.lane.b32.xlu0 %v3417_v34, %s6292_s17  ;;  %v3814_v58 = vsel %vm940_vm0, %v6022_v42, %v3443_v40 }
0x113c   : > { %v3830_v20 = vsel %vm1859_vm3, %v3814_v58, %v3491_v49 }
0x113d   : > { %v3847_v39 = vsel %vm3834_vm11, %v3830_v20, %v3539_v51 }
0x113f   : > { %v3493_v33 = vpop.permute.xlu2 %3492 }
0x1142   : > { %v3727_v52 = vpop.permute.xlu1 %3726  ;;  %v3775_v55 = vpop.permute.xlu0 %3774 }
0x1143   : > { %v3913_v24 = vsel %vm3902_vm15, %v3896_v18, %v3727_v52 }
0x1144   : > { %v3929_v28 = vsel %vm1304_vm2, %v3913_v24, %v3775_v55 }
0x1145   : > { %4361 = vmatmul.msk.f32.gmra.mxu2 %vm3938_vm5, %v3929_v28 }
0x1147   : > { %v3683_v26 = vpop.permute.xlu2 %3682 }
0x114a   : > { %v3585_v16 = vpop.permute.xlu1 %3584  ;;  %v3633_v11 = vpop.permute.xlu0 %3632 }
0x114b   : > { %v3863_v36 = vsel %vm3851_vm12, %v3846_v25, %v3585_v16 }
0x114c   : > { %v3880_v37 = vsel %vm3868_vm13, %v3863_v36, %v3633_v11 }
0x114d   : > { %v3897_v8 = vsel %vm3885_vm14, %v3880_v37, %v3681_v22  ;;  %v4575_v22 = vld [vmem:[%s4770_s27] ss:$0 sm:$0xff] }
0x114f   : > { %v3447_v42 = vpop.permute.xlu2 %3446 }
0x1150   : > { %v3816_v40 = vsel %vm940_vm0, %v6053_v47, %v3447_v42 }
0x1152   : > { %v3729_v61 = vpop.permute.xlu1 %3728  ;;  %v3445_v15 = vpop.permute.xlu0 %3444 }
0x1153   : > { %v3914_v31 = vsel %vm3902_vm15, %v3897_v8, %v3729_v61  ;;  %v3815_v10 = vsel %vm940_vm0, %v6036_v13, %v3445_v15 }
0x1154   : > { %v3831_v29 = vsel %vm1859_vm3, %v3815_v10, %v3493_v33 }
0x1157   : > { %v3637_v50 = vpop.permute.xlu2 %3636 }
0x115a   : > { %v3587_v54 = vpop.permute.xlu1 %3586  ;;  %v3777_v30 = vpop.permute.xlu0 %3776 }
0x115b   : > { %v3930_v3 = vsel %vm1304_vm2, %v3914_v31, %v3777_v30  ;;  %v3864_v1 = vsel %vm3851_vm12, %v3847_v39, %v3587_v54 }
0x115c   : > { %4362 = vmatmul.msk.f32.gmra.mxu2 %vm3938_vm5, %v3930_v3 }
0x1162   : > { %v3541_v46 = vpop.permute.xlu1 %3540  ;;  %v3635_v53 = vpop.permute.xlu0 %3634 }
0x1163   : > { %v3881_v7 = vsel %vm3868_vm13, %v3864_v1, %v3635_v53  ;;  %v3848_v14 = vsel %vm3834_vm11, %v3831_v29, %v3541_v46 }
0x1164   : > { %v3898_v48 = vsel %vm3885_vm14, %v3881_v7, %v3683_v26 }
0x116a   : > { %v3731_v57 = vpop.permute.xlu1 %3730  ;;  %v3779_v56 = vpop.permute.xlu0 %3778 }
0x116b   : > { %v3915_v9 = vsel %vm3902_vm15, %v3898_v48, %v3731_v57 }
0x116c   : > { %v3931_v5 = vsel %vm1304_vm2, %v3915_v9, %v3779_v56 }
0x116d   : > { %4363 = vmatmul.msk.f32.gmra.mxu2 %vm3938_vm5, %v3931_v5 }
0x1170   : > { %v3781_v63 = vpop.permute.xlu2 %3780 }
0x1172   : > { %v3495_v60 = vpop.permute.xlu1 %3494  ;;  %v3589_v0 = vpop.permute.xlu0 %3588 }
0x1173   : > { %v3865_v45 = vsel %vm3851_vm12, %v3848_v14, %v3589_v0  ;;  %v3832_v49 = vsel %vm1859_vm3, %v3816_v40, %v3495_v60 }
0x1174   : > { %v3882_v43 = vsel %vm3868_vm13, %v3865_v45, %v3637_v50 }
0x1178   : > { %v3591_v4 = vpop.permute.xlu2 %3590 }
0x1180   : > { %v3545_v13 = vpop.permute.xlu2 %3544 }
0x1185   : > { %v3685_v59 = vpop.permute.xlu1 %3684  ;;  %v3543_v21 = vpop.permute.xlu0 %3542 }
0x1186   : > { %v3899_v2 = vsel %vm3885_vm14, %v3882_v43, %v3685_v59  ;;  %v3849_v32 = vsel %vm3834_vm11, %v3832_v49, %v3543_v21 }
0x1187   : > { %v3866_v41 = vsel %vm3851_vm12, %v3849_v32, %v3591_v4 }
0x1188   : > { %v3735_v18 = vpop.permute.xlu2 %3734 }
0x118d   : > { %v3449_v19 = vpop.permute.xlu1 %3448  ;;  %v3733_v62 = vpop.permute.xlu0 %3732 }
0x118e   : > { %v3916_v17 = vsel %vm3902_vm15, %v3899_v2, %v3733_v62  ;;  %v3817_v11 = vsel %vm940_vm0, %v6079_v27, %v3449_v19 }
0x118f   : > { %v3932_v44 = vsel %vm1304_vm2, %v3916_v17, %v3781_v63 }
0x1190   : > { %4364 = vmatmul.msk.f32.gmra.mxu2 %vm3938_vm5, %v3932_v44  ;;  %v3689_v36 = vpop.permute.xlu2 %3688 }
0x1195   : > { %v3639_v12 = vpop.permute.xlu1 %3638  ;;  %v3497_v34 = vpop.permute.xlu0 %3496 }
0x1196   : > { %v3883_v38 = vsel %vm3868_vm13, %v3866_v41, %v3639_v12  ;;  %v3833_v51 = vsel %vm1859_vm3, %v3817_v11, %v3497_v34 }
0x1197   : > { %v3850_v25 = vsel %vm3834_vm11, %v3833_v51, %v3545_v13 }
0x119d   : > { %v3783_v35 = vpop.permute.xlu1 %3782  ;;  %v3687_v52 = vpop.permute.xlu0 %3686 }
0x119e   : > { %v3900_v55 = vsel %vm3885_vm14, %v3883_v38, %v3687_v52 }
0x119f   : > { %v3917_v24 = vsel %vm3902_vm15, %v3900_v55, %v3735_v18  ;;  %v4028_v28 = vpop.f32.mrf.mxu2 }
0x11a0   : > { %v4029_v16 = vadd.f32 %v4575_v22, %v4028_v28  ;;  %v3933_v47 = vsel %vm1304_vm2, %v3917_v24, %v3783_v35 }
0x11a1   : > { %4365 = vmatmul.msk.f32.gmra.mxu2 %vm3938_vm5, %v3933_v47 }
0x11a2   : > { %4060 = vst.msk [vmem:[%s5697_s20 + $0x40] sm:$0xff] %vm940_vm0, %v4029_v16 }
0x11a5   : > { %v3593_v23 = vpop.permute.xlu1 %3592  ;;  %v3641_v6 = vpop.permute.xlu0 %3640 }
0x11a6   : > { %v3867_v61 = vsel %vm3851_vm12, %v3850_v25, %v3593_v23 }
0x11a7   : > { %v3884_v15 = vsel %vm3868_vm13, %v3867_v61, %v3641_v6 }
0x11a8   : > { %v3901_v37 = vsel %vm3885_vm14, %v3884_v15, %v3689_v36 }
0x11ad   : > { %v3737_v33 = vpop.permute.xlu1 %3736  ;;  %v3785_v27 = vpop.permute.xlu0 %3784 }
0x11ae   : > { %v3918_v8 = vsel %vm3902_vm15, %v3901_v37, %v3737_v33 }
0x11af   : > { %v3934_v31 = vsel %vm1304_vm2, %v3918_v8, %v3785_v27 }
0x11b0   : > { %v4031_v54 = vpop.f32.mrf.mxu2  ;;  %4366 = vmatmul.msk.f32.gmra.mxu2 %vm3938_vm5, %v3934_v31 }
0x11b1   : > { %v4032_v30 = vadd.f32 %v4575_v22, %v4031_v54 }
0x11b3   : > { %4061 = vst.msk [vmem:[%s5697_s20 + $0x48] sm:$0xff] %vm940_vm0, %v4032_v30 }
0x11c8   : > { %v4034_v3 = vpop.f32.mrf.mxu2 }
0x11c9   : > { %v4035_v58 = vadd.f32 %v4575_v22, %v4034_v3 }
0x11cb   : > { %4062 = vst.msk [vmem:[%s5697_s20 + $0x50] sm:$0xff] %vm940_vm0, %v4035_v58 }
0x11df   : > { %v4037_v20 = vpop.f32.mrf.mxu2 }
0x11e0   : > { %v4038_v46 = vadd.f32 %v4575_v22, %v4037_v20 }
0x11e2   : > { %4063 = vst.msk [vmem:[%s5697_s20 + $0x58] sm:$0xff] %vm940_vm0, %v4038_v46 }
0x11f0   : > { %v4040_v53 = vpop.f32.mrf.mxu2 }
0x11f1   : > { %v4041_v26 = vadd.f32 %v4575_v22, %v4040_v53 }
0x11f3   : > { %4064 = vst.msk [vmem:[%s5697_s20 + $0x60] sm:$0xff] %vm940_vm0, %v4041_v26 }
0x1213   : > { %v4043_v39 = vpop.f32.mrf.mxu2 }
0x1214   : > { %v4044_v1 = vadd.f32 %v4575_v22, %v4043_v39 }
0x1216   : > { %4065 = vst.msk [vmem:[%s5697_s20 + $0x68] sm:$0xff] %vm940_vm0, %v4044_v1 }
0x1224   : > { %v4046_v7 = vpop.f32.mrf.mxu2 }
0x1225   : > { %v4047_v57 = vadd.f32 %v4575_v22, %v4046_v7 }
0x1227   : > { %4066 = vst.msk [vmem:[%s5697_s20 + $0x70] sm:$0xff] %vm940_vm0, %v4047_v57 }
0x1233   : > { %v4049_v48 = vpop.f32.mrf.mxu2 }
0x1234   : > { %v4050_v56 = vadd.f32 %v4575_v22, %v4049_v48 }
0x1236   : > { %4067 = vst.msk [vmem:[%s5697_s20 + $0x78] sm:$0xff] %vm940_vm0, %v4050_v56 }
0x1237 PF: > { %s69_s7 = sadd.s32 1, %s4582_s7  }
0x1238   : > { %p66_p9 = scmp.ge.s32.totalorder %s69_s7, 4  }
0x123a   :  { %68 = sbr.rel (!%p66_p9) target bundleno = 60 (0x3c), region = 209 }

// kernel: transformer_v0_forward.2
= control target key start
LH: loop header
LB: loop body
LE: loop exit
PB: predicated region body
PF: predicated region fallthrough
CT: control target
= control target key end

     0   :  { %s4712_s24 = smov 0   ;;  %s9602_s0 = inlined_call_operand.vmem [shape: f32[6,8,8,3], index: 0, kind: input, shape index: {}]   ;;  %s9603_s1 = inlined_call_operand.vmem [shape: f32[27,8], index: 1, kind: input, shape index: {}]   ;;  %s9604_s2 = inlined_call_operand.vmem [shape: f32[1,8], index: 2, kind: input, shape index: {}]   ;;  %s9605_s3 = inlined_call_operand.vmem [shape: f32[1,72,8], index: 3, kind: input, shape index: {}]   ;;  %s9606_s4 = inlined_call_operand.vmem [shape: f32[1,1,8], index: 4, kind: input, shape index: {}]   ;;  %s9607_s5 = inlined_call_operand.vmem [shape: f32[1,72,8], index: 5, kind: input, shape index: {}]   ;;  %s9608_s6 = inlined_call_operand.vmem [shape: f32[1,1,8], index: 6, kind: input, shape index: {}]   ;;  %s9609_s7 = inlined_call_operand.vmem [shape: f32[6,64,8], index: 7, kind: output, shape index: {}]  }
   0x1 LB: > { %s4453_s25 = sadd.s32 4294967295, %s4654_s24   ;;  %p4457_p0 = scmp.ge.s32.totalorder %s4654_s24, 1  ;;  %s4654_s24 = sphi %s4712_s24, %s17_s24  }
   0x2   : > { %p239_p1 = scmp.lt.s32.totalorder %s4654_s24, 3 }
   0x4   : > { %p240_p2 = pnand %p4457_p0, %p239_p1 }
   0x6   : > { %243 = sbr.rel (%p240_p2) target bundleno = 2423 (0x977), region = 48 }
   0xb   : > { %vm287_vm0 = vcmask 23552   ;;  %vm289_vm1 = vcmask 17408   ;;  %v9610_v0 = vmov 0.0   ;;  %vm511_vm2 = vcmask 1046528   ;;  %s4657_s26 = smov 3   ;;  %s273_s27 = smul.u32 3, %s4453_s25 }
   0xc   : > { %309 = vst.msk [vmem:[#allocation2 + $0xa0] sm:$0xff] %vm287_vm0, %v9610_v0  ;;  %vm584_vm3 = vcmask 1045504   ;;  %s4658_s9 = smov 6   ;;  %s4659_s10 = smov 9   ;;  %vm1556_vm4 = vcmask 1042432   ;;  %vm1305_vm5 = vcmask 48128  }
   0xd   : > { %310 = vst.msk [vmem:[#allocation2 + $0xa8] sm:$0x3] %vm289_vm1, %v9610_v0  ;;  %p274_p3 = scmp.lt.s32.totalorder %s273_s27, 5  ;;  %s4660_s11 = smov 12   ;;  %vm1330_vm6 = vcmask 72704   ;;  %vm1355_vm7 = vcmask 97280  }
   0xe   : > { %288 = vst.msk [vmem:[#allocation2] sm:$0xff] %vm287_vm0, %v9610_v0  ;;  %s4661_s12 = smov 15   ;;  %s4662_s13 = smov 18   ;;  %vm1380_vm8 = vcmask 121856   ;;  %vm1405_vm9 = vcmask 146432   ;;  %vm1430_vm10 = vcmask 171008  }
   0xf   : > { %290 = vst.msk [vmem:[#allocation2 + $0x8] sm:$0x3] %vm289_vm1, %v9610_v0  ;;  %s10454_s27 = smov (!%p274_p3, %s273_s27), 5  ;;  %s4663_s14 = smov 21   ;;  %vm1483_vm11 = vcmask 220160   ;;  %vm1455_vm12 = vcmask 195584  }
  0x10   : > { %291 = vst.msk [vmem:[#allocation2 + $0x10] sm:$0xff] %vm287_vm0, %v9610_v0  ;;  %s4537_s28 = sshll.u32 %s10454_s27, 6  ;;  %s4664_s15 = smov 24   ;;  %vm1721_vm13 = vcmask 64512   ;;  %vm1723_vm14 = vcmask 58368  }
  0x11   : > { %292 = vst.msk [vmem:[#allocation2 + $0x18] sm:$0x3] %vm289_vm1, %v9610_v0  ;;  %s4856_s8 = scalar_lea.vmem %s9602_s0, %s4537_s28  ;;  %s4665_s29 = smov 8  }
  0x12   : > { %293 = vst.msk [vmem:[#allocation2 + $0x20] sm:$0xff] %vm287_vm0, %v9610_v0  ;;  %v352_v11 = vld [vmem:[%s4856_s8 + $0x18] sm:$0xff]  ;;  %v350_v12 = vld [vmem:[%s4856_s8 + $0x8] sm:$0xff]  ;;  %v349_v13 = vld [vmem:[%s4856_s8] sm:$0xff]  ;;  %s4666_s30 = smov 16  }
  0x13   : > { %v4734_v1 = vld [vmem:[#allocation2 + $0xa0] sm:$0xff]  ;;  %294 = vst.msk [vmem:[#allocation2 + $0x28] sm:$0x3] %vm289_vm1, %v9610_v0  ;;  %v351_v15 = vld [vmem:[%s4856_s8 + $0x10] sm:$0xff]  ;;  %v354_v16 = vld [vmem:[%s4856_s8 + $0x28] sm:$0xff] }
  0x14   : > { %v4738_v2 = vld [vmem:[#allocation2 + $0xa8] sm:$0x3]  ;;  %v536_v3 = vrot.slane %v4734_v1, 1  ;;  %295 = vst.msk [vmem:[#allocation2 + $0x30] sm:$0xff] %vm287_vm0, %v9610_v0  ;;  %v353_v14 = vld [vmem:[%s4856_s8 + $0x20] sm:$0xff]  ;;  %v359_v17 = vld [vmem:[%s4856_s8 + $0x50] sm:$0xff] }
  0x15   : > { %v537_v4 = vrot.slane %v4738_v2, 1  ;;  %296 = vst.msk [vmem:[#allocation2 + $0x38] sm:$0x3] %vm289_vm1, %v9610_v0  ;;  %v4746_v5 = vld [vmem:[#allocation2] sm:$0xff]  ;;  %v355_v18 = vld [vmem:[%s4856_s8 + $0x30] sm:$0xff]  ;;  %v362_v20 = vld [vmem:[%s4856_s8 + $0x68] sm:$0xff] }
  0x16   : > { %297 = vst.msk [vmem:[#allocation2 + $0x40] sm:$0xff] %vm287_vm0, %v9610_v0  ;;  %v4750_v6 = vld [vmem:[#allocation2 + $0x8] sm:$0x3]  ;;  %v512_v7 = vrot.slane %v4746_v5, 1  ;;  %v357_v19 = vld [vmem:[%s4856_s8 + $0x40] sm:$0xff]  ;;  %v360_v22 = vld [vmem:[%s4856_s8 + $0x58] sm:$0xff] }
  0x17   : > { %v538_v8 = vsel %vm511_vm2, %v536_v3, %v537_v4  ;;  %298 = vst.msk [vmem:[#allocation2 + $0x48] sm:$0x3] %vm289_vm1, %v9610_v0  ;;  %v513_v9 = vrot.slane %v4750_v6, 1  ;;  %v358_v21 = vld [vmem:[%s4856_s8 + $0x48] sm:$0xff]  ;;  %v365_v25 = vld [vmem:[%s4856_s8 + $0x80] sm:$0xff]  ;;  %v363_v43 = vld [vmem:[%s4856_s8 + $0x70] sm:$0xff] }
  0x18   : > { %721 = vrot.lane.b32.xlu2 %v538_v8, %s4657_s26  ;;  %299 = vst.msk [vmem:[#allocation2 + $0x50] sm:$0xff] %vm287_vm0, %v9610_v0  ;;  %v361_v30 = vld [vmem:[%s4856_s8 + $0x60] sm:$0xff]  ;;  %v368_v53 = vld [vmem:[%s4856_s8 + $0x98] sm:$0xff]  ;;  %v366_v63 = vld [vmem:[%s4856_s8 + $0x88] sm:$0xff] }
  0x19   : > { %300 = vst.msk [vmem:[#allocation2 + $0x58] sm:$0x3] %vm289_vm1, %v9610_v0  ;;  %v514_v10 = vsel %vm511_vm2, %v512_v7, %v513_v9  ;;  %v371_v9 = vld [vmem:[%s4856_s8 + $0xb0] sm:$0xff] }
  0x1a   : > { %301 = vst.msk [vmem:[#allocation2 + $0x60] sm:$0xff] %vm287_vm0, %v9610_v0  ;;  %705 = vrot.lane.b32.xlu0 %v514_v10, %s4657_s26 }
  0x1b   : > { %302 = vst.msk [vmem:[#allocation2 + $0x68] sm:$0x3] %vm289_vm1, %v9610_v0 }
  0x1c   : > { %303 = vst.msk [vmem:[#allocation2 + $0x70] sm:$0xff] %vm287_vm0, %v9610_v0 }
  0x1d   : > { %304 = vst.msk [vmem:[#allocation2 + $0x78] sm:$0x3] %vm289_vm1, %v9610_v0 }
  0x1e   : > { %305 = vst.msk [vmem:[#allocation2 + $0x80] sm:$0xff] %vm287_vm0, %v9610_v0 }
  0x1f   : > { %306 = vst.msk [vmem:[#allocation2 + $0x88] sm:$0x3] %vm289_vm1, %v9610_v0 }
  0x20   : > { %307 = vst.msk [vmem:[#allocation2 + $0x90] sm:$0xff] %vm287_vm0, %v9610_v0 }
  0x21   : > { %308 = vst.msk [vmem:[#allocation2 + $0x98] sm:$0x3] %vm289_vm1, %v9610_v0 }
  0x22   : > { %311 = vst.msk [vmem:[#allocation2 + $0xb0] sm:$0xff] %vm287_vm0, %v9610_v0 }
  0x23   : > { %312 = vst.msk [vmem:[#allocation2 + $0xb8] sm:$0x3] %vm289_vm1, %v9610_v0 }
  0x24   : > { %313 = vst.msk [vmem:[#allocation2 + $0xc0] sm:$0xff] %vm287_vm0, %v9610_v0 }
  0x25   : > { %314 = vst.msk [vmem:[#allocation2 + $0xc8] sm:$0x3] %vm289_vm1, %v9610_v0 }
  0x26   : > { %315 = vst.msk [vmem:[#allocation2 + $0xd0] sm:$0xff] %vm287_vm0, %v9610_v0 }
  0x27   : > { %316 = vst.msk [vmem:[#allocation2 + $0xd8] sm:$0x3] %vm289_vm1, %v9610_v0 }
  0x28   : > { %317 = vst.msk [vmem:[#allocation2 + $0xe0] sm:$0xff] %vm287_vm0, %v9610_v0 }
  0x29   : > { %318 = vst.msk [vmem:[#allocation2 + $0xe8] sm:$0x3] %vm289_vm1, %v9610_v0 }
  0x2a   : > { %319 = vst.msk [vmem:[#allocation2 + $0xf0] sm:$0xff] %vm287_vm0, %v9610_v0 }
  0x2b   : > { %320 = vst.msk [vmem:[#allocation2 + $0xf8] sm:$0x3] %vm289_vm1, %v9610_v0 }
  0x2c   : > { %321 = vst.msk [vmem:[#allocation2 + $0x100] sm:$0xff] %vm287_vm0, %v9610_v0 }
  0x2d   : > { %322 = vst.msk [vmem:[#allocation2 + $0x108] sm:$0x3] %vm289_vm1, %v9610_v0 }
  0x2e   : > { %323 = vst.msk [vmem:[#allocation2 + $0x110] sm:$0xff] %vm287_vm0, %v9610_v0 }
  0x2f   : > { %324 = vst.msk [vmem:[#allocation2 + $0x118] sm:$0x3] %vm289_vm1, %v9610_v0 }
  0x30   : > { %325 = vst.msk [vmem:[#allocation2 + $0x120] sm:$0xff] %vm287_vm0, %v9610_v0 }
  0x31   : > { %326 = vst.msk [vmem:[#allocation2 + $0x128] sm:$0x3] %vm289_vm1, %v9610_v0 }
  0x32   : > { %327 = vst.msk [vmem:[#allocation2 + $0x130] sm:$0xff] %vm287_vm0, %v9610_v0 }
  0x33   : > { %328 = vst.msk [vmem:[#allocation2 + $0x138] sm:$0x3] %vm289_vm1, %v9610_v0 }
  0x34   : > { %329 = vst.msk [vmem:[#allocation2 + $0x140] sm:$0xff] %vm287_vm0, %v9610_v0 }
  0x35   : > { %330 = vst.msk [vmem:[#allocation2 + $0x148] sm:$0x3] %vm289_vm1, %v9610_v0 }
  0x36   : > { %331 = vst.msk [vmem:[#allocation2 + $0x150] sm:$0xff] %vm287_vm0, %v9610_v0 }
  0x37   : > { %332 = vst.msk [vmem:[#allocation2 + $0x158] sm:$0x3] %vm289_vm1, %v9610_v0 }
  0x38   : > { %333 = vst.msk [vmem:[#allocation2 + $0x160] sm:$0xff] %vm287_vm0, %v9610_v0 }
  0x39   : > { %334 = vst.msk [vmem:[#allocation2 + $0x168] sm:$0x3] %vm289_vm1, %v9610_v0 }
  0x3a   : > { %335 = vst.msk [vmem:[#allocation2 + $0x170] sm:$0xff] %vm287_vm0, %v9610_v0 }
  0x3b   : > { %336 = vst.msk [vmem:[#allocation2 + $0x178] sm:$0x3] %vm289_vm1, %v9610_v0 }
  0x3c   : > { %337 = vst.msk [vmem:[#allocation2 + $0x180] sm:$0xff] %vm287_vm0, %v9610_v0 }
  0x3d   : > { %338 = vst.msk [vmem:[#allocation2 + $0x188] sm:$0x3] %vm289_vm1, %v9610_v0 }
  0x3e   : > { %339 = vst.msk [vmem:[#allocation2 + $0x190] sm:$0xff] %vm287_vm0, %v9610_v0 }
  0x3f   : > { %340 = vst.msk [vmem:[#allocation2 + $0x198] sm:$0x3] %vm289_vm1, %v9610_v0 }
  0x40   : > { %341 = vst.msk [vmem:[#allocation2 + $0x1a0] sm:$0xff] %vm287_vm0, %v9610_v0 }
  0x41   : > { %342 = vst.msk [vmem:[#allocation2 + $0x1a8] sm:$0x3] %vm289_vm1, %v9610_v0 }
  0x42   : > { %343 = vst.msk [vmem:[#allocation2 + $0x1b0] sm:$0xff] %vm287_vm0, %v9610_v0 }
  0x43   : > { %344 = vst.msk [vmem:[#allocation2 + $0x1b8] sm:$0x3] %vm289_vm1, %v9610_v0 }
  0x44   : > { %345 = vst.msk [vmem:[#allocation2 + $0x1c0] sm:$0xff] %vm287_vm0, %v9610_v0 }
  0x45   : > { %346 = vst.msk [vmem:[#allocation2 + $0x1c8] sm:$0x3] %vm289_vm1, %v9610_v0 }
  0x46   : > { %347 = vst.msk [vmem:[#allocation2 + $0x1d0] sm:$0xff] %vm287_vm0, %v9610_v0 }
  0x47   : > { %348 = vst.msk [vmem:[#allocation2 + $0x1d8] sm:$0x3] %vm289_vm1, %v9610_v0 }
  0x48   : > { %377 = vst.msk [vmem:[#allocation2 + $0x41] sm:$0xff] %vm287_vm0, %v352_v11 }
  0x49   : > { %375 = vst.msk [vmem:[#allocation2 + $0x21] sm:$0xff] %vm287_vm0, %v350_v12  ;;  %v367_v12 = vld [vmem:[%s4856_s8 + $0x90] sm:$0xff] }
  0x4a   : > { %374 = vst.msk [vmem:[#allocation2 + $0x11] sm:$0xff] %vm287_vm0, %v349_v13  ;;  %v369_v13 = vld [vmem:[%s4856_s8 + $0xa0] sm:$0xff] }
  0x4b   : > { %378 = vst.msk [vmem:[#allocation2 + $0x51] sm:$0xff] %vm287_vm0, %v353_v14 }
  0x4c   : > { %376 = vst.msk [vmem:[#allocation2 + $0x31] sm:$0xff] %vm287_vm0, %v351_v15 }
  0x4d   : > { %379 = vst.msk [vmem:[#allocation2 + $0x61] sm:$0xff] %vm287_vm0, %v354_v16 }
  0x4e   : > { %384 = vst.msk [vmem:[#allocation2 + $0xd1] sm:$0xff] %vm287_vm0, %v359_v17 }
  0x4f   : > { %v4887_v23 = vld [vmem:[#allocation2 + $0x40] sm:$0xff]  ;;  %v4889_v24 = vld [vmem:[#allocation2 + $0x48] sm:$0x3]  ;;  %380 = vst.msk [vmem:[#allocation2 + $0x71] sm:$0xff] %vm287_vm0, %v355_v18 }
  0x50   : > { %v524_v26 = vrot.slane %v4887_v23, 1  ;;  %v525_v27 = vrot.slane %v4889_v24, 1  ;;  %v4895_v28 = vld [vmem:[#allocation2 + $0x20] sm:$0xff]  ;;  %v4897_v29 = vld [vmem:[#allocation2 + $0x28] sm:$0x3]  ;;  %382 = vst.msk [vmem:[#allocation2 + $0xb1] sm:$0xff] %vm287_vm0, %v357_v19 }
  0x51   : > { %v518_v31 = vrot.slane %v4895_v28, 1  ;;  %v519_v32 = vrot.slane %v4897_v29, 1  ;;  %v4903_v33 = vld [vmem:[#allocation2 + $0x10] sm:$0xff]  ;;  %v4905_v34 = vld [vmem:[#allocation2 + $0x18] sm:$0x3]  ;;  %387 = vst.msk [vmem:[#allocation2 + $0x101] sm:$0xff] %vm287_vm0, %v362_v20 }
  0x52   : > { %v4909_v35 = vsel %vm511_vm2, %v524_v26, %v525_v27  ;;  %v515_v36 = vrot.slane %v4903_v33, 1  ;;  %v516_v37 = vrot.slane %v4905_v34, 1  ;;  %v4913_v38 = vld [vmem:[#allocation2 + $0x50] sm:$0xff]  ;;  %v4915_v39 = vld [vmem:[#allocation2 + $0x58] sm:$0x3]  ;;  %383 = vst.msk [vmem:[#allocation2 + $0xc1] sm:$0xff] %vm287_vm0, %v358_v21 }
  0x53   : > { %713 = vrot.lane.b32.xlu2 %v4909_v35, %s4657_s26  ;;  %v4921_v40 = vsel %vm511_vm2, %v518_v31, %v519_v32  ;;  %v4923_v41 = vld [vmem:[#allocation2 + $0x30] sm:$0xff]  ;;  %v4925_v42 = vld [vmem:[#allocation2 + $0x38] sm:$0x3]  ;;  %385 = vst.msk [vmem:[#allocation2 + $0xe1] sm:$0xff] %vm287_vm0, %v360_v22  ;;  %v527_v45 = vrot.slane %v4913_v38, 1  ;;  %v528_v46 = vrot.slane %v4915_v39, 1 }
  0x54   : > { %709 = vrot.lane.b32.xlu1 %v4921_v40, %s4657_s26  ;;  %v4932_v44 = vsel %vm511_vm2, %v515_v36, %v516_v37  ;;  %v4936_v47 = vld [vmem:[#allocation2 + $0x60] sm:$0xff]  ;;  %v4938_v48 = vld [vmem:[#allocation2 + $0x68] sm:$0x3]  ;;  %390 = vst.msk [vmem:[#allocation2 + $0x151] sm:$0xff] %vm287_vm0, %v365_v25  ;;  %v521_v49 = vrot.slane %v4923_v41, 1  ;;  %v522_v50 = vrot.slane %v4925_v42, 1 }
  0x55   : > { %707 = vrot.lane.b32.xlu0 %v4932_v44, %s4657_s26  ;;  %386 = vst.msk [vmem:[#allocation2 + $0xf1] sm:$0xff] %vm287_vm0, %v361_v30  ;;  %v530_v51 = vrot.slane %v4936_v47, 1  ;;  %v531_v52 = vrot.slane %v4938_v48, 1  ;;  %v4951_v54 = vsel %vm511_vm2, %v527_v45, %v528_v46  ;;  %v4957_v56 = vld [vmem:[#allocation2 + $0xd0] sm:$0xff]  ;;  %v4959_v57 = vld [vmem:[#allocation2 + $0xd8] sm:$0x3] }
  0x56   : > { %388 = vst.msk [vmem:[#allocation2 + $0x111] sm:$0xff] %vm287_vm0, %v363_v43  ;;  %v4955_v55 = vsel %vm511_vm2, %v521_v49, %v522_v50  ;;  %v4964_v59 = vld [vmem:[#allocation2 + $0x70] sm:$0xff]  ;;  %v4966_v60 = vld [vmem:[#allocation2 + $0x78] sm:$0x3]  ;;  %v545_v3 = vrot.slane %v4957_v56, 1  ;;  %v546_v4 = vrot.slane %v4959_v57, 1 }
  0x57   : > { %9746 = vst [vmem:[#allocation4_spill] sm:$0xff] %v4951_v54  ;;  %v4962_v58 = vsel %vm511_vm2, %v530_v51, %v531_v52  ;;  %v4970_v61 = vld [vmem:[#allocation2 + $0xb0] sm:$0xff]  ;;  %v4972_v62 = vld [vmem:[#allocation2 + $0xb8] sm:$0x3]  ;;  %v533_v7 = vrot.slane %v4964_v59, 1  ;;  %v534_v8 = vrot.slane %v4966_v60, 1 }
  0x58   : > { %393 = vst.msk [vmem:[#allocation2 + $0x181] sm:$0xff] %vm287_vm0, %v368_v53  ;;  %v539_v10 = vrot.slane %v4970_v61, 1  ;;  %v540_v11 = vrot.slane %v4972_v62, 1  ;;  %v4992_v14 = vsel %vm511_vm2, %v545_v3, %v546_v4  ;;  %v4998_v16 = vld [vmem:[#allocation2 + $0x100] sm:$0xff]  ;;  %v5000_v17 = vld [vmem:[#allocation2 + $0x108] sm:$0x3] }
  0x59   : > { %391 = vst.msk [vmem:[#allocation2 + $0x161] sm:$0xff] %vm287_vm0, %v366_v63  ;;  %v4996_v15 = vsel %vm511_vm2, %v533_v7, %v534_v8  ;;  %v370_v18 = vld [vmem:[%s4856_s8 + $0xa8] sm:$0xff]  ;;  %v5006_v20 = vld [vmem:[#allocation2 + $0xc0] sm:$0xff]  ;;  %v554_v26 = vrot.slane %v4998_v16, 1  ;;  %v555_v27 = vrot.slane %v5000_v17, 1 }
  0x5a   : > { %396 = vst.msk [vmem:[#allocation2 + $0x1b1] sm:$0xff] %vm287_vm0, %v371_v9  ;;  %v5004_v19 = vsel %vm511_vm2, %v539_v10, %v540_v11  ;;  %v5008_v21 = vld [vmem:[#allocation2 + $0xc8] sm:$0x3]  ;;  %v5013_v22 = vld [vmem:[#allocation2 + $0xe0] sm:$0xff]  ;;  %v542_v30 = vrot.slane %v5006_v20, 1 }
  0x5b   : > { %715 = vrot.lane.b32.xlu2 %v4951_v54, %s4657_s26  ;;  %392 = vst.msk [vmem:[#allocation2 + $0x171] sm:$0xff] %vm287_vm0, %v367_v12  ;;  %v5015_v25 = vld [vmem:[#allocation2 + $0xe8] sm:$0x3]  ;;  %v543_v31 = vrot.slane %v5008_v21, 1  ;;  %v548_v32 = vrot.slane %v5013_v22, 1  ;;  %v5028_v37 = vsel %vm511_vm2, %v554_v26, %v555_v27  ;;  %v5033_v45 = vld [vmem:[#allocation2 + $0x150] sm:$0xff] }
  0x5c   : > { %711 = vrot.lane.b32.xlu1 %v4955_v55, %s4657_s26  ;;  %9747 = vst [vmem:[#allocation5_spill] sm:$0xff] %v4992_v14  ;;  %v549_v36 = vrot.slane %v5015_v25, 1  ;;  %v5035_v46 = vld [vmem:[#allocation2 + $0x158] sm:$0x3]  ;;  %v5040_v50 = vld [vmem:[#allocation2 + $0xf0] sm:$0xff]  ;;  %v563_v63 = vrot.slane %v5033_v45, 1 }
  0x5d   : > { %717 = vrot.lane.b32.xlu0 %v4962_v58, %s4657_s26  ;;  %394 = vst.msk [vmem:[#allocation2 + $0x191] sm:$0xff] %vm287_vm0, %v369_v13  ;;  %v5031_v43 = vsel %vm511_vm2, %v542_v30, %v543_v31  ;;  %v5042_v51 = vld [vmem:[#allocation2 + $0xf8] sm:$0x3]  ;;  %v5046_v52 = vld [vmem:[#allocation2 + $0x110] sm:$0xff]  ;;  %v564_v3 = vrot.slane %v5035_v46, 1  ;;  %v551_v4 = vrot.slane %v5040_v50, 1 }
  0x5e   : > { %9748 = vst [vmem:[#allocation6_spill] sm:$0xff] %v4996_v15  ;;  %v5038_v49 = vsel %vm511_vm2, %v548_v32, %v549_v36  ;;  %v5048_v53 = vld [vmem:[#allocation2 + $0x118] sm:$0x3]  ;;  %v552_v7 = vrot.slane %v5042_v51, 1  ;;  %v557_v8 = vrot.slane %v5046_v52, 1  ;;  %v5073_v26 = vld [vmem:[#allocation2 + $0x140] sm:$0xff] }
  0x5f   : > { %395 = vst.msk [vmem:[#allocation2 + $0x1a1] sm:$0xff] %vm287_vm0, %v370_v18  ;;  %v558_v9 = vrot.slane %v5048_v53, 1  ;;  %v5061_v10 = vsel %vm511_vm2, %v563_v63, %v564_v3  ;;  %v5066_v12 = vld [vmem:[#allocation2 + $0x180] sm:$0xff]  ;;  %v5068_v13 = vld [vmem:[#allocation2 + $0x188] sm:$0x3]  ;;  %v560_v63 = vrot.slane %v5073_v26, 1 }
  0x60   : > { %9749 = vst [vmem:[#allocation7_spill] sm:$0xff] %v5028_v37  ;;  %v5064_v11 = vsel %vm511_vm2, %v551_v4, %v552_v7  ;;  %v5075_v27 = vld [vmem:[#allocation2 + $0x148] sm:$0x3]  ;;  %v5079_v30 = vld [vmem:[#allocation2 + $0x160] sm:$0xff]  ;;  %v572_v32 = vrot.slane %v5066_v12, 1  ;;  %v573_v36 = vrot.slane %v5068_v13, 1 }
  0x61   : > { %9750 = vst [vmem:[#allocation8_spill] sm:$0xff] %v5031_v43  ;;  %v5071_v18 = vsel %vm511_vm2, %v557_v8, %v558_v9  ;;  %v5081_v31 = vld [vmem:[#allocation2 + $0x168] sm:$0x3]  ;;  %v561_v3 = vrot.slane %v5075_v27, 1  ;;  %v566_v4 = vrot.slane %v5079_v30, 1  ;;  %v5097_v0 = vld [vmem:[#allocation2 + $0x1b0] sm:$0xff] }
  0x62   : > { %9751 = vst [vmem:[#allocation9_spill] sm:$0xff] %v5038_v49  ;;  %v567_v7 = vrot.slane %v5081_v31, 1  ;;  %v5094_v8 = vsel %vm511_vm2, %v572_v32, %v573_v36  ;;  %v581_v36 = vrot.slane %v5097_v0, 1  ;;  %v591_v54 = vrot.slane %v4895_v28, 2 }
  0x63   : > { %727 = vrot.lane.b32.xlu2 %v4992_v14, %s4657_s26  ;;  %9752 = vst [vmem:[#allocation10_spill] sm:$0xff] %v5061_v10  ;;  %v562_v9 = vsel %vm511_vm2, %v560_v63, %v561_v3  ;;  %v5106_v14 = vld [vmem:[#allocation2 + $0x178] sm:$0x3] }
  0x64   : > { %719 = vrot.lane.b32.xlu1 %v4996_v15, %s4657_s26  ;;  %9753 = vst [vmem:[#allocation11_spill] sm:$0xff] %v5064_v11  ;;  %v5112_v32 = vld [vmem:[#allocation2 + $0x198] sm:$0x3] }
  0x65   : > { %723 = vrot.lane.b32.xlu0 %v5004_v19, %s4657_s26  ;;  %9754 = vst [vmem:[#allocation12_spill] sm:$0xff] %v5071_v18 }
  0x66   : > { %9755 = vst [vmem:[#allocation13_spill] sm:$0xff] %v5094_v8  ;;  %v5132_v15 = vld [vmem:[#allocation2 + $0x1a0] sm:$0xff] }
  0x6b   : > { %733 = vrot.lane.b32.xlu2 %v5028_v37, %s4657_s26  ;;  %v5102_v37 = vsel %vm511_vm2, %v566_v4, %v567_v7  ;;  %v570_v4 = vrot.slane %v5106_v14, 1 }
  0x6c   : > { %725 = vrot.lane.b32.xlu1 %v5031_v43, %s4657_s26  ;;  %9756 = vst [vmem:[#allocation14_spill] sm:$0xff] %v5102_v37 }
  0x6d   : > { %729 = vrot.lane.b32.xlu0 %v5038_v49, %s4657_s26 }
  0x73   : > { %739 = vrot.lane.b32.xlu2 %v5061_v10, %s4657_s26  ;;  %v5099_v10 = vld [vmem:[#allocation2 + $0x1b8] sm:$0x3] }
  0x74   : > { %731 = vrot.lane.b32.xlu1 %v5064_v11, %s4657_s26  ;;  %v5104_v11 = vld [vmem:[#allocation2 + $0x170] sm:$0xff]  ;;  %v582_v63 = vrot.slane %v5099_v10, 1 }
  0x75   : > { %735 = vrot.lane.b32.xlu0 %v5071_v18, %s4657_s26  ;;  %v5110_v18 = vld [vmem:[#allocation2 + $0x190] sm:$0xff]  ;;  %v569_v3 = vrot.slane %v5104_v11, 1 }
  0x76   : > { %v575_v7 = vrot.slane %v5110_v18, 1  ;;  %v5124_v43 = vsel %vm511_vm2, %v581_v36, %v582_v63  ;;  %v592_v36 = vrot.slane %v4897_v29, 2 }
  0x77   : > { %9757 = vst [vmem:[#allocation15_spill] sm:$0xff] %v5124_v43 }
  0x7b   : > { %745 = vrot.lane.b32.xlu2 %v5094_v8, %s4657_s26  ;;  %v576_v8 = vrot.slane %v5112_v32, 1 }
  0x7c   : > { %737 = vrot.lane.b32.xlu1 %v562_v9, %s4657_s26  ;;  %v5127_v9 = vsel %vm511_vm2, %v569_v3, %v570_v4  ;;  %v585_v3 = vrot.slane %v4746_v5, 2  ;;  %v586_v4 = vrot.slane %v4750_v6, 2  ;;  %v601_v5 = vrot.slane %v4915_v39, 2 }
  0x7d   : > { %741 = vrot.lane.b32.xlu0 %v5102_v37, %s4657_s26  ;;  %9758 = vst [vmem:[#allocation16_spill] sm:$0xff] %v5127_v9  ;;  %v5130_v49 = vsel %vm511_vm2, %v575_v7, %v576_v8  ;;  %v5134_v37 = vld [vmem:[#allocation2 + $0x1a8] sm:$0x3]  ;;  %v578_v8 = vrot.slane %v5132_v15, 1  ;;  %v5149_v7 = vsel %vm584_vm3, %v591_v54, %v592_v36  ;;  %v588_v6 = vrot.slane %v4903_v33, 2 }
  0x7e   : > { %9759 = vst [vmem:[#allocation17_spill] sm:$0xff] %v5130_v49  ;;  %v579_v63 = vrot.slane %v5134_v37, 1  ;;  %v587_v29 = vsel %vm584_vm3, %v585_v3, %v586_v4  ;;  %v589_v54 = vrot.slane %v4905_v34, 2  ;;  %v594_v36 = vrot.slane %v4923_v41, 2 }
  0x7f   : > { %v609_v34 = vrot.slane %v4734_v1, 2  ;;  %v610_v39 = vrot.slane %v4738_v2, 2  ;;  %v618_v2 = vrot.slane %v4957_v56, 2 }
  0x80   : > { %v5170_v3 = vsel %vm584_vm3, %v588_v6, %v589_v54 }
  0x81   : > { %v611_v6 = vsel %vm584_vm3, %v609_v34, %v610_v39  ;;  %v613_v34 = vrot.slane %v4972_v62, 2  ;;  %v628_v62 = vrot.slane %v5000_v17, 2  ;;  %v636_v17 = vrot.slane %v5033_v45, 2 }
  0x83   : > { %751 = vrot.lane.b32.xlu2 %v5124_v43, %s4657_s26  ;;  %v5152_v43 = vsel %vm511_vm2, %v578_v8, %v579_v63  ;;  %v595_v8 = vrot.slane %v4925_v42, 2  ;;  %v597_v42 = vrot.slane %v4887_v23, 2 }
  0x84   : > { %743 = vrot.lane.b32.xlu1 %v5127_v9, %s4657_s26  ;;  %v600_v9 = vrot.slane %v4913_v38, 2 }
  0x85   : > { %747 = vrot.lane.b32.xlu0 %v5130_v49, %s4657_s26  ;;  %v5173_v4 = vsel %vm584_vm3, %v594_v36, %v595_v8  ;;  %v607_v36 = vrot.slane %v4966_v60, 2  ;;  %v612_v8 = vrot.slane %v4970_v61, 2  ;;  %v627_v60 = vrot.slane %v4998_v16, 2 }
  0x86   : > { %v5167_v63 = vsel %vm584_vm3, %v600_v9, %v601_v5  ;;  %v598_v9 = vrot.slane %v4889_v24, 2  ;;  %v604_v5 = vrot.slane %v4938_v48, 2  ;;  %v619_v24 = vrot.slane %v4959_v57, 2  ;;  %v5216_v57 = vpop.permute.xlu2 %721 }
  0x87   : > { %v606_v48 = vrot.slane %v4964_v59, 2  ;;  %9760 = vst [vmem:[#allocation18_spill] sm:$0xff] %v5216_v57 }
  0x88   : > { %v5189_v54 = vsel %vm584_vm3, %v597_v42, %v598_v9  ;;  %v5206_v39 = vsel %vm584_vm3, %v618_v2, %v619_v24  ;;  %v5212_v9 = vsel %vm584_vm3, %v612_v8, %v613_v34  ;;  %v622_v2 = vrot.slane %v5015_v25, 2 }
  0x89   : > { %v5209_v42 = vsel %vm584_vm3, %v606_v48, %v607_v36  ;;  %v5229_v24 = vsel %vm584_vm3, %v627_v60, %v628_v62  ;;  %v624_v8 = vrot.slane %v5040_v50, 2  ;;  %v625_v34 = vrot.slane %v5042_v51, 2 }
  0x8a   : > { %v630_v60 = vrot.slane %v5046_v52, 2  ;;  %v631_v62 = vrot.slane %v5048_v53, 2  ;;  %v645_v51 = vrot.slane %v5066_v12, 2  ;;  %v646_v53 = vrot.slane %v5068_v13, 2 }
  0x8b   : > { %781 = vrot.lane.b32.xlu2 %v5149_v7, %s4658_s9 }
  0x8c   : > { %749 = vrot.lane.b32.xlu1 %v5152_v43, %s4657_s26 }
  0x8d   : > { %777 = vrot.lane.b32.xlu0 %v587_v29, %s4658_s9  ;;  %v603_v29 = vrot.slane %v4936_v47, 2 }
  0x8f   : > { %v5192_v1 = vsel %vm584_vm3, %v603_v29, %v604_v5  ;;  %v615_v29 = vrot.slane %v5006_v20, 2  ;;  %v616_v5 = vrot.slane %v5008_v21, 2  ;;  %v637_v21 = vrot.slane %v5035_v46, 2 }
  0x90   : > { %v5258_v46 = vsel %vm584_vm3, %v630_v60, %v631_v62  ;;  %v356_v62 = vld [vmem:[%s4856_s8 + $0x38] sm:$0xff] }
  0x91   : > { %v5232_v48 = vsel %vm584_vm3, %v615_v29, %v616_v5  ;;  %v5252_v29 = vsel %vm584_vm3, %v636_v17, %v637_v21  ;;  %v5255_v5 = vsel %vm584_vm3, %v624_v8, %v625_v34  ;;  %v634_v17 = vrot.slane %v5075_v27, 2  ;;  %381 = vst.msk [vmem:[#allocation2 + $0x81] sm:$0xff] %vm287_vm0, %v356_v62 }
  0x92   : > { %v639_v21 = vrot.slane %v5079_v30, 2  ;;  %v640_v8 = vrot.slane %v5081_v31, 2  ;;  %v5275_v34 = vsel %vm584_vm3, %v645_v51, %v646_v53  ;;  %v655_v27 = vrot.slane %v5099_v10, 2  ;;  %v5289_v31 = vpop.permute.xlu0 %705 }
  0x93   : > { %787 = vrot.lane.b32.xlu2 %v5167_v63, %s4658_s9  ;;  %9763 = vst [vmem:[#allocation21_spill] sm:$0xff] %v5289_v31  ;;  %v642_v53 = vrot.slane %v5104_v11, 2 }
  0x94   : > { %779 = vrot.lane.b32.xlu1 %v5170_v3, %s4658_s9  ;;  %v5279_v13 = vsel %vm584_vm3, %v639_v21, %v640_v8  ;;  %v649_v21 = vrot.slane %v5112_v32, 2  ;;  %v651_v32 = vrot.slane %v5132_v15, 2 }
  0x95   : > { %783 = vrot.lane.b32.xlu0 %v5173_v4, %s4658_s9 }
  0x98   : > { %v5364_v57 = vld [vmem:[#allocation2 + $0x80] sm:$0xff] }
  0x9b   : > { %793 = vrot.lane.b32.xlu2 %v611_v6, %s4658_s9  ;;  %v621_v6 = vrot.slane %v5013_v22, 2 }
  0x9c   : > { %785 = vrot.lane.b32.xlu1 %v5189_v54, %s4658_s9 }
  0x9d   : > { %789 = vrot.lane.b32.xlu0 %v5192_v1, %s4658_s9  ;;  %v5235_v36 = vsel %vm584_vm3, %v621_v6, %v622_v2  ;;  %v633_v2 = vrot.slane %v5073_v26, 2  ;;  %v654_v26 = vrot.slane %v5097_v0, 2 }
  0x9f   : > { %v635_v60 = vsel %vm584_vm3, %v633_v2, %v634_v17  ;;  %v643_v2 = vrot.slane %v5106_v14, 2  ;;  %v648_v17 = vrot.slane %v5110_v18, 2  ;;  %v5299_v10 = vsel %vm584_vm3, %v654_v26, %v655_v27 }
  0xa0   : > { %v652_v26 = vrot.slane %v5134_v37, 2 }
  0xa1   : > { %v5302_v8 = vsel %vm584_vm3, %v642_v53, %v643_v2  ;;  %v364_v2 = vld [vmem:[%s4856_s8 + $0x78] sm:$0xff] }
  0xa2   : > { %v5322_v53 = vsel %vm584_vm3, %v651_v32, %v652_v26  ;;  %389 = vst.msk [vmem:[#allocation2 + $0x121] sm:$0xff] %vm287_vm0, %v364_v2  ;;  %v372_v2 = vld [vmem:[%s4856_s8 + $0xb8] sm:$0xff]  ;;  %s4667_s8 = smov 32  }
  0xa3   : > { %799 = vrot.lane.b32.xlu2 %v5206_v39, %s4658_s9  ;;  %397 = vst.msk [vmem:[#allocation2 + $0x1c1] sm:$0xff] %vm287_vm0, %v372_v2 }
  0xa4   : > { %791 = vrot.lane.b32.xlu1 %v5209_v42, %s4658_s9 }
  0xa5   : > { %795 = vrot.lane.b32.xlu0 %v5212_v9, %s4658_s9 }
  0xab   : > { %805 = vrot.lane.b32.xlu2 %v5229_v24, %s4658_s9 }
  0xac   : > { %797 = vrot.lane.b32.xlu1 %v5232_v48, %s4658_s9 }
  0xad   : > { %801 = vrot.lane.b32.xlu0 %v5235_v36, %s4658_s9  ;;  %v5245_v25 = vpop.permute.xlu2 %713 }
  0xae   : > { %9761 = vst [vmem:[#allocation19_spill] sm:$0xff] %v5245_v25 }
  0xb3   : > { %811 = vrot.lane.b32.xlu2 %v5252_v29, %s4658_s9 }
  0xb4   : > { %803 = vrot.lane.b32.xlu1 %v5255_v5, %s4658_s9 }
  0xb5   : > { %807 = vrot.lane.b32.xlu0 %v5258_v46, %s4658_s9  ;;  %v5268_v6 = vpop.permute.xlu2 %715 }
  0xb6   : > { %9762 = vst [vmem:[#allocation20_spill] sm:$0xff] %v5268_v6 }
  0xbb   : > { %817 = vrot.lane.b32.xlu2 %v5275_v34, %s4658_s9 }
  0xbc   : > { %809 = vrot.lane.b32.xlu1 %v635_v60, %s4658_s9  ;;  %v5305_v60 = vsel %vm584_vm3, %v648_v17, %v649_v21 }
  0xbd   : > { %813 = vrot.lane.b32.xlu0 %v5279_v13, %s4658_s9  ;;  %v5291_v51 = vpop.permute.xlu2 %727 }
  0xbe   : > { %9764 = vst [vmem:[#allocation22_spill] sm:$0xff] %v5291_v51 }
  0xc3   : > { %823 = vrot.lane.b32.xlu2 %v5299_v10, %s4658_s9 }
  0xc4   : > { %815 = vrot.lane.b32.xlu1 %v5302_v8, %s4658_s9 }
  0xc5   : > { %819 = vrot.lane.b32.xlu0 %v5305_v60, %s4658_s9  ;;  %v5313_v14 = vpop.permute.xlu2 %733 }
  0xc6   : > { %9765 = vst [vmem:[#allocation23_spill] sm:$0xff] %v5313_v14  ;;  %v5317_v27 = vpop.permute.xlu1 %709 }
  0xc7   : > { %9766 = vst [vmem:[#allocation24_spill] sm:$0xff] %v5317_v27  ;;  %v5319_v62 = vpop.permute.xlu0 %707 }
  0xc8   : > { %9767 = vst [vmem:[#allocation25_spill] sm:$0xff] %v5319_v62 }
  0xcb   : > { %853 = vrot.lane.b32.xlu2 %v4923_v41, %s4659_s10 }
  0xcc   : > { %821 = vrot.lane.b32.xlu1 %v5322_v53, %s4658_s9  ;;  %s4668_s9 = smov 40  }
  0xcd   : > { %849 = vrot.lane.b32.xlu0 %v4903_v33, %s4659_s10  ;;  %v5331_v37 = vpop.permute.xlu2 %739 }
  0xce   : > { %9768 = vst [vmem:[#allocation26_spill] sm:$0xff] %v5331_v37  ;;  %v5334_v17 = vpop.permute.xlu1 %711 }
  0xcf   : > { %9769 = vst [vmem:[#allocation27_spill] sm:$0xff] %v5334_v17  ;;  %v5336_v21 = vpop.permute.xlu0 %717 }
  0xd0   : > { %9770 = vst [vmem:[#allocation28_spill] sm:$0xff] %v5336_v21 }
  0xd3   : > { %859 = vrot.lane.b32.xlu2 %v4936_v47, %s4659_s10 }
  0xd4   : > { %851 = vrot.lane.b32.xlu1 %v4895_v28, %s4659_s10 }
  0xd5   : > { %855 = vrot.lane.b32.xlu0 %v4887_v23, %s4659_s10  ;;  %v5344_v32 = vpop.permute.xlu2 %745 }
  0xd6   : > { %9771 = vst [vmem:[#allocation29_spill] sm:$0xff] %v5344_v32  ;;  %v5346_v33 = vpop.permute.xlu1 %719  ;;  %v5390_v32 = vld [vmem:[#allocation2 + $0x120] sm:$0xff] }
  0xd7   : > { %9772 = vst [vmem:[#allocation30_spill] sm:$0xff] %v5346_v33  ;;  %v5348_v26 = vpop.permute.xlu0 %723 }
  0xd8   : > { %9773 = vst [vmem:[#allocation31_spill] sm:$0xff] %v5348_v26 }
  0xdb   : > { %865 = vrot.lane.b32.xlu2 %v4970_v61, %s4659_s10 }
  0xdc   : > { %857 = vrot.lane.b32.xlu1 %v4913_v38, %s4659_s10 }
  0xdd   : > { %861 = vrot.lane.b32.xlu0 %v4964_v59, %s4659_s10  ;;  %v5357_v37 = vpop.permute.xlu2 %751 }
  0xde   : > { %9774 = vst [vmem:[#allocation32_spill] sm:$0xff] %v5357_v37  ;;  %v5360_v14 = vpop.permute.xlu1 %725 }
  0xdf   : > { %9775 = vst [vmem:[#allocation33_spill] sm:$0xff] %v5360_v14  ;;  %v5362_v51 = vpop.permute.xlu0 %729 }
  0xe0   : > { %9776 = vst [vmem:[#allocation34_spill] sm:$0xff] %v5362_v51 }
  0xe3   : > { %871 = vrot.lane.b32.xlu2 %v5013_v22, %s4659_s10 }
  0xe4   : > { %863 = vrot.lane.b32.xlu1 %v5364_v57, %s4659_s10 }
  0xe5   : > { %867 = vrot.lane.b32.xlu0 %v5006_v20, %s4659_s10  ;;  %v5372_v61 = vpop.permute.xlu2 %781 }
  0xe6   : > { %9777 = vst [vmem:[#allocation35_spill] sm:$0xff] %v5372_v61  ;;  %v5374_v37 = vpop.permute.xlu1 %731  ;;  %v9804_v61 = vld [vmem:[#allocation8_spill] sm:$0xff] }
  0xe7   : > { %9778 = vst [vmem:[#allocation36_spill] sm:$0xff] %v5374_v37  ;;  %v5376_v2 = vpop.permute.xlu0 %735 }
  0xe8   : > { %9779 = vst [vmem:[#allocation37_spill] sm:$0xff] %v5376_v2 }
  0xeb   : > { %877 = vrot.lane.b32.xlu2 %v5046_v52, %s4659_s10 }
  0xec   : > { %869 = vrot.lane.b32.xlu1 %v4957_v56, %s4659_s10 }
  0xed   : > { %873 = vrot.lane.b32.xlu0 %v5040_v50, %s4659_s10  ;;  %v5384_v51 = vpop.permute.xlu2 %787 }
  0xee   : > { %9780 = vst [vmem:[#allocation38_spill] sm:$0xff] %v5384_v51  ;;  %v5386_v14 = vpop.permute.xlu1 %737 }
  0xef   : > { %9781 = vst [vmem:[#allocation39_spill] sm:$0xff] %v5386_v14  ;;  %v5388_v26 = vpop.permute.xlu0 %741 }
  0xf0   : > { %9782 = vst [vmem:[#allocation40_spill] sm:$0xff] %v5388_v26 }
  0xf3   : > { %883 = vrot.lane.b32.xlu2 %v5079_v30, %s4659_s10 }
  0xf4   : > { %875 = vrot.lane.b32.xlu1 %v4998_v16, %s4659_s10 }
  0xf5   : > { %879 = vrot.lane.b32.xlu0 %v5390_v32, %s4659_s10  ;;  %v5398_v2 = vpop.permute.xlu2 %793 }
  0xf6   : > { %9783 = vst [vmem:[#allocation41_spill] sm:$0xff] %v5398_v2  ;;  %v5400_v37 = vpop.permute.xlu1 %743  ;;  %v5416_v2 = vld [vmem:[#allocation2 + $0x1c0] sm:$0xff] }
  0xf7   : > { %9784 = vst [vmem:[#allocation42_spill] sm:$0xff] %v5400_v37  ;;  %v5402_v33 = vpop.permute.xlu0 %747 }
  0xf8   : > { %9785 = vst [vmem:[#allocation43_spill] sm:$0xff] %v5402_v33 }
  0xfb   : > { %889 = vrot.lane.b32.xlu2 %v5110_v18, %s4659_s10 }
  0xfc   : > { %881 = vrot.lane.b32.xlu1 %v5033_v45, %s4659_s10 }
  0xfd   : > { %885 = vrot.lane.b32.xlu0 %v5104_v11, %s4659_s10  ;;  %v5410_v26 = vpop.permute.xlu2 %799 }
  0xfe   : > { %9786 = vst [vmem:[#allocation44_spill] sm:$0xff] %v5410_v26  ;;  %v5412_v14 = vpop.permute.xlu1 %749 }
  0xff   : > { %9787 = vst [vmem:[#allocation45_spill] sm:$0xff] %v5412_v14  ;;  %v5414_v21 = vpop.permute.xlu0 %777 }
 0x100   : > { %9788 = vst [vmem:[#allocation46_spill] sm:$0xff] %v5414_v21 }
 0x103   : > { %895 = vrot.lane.b32.xlu2 %v5416_v2, %s4659_s10 }
 0x104   : > { %887 = vrot.lane.b32.xlu1 %v5066_v12, %s4659_s10 }
 0x105   : > { %891 = vrot.lane.b32.xlu0 %v5132_v15, %s4659_s10  ;;  %v5424_v45 = vpop.permute.xlu2 %805 }
 0x106   : > { %9789 = vst [vmem:[#allocation47_spill] sm:$0xff] %v5424_v45  ;;  %v5426_v33 = vpop.permute.xlu1 %779 }
 0x107   : > { %9790 = vst [vmem:[#allocation48_spill] sm:$0xff] %v5426_v33  ;;  %v5428_v26 = vpop.permute.xlu0 %783 }
 0x108   : > { %9791 = vst [vmem:[#allocation49_spill] sm:$0xff] %v5428_v26  ;;  %v663_v26 = vrot.slane %v5364_v57, 1 }
 0x10b   : > { %925 = vrot.lane.b32.xlu2 %v4955_v55, %s4660_s11 }
 0x10c   : > { %893 = vrot.lane.b32.xlu1 %v5097_v0, %s4659_s10  ;;  %s4669_s10 = smov 48  }
 0x10d   : > { %921 = vrot.lane.b32.xlu0 %v4932_v44, %s4660_s11  ;;  %v5436_v14 = vpop.permute.xlu2 %811 }
 0x10e   : > { %9792 = vst [vmem:[#allocation50_spill] sm:$0xff] %v5436_v14  ;;  %v5438_v37 = vpop.permute.xlu1 %785  ;;  %v5454_v14 = vld [vmem:[#allocation2 + $0x88] sm:$0x3] }
 0x10f   : > { %9793 = vst [vmem:[#allocation51_spill] sm:$0xff] %v5438_v37  ;;  %v5440_v51 = vpop.permute.xlu0 %789  ;;  %v9799_v37 = vld [vmem:[#allocation6_spill] sm:$0xff] }
 0x110   : > { %9794 = vst [vmem:[#allocation52_spill] sm:$0xff] %v5440_v51  ;;  %v9798_v51 = vld [vmem:[#allocation4_spill] sm:$0xff] }
 0x113   : > { %931 = vrot.lane.b32.xlu2 %v4962_v58, %s4660_s11 }
 0x114   : > { %923 = vrot.lane.b32.xlu1 %v4921_v40, %s4660_s11 }
 0x115   : > { %927 = vrot.lane.b32.xlu0 %v4909_v35, %s4660_s11  ;;  %v5448_v45 = vpop.permute.xlu2 %817 }
 0x116   : > { %9795 = vst [vmem:[#allocation53_spill] sm:$0xff] %v5448_v45  ;;  %v5450_v6 = vpop.permute.xlu1 %791  ;;  %v664_v45 = vrot.slane %v5454_v14, 1 }
 0x117   : > { %9796 = vst [vmem:[#allocation54_spill] sm:$0xff] %v5450_v6  ;;  %v5452_v44 = vpop.permute.xlu0 %795 }
 0x118   : > { %9797 = vst [vmem:[#allocation55_spill] sm:$0xff] %v5452_v44  ;;  %v5471_v17 = vsel %vm511_vm2, %v663_v26, %v664_v45  ;;  %v5487_v26 = vld [vmem:[#allocation2 + $0x128] sm:$0x3] }
 0x119   : > { %v9809_v45 = vld [vmem:[#allocation5_spill] sm:$0xff] }
 0x11b   : > { %937 = vrot.lane.b32.xlu2 %v5004_v19, %s4660_s11  ;;  %v9803_v19 = vld [vmem:[#allocation9_spill] sm:$0xff] }
 0x11c   : > { %929 = vrot.lane.b32.xlu1 %v9798_v51, %s4660_s11 }
 0x11d   : > { %933 = vrot.lane.b32.xlu0 %v9799_v37, %s4660_s11  ;;  %v5462_v25 = vpop.permute.xlu2 %823 }
 0x11e   : > { %9800 = vst [vmem:[#allocation4_spill] sm:$0xff] %v5462_v25  ;;  %v5466_v6 = vpop.permute.xlu1 %797 }
 0x11f   : > { %9801 = vst [vmem:[#allocation6_spill] sm:$0xff] %v5466_v6  ;;  %v5468_v44 = vpop.permute.xlu0 %801  ;;  %v9810_v6 = vld [vmem:[#allocation11_spill] sm:$0xff] }
 0x120   : > { %9802 = vst [vmem:[#allocation56_spill] sm:$0xff] %v5468_v44  ;;  %v9808_v44 = vld [vmem:[#allocation12_spill] sm:$0xff] }
 0x123   : > { %943 = vrot.lane.b32.xlu2 %v9803_v19, %s4660_s11  ;;  %v9815_v19 = vld [vmem:[#allocation7_spill] sm:$0xff] }
 0x124   : > { %935 = vrot.lane.b32.xlu1 %v5471_v17, %s4660_s11 }
 0x125   : > { %939 = vrot.lane.b32.xlu0 %v9804_v61, %s4660_s11  ;;  %v5479_v25 = vpop.permute.xlu2 %853 }
 0x126   : > { %9805 = vst [vmem:[#allocation8_spill] sm:$0xff] %v5479_v25  ;;  %v5481_v27 = vpop.permute.xlu1 %803  ;;  %v666_v25 = vrot.slane %v5390_v32, 1 }
 0x127   : > { %9806 = vst [vmem:[#allocation57_spill] sm:$0xff] %v5481_v27  ;;  %v5483_v33 = vpop.permute.xlu0 %807  ;;  %v667_v27 = vrot.slane %v5487_v26, 1 }
 0x128   : > { %9807 = vst [vmem:[#allocation58_spill] sm:$0xff] %v5483_v33 }
 0x129   : > { %v5502_v31 = vsel %vm511_vm2, %v666_v25, %v667_v27  ;;  %v9819_v25 = vld [vmem:[#allocation10_spill] sm:$0xff]  ;;  %v669_v27 = vrot.slane %v5416_v2, 1 }
 0x12b   : > { %949 = vrot.lane.b32.xlu2 %v9808_v44, %s4660_s11  ;;  %v9814_v44 = vld [vmem:[#allocation14_spill] sm:$0xff] }
 0x12c   : > { %941 = vrot.lane.b32.xlu1 %v9809_v45, %s4660_s11 }
 0x12d   : > { %945 = vrot.lane.b32.xlu0 %v9810_v6, %s4660_s11  ;;  %v5493_v62 = vpop.permute.xlu2 %859  ;;  %v5516_v6 = vld [vmem:[#allocation2 + $0x1c8] sm:$0x3] }
 0x12e   : > { %9811 = vst [vmem:[#allocation59_spill] sm:$0xff] %v5493_v62  ;;  %v5495_v21 = vpop.permute.xlu1 %809 }
 0x12f   : > { %9812 = vst [vmem:[#allocation60_spill] sm:$0xff] %v5495_v21  ;;  %v5499_v33 = vpop.permute.xlu0 %813 }
 0x130   : > { %9813 = vst [vmem:[#allocation61_spill] sm:$0xff] %v5499_v33  ;;  %v670_v33 = vrot.slane %v5516_v6, 1 }
 0x133   : > { %955 = vrot.lane.b32.xlu2 %v9814_v44, %s4660_s11  ;;  %v9820_v44 = vld [vmem:[#allocation16_spill] sm:$0xff] }
 0x134   : > { %947 = vrot.lane.b32.xlu1 %v9815_v19, %s4660_s11  ;;  %v5533_v19 = vsel %vm511_vm2, %v669_v27, %v670_v33  ;;  %v9827_v33 = vld [vmem:[#allocation15_spill] sm:$0xff] }
 0x135   : > { %951 = vrot.lane.b32.xlu0 %v5502_v31, %s4660_s11  ;;  %v5510_v62 = vpop.permute.xlu2 %865 }
 0x136   : > { %9816 = vst [vmem:[#allocation62_spill] sm:$0xff] %v5510_v62  ;;  %v5512_v21 = vpop.permute.xlu1 %815 }
 0x137   : > { %9817 = vst [vmem:[#allocation63_spill] sm:$0xff] %v5512_v21  ;;  %v5514_v45 = vpop.permute.xlu0 %819 }
 0x138   : > { %9818 = vst [vmem:[#allocation64_spill] sm:$0xff] %v5514_v45 }
 0x13b   : > { %961 = vrot.lane.b32.xlu2 %v5130_v49, %s4660_s11 }
 0x13c   : > { %953 = vrot.lane.b32.xlu1 %v9819_v25, %s4660_s11  ;;  %v9824_v25 = vld [vmem:[#allocation13_spill] sm:$0xff] }
 0x13d   : > { %957 = vrot.lane.b32.xlu0 %v9820_v44, %s4660_s11  ;;  %v5526_v62 = vpop.permute.xlu2 %871 }
 0x13e   : > { %9821 = vst [vmem:[#allocation10_spill] sm:$0xff] %v5526_v62  ;;  %v5528_v21 = vpop.permute.xlu1 %821 }
 0x13f   : > { %9822 = vst [vmem:[#allocation65_spill] sm:$0xff] %v5528_v21  ;;  %v5530_v45 = vpop.permute.xlu0 %849 }
 0x140   : > { %9823 = vst [vmem:[#allocation66_spill] sm:$0xff] %v5530_v45 }
 0x143   : > { %967 = vrot.lane.b32.xlu2 %v5533_v19, %s4660_s11 }
 0x144   : > { %959 = vrot.lane.b32.xlu1 %v9824_v25, %s4660_s11 }
 0x145   : > { %963 = vrot.lane.b32.xlu0 %v5152_v43, %s4660_s11  ;;  %v5541_v49 = vpop.permute.xlu2 %877 }
 0x146   : > { %9825 = vst [vmem:[#allocation13_spill] sm:$0xff] %v5541_v49  ;;  %v5543_v44 = vpop.permute.xlu1 %851 }
 0x147   : > { %v5545_v62 = vpop.permute.xlu0 %855 }
 0x148   : > { %9826 = vst [vmem:[#allocation67_spill] sm:$0xff] %v5545_v62 }
 0x14b   : > { %997 = vrot.lane.b32.xlu2 %v5173_v4, %s4661_s12 }
 0x14c   : > { %965 = vrot.lane.b32.xlu1 %v9827_v33, %s4660_s11  ;;  %s4670_s11 = smov 56  }
 0x14d   : > { %993 = vrot.lane.b32.xlu0 %v5170_v3, %s4661_s12  ;;  %v5553_v27 = vpop.permute.xlu2 %883 }
 0x14e   : > { %9828 = vst [vmem:[#allocation15_spill] sm:$0xff] %v5553_v27  ;;  %v5555_v21 = vpop.permute.xlu1 %857 }
 0x14f   : > { %9829 = vst [vmem:[#allocation68_spill] sm:$0xff] %v5555_v21  ;;  %v5557_v45 = vpop.permute.xlu0 %861  ;;  %v673_v21 = vrot.slane %v5454_v14, 2 }
 0x150   : > { %9830 = vst [vmem:[#allocation69_spill] sm:$0xff] %v5557_v45  ;;  %v672_v45 = vrot.slane %v5364_v57, 2 }
 0x153   : > { %1003 = vrot.lane.b32.xlu2 %v5192_v1, %s4661_s12 }
 0x154   : > { %995 = vrot.lane.b32.xlu1 %v5149_v7, %s4661_s12 }
 0x155   : > { %999 = vrot.lane.b32.xlu0 %v5189_v54, %s4661_s12  ;;  %v5565_v49 = vpop.permute.xlu2 %889 }
 0x156   : > { %9831 = vst [vmem:[#allocation70_spill] sm:$0xff] %v5565_v49  ;;  %v5567_v62 = vpop.permute.xlu1 %863 }
 0x157   : > { %9832 = vst [vmem:[#allocation71_spill] sm:$0xff] %v5567_v62  ;;  %v5569_v3 = vpop.permute.xlu0 %867 }
 0x158   : > { %9833 = vst [vmem:[#allocation72_spill] sm:$0xff] %v5569_v3  ;;  %v5586_v3 = vsel %vm584_vm3, %v672_v45, %v673_v21 }
 0x15b   : > { %1009 = vrot.lane.b32.xlu2 %v5212_v9, %s4661_s12 }
 0x15c   : > { %1001 = vrot.lane.b32.xlu1 %v5167_v63, %s4661_s12 }
 0x15d   : > { %1005 = vrot.lane.b32.xlu0 %v5209_v42, %s4661_s12  ;;  %v5577_v27 = vpop.permute.xlu2 %895 }
 0x15e   : > { %9834 = vst [vmem:[#allocation73_spill] sm:$0xff] %v5577_v27  ;;  %v5581_v49 = vpop.permute.xlu1 %869 }
 0x15f   : > { %9835 = vst [vmem:[#allocation74_spill] sm:$0xff] %v5581_v49  ;;  %v5583_v62 = vpop.permute.xlu0 %873  ;;  %v676_v49 = vrot.slane %v5487_v26, 2 }
 0x160   : > { %9836 = vst [vmem:[#allocation75_spill] sm:$0xff] %v5583_v62  ;;  %v675_v62 = vrot.slane %v5390_v32, 2 }
 0x163   : > { %1015 = vrot.lane.b32.xlu2 %v5235_v36, %s4661_s12 }
 0x164   : > { %1007 = vrot.lane.b32.xlu1 %v5586_v3, %s4661_s12 }
 0x165   : > { %1011 = vrot.lane.b32.xlu0 %v5232_v48, %s4661_s12  ;;  %v5594_v9 = vpop.permute.xlu2 %925 }
 0x166   : > { %9837 = vst [vmem:[#allocation76_spill] sm:$0xff] %v5594_v9  ;;  %v5596_v27 = vpop.permute.xlu1 %875 }
 0x167   : > { %9838 = vst [vmem:[#allocation77_spill] sm:$0xff] %v5596_v27  ;;  %v5598_v14 = vpop.permute.xlu0 %879 }
 0x168   : > { %9839 = vst [vmem:[#allocation78_spill] sm:$0xff] %v5598_v14  ;;  %v5615_v14 = vsel %vm584_vm3, %v675_v62, %v676_v49  ;;  %v678_v49 = vrot.slane %v5416_v2, 2  ;;  %v679_v62 = vrot.slane %v5516_v6, 2 }
 0x16b   : > { %1021 = vrot.lane.b32.xlu2 %v5258_v46, %s4661_s12 }
 0x16c   : > { %1013 = vrot.lane.b32.xlu1 %v5206_v39, %s4661_s12 }
 0x16d   : > { %1017 = vrot.lane.b32.xlu0 %v5255_v5, %s4661_s12  ;;  %v5606_v21 = vpop.permute.xlu2 %931 }
 0x16e   : > { %9840 = vst [vmem:[#allocation79_spill] sm:$0xff] %v5606_v21  ;;  %v5608_v45 = vpop.permute.xlu1 %881 }
 0x16f   : > { %9841 = vst [vmem:[#allocation80_spill] sm:$0xff] %v5608_v45  ;;  %v5612_v27 = vpop.permute.xlu0 %885 }
 0x170   : > { %9842 = vst [vmem:[#allocation81_spill] sm:$0xff] %v5612_v27 }
 0x173   : > { %1027 = vrot.lane.b32.xlu2 %v5279_v13, %s4661_s12 }
 0x174   : > { %1019 = vrot.lane.b32.xlu1 %v5229_v24, %s4661_s12 }
 0x175   : > { %1023 = vrot.lane.b32.xlu0 %v5615_v14, %s4661_s12  ;;  %v5623_v21 = vpop.permute.xlu2 %937 }
 0x176   : > { %9843 = vst [vmem:[#allocation82_spill] sm:$0xff] %v5623_v21  ;;  %v5625_v45 = vpop.permute.xlu1 %887 }
 0x177   : > { %v5627_v9 = vpop.permute.xlu0 %891 }
 0x178   : > { %9844 = vst [vmem:[#allocation83_spill] sm:$0xff] %v5627_v9  ;;  %v5644_v9 = vsel %vm584_vm3, %v678_v49, %v679_v62 }
 0x17b   : > { %1033 = vrot.lane.b32.xlu2 %v5305_v60, %s4661_s12 }
 0x17c   : > { %1025 = vrot.lane.b32.xlu1 %v5252_v29, %s4661_s12 }
 0x17d   : > { %1029 = vrot.lane.b32.xlu0 %v5302_v8, %s4661_s12  ;;  %v5637_v26 = vpop.permute.xlu2 %943 }
 0x17e   : > { %9845 = vst [vmem:[#allocation84_spill] sm:$0xff] %v5637_v26  ;;  %v5639_v27 = vpop.permute.xlu1 %893 }
 0x17f   : > { %9846 = vst [vmem:[#allocation85_spill] sm:$0xff] %v5639_v27  ;;  %v5641_v21 = vpop.permute.xlu0 %921 }
 0x183   : > { %1039 = vrot.lane.b32.xlu2 %v5644_v9, %s4661_s12 }
 0x184   : > { %1031 = vrot.lane.b32.xlu1 %v5275_v34, %s4661_s12 }
 0x185   : > { %1035 = vrot.lane.b32.xlu0 %v5322_v53, %s4661_s12  ;;  %v5652_v29 = vpop.permute.xlu2 %949 }
 0x186   : > { %9847 = vst [vmem:[#allocation86_spill] sm:$0xff] %v5652_v29  ;;  %v5654_v6 = vpop.permute.xlu1 %923 }
 0x187   : > { %v5656_v26 = vpop.permute.xlu0 %927 }
 0x18b   : > { %1069 = vrot.lane.b32.xlu2 %v4887_v23, %s4662_s13 }
 0x18c   : > { %1037 = vrot.lane.b32.xlu1 %v5299_v10, %s4661_s12  ;;  %s4671_s12 = smov 64  }
 0x18d   : > { %1065 = vrot.lane.b32.xlu0 %v4895_v28, %s4662_s13  ;;  %v5664_v49 = vpop.permute.xlu2 %955 }
 0x18e   : > { %9848 = vst [vmem:[#allocation87_spill] sm:$0xff] %v5664_v49  ;;  %v5666_v62 = vpop.permute.xlu1 %929  ;;  %v5694_v49 = vld [vmem:[#allocation2 + $0x90] sm:$0xff] }
 0x18f   : > { %v5668_v27 = vpop.permute.xlu0 %933 }
 0x193   : > { %1075 = vrot.lane.b32.xlu2 %v4964_v59, %s4662_s13 }
 0x194   : > { %1067 = vrot.lane.b32.xlu1 %v4923_v41, %s4662_s13 }
 0x195   : > { %1071 = vrot.lane.b32.xlu0 %v4913_v38, %s4662_s13  ;;  %v5676_v23 = vpop.permute.xlu2 %961 }
 0x196   : > { %v5678_v29 = vpop.permute.xlu1 %935 }
 0x197   : > { %v5680_v28 = vpop.permute.xlu0 %939 }
 0x198   : > { %9849 = vst [vmem:[#allocation88_spill] sm:$0xff] %v5680_v28 }
 0x19b   : > { %1081 = vrot.lane.b32.xlu2 %v5006_v20, %s4662_s13 }
 0x19c   : > { %1073 = vrot.lane.b32.xlu1 %v4936_v47, %s4662_s13 }
 0x19d   : > { %1077 = vrot.lane.b32.xlu0 %v5364_v57, %s4662_s13  ;;  %v5688_v59 = vpop.permute.xlu2 %967 }
 0x19e   : > { %9850 = vst [vmem:[#allocation89_spill] sm:$0xff] %v5688_v59  ;;  %v5690_v41 = vpop.permute.xlu1 %941  ;;  %v5720_v59 = vld [vmem:[#allocation2 + $0x130] sm:$0xff] }
 0x19f   : > { %9851 = vst [vmem:[#allocation90_spill] sm:$0xff] %v5690_v41  ;;  %v5692_v38 = vpop.permute.xlu0 %945  ;;  %v9866_v41 = vld [vmem:[#allocation11_spill] sm:$0xff] }
 0x1a0   : > { %9852 = vst [vmem:[#allocation91_spill] sm:$0xff] %v5692_v38 }
 0x1a3   : > { %1087 = vrot.lane.b32.xlu2 %v5040_v50, %s4662_s13 }
 0x1a4   : > { %1079 = vrot.lane.b32.xlu1 %v5694_v49, %s4662_s13 }
 0x1a5   : > { %1083 = vrot.lane.b32.xlu0 %v4957_v56, %s4662_s13  ;;  %v5702_v47 = vpop.permute.xlu2 %997 }
 0x1a6   : > { %v5704_v20 = vpop.permute.xlu1 %947 }
 0x1a7   : > { %9853 = vst [vmem:[#allocation92_spill] sm:$0xff] %v5704_v20  ;;  %v5706_v57 = vpop.permute.xlu0 %951 }
 0x1a8   : > { %9854 = vst [vmem:[#allocation93_spill] sm:$0xff] %v5706_v57 }
 0x1ab   : > { %1093 = vrot.lane.b32.xlu2 %v5390_v32, %s4662_s13 }
 0x1ac   : > { %1085 = vrot.lane.b32.xlu1 %v5013_v22, %s4662_s13 }
 0x1ad   : > { %1089 = vrot.lane.b32.xlu0 %v4998_v16, %s4662_s13  ;;  %v5714_v50 = vpop.permute.xlu2 %1003 }
 0x1ae   : > { %v5716_v38 = vpop.permute.xlu1 %953 }
 0x1af   : > { %9855 = vst [vmem:[#allocation94_spill] sm:$0xff] %v5716_v38  ;;  %v5718_v56 = vpop.permute.xlu0 %957  ;;  %v5746_v38 = vld [vmem:[#allocation2 + $0x1d0] sm:$0xff] }
 0x1b0   : > { %9856 = vst [vmem:[#allocation95_spill] sm:$0xff] %v5718_v56 }
 0x1b3   : > { %1099 = vrot.lane.b32.xlu2 %v5104_v11, %s4662_s13 }
 0x1b4   : > { %1091 = vrot.lane.b32.xlu1 %v5046_v52, %s4662_s13 }
 0x1b5   : > { %1095 = vrot.lane.b32.xlu0 %v5720_v59, %s4662_s13  ;;  %v5728_v22 = vpop.permute.xlu2 %1009 }
 0x1b6   : > { %v5730_v16 = vpop.permute.xlu1 %959 }
 0x1b7   : > { %v5732_v32 = vpop.permute.xlu0 %963 }
 0x1b8   : > { %9857 = vst [vmem:[#allocation96_spill] sm:$0xff] %v5732_v32  ;;  %v9880_v32 = vld [vmem:[#allocation17_spill] sm:$0xff] }
 0x1bb   : > { %1105 = vrot.lane.b32.xlu2 %v5132_v15, %s4662_s13 }
 0x1bc   : > { %1097 = vrot.lane.b32.xlu1 %v5079_v30, %s4662_s13 }
 0x1bd   : > { %1101 = vrot.lane.b32.xlu0 %v5066_v12, %s4662_s13  ;;  %v5740_v11 = vpop.permute.xlu2 %1015 }
 0x1be   : > { %9858 = vst [vmem:[#allocation97_spill] sm:$0xff] %v5740_v11  ;;  %v5742_v52 = vpop.permute.xlu1 %965 }
 0x1bf   : > { %9859 = vst [vmem:[#allocation98_spill] sm:$0xff] %v5742_v52  ;;  %v5744_v56 = vpop.permute.xlu0 %993  ;;  %v9875_v52 = vld [vmem:[#allocation12_spill] sm:$0xff] }
 0x1c3   : > { %1111 = vrot.lane.b32.xlu2 %v5746_v38, %s4662_s13 }
 0x1c4   : > { %1103 = vrot.lane.b32.xlu1 %v5110_v18, %s4662_s13 }
 0x1c5   : > { %1107 = vrot.lane.b32.xlu0 %v5097_v0, %s4662_s13  ;;  %v5754_v15 = vpop.permute.xlu2 %1021 }
 0x1c6   : > { %9860 = vst [vmem:[#allocation99_spill] sm:$0xff] %v5754_v15  ;;  %v5756_v12 = vpop.permute.xlu1 %995 }
 0x1c7   : > { %v5758_v30 = vpop.permute.xlu0 %999 }
 0x1cb   : > { %1141 = vrot.lane.b32.xlu2 %v4909_v35, %s4663_s14 }
 0x1cc   : > { %1109 = vrot.lane.b32.xlu1 %v5416_v2, %s4662_s13  ;;  %s9397_s13 = scalar_lea.vmem %s9609_s7, %s4537_s28 }
 0x1cd   : > { %1137 = vrot.lane.b32.xlu0 %v4921_v40, %s4663_s14  ;;  %v5766_v18 = vpop.permute.xlu2 %1027 }
 0x1ce   : > { %9861 = vst [vmem:[#allocation100_spill] sm:$0xff] %v5766_v18  ;;  %v5768_v57 = vpop.permute.xlu1 %1001  ;;  %v417_v18 = vld [vmem:[#allocation2 + $0x98] sm:$0x3] }
 0x1cf   : > { %v5770_v0 = vpop.permute.xlu0 %1005 }
 0x1d3   : > { %1147 = vrot.lane.b32.xlu2 %v9799_v37, %s4663_s14  ;;  %v687_v37 = vrot.slane %v5694_v49, 1 }
 0x1d4   : > { %1139 = vrot.lane.b32.xlu1 %v4955_v55, %s4663_s14 }
 0x1d5   : > { %1143 = vrot.lane.b32.xlu0 %v9798_v51, %s4663_s14  ;;  %v5778_v35 = vpop.permute.xlu2 %1033  ;;  %v688_v51 = vrot.slane %v417_v18, 1 }
 0x1d6   : > { %v5780_v2 = vpop.permute.xlu1 %1007 }
 0x1d7   : > { %v5782_v40 = vpop.permute.xlu0 %1011  ;;  %v689_v11 = vsel %vm511_vm2, %v687_v37, %v688_v51  ;;  %v9870_v37 = vld [vmem:[#allocation9_spill] sm:$0xff]  ;;  %v690_v51 = vrot.slane %v5720_v59, 1 }
 0x1d8   : > { %9862 = vst [vmem:[#allocation101_spill] sm:$0xff] %v5782_v40 }
 0x1db   : > { %1153 = vrot.lane.b32.xlu2 %v9804_v61, %s4663_s14 }
 0x1dc   : > { %1145 = vrot.lane.b32.xlu1 %v4962_v58, %s4663_s14  ;;  %v9867_v58 = vld [vmem:[#allocation5_spill] sm:$0xff] }
 0x1dd   : > { %1149 = vrot.lane.b32.xlu0 %v5471_v17, %s4663_s14  ;;  %v5791_v55 = vpop.permute.xlu2 %1039 }
 0x1de   : > { %9863 = vst [vmem:[#allocation102_spill] sm:$0xff] %v5791_v55  ;;  %v5793_v15 = vpop.permute.xlu1 %1013 }
 0x1df   : > { %9864 = vst [vmem:[#allocation103_spill] sm:$0xff] %v5793_v15  ;;  %v5795_v20 = vpop.permute.xlu0 %1017 }
 0x1e0   : > { %9865 = vst [vmem:[#allocation104_spill] sm:$0xff] %v5795_v20  ;;  %v437_v20 = vld [vmem:[#allocation2 + $0x138] sm:$0x3] }
 0x1e1   : > { %v691_v15 = vrot.slane %v437_v20, 1 }
 0x1e3   : > { %1159 = vrot.lane.b32.xlu2 %v9866_v41, %s4663_s14  ;;  %v9871_v41 = vld [vmem:[#allocation7_spill] sm:$0xff] }
 0x1e4   : > { %1151 = vrot.lane.b32.xlu1 %v689_v11, %s4663_s14 }
 0x1e5   : > { %1155 = vrot.lane.b32.xlu0 %v9867_v58, %s4663_s14  ;;  %v5803_v61 = vpop.permute.xlu2 %1069 }
 0x1e6   : > { %v5805_v17 = vpop.permute.xlu1 %1019 }
 0x1e7   : > { %9868 = vst [vmem:[#allocation11_spill] sm:$0xff] %v5805_v17  ;;  %v5807_v55 = vpop.permute.xlu0 %1023 }
 0x1e8   : > { %9869 = vst [vmem:[#allocation5_spill] sm:$0xff] %v5807_v55  ;;  %v692_v55 = vsel %vm511_vm2, %v690_v51, %v691_v15  ;;  %v693_v15 = vrot.slane %v5746_v38, 1  ;;  %v9877_v51 = vld [vmem:[#allocation14_spill] sm:$0xff] }
 0x1eb   : > { %1165 = vrot.lane.b32.xlu2 %v5502_v31, %s4663_s14  ;;  %v9874_v31 = vld [vmem:[#allocation16_spill] sm:$0xff] }
 0x1ec   : > { %1157 = vrot.lane.b32.xlu1 %v9870_v37, %s4663_s14 }
 0x1ed   : > { %1161 = vrot.lane.b32.xlu0 %v9871_v41, %s4663_s14  ;;  %v5815_v11 = vpop.permute.xlu2 %1075 }
 0x1ee   : > { %v5818_v58 = vpop.permute.xlu1 %1025 }
 0x1ef   : > { %9872 = vst [vmem:[#allocation9_spill] sm:$0xff] %v5818_v58  ;;  %v5820_v17 = vpop.permute.xlu0 %1029  ;;  %v457_v58 = vld [vmem:[#allocation2 + $0x1d8] sm:$0x3] }
 0x1f0   : > { %9873 = vst [vmem:[#allocation7_spill] sm:$0xff] %v5820_v17 }
 0x1f3   : > { %1171 = vrot.lane.b32.xlu2 %v9874_v31, %s4663_s14  ;;  %v694_v31 = vrot.slane %v457_v58, 1 }
 0x1f4   : > { %1163 = vrot.lane.b32.xlu1 %v9875_v52, %s4663_s14 }
 0x1f5   : > { %1167 = vrot.lane.b32.xlu0 %v692_v55, %s4663_s14  ;;  %v5828_v37 = vpop.permute.xlu2 %1081  ;;  %v695_v28 = vsel %vm511_vm2, %v693_v15, %v694_v31 }
 0x1f6   : > { %v5830_v41 = vpop.permute.xlu1 %1031 }
 0x1f7   : > { %v5832_v40 = vpop.permute.xlu0 %1035 }
 0x1f8   : > { %9876 = vst [vmem:[#allocation16_spill] sm:$0xff] %v5832_v40  ;;  %v696_v40 = vrot.slane %v5694_v49, 2 }
 0x1fb   : > { %1177 = vrot.lane.b32.xlu2 %v5152_v43, %s4663_s14  ;;  %v697_v43 = vrot.slane %v417_v18, 2  ;;  %v700_v18 = vrot.slane %v437_v20, 2  ;;  %v703_v20 = vrot.slane %v457_v58, 2 }
 0x1fc   : > { %1169 = vrot.lane.b32.xlu1 %v9877_v51, %s4663_s14 }
 0x1fd   : > { %1173 = vrot.lane.b32.xlu0 %v9824_v25, %s4663_s14  ;;  %v5841_v52 = vpop.permute.xlu2 %1087  ;;  %v698_v51 = vsel %vm584_vm3, %v696_v40, %v697_v43 }
 0x1fe   : > { %9878 = vst [vmem:[#allocation12_spill] sm:$0xff] %v5841_v52  ;;  %v5843_v55 = vpop.permute.xlu1 %1037 }
 0x1ff   : > { %9879 = vst [vmem:[#allocation14_spill] sm:$0xff] %v5843_v55  ;;  %v5845_v17 = vpop.permute.xlu0 %1065 }
 0x203   : > { %1183 = vrot.lane.b32.xlu2 %v695_v28, %s4663_s14 }
 0x204   : > { %1175 = vrot.lane.b32.xlu1 %v9880_v32, %s4663_s14 }
 0x205   : > { %1179 = vrot.lane.b32.xlu0 %v9827_v33, %s4663_s14  ;;  %v5859_v55 = vpop.permute.xlu2 %1093  ;;  %v699_v33 = vrot.slane %v5720_v59, 2 }
 0x206   : > { %v5855_v25 = vpop.permute.xlu1 %1067  ;;  %9881 = vst [vmem:[#allocation17_spill] sm:$0xff] %v5859_v55  ;;  %v9895_v55 = vld [vmem:[#allocation46_spill] sm:$0xff] }
 0x207   : > { %v5857_v52 = vpop.permute.xlu0 %1071 }
 0x20b   : > { %1213 = vrot.lane.b32.xlu2 %v5189_v54, %s4664_s15  ;;  %v701_v54 = vsel %vm584_vm3, %v699_v33, %v700_v18  ;;  %v459_v33 = vld [vmem:[%s9603_s1 + $0x8] sm:$0xff] }
 0x20c   : > { %1181 = vrot.lane.b32.xlu1 %v5533_v19, %s4663_s14 }
 0x20d   : > { %1209 = vrot.lane.b32.xlu0 %v5149_v7, %s4664_s15  ;;  %v5872_v32 = vpop.permute.xlu2 %1099 }
 0x20e   : > { %v5867_v49 = vpop.permute.xlu1 %1073  ;;  %9882 = vst [vmem:[#allocation105_spill] sm:$0xff] %v5872_v32 }
 0x20f   : > { %v5869_v28 = vpop.permute.xlu0 %1077 }
 0x213   : > { %1219 = vrot.lane.b32.xlu2 %v5209_v42, %s4664_s15 }
 0x214   : > { %1211 = vrot.lane.b32.xlu1 %v5173_v4, %s4664_s15  ;;  %v702_v4 = vrot.slane %v5746_v38, 2 }
 0x215   : > { %1215 = vrot.lane.b32.xlu0 %v5167_v63, %s4664_s15  ;;  %v5887_v59 = vpop.permute.xlu2 %1105 }
 0x216   : > { %v5881_v7 = vpop.permute.xlu1 %1079  ;;  %v704_v40 = vsel %vm584_vm3, %v702_v4, %v703_v20  ;;  %v458_v4 = vld [vmem:[%s9603_s1] sm:$0xff] }
 0x217   : > { %v5883_v19 = vpop.permute.xlu0 %1083 }
 0x21b   : > { %1225 = vrot.lane.b32.xlu2 %v5232_v48, %s4664_s15 }
 0x21c   : > { %1217 = vrot.lane.b32.xlu1 %v5192_v1, %s4664_s15 }
 0x21d   : > { %1221 = vrot.lane.b32.xlu0 %v5586_v3, %s4664_s15  ;;  %v5904_v1 = vpop.permute.xlu2 %1111 }
 0x21e   : > { %v5894_v42 = vpop.permute.xlu1 %1085 }
 0x21f   : > { %v5896_v63 = vpop.permute.xlu0 %1089 }
 0x223   : > { %1231 = vrot.lane.b32.xlu2 %v5255_v5, %s4664_s15 }
 0x224   : > { %1223 = vrot.lane.b32.xlu1 %v698_v51, %s4664_s15 }
 0x225   : > { %1227 = vrot.lane.b32.xlu0 %v5206_v39, %s4664_s15  ;;  %v5920_v39 = vpop.permute.xlu2 %1141 }
 0x226   : > { %v5906_v48 = vpop.permute.xlu1 %1091 }
 0x227   : > { %9883 = vst [vmem:[#allocation106_spill] sm:$0xff] %v5906_v48  ;;  %v5908_v3 = vpop.permute.xlu0 %1095 }
 0x228   : > { %9884 = vst [vmem:[#allocation107_spill] sm:$0xff] %v5908_v3 }
 0x22b   : > { %1237 = vrot.lane.b32.xlu2 %v5615_v14, %s4664_s15 }
 0x22c   : > { %1229 = vrot.lane.b32.xlu1 %v5235_v36, %s4664_s15 }
 0x22d   : > { %1233 = vrot.lane.b32.xlu0 %v5229_v24, %s4664_s15  ;;  %v5931_v58 = vpop.permute.xlu2 %1147 }
 0x22e   : > { %v5916_v5 = vpop.permute.xlu1 %1097 }
 0x22f   : > { %9885 = vst [vmem:[#allocation108_spill] sm:$0xff] %v5916_v5  ;;  %v5918_v38 = vpop.permute.xlu0 %1101 }
 0x230   : > { %9886 = vst [vmem:[#allocation109_spill] sm:$0xff] %v5918_v38 }
 0x233   : > { %1243 = vrot.lane.b32.xlu2 %v5302_v8, %s4664_s15 }
 0x234   : > { %1235 = vrot.lane.b32.xlu1 %v5258_v46, %s4664_s15 }
 0x235   : > { %1239 = vrot.lane.b32.xlu0 %v701_v54, %s4664_s15  ;;  %v5942_v8 = vpop.permute.xlu2 %1153 }
 0x236   : > { %v5927_v14 = vpop.permute.xlu1 %1103 }
 0x237   : > { %v5929_v36 = vpop.permute.xlu0 %1107 }
 0x23b   : > { %1249 = vrot.lane.b32.xlu2 %v5322_v53, %s4664_s15 }
 0x23c   : > { %1241 = vrot.lane.b32.xlu1 %v5279_v13, %s4664_s15 }
 0x23d   : > { %1245 = vrot.lane.b32.xlu0 %v5275_v34, %s4664_s15  ;;  %v5952_v34 = vpop.permute.xlu2 %1159 }
 0x23e   : > { %v5939_v24 = vpop.permute.xlu1 %1109 }
 0x23f   : > { %v1138_v46 = vpop.permute.xlu0 %1137 }
 0x243   : > { %1255 = vrot.lane.b32.xlu2 %v704_v40, %s4664_s15 }
 0x244   : > { %1247 = vrot.lane.b32.xlu1 %v5305_v60, %s4664_s15 }
 0x245   : > { %1251 = vrot.lane.b32.xlu0 %v5299_v10, %s4664_s15  ;;  %v5962_v60 = vpop.permute.xlu2 %1165  ;;  %v461_v10 = vld [vmem:[%s9603_s1 + $0x18] sm:$0x7] }
 0x246   : > { %v1140_v53 = vpop.permute.xlu1 %1139  ;;  %9887 = vst [vmem:[#allocation110_spill] sm:$0xff] %v5962_v60  ;;  %4462 = vmatpush.msk.msra.mxu0 %vm1556_vm4, %v461_v10  ;;  %4539 = vmatpush.msk.msra.mxu3 %vm1556_vm4, %v461_v10  ;;  %v4588_v60 = vld [vmem:[#allocation2] sm:$0xff] }
 0x247   : > { %v5948_v15 = vpop.permute.xlu0 %1143 }
 0x24c   : > { %1253 = vrot.lane.b32.xlu1 %v5644_v9, %s4664_s15  ;;  %v460_v9 = vld [vmem:[%s9603_s1 + $0x10] sm:$0xff] }
 0x24d   : > { %1573 = vmatpush.msra.mxu0 %v460_v9  ;;  %4540 = vmatpush.msra.mxu3 %v460_v9  ;;  %v5980_v20 = vpop.permute.xlu2 %1171 }
 0x24e   : > { %v5954_v13 = vpop.permute.xlu1 %1145  ;;  %9889 = vst [vmem:[#allocation112_spill] sm:$0xff] %v5980_v20 }
 0x24f   : > { %v5956_v31 = vpop.permute.xlu0 %1149  ;;  %1574 = vmatpush.msra.mxu0 %v459_v33  ;;  %4541 = vmatpush.msra.mxu3 %v459_v33 }
 0x251   : > { %1575 = vmatpush.msra.mxu0 %v458_v4  ;;  %4542 = vmatpush.msra.mxu3 %v458_v4  ;;  %v9894_v4 = vld [vmem:[#allocation21_spill] sm:$0xff] }
 0x252   : > { %v1281_v20 = vsel %vm287_vm0, %v4588_v60, %v9894_v4 }
 0x255   : > { %v5986_v38 = vpop.permute.xlu2 %1177 }
 0x256   : > { %v5958_v43 = vpop.permute.xlu1 %1151 }
 0x257   : > { %v5960_v51 = vpop.permute.xlu0 %1155 }
 0x25d   : > { %v5992_v32 = vpop.permute.xlu2 %1183 }
 0x25e   : > { %v5973_v18 = vpop.permute.xlu1 %1157 }
 0x25f   : > { %v5975_v54 = vpop.permute.xlu0 %1161 }
 0x260   : > { %9888 = vst [vmem:[#allocation111_spill] sm:$0xff] %v5975_v54 }
 0x266   : > { %v5982_v40 = vpop.permute.xlu1 %1163 }
 0x267   : > { %9890 = vst [vmem:[#allocation113_spill] sm:$0xff] %v5982_v40  ;;  %v5984_v10 = vpop.permute.xlu0 %1167  ;;  %v9896_v40 = vld [vmem:[#allocation66_spill] sm:$0xff] }
 0x268   : > { %9891 = vst [vmem:[#allocation114_spill] sm:$0xff] %v5984_v10  ;;  %v1306_v10 = vsel %vm1305_vm5, %v1281_v20, %v9895_v55 }
 0x26e   : > { %v5988_v9 = vpop.permute.xlu1 %1169 }
 0x26f   : > { %9892 = vst [vmem:[#allocation115_spill] sm:$0xff] %v5988_v9  ;;  %v5990_v33 = vpop.permute.xlu0 %1173  ;;  %v1331_v9 = vsel %vm1330_vm6, %v1306_v10, %v9896_v40  ;;  %v4589_v40 = vld [vmem:[#allocation2 + $0x10] sm:$0xff]  ;;  %v9897_v10 = vld [vmem:[#allocation25_spill] sm:$0xff] }
 0x270   : > { %9893 = vst [vmem:[#allocation116_spill] sm:$0xff] %v5990_v33  ;;  %v1356_v33 = vsel %vm1355_vm7, %v1331_v9, %v5641_v21  ;;  %v1282_v21 = vsel %vm287_vm0, %v4589_v40, %v9897_v10  ;;  %v1214_v9 = vpop.permute.xlu2 %1213 }
 0x271   : > { %v1381_v48 = vsel %vm1380_vm8, %v1356_v33, %v5744_v56  ;;  %v9898_v56 = vld [vmem:[#allocation48_spill] sm:$0xff] }
 0x272   : > { %v1406_v60 = vsel %vm1405_vm9, %v1381_v48, %v5845_v17  ;;  %v1307_v33 = vsel %vm1305_vm5, %v1282_v21, %v9898_v56  ;;  %v4590_v21 = vld [vmem:[#allocation2 + $0x20] sm:$0xff] }
 0x273   : > { %v1431_v55 = vsel %vm1430_vm10, %v1406_v60, %v1138_v46  ;;  %v1332_v17 = vsel %vm1330_vm6, %v1307_v33, %v5543_v44  ;;  %v9900_v44 = vld [vmem:[#allocation35_spill] sm:$0xff] }
 0x274   : > { %v1357_v48 = vsel %vm1355_vm7, %v1332_v17, %v5654_v6 }
 0x275   : > { %v1382_v46 = vsel %vm1380_vm8, %v1357_v48, %v5756_v12  ;;  %v9901_v12 = vld [vmem:[#allocation8_spill] sm:$0xff] }
 0x276   : > { %v5994_v5 = vpop.permute.xlu1 %1175  ;;  %v1407_v60 = vsel %vm1405_vm9, %v1382_v46, %v5855_v25  ;;  %v9902_v25 = vld [vmem:[#allocation76_spill] sm:$0xff] }
 0x277   : > { %v5996_v3 = vpop.permute.xlu0 %1179  ;;  %v1432_v40 = vsel %vm1430_vm10, %v1407_v60, %v1140_v53 }
 0x278   : > { %v1220_v33 = vpop.permute.xlu2 %1219 }
 0x27e   : > { %v6010_v4 = vpop.permute.xlu1 %1181 }
 0x27f   : > { %v1210_v20 = vpop.permute.xlu0 %1209 }
 0x280   : > { %v1456_v54 = vsel %vm1455_vm12, %v1431_v55, %v1210_v20 }
 0x281   : > { %4463 = vmatmul.msk.f32.vlgmr.msra.gmra.mxu0 %vm1483_vm11, %v1456_v54  ;;  %v9899_v54 = vld [vmem:[#allocation24_spill] sm:$0xff] }
 0x282   : > { %v1283_v56 = vsel %vm287_vm0, %v4590_v21, %v9899_v54  ;;  %v9903_v21 = vld [vmem:[#allocation27_spill] sm:$0xff] }
 0x283   : > { %v1308_v6 = vsel %vm1305_vm5, %v1283_v56, %v9900_v44  ;;  %v9904_v56 = vld [vmem:[#allocation49_spill] sm:$0xff] }
 0x284   : > { %v1333_v17 = vsel %vm1330_vm6, %v1308_v6, %v9901_v12 }
 0x285   : > { %v1358_v53 = vsel %vm1355_vm7, %v1333_v17, %v9902_v25  ;;  %v6054_v17 = vpop.permute.xlu2 %1225 }
 0x286   : > { %v1212_v55 = vpop.permute.xlu1 %1211  ;;  %v1383_v48 = vsel %vm1380_vm8, %v1358_v53, %v5702_v47  ;;  %v9905_v47 = vld [vmem:[#allocation67_spill] sm:$0xff] }
 0x287   : > { %v1457_v20 = vsel %vm1455_vm12, %v1432_v40, %v1212_v55  ;;  %v1216_v10 = vpop.permute.xlu0 %1215  ;;  %v1408_v46 = vsel %vm1405_vm9, %v1383_v48, %v5803_v61 }
 0x288   : > { %v1433_v40 = vsel %vm1430_vm10, %v1408_v46, %v5920_v39  ;;  %v4592_v46 = vld [vmem:[#allocation2 + $0x40] sm:$0xff] }
 0x289   : > { %4464 = vmatmul.msk.f32.gmra.mxu0 %vm1483_vm11, %v1457_v20  ;;  %v1458_v55 = vsel %vm1455_vm12, %v1433_v40, %v1214_v9  ;;  %v4591_v20 = vld [vmem:[#allocation2 + $0x30] sm:$0xff]  ;;  %v9906_v40 = vld [vmem:[#allocation19_spill] sm:$0xff] }
 0x28a   : > { %v1284_v54 = vsel %vm287_vm0, %v4591_v20, %v9903_v21 }
 0x28b   : > { %v1309_v44 = vsel %vm1305_vm5, %v1284_v54, %v9904_v56 }
 0x28c   : > { %v1334_v12 = vsel %vm1330_vm6, %v1309_v44, %v9905_v47 }
 0x28d   : > { %v1359_v61 = vsel %vm1355_vm7, %v1334_v12, %v5656_v26  ;;  %v9907_v26 = vld [vmem:[#allocation51_spill] sm:$0xff]  ;;  %v6080_v56 = vpop.permute.xlu2 %1231 }
 0x28e   : > { %v1218_v60 = vpop.permute.xlu1 %1217  ;;  %v1384_v39 = vsel %vm1380_vm8, %v1359_v61, %v5758_v30  ;;  %v9908_v30 = vld [vmem:[#allocation68_spill] sm:$0xff]  ;;  %v4593_v61 = vld [vmem:[#allocation2 + $0x50] sm:$0xff] }
 0x28f   : > { %v1222_v6 = vpop.permute.xlu0 %1221  ;;  %v1409_v9 = vsel %vm1405_vm9, %v1384_v39, %v5857_v52  ;;  %v9909_v39 = vld [vmem:[#allocation20_spill] sm:$0xff] }
 0x290   : > { %v1434_v53 = vsel %vm1430_vm10, %v1409_v9, %v5948_v15  ;;  %v9910_v9 = vld [vmem:[#allocation38_spill] sm:$0xff] }
 0x291   : > { %4465 = vmatmul.msk.f32.gmra.mxu0 %vm1483_vm11, %v1458_v55  ;;  %v1459_v48 = vsel %vm1455_vm12, %v1434_v53, %v1216_v10  ;;  %v1285_v55 = vsel %vm287_vm0, %v4592_v46, %v9906_v40  ;;  %v9911_v53 = vld [vmem:[#allocation59_spill] sm:$0xff] }
 0x292   : > { %v1310_v20 = vsel %vm1305_vm5, %v1285_v55, %v9907_v26 }
 0x293   : > { %v1335_v21 = vsel %vm1330_vm6, %v1310_v20, %v9908_v30 }
 0x294   : > { %v1360_v52 = vsel %vm1355_vm7, %v1335_v21, %v5666_v62  ;;  %v1286_v62 = vsel %vm287_vm0, %v4593_v61, %v9909_v39  ;;  %v4594_v21 = vld [vmem:[#allocation2 + $0x60] sm:$0xff] }
 0x295   : > { %v1385_v15 = vsel %vm1380_vm8, %v1360_v52, %v5768_v57  ;;  %v1311_v57 = vsel %vm1305_vm5, %v1286_v62, %v9910_v9  ;;  %v6106_v20 = vpop.permute.xlu2 %1237  ;;  %v9913_v52 = vld [vmem:[#allocation28_spill] sm:$0xff]  ;;  %v4595_v62 = vld [vmem:[#allocation2 + $0x170] sm:$0xff] }
 0x296   : > { %v6060_v25 = vpop.permute.xlu1 %1223  ;;  %v1410_v10 = vsel %vm1405_vm9, %v1385_v15, %v5867_v49  ;;  %v1336_v49 = vsel %vm1330_vm6, %v1311_v57, %v9911_v53  ;;  %v1287_v15 = vsel %vm287_vm0, %v4594_v21, %v9913_v52  ;;  %v9916_v9 = vld [vmem:[#allocation42_spill] sm:$0xff] }
 0x297   : > { %v6074_v54 = vpop.permute.xlu0 %1227  ;;  %v1435_v47 = vsel %vm1430_vm10, %v1410_v10, %v5954_v13  ;;  %v9915_v10 = vld [vmem:[#allocation69_spill] sm:$0xff]  ;;  %v1300_v57 = vsel %vm287_vm0, %v4595_v62, %v9916_v9  ;;  %v9925_v9 = vld [vmem:[#allocation70_spill] sm:$0xff] }
 0x298   : > { %v1460_v12 = vsel %vm1455_vm12, %v1435_v47, %v1218_v60 }
 0x299   : > { %4466 = vmatmul.msk.f32.gmra.mxu0 %vm1483_vm11, %v1459_v48  ;;  %v9912_v48 = vld [vmem:[#allocation79_spill] sm:$0xff] }
 0x29a   : > { %v1361_v46 = vsel %vm1355_vm7, %v1336_v49, %v9912_v48  ;;  %v9917_v48 = vld [vmem:[#allocation30_spill] sm:$0xff] }
 0x29b   : > { %v1386_v13 = vsel %vm1380_vm8, %v1361_v46, %v5714_v50  ;;  %v9914_v50 = vld [vmem:[#allocation52_spill] sm:$0xff]  ;;  %v9918_v46 = vld [vmem:[#allocation63_spill] sm:$0xff] }
 0x29c   : > { %v1411_v60 = vsel %vm1405_vm9, %v1386_v13, %v5815_v11  ;;  %v1312_v11 = vsel %vm1305_vm5, %v1287_v15, %v9914_v50  ;;  %v9919_v13 = vld [vmem:[#allocation54_spill] sm:$0xff] }
 0x29d   : > { %v1436_v26 = vsel %vm1430_vm10, %v1411_v60, %v5931_v58  ;;  %v1337_v47 = vsel %vm1330_vm6, %v1312_v11, %v9915_v10 }
 0x29e   : > { %v6082_v44 = vpop.permute.xlu1 %1229  ;;  %v1461_v30 = vsel %vm1455_vm12, %v1436_v26, %v1220_v33  ;;  %v6140_v26 = vpop.permute.xlu2 %1243 }
 0x29f   : > { %v6100_v40 = vpop.permute.xlu0 %1233 }
 0x2a1   : > { %4467 = vmatmul.msk.f32.gmra.mxu0 %vm1483_vm11, %v1460_v12  ;;  %v1362_v12 = vsel %vm1355_vm7, %v1337_v47, %v5668_v27  ;;  %v4596_v27 = vld [vmem:[#allocation2 + $0x70] sm:$0xff] }
 0x2a2   : > { %v1387_v58 = vsel %vm1380_vm8, %v1362_v12, %v5770_v0  ;;  %v1288_v0 = vsel %vm287_vm0, %v4596_v27, %v9917_v48  ;;  %v4597_v12 = vld [vmem:[#allocation2 + $0x180] sm:$0xff] }
 0x2a3   : > { %v1412_v33 = vsel %vm1405_vm9, %v1387_v58, %v5869_v28  ;;  %v1325_v28 = vsel %vm1305_vm5, %v1300_v57, %v9918_v46 }
 0x2a4   : > { %v1437_v39 = vsel %vm1430_vm10, %v1412_v33, %v5956_v31  ;;  %v1313_v31 = vsel %vm1305_vm5, %v1288_v0, %v9919_v13  ;;  %v1350_v60 = vsel %vm1330_vm6, %v1325_v28, %v5625_v45  ;;  %v9927_v0 = vld [vmem:[#allocation82_spill] sm:$0xff] }
 0x2a5   : > { %v1462_v49 = vsel %vm1455_vm12, %v1437_v39, %v1222_v6  ;;  %v1375_v21 = vsel %vm1355_vm7, %v1350_v60, %v5730_v16 }
 0x2a6   : > { %v6102_v55 = vpop.permute.xlu1 %1235  ;;  %v1400_v15 = vsel %vm1380_vm8, %v1375_v21, %v5830_v41  ;;  %v9921_v41 = vld [vmem:[#allocation29_spill] sm:$0xff]  ;;  %v1250_v13 = vpop.permute.xlu2 %1249 }
 0x2a7   : > { %v6128_v53 = vpop.permute.xlu0 %1239  ;;  %v1425_v45 = vsel %vm1405_vm9, %v1400_v15, %v5927_v14  ;;  %v1301_v58 = vsel %vm287_vm0, %v4597_v12, %v9921_v41  ;;  %v4598_v14 = vld [vmem:[#allocation2 + $0xa0] sm:$0xff] }
 0x2a8   : > { %v1450_v10 = vsel %vm1430_vm10, %v1425_v45, %v5994_v5  ;;  %v9923_v5 = vld [vmem:[#allocation53_spill] sm:$0xff]  ;;  %v9930_v45 = vld [vmem:[#allocation64_spill] sm:$0xff] }
 0x2a9   : > { %4468 = vmatmul.msk.f32.gmra.mxu0 %vm1483_vm11, %v1461_v30  ;;  %v9920_v30 = vld [vmem:[#allocation71_spill] sm:$0xff]  ;;  %v1326_v39 = vsel %vm1305_vm5, %v1301_v58, %v9923_v5  ;;  %v9935_v41 = vld [vmem:[#allocation88_spill] sm:$0xff] }
 0x2aa   : > { %v1338_v6 = vsel %vm1330_vm6, %v1313_v31, %v9920_v30  ;;  %v1351_v57 = vsel %vm1330_vm6, %v1326_v39, %v9925_v9 }
 0x2ab   : > { %v1363_v52 = vsel %vm1355_vm7, %v1338_v6, %v5678_v29  ;;  %v1376_v48 = vsel %vm1355_vm7, %v1351_v57, %v5676_v23 }
 0x2ac   : > { %v1388_v50 = vsel %vm1380_vm8, %v1363_v52, %v5780_v2  ;;  %v1401_v28 = vsel %vm1380_vm8, %v1376_v48, %v5778_v35  ;;  %v4599_v52 = vld [vmem:[#allocation2 + $0x190] sm:$0xff]  ;;  %v9928_v35 = vld [vmem:[#allocation43_spill] sm:$0xff] }
 0x2ad   : > { %v1413_v11 = vsel %vm1405_vm9, %v1388_v50, %v5881_v7  ;;  %v9922_v7 = vld [vmem:[#allocation18_spill] sm:$0xff]  ;;  %v1426_v60 = vsel %vm1405_vm9, %v1401_v28, %v5887_v59  ;;  %v1302_v15 = vsel %vm287_vm0, %v4599_v52, %v9928_v35  ;;  %v9929_v50 = vld [vmem:[#allocation31_spill] sm:$0xff]  ;;  %v9940_v28 = vld [vmem:[#allocation65_spill] sm:$0xff] }
 0x2ae   : > { %v6122_v61 = vpop.permute.xlu1 %1241  ;;  %v1438_v16 = vsel %vm1430_vm10, %v1413_v11, %v5958_v43  ;;  %v1289_v33 = vsel %vm287_vm0, %v4598_v14, %v9922_v7  ;;  %v9924_v43 = vld [vmem:[#allocation41_spill] sm:$0xff]  ;;  %v1451_v6 = vsel %vm1430_vm10, %v1426_v60, %v5986_v38  ;;  %v4600_v59 = vld [vmem:[#allocation2 + $0xb0] sm:$0xff]  ;;  %v1327_v38 = vsel %vm1305_vm5, %v1302_v15, %v9930_v45 }
 0x2af   : > { %v1463_v2 = vsel %vm1455_vm12, %v1438_v16, %v6060_v25  ;;  %v1314_v62 = vsel %vm1305_vm5, %v1289_v33, %v9924_v43  ;;  %v9926_v25 = vld [vmem:[#allocation62_spill] sm:$0xff]  ;;  %v1476_v21 = vsel %vm1455_vm12, %v1451_v6, %v1250_v13  ;;  %v9933_v16 = vld [vmem:[#allocation72_spill] sm:$0xff]  ;;  %v9937_v33 = vld [vmem:[#allocation101_spill] sm:$0xff] }
 0x2b0   : > { %v1339_v27 = vsel %vm1330_vm6, %v1314_v62, %v9926_v25  ;;  %v4601_v25 = vld [vmem:[#allocation2 + $0x1a0] sm:$0xff]  ;;  %v9944_v6 = vld [vmem:[#allocation98_spill] sm:$0xff] }
 0x2b1   : > { %4469 = vmatmul.msk.f32.gmra.mxu0 %vm1483_vm11, %v1462_v49  ;;  %v6175_v49 = vpop.permute.xlu0 %1245  ;;  %v1364_v46 = vsel %vm1355_vm7, %v1339_v27, %v9927_v0  ;;  %v9938_v27 = vld [vmem:[#allocation45_spill] sm:$0xff]  ;;  %v9946_v35 = vld [vmem:[#allocation14_spill] sm:$0xff] }
 0x2b2   : > { %v1389_v31 = vsel %vm1380_vm8, %v1364_v46, %v5728_v22  ;;  %v1303_v48 = vsel %vm287_vm0, %v4601_v25, %v9938_v27  ;;  %v9939_v46 = vld [vmem:[#allocation33_spill] sm:$0xff] }
 0x2b3   : > { %v1414_v30 = vsel %vm1405_vm9, %v1389_v31, %v5828_v37  ;;  %v1290_v37 = vsel %vm287_vm0, %v4600_v59, %v9929_v50  ;;  %v9942_v31 = vld [vmem:[#allocation85_spill] sm:$0xff]  ;;  %v9947_v59 = vld [vmem:[#allocation103_spill] sm:$0xff] }
 0x2b4   : > { %v1439_v23 = vsel %vm1430_vm10, %v1414_v30, %v5942_v8  ;;  %v9931_v8 = vld [vmem:[#allocation55_spill] sm:$0xff]  ;;  %v9943_v30 = vld [vmem:[#allocation74_spill] sm:$0xff] }
 0x2b5   : > { %v1464_v22 = vsel %vm1455_vm12, %v1439_v23, %v6054_v17  ;;  %v1315_v11 = vsel %vm1305_vm5, %v1290_v37, %v9931_v8 }
 0x2b6   : > { %v1248_v47 = vpop.permute.xlu1 %1247  ;;  %v1340_v17 = vsel %vm1330_vm6, %v1315_v11, %v9933_v16 }
 0x2b7   : > { %v1475_v29 = vsel %vm1455_vm12, %v1450_v10, %v1248_v47  ;;  %v9932_v10 = vld [vmem:[#allocation83_spill] sm:$0xff]  ;;  %v1365_v58 = vsel %vm1355_vm7, %v1340_v17, %v9935_v41 }
 0x2b8   : > { %4482 = vmatmul.msk.f32.vlgmr.msra.gmra.mxu3 %vm1483_vm11, %v1475_v29  ;;  %v1352_v47 = vsel %vm1330_vm6, %v1327_v38, %v9932_v10  ;;  %v9934_v29 = vld [vmem:[#allocation96_spill] sm:$0xff]  ;;  %v1390_v5 = vsel %vm1380_vm8, %v1365_v58, %v9937_v33  ;;  %v4603_v10 = vld [vmem:[#allocation2 + $0x1b0] sm:$0xff]  ;;  %v9952_v58 = vld [vmem:[#allocation73_spill] sm:$0xff] }
 0x2b9   : > { %4470 = vmatmul.msk.f32.gmra.mxu0 %vm1483_vm11, %v1463_v2  ;;  %v1377_v12 = vsel %vm1355_vm7, %v1352_v47, %v9934_v29  ;;  %v9936_v2 = vld [vmem:[#allocation16_spill] sm:$0xff]  ;;  %v1252_v7 = vpop.permute.xlu0 %1251  ;;  %v1415_v43 = vsel %vm1405_vm9, %v1390_v5, %v5883_v19  ;;  %v9949_v29 = vld [vmem:[#allocation22_spill] sm:$0xff] }
 0x2ba   : > { %v1402_v14 = vsel %vm1380_vm8, %v1377_v12, %v9936_v2  ;;  %v1440_v9 = vsel %vm1430_vm10, %v1415_v43, %v5960_v51  ;;  %v9941_v51 = vld [vmem:[#allocation6_spill] sm:$0xff]  ;;  %v9948_v47 = vld [vmem:[#allocation32_spill] sm:$0xff] }
 0x2bb   : > { %v1427_v39 = vsel %vm1405_vm9, %v1402_v14, %v5929_v36  ;;  %v1465_v0 = vsel %vm1455_vm12, %v1440_v9, %v6074_v54  ;;  %v4602_v36 = vld [vmem:[#allocation2 + $0xc0] sm:$0xff]  ;;  %v1304_v16 = vsel %vm287_vm0, %v4603_v10, %v9948_v47  ;;  %v9953_v14 = vld [vmem:[#allocation10_spill] sm:$0xff]  ;;  %v1256_v9 = vpop.permute.xlu2 %1255 }
 0x2bc   : > { %v1452_v62 = vsel %vm1430_vm10, %v1427_v39, %v5996_v3  ;;  %v1291_v19 = vsel %vm287_vm0, %v4602_v36, %v9939_v46  ;;  %v1328_v3 = vsel %vm1305_vm5, %v1303_v48, %v9940_v28  ;;  %v9950_v12 = vld [vmem:[#allocation4_spill] sm:$0xff]  ;;  %v9956_v43 = vld [vmem:[#allocation102_spill] sm:$0xff] }
 0x2bd   : > { %v1477_v57 = vsel %vm1455_vm12, %v1452_v62, %v1252_v7  ;;  %v1316_v13 = vsel %vm1305_vm5, %v1291_v19, %v9941_v51  ;;  %v1353_v60 = vsel %vm1330_vm6, %v1328_v3, %v9942_v31  ;;  %v9954_v7 = vld [vmem:[#allocation89_spill] sm:$0xff]  ;;  %v9955_v5 = vld [vmem:[#allocation84_spill] sm:$0xff]  ;;  %v9959_v51 = vld [vmem:[#allocation34_spill] sm:$0xff] }
 0x2be   : > { %v1341_v54 = vsel %vm1330_vm6, %v1316_v13, %v9943_v30  ;;  %v1378_v23 = vsel %vm1355_vm7, %v1353_v60, %v9944_v6  ;;  %v9958_v48 = vld [vmem:[#allocation12_spill] sm:$0xff]  ;;  %v9971_v10 = vld [vmem:[#allocation106_spill] sm:$0xff] }
 0x2bf   : > { %v1403_v15 = vsel %vm1380_vm8, %v1378_v23, %v9946_v35  ;;  %v4605_v3 = vld [vmem:[#allocation2 + $0xe0] sm:$0xff]  ;;  %v9964_v23 = vld [vmem:[#allocation111_spill] sm:$0xff]  ;;  %v4606_v35 = vld [vmem:[#allocation2 + $0xf0] sm:$0xff] }
 0x2c0   : > { %4483 = vmatmul.msk.f32.gmra.mxu3 %vm1483_vm11, %v1476_v21  ;;  %v9945_v21 = vld [vmem:[#allocation90_spill] sm:$0xff]  ;;  %v1428_v37 = vsel %vm1405_vm9, %v1403_v15, %v5939_v24  ;;  %v9960_v13 = vld [vmem:[#allocation56_spill] sm:$0xff] }
 0x2c1   : > { %4471 = vmatmul.msk.f32.gmra.mxu0 %vm1483_vm11, %v1464_v22  ;;  %v1366_v52 = vsel %vm1355_vm7, %v1341_v54, %v9945_v21  ;;  %v1254_v22 = vpop.permute.xlu1 %1253  ;;  %v1453_v38 = vsel %vm1430_vm10, %v1428_v37, %v6010_v4  ;;  %v4604_v24 = vld [vmem:[#allocation2 + $0xd0] sm:$0xff]  ;;  %v1329_v4 = vsel %vm1305_vm5, %v1304_v16, %v9950_v12  ;;  %v9963_v54 = vld [vmem:[#allocation104_spill] sm:$0xff]  ;;  %v9967_v37 = vld [vmem:[#allocation77_spill] sm:$0xff] }
 0x2c2   : > { %v1391_v50 = vsel %vm1380_vm8, %v1366_v52, %v9947_v59  ;;  %v1478_v11 = vsel %vm1455_vm12, %v1453_v38, %v1254_v22  ;;  %v1354_v2 = vsel %vm1330_vm6, %v1329_v4, %v9952_v58  ;;  %v9965_v15 = vld [vmem:[#allocation36_spill] sm:$0xff]  ;;  %v9966_v59 = vld [vmem:[#allocation57_spill] sm:$0xff]  ;;  %v9974_v4 = vld [vmem:[#allocation47_spill] sm:$0xff] }
 0x2c3   : > { %v1416_v45 = vsel %vm1405_vm9, %v1391_v50, %v5894_v42  ;;  %v1292_v42 = vsel %vm287_vm0, %v4604_v24, %v9949_v29  ;;  %v1379_v33 = vsel %vm1355_vm7, %v1354_v2, %v9954_v7  ;;  %v1294_v22 = vsel %vm287_vm0, %v4606_v35, %v9965_v15  ;;  %v9969_v38 = vld [vmem:[#allocation92_spill] sm:$0xff]  ;;  %v9972_v16 = vld [vmem:[#allocation113_spill] sm:$0xff]  ;;  %v9976_v58 = vld [vmem:[#allocation86_spill] sm:$0xff] }
 0x2c4   : > { %v1441_v8 = vsel %vm1430_vm10, %v1416_v45, %v5973_v18  ;;  %v9951_v18 = vld [vmem:[#allocation44_spill] sm:$0xff]  ;;  %v1404_v62 = vsel %vm1380_vm8, %v1379_v33, %v9956_v43  ;;  %v1319_v50 = vsel %vm1305_vm5, %v1294_v22, %v9966_v59  ;;  %v9968_v45 = vmov 0.0   ;;  %v9978_v7 = vld [vmem:[#allocation17_spill] sm:$0xff]  ;;  %v9993_v59 = vld [vmem:[#allocation115_spill] sm:$0xff] }
 0x2c5   : > { %v1466_v17 = vsel %vm1455_vm12, %v1441_v8, %v6082_v44  ;;  %v1317_v41 = vsel %vm1305_vm5, %v1292_v42, %v9951_v18  ;;  %v1429_v27 = vsel %vm1405_vm9, %v1404_v62, %v5904_v1  ;;  %v1293_v1 = vsel %vm287_vm0, %v4605_v3, %v9959_v51  ;;  %1725 = vst.msk [vmem:[#allocation3 + $0x10] sm:$0xff] %vm1721_vm13, %v9968_v45  ;;  %v9970_v8 = vld [vmem:[#allocation11_spill] sm:$0xff]  ;;  %v4607_v29 = vld [vmem:[#allocation2 + $0x100] sm:$0xff]  ;;  %v4608_v62 = vld [vmem:[#allocation2 + $0x110] sm:$0xff] }
 0x2c6   : > { %v1342_v44 = vsel %vm1330_vm6, %v1317_v41, %v9953_v14  ;;  %v1454_v36 = vsel %vm1430_vm10, %v1429_v27, %v5992_v32  ;;  %v1318_v31 = vsel %vm1305_vm5, %v1293_v1, %v9960_v13  ;;  %v9961_v32 = vld [vmem:[#allocation75_spill] sm:$0xff]  ;;  %1726 = vst.msk [vmem:[#allocation3 + $0x18] sm:$0x3] %vm1723_vm14, %v9968_v45  ;;  %v9975_v41 = vld [vmem:[#allocation13_spill] sm:$0xff]  ;;  %v9986_v51 = vld [vmem:[#allocation114_spill] sm:$0xff] }
 0x2c7   : > { %v1367_v39 = vsel %vm1355_vm7, %v1342_v44, %v9955_v5  ;;  %v1479_v19 = vsel %vm1455_vm12, %v1454_v36, %v1256_v9  ;;  %v1343_v60 = vsel %vm1330_vm6, %v1318_v31, %v9961_v32  ;;  %1722 = vst.msk [vmem:[#allocation3] sm:$0xff] %vm1721_vm13, %v9968_v45  ;;  %v9973_v42 = vld [vmem:[#allocation23_spill] sm:$0xff]  ;;  %v9979_v5 = vld [vmem:[#allocation110_spill] sm:$0xff]  ;;  %v9980_v9 = vld [vmem:[#allocation37_spill] sm:$0xff] }
 0x2c8   : > { %4484 = vmatmul.msk.f32.gmra.mxu3 %vm1483_vm11, %v1477_v57  ;;  %v9957_v57 = vld [vmem:[#allocation97_spill] sm:$0xff]  ;;  %1724 = vst.msk [vmem:[#allocation3 + $0x8] sm:$0x3] %vm1723_vm14, %v9968_v45  ;;  %v1295_v12 = vsel %vm287_vm0, %v4607_v29, %v9973_v42  ;;  %v9977_v14 = vld [vmem:[#allocation99_spill] sm:$0xff]  ;;  %v4609_v31 = vld [vmem:[#allocation2 + $0x140] sm:$0xff] }
 0x2c9   : > { %4472 = vmatmul.msk.f32.gmra.mxu0 %vm1483_vm11, %v1465_v0  ;;  %v1392_v25 = vsel %vm1380_vm8, %v1367_v39, %v9957_v57  ;;  %1727 = vst.msk [vmem:[#allocation3 + $0x20] sm:$0xff] %vm1721_vm13, %v9968_v45  ;;  %v1320_v18 = vsel %vm1305_vm5, %v1295_v12, %v9974_v4  ;;  %v1296_v57 = vsel %vm287_vm0, %v4608_v62, %v9980_v9  ;;  %v9987_v32 = vld [vmem:[#allocation39_spill] sm:$0xff]  ;;  %v9992_v35 = vld [vmem:[#allocation108_spill] sm:$0xff]  ;;  %v10003_v9 = vld [vmem:[#allocation61_spill] sm:$0xff] }
 0x2ca   : > { %v1417_v0 = vsel %vm1405_vm9, %v1392_v25, %v9958_v48  ;;  %1728 = vst.msk [vmem:[#allocation3 + $0x28] sm:$0x3] %vm1723_vm14, %v9968_v45  ;;  %v9981_v25 = vld [vmem:[#allocation58_spill] sm:$0xff]  ;;  %v9998_v4 = vld [vmem:[#allocation87_spill] sm:$0xff] }
 0x2cb   : > { %v1442_v46 = vsel %vm1430_vm10, %v1417_v0, %v5952_v34  ;;  %v9962_v34 = vld [vmem:[#allocation91_spill] sm:$0xff]  ;;  %1729 = vst.msk [vmem:[#allocation3 + $0x30] sm:$0xff] %vm1721_vm13, %v9968_v45  ;;  %v1321_v27 = vsel %vm1305_vm5, %v1296_v57, %v9981_v25  ;;  %v9982_v48 = vld [vmem:[#allocation78_spill] sm:$0xff]  ;;  %v9983_v0 = vld [vmem:[#allocation93_spill] sm:$0xff] }
 0x2cc   : > { %v1467_v28 = vsel %vm1455_vm12, %v1442_v46, %v6080_v56  ;;  %v1368_v30 = vsel %vm1355_vm7, %v1343_v60, %v9962_v34  ;;  %1730 = vst.msk [vmem:[#allocation3 + $0x38] sm:$0x3] %vm1723_vm14, %v9968_v45  ;;  %v9984_v46 = vld [vmem:[#allocation5_spill] sm:$0xff]  ;;  %v1297_v60 = vsel %vm287_vm0, %v4609_v31, %v9987_v32  ;;  %v9988_v34 = vld [vmem:[#allocation60_spill] sm:$0xff] }
 0x2cd   : > { %v1393_v56 = vsel %vm1380_vm8, %v1368_v30, %v9963_v54  ;;  %1731 = vst.msk [vmem:[#allocation3 + $0x40] sm:$0xff] %vm1721_vm13, %v9968_v45  ;;  %v1322_v30 = vsel %vm1305_vm5, %v1297_v60, %v9988_v34  ;;  %v9989_v54 = vld [vmem:[#allocation80_spill] sm:$0xff]  ;;  %v10004_v25 = vld [vmem:[#allocation81_spill] sm:$0xff] }
 0x2ce   : > { %v1418_v6 = vsel %vm1405_vm9, %v1393_v56, %v5896_v63  ;;  %v1344_v63 = vsel %vm1330_vm6, %v1319_v50, %v9967_v37  ;;  %1732 = vst.msk [vmem:[#allocation3 + $0x48] sm:$0x3] %vm1723_vm14, %v9968_v45  ;;  %v6424_v56 = vld [vmem:[%s9604_s2] ss:$0 sm:$0xff] }
 0x2cf   : > { %v1443_v21 = vsel %vm1430_vm10, %v1418_v6, %v9964_v23  ;;  %1733 = vst.msk [vmem:[#allocation3 + $0x50] sm:$0xff] %vm1721_vm13, %v9968_v45  ;;  %v9990_v6 = vld [vmem:[#allocation94_spill] sm:$0xff]  ;;  %v10008_v31 = vld [vmem:[#allocation116_spill] sm:$0xff] }
 0x2d0   : > { %4485 = vmatmul.msk.f32.gmra.mxu3 %vm1483_vm11, %v1478_v11  ;;  %v1468_v52 = vsel %vm1455_vm12, %v1443_v21, %v6100_v40  ;;  %v1369_v40 = vsel %vm1355_vm7, %v1344_v63, %v9969_v38  ;;  %1734 = vst.msk [vmem:[#allocation3 + $0x58] sm:$0x3] %vm1723_vm14, %v9968_v45  ;;  %v9991_v21 = vld [vmem:[#allocation9_spill] sm:$0xff]  ;;  %v4610_v38 = vld [vmem:[#allocation2 + $0x150] sm:$0xff] }
 0x2d1   : > { %4473 = vmatmul.msk.f32.gmra.mxu0 %vm1483_vm11, %v1466_v17  ;;  %v1394_v11 = vsel %vm1380_vm8, %v1369_v40, %v9970_v8  ;;  %1735 = vst.msk [vmem:[#allocation3 + $0x60] sm:$0xff] %vm1721_vm13, %v9968_v45  ;;  %v9994_v40 = vld [vmem:[#allocation26_spill] sm:$0xff] }
 0x2d2   : > { %v1419_v47 = vsel %vm1405_vm9, %v1394_v11, %v9971_v10  ;;  %1736 = vst.msk [vmem:[#allocation3 + $0x68] sm:$0x3] %vm1723_vm14, %v9968_v45  ;;  %v1298_v8 = vsel %vm287_vm0, %v4610_v38, %v9994_v40  ;;  %v9995_v10 = vld [vmem:[#allocation50_spill] sm:$0xff] }
 0x2d3   : > { %v1444_v17 = vsel %vm1430_vm10, %v1419_v47, %v9972_v16  ;;  %1737 = vst.msk [vmem:[#allocation3 + $0x70] sm:$0xff] %vm1721_vm13, %v9968_v45  ;;  %v1323_v47 = vsel %vm1305_vm5, %v1298_v8, %v9995_v10  ;;  %v6458_v16 = vld [vmem:[#allocation3] sm:$0xff] }
 0x2d4   : > { %v1469_v24 = vsel %vm1455_vm12, %v1444_v17, %v6102_v55  ;;  %v1345_v55 = vsel %vm1330_vm6, %v1320_v18, %v9975_v41  ;;  %1738 = vst.msk [vmem:[#allocation3 + $0x78] sm:$0x3] %vm1723_vm14, %v9968_v45  ;;  %v9996_v17 = vld [vmem:[#allocation15_spill] sm:$0xff]  ;;  %v1926_v42 = vrot.slane %v6458_v16, 1  ;;  %v9999_v41 = vld [vmem:[#allocation100_spill] sm:$0xff] }
 0x2d5   : > { %v1370_v2 = vsel %vm1355_vm7, %v1345_v55, %v9976_v58  ;;  %1739 = vst.msk [vmem:[#allocation3 + $0x80] sm:$0xff] %vm1721_vm13, %v9968_v45 }
 0x2d6   : > { %v1395_v44 = vsel %vm1380_vm8, %v1370_v2, %v9977_v14  ;;  %1740 = vst.msk [vmem:[#allocation3 + $0x88] sm:$0x3] %vm1723_vm14, %v9968_v45  ;;  %v10000_v2 = vld [vmem:[#allocation105_spill] sm:$0xff] }
 0x2d7   : > { %v1420_v33 = vsel %vm1405_vm9, %v1395_v44, %v9978_v7  ;;  %1741 = vst.msk [vmem:[#allocation3 + $0x90] sm:$0xff] %vm1721_vm13, %v9968_v45  ;;  %v10001_v7 = vld [vmem:[#allocation112_spill] sm:$0xff] }
 0x2d8   : > { %4486 = vmatmul.msk.f32.gmra.mxu3 %vm1483_vm11, %v1479_v19  ;;  %v1445_v39 = vsel %vm1430_vm10, %v1420_v33, %v9979_v5  ;;  %1742 = vst.msk [vmem:[#allocation3 + $0x98] sm:$0x3] %vm1723_vm14, %v9968_v45 }
 0x2d9   : > { %4474 = vmatmul.msk.f32.gmra.mxu0 %vm1483_vm11, %v1467_v28  ;;  %v1470_v43 = vsel %vm1455_vm12, %v1445_v39, %v6106_v20  ;;  %v1346_v20 = vsel %vm1330_vm6, %v1321_v27, %v9982_v48  ;;  %v9985_v28 = vld [vmem:[#allocation107_spill] sm:$0xff]  ;;  %1743 = vst.msk [vmem:[#allocation3 + $0xa0] sm:$0xff] %vm1721_vm13, %v9968_v45  ;;  %v4611_v39 = vld [vmem:[#allocation2 + $0x160] sm:$0xff] }
 0x2da   : > { %v1371_v36 = vsel %vm1355_vm7, %v1346_v20, %v9983_v0  ;;  %1744 = vst.msk [vmem:[#allocation3 + $0xa8] sm:$0x3] %vm1723_vm14, %v9968_v45  ;;  %v10005_v20 = vld [vmem:[#allocation95_spill] sm:$0xff] }
 0x2db   : > { %v1396_v19 = vsel %vm1380_vm8, %v1371_v36, %v9984_v46  ;;  %1745 = vst.msk [vmem:[#allocation3 + $0xb0] sm:$0xff] %vm1721_vm13, %v9968_v45 }
 0x2dc   : > { %v1421_v3 = vsel %vm1405_vm9, %v1396_v19, %v9985_v28  ;;  %1746 = vst.msk [vmem:[#allocation3 + $0xb8] sm:$0x3] %vm1723_vm14, %v9968_v45  ;;  %v10006_v19 = vld [vmem:[#allocation7_spill] sm:$0xff] }
 0x2dd   : > { %v1446_v1 = vsel %vm1430_vm10, %v1421_v3, %v9986_v51  ;;  %1747 = vst.msk [vmem:[#allocation3 + $0xc0] sm:$0xff] %vm1721_vm13, %v9968_v45  ;;  %v10007_v3 = vld [vmem:[#allocation109_spill] sm:$0xff] }
 0x2de   : > { %v1471_v13 = vsel %vm1455_vm12, %v1446_v1, %v6128_v53  ;;  %v1347_v53 = vsel %vm1330_vm6, %v1322_v30, %v9989_v54  ;;  %1748 = vst.msk [vmem:[#allocation3 + $0xc8] sm:$0x3] %vm1723_vm14, %v9968_v45 }
 0x2df   : > { %v1372_v23 = vsel %vm1355_vm7, %v1347_v53, %v9990_v6  ;;  %1749 = vst.msk [vmem:[#allocation3 + $0xd0] sm:$0xff] %vm1721_vm13, %v9968_v45 }
 0x2e0   : > { %1750 = vst.msk [vmem:[#allocation3 + $0xd8] sm:$0x3] %vm1723_vm14, %v9968_v45 }
 0x2e1   : > { %4475 = vmatmul.msk.f32.gmra.mxu0 %vm1483_vm11, %v1468_v52  ;;  %v1397_v52 = vsel %vm1380_vm8, %v1372_v23, %v9991_v21  ;;  %1751 = vst.msk [vmem:[#allocation3 + $0xe0] sm:$0xff] %vm1721_vm13, %v9968_v45 }
 0x2e2   : > { %v1422_v15 = vsel %vm1405_vm9, %v1397_v52, %v9992_v35  ;;  %1752 = vst.msk [vmem:[#allocation3 + $0xe8] sm:$0x3] %vm1723_vm14, %v9968_v45 }
 0x2e3   : > { %v1447_v50 = vsel %vm1430_vm10, %v1422_v15, %v9993_v59  ;;  %1753 = vst.msk [vmem:[#allocation3 + $0xf0] sm:$0xff] %vm1721_vm13, %v9968_v45 }
 0x2e4   : > { %v1472_v63 = vsel %vm1455_vm12, %v1447_v50, %v6122_v61  ;;  %1754 = vst.msk [vmem:[#allocation3 + $0xf8] sm:$0x3] %vm1723_vm14, %v9968_v45  ;;  %v6460_v61 = vld [vmem:[#allocation3 + $0x8] sm:$0x3] }
 0x2e5   : > { %1755 = vst.msk [vmem:[#allocation3 + $0x100] sm:$0xff] %vm1721_vm13, %v9968_v45  ;;  %v1927_v12 = vrot.slane %v6460_v61, 1 }
 0x2e6   : > { %1756 = vst.msk [vmem:[#allocation3 + $0x108] sm:$0x3] %vm1723_vm14, %v9968_v45 }
 0x2e7   : > { %v1928_v58 = vsel %vm511_vm2, %v1926_v42, %v1927_v12  ;;  %1757 = vst.msk [vmem:[#allocation3 + $0x110] sm:$0xff] %vm1721_vm13, %v9968_v45 }
 0x2e8   : > { %2118 = vrot.lane.b32.xlu0 %v1928_v58, %s4665_s29  ;;  %1758 = vst.msk [vmem:[#allocation3 + $0x118] sm:$0x3] %vm1723_vm14, %v9968_v45 }
 0x2e9   : > { %4476 = vmatmul.msk.f32.gmra.mxu0 %vm1483_vm11, %v1469_v24  ;;  %v1348_v24 = vsel %vm1330_vm6, %v1323_v47, %v9996_v17  ;;  %1759 = vst.msk [vmem:[#allocation3 + $0x120] sm:$0xff] %vm1721_vm13, %v9968_v45 }
 0x2ea   : > { %v1373_v18 = vsel %vm1355_vm7, %v1348_v24, %v9998_v4  ;;  %1760 = vst.msk [vmem:[#allocation3 + $0x128] sm:$0x3] %vm1723_vm14, %v9968_v45 }
 0x2eb   : > { %v1398_v55 = vsel %vm1380_vm8, %v1373_v18, %v9999_v41  ;;  %1761 = vst.msk [vmem:[#allocation3 + $0x130] sm:$0xff] %vm1721_vm13, %v9968_v45 }
 0x2ec   : > { %v1423_v14 = vsel %vm1405_vm9, %v1398_v55, %v10000_v2  ;;  %1762 = vst.msk [vmem:[#allocation3 + $0x138] sm:$0x3] %vm1723_vm14, %v9968_v45 }
 0x2ed   : > { %v1448_v33 = vsel %vm1430_vm10, %v1423_v14, %v10001_v7  ;;  %1763 = vst.msk [vmem:[#allocation3 + $0x140] sm:$0xff] %vm1721_vm13, %v9968_v45 }
 0x2ee   : > { %v1473_v5 = vsel %vm1455_vm12, %v1448_v33, %v6140_v26  ;;  %1764 = vst.msk [vmem:[#allocation3 + $0x148] sm:$0x3] %vm1723_vm14, %v9968_v45 }
 0x2ef   : > { %1765 = vst.msk [vmem:[#allocation3 + $0x150] sm:$0xff] %vm1721_vm13, %v9968_v45 }
 0x2f0   : > { %1766 = vst.msk [vmem:[#allocation3 + $0x158] sm:$0x3] %vm1723_vm14, %v9968_v45 }
 0x2f1   : > { %4477 = vmatmul.msk.f32.gmra.mxu0 %vm1483_vm11, %v1470_v43  ;;  %v10002_v43 = vld [vmem:[#allocation40_spill] sm:$0xff]  ;;  %1767 = vst.msk [vmem:[#allocation3 + $0x160] sm:$0xff] %vm1721_vm13, %v9968_v45 }
 0x2f2   : > { %v1299_v62 = vsel %vm287_vm0, %v4611_v39, %v10002_v43  ;;  %1768 = vst.msk [vmem:[#allocation3 + $0x168] sm:$0x3] %vm1723_vm14, %v9968_v45 }
 0x2f3   : > { %v1324_v57 = vsel %vm1305_vm5, %v1299_v62, %v10003_v9  ;;  %1769 = vst.msk [vmem:[#allocation3 + $0x170] sm:$0xff] %vm1721_vm13, %v9968_v45 }
 0x2f4   : > { %v1349_v27 = vsel %vm1330_vm6, %v1324_v57, %v10004_v25  ;;  %1770 = vst.msk [vmem:[#allocation3 + $0x178] sm:$0x3] %vm1723_vm14, %v9968_v45 }
 0x2f5   : > { %v1374_v0 = vsel %vm1355_vm7, %v1349_v27, %v10005_v20  ;;  %1771 = vst.msk [vmem:[#allocation3 + $0x180] sm:$0xff] %vm1721_vm13, %v9968_v45 }
 0x2f6   : > { %v1399_v28 = vsel %vm1380_vm8, %v1374_v0, %v10006_v19  ;;  %1772 = vst.msk [vmem:[#allocation3 + $0x188] sm:$0x3] %vm1723_vm14, %v9968_v45 }
 0x2f7   : > { %v1424_v51 = vsel %vm1405_vm9, %v1399_v28, %v10007_v3  ;;  %1773 = vst.msk [vmem:[#allocation3 + $0x190] sm:$0xff] %vm1721_vm13, %v9968_v45 }
 0x2f8   : > { %v1449_v32 = vsel %vm1430_vm10, %v1424_v51, %v10008_v31  ;;  %1774 = vst.msk [vmem:[#allocation3 + $0x198] sm:$0x3] %vm1723_vm14, %v9968_v45 }
 0x2f9   : > { %4478 = vmatmul.msk.f32.gmra.mxu0 %vm1483_vm11, %v1471_v13  ;;  %v1474_v60 = vsel %vm1455_vm12, %v1449_v32, %v6175_v49  ;;  %1775 = vst.msk [vmem:[#allocation3 + $0x1a0] sm:$0xff] %vm1721_vm13, %v9968_v45 }
 0x2fa   : > { %1776 = vst.msk [vmem:[#allocation3 + $0x1a8] sm:$0x3] %vm1723_vm14, %v9968_v45 }
 0x2fb   : > { %1777 = vst.msk [vmem:[#allocation3 + $0x1b0] sm:$0xff] %vm1721_vm13, %v9968_v45 }
 0x2fc   : > { %1778 = vst.msk [vmem:[#allocation3 + $0x1b8] sm:$0x3] %vm1723_vm14, %v9968_v45 }
 0x2fd   : > { %1779 = vst.msk [vmem:[#allocation3 + $0x1c0] sm:$0xff] %vm1721_vm13, %v9968_v45 }
 0x2fe   : > { %v1577_v22 = vpop.f32.mrf.mxu0  ;;  %1780 = vst.msk [vmem:[#allocation3 + $0x1c8] sm:$0x3] %vm1723_vm14, %v9968_v45 }
 0x2ff   : > { %v1578_v37 = vadd.f32 %v6424_v56, %v1577_v22  ;;  %1781 = vst.msk [vmem:[#allocation3 + $0x1d0] sm:$0xff] %vm1721_vm13, %v9968_v45 }
 0x300   : > { %1782 = vst.msk [vmem:[#allocation3 + $0x1d8] sm:$0x3] %vm1723_vm14, %v9968_v45 }
 0x301   : > { %vm1649_vm15 = vcmp.ge.f32.partialorder %v1578_v37, 0.0  ;;  %v1673_v11 = vmul.f32 0.1, %v1578_v37  ;;  %4479 = vmatmul.msk.f32.gmra.mxu0 %vm1483_vm11, %v1472_v63 }
 0x303   : > { %v6464_v29 = vsel %vm1649_vm15, %v1578_v37, %v1673_v11 }
 0x304   : > { %9997 = vst [vmem:[#allocation21_spill] sm:$0xff] %v6464_v29 }
 0x305   : > { %1784 = vst.msk [vmem:[#allocation3 + $0x11] sm:$0xff] %vm1721_vm13, %v6464_v29 }
 0x306   : > { %v1580_v44 = vpop.f32.mrf.mxu0 }
 0x307   : > { %v1581_v34 = vadd.f32 %v6424_v56, %v1580_v44 }
 0x309   : > { %4480 = vmatmul.msk.f32.gmra.mxu0 %vm1483_vm11, %v1473_v5  ;;  %v1674_v53 = vmul.f32 0.1, %v1581_v34  ;;  %vm1650_vm0 = vcmp.ge.f32.partialorder %v1581_v34, 0.0 }
 0x30b   : > { %v6566_v21 = vsel %vm1650_vm0, %v1581_v34, %v1674_v53  ;;  %v6664_v34 = vld [vmem:[#allocation3 + $0xa0] sm:$0xff] }
 0x30c   : > { %v6505_v26 = vld [vmem:[#allocation3 + $0x10] sm:$0xff]  ;;  %v6507_v48 = vld [vmem:[#allocation3 + $0x18] sm:$0x3]  ;;  %10009 = vst [vmem:[#allocation46_spill] sm:$0xff] %v6566_v21 }
 0x30d   : > { %v1929_v36 = vrot.slane %v6505_v26, 1  ;;  %v1930_v46 = vrot.slane %v6507_v48, 1  ;;  %1785 = vst.msk [vmem:[#allocation3 + $0x21] sm:$0xff] %vm1721_vm13, %v6566_v21 }
 0x30e   : > { %v1583_v1 = vpop.f32.mrf.mxu0 }
 0x30f   : > { %v6524_v13 = vsel %vm511_vm2, %v1929_v36, %v1930_v46  ;;  %v1584_v49 = vadd.f32 %v6424_v56, %v1583_v1 }
 0x310   : > { %2120 = vrot.lane.b32.xlu1 %v6524_v13, %s4665_s29 }
 0x311   : > { %4481 = vmatmul.msk.f32.gmra.mxu0 %vm1483_vm11, %v1474_v60  ;;  %v1675_v6 = vmul.f32 0.1, %v1584_v49  ;;  %vm1651_vm1 = vcmp.ge.f32.partialorder %v1584_v49, 0.0 }
 0x313   : > { %v6570_v52 = vsel %vm1651_vm1, %v1584_v49, %v1675_v6  ;;  %v6666_v49 = vld [vmem:[#allocation3 + $0xa8] sm:$0x3] }
 0x314   : > { %10010 = vst [vmem:[#allocation66_spill] sm:$0xff] %v6570_v52  ;;  %v6587_v37 = vld [vmem:[#allocation3 + $0x20] sm:$0xff]  ;;  %v6589_v63 = vld [vmem:[#allocation3 + $0x28] sm:$0x3] }
 0x315   : > { %1786 = vst.msk [vmem:[#allocation3 + $0x31] sm:$0xff] %vm1721_vm13, %v6570_v52  ;;  %v1932_v40 = vrot.slane %v6587_v37, 1  ;;  %v1933_v8 = vrot.slane %v6589_v63, 1 }
 0x316   : > { %v1586_v30 = vpop.f32.mrf.mxu0 }
 0x317   : > { %v1587_v54 = vadd.f32 %v6424_v56, %v1586_v30  ;;  %v6603_v12 = vsel %vm511_vm2, %v1932_v40, %v1933_v8  ;;  %v1950_v30 = vrot.slane %v6664_v34, 1 }
 0x318   : > { %2122 = vrot.lane.b32.xlu2 %v6603_v12, %s4665_s29 }
 0x319   : > { %v1676_v23 = vmul.f32 0.1, %v1587_v54  ;;  %vm1652_vm4 = vcmp.ge.f32.partialorder %v1587_v54, 0.0 }
 0x31b   : > { %v6574_v15 = vsel %vm1652_vm4, %v1587_v54, %v1676_v23  ;;  %v1951_v54 = vrot.slane %v6666_v49, 1 }
 0x31c   : > { %10011 = vst [vmem:[#allocation25_spill] sm:$0xff] %v6574_v15  ;;  %v6594_v11 = vld [vmem:[#allocation3 + $0x30] sm:$0xff]  ;;  %v6596_v10 = vld [vmem:[#allocation3 + $0x38] sm:$0x3] }
 0x31d   : > { %1787 = vst.msk [vmem:[#allocation3 + $0x41] sm:$0xff] %vm1721_vm13, %v6574_v15  ;;  %v1935_v47 = vrot.slane %v6594_v11, 1  ;;  %v1936_v17 = vrot.slane %v6596_v10, 1 }
 0x31e   : > { %v1589_v35 = vpop.f32.mrf.mxu0 }
 0x31f   : > { %v1590_v22 = vadd.f32 %v6424_v56, %v1589_v35  ;;  %v6611_v41 = vsel %vm511_vm2, %v1935_v47, %v1936_v17 }
 0x320   : > { %2124 = vrot.lane.b32.xlu0 %v6611_v41, %s4665_s29 }
 0x321   : > { %vm1653_vm5 = vcmp.ge.f32.partialorder %v1590_v22, 0.0  ;;  %v1677_v59 = vmul.f32 0.1, %v1590_v22 }
 0x323   : > { %v6583_v50 = vsel %vm1653_vm5, %v1590_v22, %v1677_v59  ;;  %v1952_v22 = vsel %vm511_vm2, %v1950_v30, %v1951_v54 }
 0x324   : > { %10012 = vst [vmem:[#allocation48_spill] sm:$0xff] %v6583_v50  ;;  %v6600_v42 = vld [vmem:[#allocation3 + $0x40] sm:$0xff]  ;;  %v6605_v4 = vld [vmem:[#allocation3 + $0x48] sm:$0x3] }
 0x325   : > { %1788 = vst.msk [vmem:[#allocation3 + $0x51] sm:$0xff] %vm1721_vm13, %v6583_v50  ;;  %v1938_v18 = vrot.slane %v6600_v42, 1  ;;  %v1939_v58 = vrot.slane %v6605_v4, 1 }
 0x326   : > { %v1592_v45 = vpop.f32.mrf.mxu0 }
 0x327   : > { %v1593_v38 = vadd.f32 %v6424_v56, %v1592_v45  ;;  %v6627_v33 = vsel %vm511_vm2, %v1938_v18, %v1939_v58 }
 0x328   : > { %2126 = vrot.lane.b32.xlu1 %v6627_v33, %s4665_s29 }
 0x329   : > { %vm1654_vm6 = vcmp.ge.f32.partialorder %v1593_v38, 0.0  ;;  %v1678_v24 = vmul.f32 0.1, %v1593_v38 }
 0x32b   : > { %v6613_v55 = vsel %vm1654_vm6, %v1593_v38, %v1678_v24 }
 0x32c   : > { %10013 = vst [vmem:[#allocation24_spill] sm:$0xff] %v6613_v55  ;;  %v6616_v2 = vld [vmem:[#allocation3 + $0x50] sm:$0xff]  ;;  %v6618_v14 = vld [vmem:[#allocation3 + $0x58] sm:$0x3] }
 0x32d   : > { %1789 = vst.msk [vmem:[#allocation3 + $0x61] sm:$0xff] %vm1721_vm13, %v6613_v55  ;;  %v1941_v44 = vrot.slane %v6616_v2, 1  ;;  %v1942_v7 = vrot.slane %v6618_v14, 1 }
 0x32e   : > { %v1595_v5 = vpop.f32.mrf.mxu0 }
 0x32f   : > { %v1596_v39 = vadd.f32 %v6424_v56, %v1595_v5  ;;  %v6633_v43 = vsel %vm511_vm2, %v1941_v44, %v1942_v7 }
 0x330   : > { %2128 = vrot.lane.b32.xlu2 %v6633_v43, %s4665_s29 }
 0x331   : > { %vm1655_vm7 = vcmp.ge.f32.partialorder %v1596_v39, 0.0  ;;  %v1679_v62 = vmul.f32 0.1, %v1596_v39 }
 0x333   : > { %v6635_v9 = vsel %vm1655_vm7, %v1596_v39, %v1679_v62 }
 0x334   : > { %10014 = vst [vmem:[#allocation35_spill] sm:$0xff] %v6635_v9  ;;  %v6639_v57 = vld [vmem:[#allocation3 + $0x60] sm:$0xff]  ;;  %v6641_v25 = vld [vmem:[#allocation3 + $0x68] sm:$0x3] }
 0x335   : > { %1790 = vst.msk [vmem:[#allocation3 + $0x71] sm:$0xff] %vm1721_vm13, %v6635_v9  ;;  %v1944_v27 = vrot.slane %v6639_v57, 1  ;;  %v1945_v20 = vrot.slane %v6641_v25, 1 }
 0x336   : > { %v1598_v0 = vpop.f32.mrf.mxu0 }
 0x337   : > { %v6648_v36 = vsel %vm511_vm2, %v1944_v27, %v1945_v20  ;;  %v1599_v46 = vadd.f32 %v6424_v56, %v1598_v0 }
 0x338   : > { %2130 = vrot.lane.b32.xlu0 %v6648_v36, %s4665_s29  ;;  %2134 = vrot.lane.b32.xlu2 %v1952_v22, %s4665_s29 }
 0x339   : > { %vm1656_vm8 = vcmp.ge.f32.partialorder %v1599_v46, 0.0  ;;  %v1680_v19 = vmul.f32 0.1, %v1599_v46 }
 0x33b   : > { %v6653_v28 = vsel %vm1656_vm8, %v1599_v46, %v1680_v19  ;;  %v1634_v3 = vpop.f32.mrf.mxu3 }
 0x33c   : > { %10015 = vst [vmem:[#allocation8_spill] sm:$0xff] %v6653_v28  ;;  %v6655_v51 = vld [vmem:[#allocation3 + $0x70] sm:$0xff]  ;;  %v6657_v1 = vld [vmem:[#allocation3 + $0x78] sm:$0x3]  ;;  %v1635_v31 = vadd.f32 %v6424_v56, %v1634_v3 }
 0x33d   : > { %1791 = vst.msk [vmem:[#allocation3 + $0x81] sm:$0xff] %vm1721_vm13, %v6653_v28  ;;  %v1947_v32 = vrot.slane %v6655_v51, 1  ;;  %v1948_v60 = vrot.slane %v6657_v1, 1 }
 0x33e   : > { %vm1668_vm9 = vcmp.ge.f32.partialorder %v1635_v31, 0.0  ;;  %v1692_v53 = vmul.f32 0.1, %v1635_v31  ;;  %v1601_v6 = vpop.f32.mrf.mxu0 }
 0x33f   : > { %v6671_v23 = vsel %vm511_vm2, %v1947_v32, %v1948_v60  ;;  %v1602_v35 = vadd.f32 %v6424_v56, %v1601_v6 }
 0x340   : > { %2132 = vrot.lane.b32.xlu1 %v6671_v23, %s4665_s29  ;;  %v6677_v59 = vsel %vm1668_vm9, %v1635_v31, %v1692_v53 }
 0x341   : > { %10016 = vst [vmem:[#allocation76_spill] sm:$0xff] %v6677_v59  ;;  %vm1657_vm10 = vcmp.ge.f32.partialorder %v1602_v35, 0.0  ;;  %v1681_v45 = vmul.f32 0.1, %v1602_v35 }
 0x342   : > { %1803 = vst.msk [vmem:[#allocation3 + $0x181] sm:$0xff] %vm1721_vm13, %v6677_v59 }
 0x343   : > { %v6682_v38 = vsel %vm1657_vm10, %v1602_v35, %v1681_v45  ;;  %v1637_v40 = vpop.f32.mrf.mxu3 }
 0x344   : > { %10017 = vst [vmem:[#allocation27_spill] sm:$0xff] %v6682_v38  ;;  %v1638_v8 = vadd.f32 %v6424_v56, %v1637_v40 }
 0x345   : > { %1792 = vst.msk [vmem:[#allocation3 + $0xb1] sm:$0xff] %vm1721_vm13, %v6682_v38 }
 0x346   : > { %vm1669_vm11 = vcmp.ge.f32.partialorder %v1638_v8, 0.0  ;;  %v1693_v47 = vmul.f32 0.1, %v1638_v8  ;;  %v1604_v17 = vpop.f32.mrf.mxu0 }
 0x347   : > { %v1605_v24 = vadd.f32 %v6424_v56, %v1604_v17 }
 0x348   : > { %v6688_v18 = vsel %vm1669_vm11, %v1638_v8, %v1693_v47 }
 0x349   : > { %10018 = vst [vmem:[#allocation49_spill] sm:$0xff] %v6688_v18  ;;  %vm1658_vm14 = vcmp.ge.f32.partialorder %v1605_v24, 0.0  ;;  %v1682_v58 = vmul.f32 0.1, %v1605_v24 }
 0x34a   : > { %1804 = vst.msk [vmem:[#allocation3 + $0x191] sm:$0xff] %vm1721_vm13, %v6688_v18 }
 0x34b   : > { %v6692_v44 = vsel %vm1658_vm14, %v1605_v24, %v1682_v58  ;;  %v1640_v7 = vpop.f32.mrf.mxu3 }
 0x34c   : > { %10019 = vst [vmem:[#allocation67_spill] sm:$0xff] %v6692_v44  ;;  %v6694_v5 = vld [vmem:[#allocation3 + $0xb0] sm:$0xff]  ;;  %v6696_v39 = vld [vmem:[#allocation3 + $0xb8] sm:$0x3]  ;;  %v1641_v62 = vadd.f32 %v6424_v56, %v1640_v7 }
 0x34d   : > { %1793 = vst.msk [vmem:[#allocation3 + $0xc1] sm:$0xff] %vm1721_vm13, %v6692_v44  ;;  %v1953_v27 = vrot.slane %v6694_v5, 1  ;;  %v1954_v20 = vrot.slane %v6696_v39, 1 }
 0x34e   : > { %vm1670_vm15 = vcmp.ge.f32.partialorder %v1641_v62, 0.0  ;;  %v1694_v0 = vmul.f32 0.1, %v1641_v62  ;;  %v1607_v46 = vpop.f32.mrf.mxu0 }
 0x34f   : > { %v6704_v19 = vsel %vm511_vm2, %v1953_v27, %v1954_v20  ;;  %v1608_v3 = vadd.f32 %v6424_v56, %v1607_v46 }
 0x350   : > { %10020 = vst [vmem:[#allocation19_spill] sm:$0xff] %v6704_v19  ;;  %2136 = vrot.lane.b32.xlu0 %v6704_v19, %s4665_s29  ;;  %v6709_v31 = vsel %vm1670_vm15, %v1641_v62, %v1694_v0  ;;  %vm2718_vm15 = vcmask 130048  }
 0x351   : > { %10021 = vst [vmem:[#allocation51_spill] sm:$0xff] %v6709_v31  ;;  %vm1659_vm0 = vcmp.ge.f32.partialorder %v1608_v3, 0.0  ;;  %v1683_v32 = vmul.f32 0.1, %v1608_v3 }
 0x352   : > { %1805 = vst.msk [vmem:[#allocation3 + $0x1a1] sm:$0xff] %vm1721_vm13, %v6709_v31 }
 0x353   : > { %v6713_v60 = vsel %vm1659_vm0, %v1608_v3, %v1683_v32  ;;  %v1643_v30 = vpop.f32.mrf.mxu3  ;;  %vm2767_vm0 = vcmask 261120  }
 0x354   : > { %10022 = vst [vmem:[#allocation68_spill] sm:$0xff] %v6713_v60  ;;  %v6715_v54 = vld [vmem:[#allocation3 + $0xc0] sm:$0xff]  ;;  %v6717_v53 = vld [vmem:[#allocation3 + $0xc8] sm:$0x3]  ;;  %v1644_v6 = vadd.f32 %v6424_v56, %v1643_v30 }
 0x355   : > { %1794 = vst.msk [vmem:[#allocation3 + $0xd1] sm:$0xff] %vm1721_vm13, %v6713_v60  ;;  %v1956_v35 = vrot.slane %v6715_v54, 1  ;;  %v1957_v22 = vrot.slane %v6717_v53, 1 }
 0x356   : > { %vm1671_vm1 = vcmp.ge.f32.partialorder %v1644_v6, 0.0  ;;  %v1695_v45 = vmul.f32 0.1, %v1644_v6  ;;  %v1610_v40 = vpop.f32.mrf.mxu0 }
 0x357   : > { %v6725_v8 = vsel %vm511_vm2, %v1956_v35, %v1957_v22  ;;  %v1611_v47 = vadd.f32 %v6424_v56, %v1610_v40 }
 0x358   : > { %10023 = vst [vmem:[#allocation20_spill] sm:$0xff] %v6725_v8  ;;  %2138 = vrot.lane.b32.xlu1 %v6725_v8, %s4665_s29  ;;  %v6730_v17 = vsel %vm1671_vm1, %v1644_v6, %v1695_v45  ;;  %vm2792_vm1 = vcmask 326656  }
 0x359   : > { %10024 = vst [vmem:[#allocation38_spill] sm:$0xff] %v6730_v17  ;;  %vm1660_vm4 = vcmp.ge.f32.partialorder %v1611_v47, 0.0  ;;  %v1684_v24 = vmul.f32 0.1, %v1611_v47  ;;  %v6905_v8 = vld [vmem:[#allocation3 + $0x1a0] sm:$0xff] }
 0x35a   : > { %1806 = vst.msk [vmem:[#allocation3 + $0x1b1] sm:$0xff] %vm1721_vm13, %v6730_v17  ;;  %v6907_v19 = vld [vmem:[#allocation3 + $0x1a8] sm:$0x3] }
 0x35b   : > { %v6734_v58 = vsel %vm1660_vm4, %v1611_v47, %v1684_v24  ;;  %v1646_v7 = vpop.f32.mrf.mxu3  ;;  %vm2817_vm4 = vcmask 392192  }
 0x35c   : > { %10025 = vst [vmem:[#allocation59_spill] sm:$0xff] %v6734_v58  ;;  %v6736_v62 = vld [vmem:[#allocation3 + $0xd0] sm:$0xff]  ;;  %v6738_v27 = vld [vmem:[#allocation3 + $0xd8] sm:$0x3]  ;;  %v1647_v20 = vadd.f32 %v6424_v56, %v1646_v7 }
 0x35d   : > { %1795 = vst.msk [vmem:[#allocation3 + $0xe1] sm:$0xff] %vm1721_vm13, %v6734_v58  ;;  %v1959_v0 = vrot.slane %v6736_v62, 1  ;;  %v1960_v46 = vrot.slane %v6738_v27, 1 }
 0x35e   : > { %vm1672_vm5 = vcmp.ge.f32.partialorder %v1647_v20, 0.0  ;;  %v1696_v3 = vmul.f32 0.1, %v1647_v20  ;;  %v1613_v32 = vpop.f32.mrf.mxu0 }
 0x35f   : > { %v6746_v30 = vsel %vm511_vm2, %v1959_v0, %v1960_v46  ;;  %v1614_v6 = vadd.f32 %v6424_v56, %v1613_v32 }
 0x360   : > { %10026 = vst [vmem:[#allocation79_spill] sm:$0xff] %v6746_v30  ;;  %2140 = vrot.lane.b32.xlu2 %v6746_v30, %s4665_s29  ;;  %v6751_v35 = vsel %vm1672_vm5, %v1647_v20, %v1696_v3  ;;  %vm2842_vm5 = vcmask 457728  }
 0x361   : > { %10027 = vst [vmem:[#allocation28_spill] sm:$0xff] %v6751_v35  ;;  %vm1661_vm6 = vcmp.ge.f32.partialorder %v1614_v6, 0.0  ;;  %v1685_v22 = vmul.f32 0.1, %v1614_v6 }
 0x362   : > { %1807 = vst.msk [vmem:[#allocation3 + $0x1c1] sm:$0xff] %vm1721_vm13, %v6751_v35 }
 0x363   : > { %v6755_v45 = vsel %vm1661_vm6, %v1614_v6, %v1685_v22  ;;  %vm2895_vm6 = vcmask 588800  }
 0x364   : > { %10028 = vst [vmem:[#allocation52_spill] sm:$0xff] %v6755_v45  ;;  %v6757_v40 = vld [vmem:[#allocation3 + $0xe0] sm:$0xff]  ;;  %v6759_v47 = vld [vmem:[#allocation3 + $0xe8] sm:$0x3] }
 0x365   : > { %1796 = vst.msk [vmem:[#allocation3 + $0xf1] sm:$0xff] %vm1721_vm13, %v6755_v45  ;;  %v1962_v24 = vrot.slane %v6757_v40, 1  ;;  %v1963_v7 = vrot.slane %v6759_v47, 1 }
 0x366   : > { %v1616_v20 = vpop.f32.mrf.mxu0 }
 0x367   : > { %v6766_v0 = vsel %vm511_vm2, %v1962_v24, %v1963_v7  ;;  %v1617_v46 = vadd.f32 %v6424_v56, %v1616_v20 }
 0x368   : > { %10029 = vst [vmem:[#allocation69_spill] sm:$0xff] %v6766_v0  ;;  %2142 = vrot.lane.b32.xlu0 %v6766_v0, %s4665_s29 }
 0x369   : > { %vm1662_vm7 = vcmp.ge.f32.partialorder %v1617_v46, 0.0  ;;  %v1686_v3 = vmul.f32 0.1, %v1617_v46 }
 0x36b   : > { %v6771_v32 = vsel %vm1662_vm7, %v1617_v46, %v1686_v3  ;;  %vm2867_vm7 = vcmask 523264  }
 0x36c   : > { %10030 = vst [vmem:[#allocation42_spill] sm:$0xff] %v6771_v32  ;;  %v6773_v6 = vld [vmem:[#allocation3 + $0xf0] sm:$0xff]  ;;  %v6775_v22 = vld [vmem:[#allocation3 + $0xf8] sm:$0x3] }
 0x36d   : > { %1797 = vst.msk [vmem:[#allocation3 + $0x101] sm:$0xff] %vm1721_vm13, %v6771_v32  ;;  %v1965_v35 = vrot.slane %v6773_v6, 1  ;;  %v1966_v24 = vrot.slane %v6775_v22, 1 }
 0x36e   : > { %v1619_v7 = vpop.f32.mrf.mxu0 }
 0x36f   : > { %v6782_v20 = vsel %vm511_vm2, %v1965_v35, %v1966_v24  ;;  %v1620_v17 = vadd.f32 %v6424_v56, %v1619_v7 }
 0x370   : > { %10031 = vst [vmem:[#allocation30_spill] sm:$0xff] %v6782_v20  ;;  %2144 = vrot.lane.b32.xlu1 %v6782_v20, %s4665_s29 }
 0x371   : > { %vm1663_vm8 = vcmp.ge.f32.partialorder %v1620_v17, 0.0  ;;  %v1687_v46 = vmul.f32 0.1, %v1620_v17 }
 0x373   : > { %v6787_v3 = vsel %vm1663_vm8, %v1620_v17, %v1687_v46 }
 0x374   : > { %10032 = vst [vmem:[#allocation63_spill] sm:$0xff] %v6787_v3  ;;  %v6789_v31 = vld [vmem:[#allocation3 + $0x100] sm:$0xff]  ;;  %v6791_v18 = vld [vmem:[#allocation3 + $0x108] sm:$0x3] }
 0x375   : > { %1798 = vst.msk [vmem:[#allocation3 + $0x111] sm:$0xff] %vm1721_vm13, %v6787_v3  ;;  %v1968_v59 = vrot.slane %v6789_v31, 1  ;;  %v1969_v35 = vrot.slane %v6791_v18, 1 }
 0x376   : > { %v1622_v24 = vpop.f32.mrf.mxu0 }
 0x377   : > { %v6798_v7 = vsel %vm511_vm2, %v1968_v59, %v1969_v35  ;;  %v1623_v32 = vadd.f32 %v6424_v56, %v1622_v24 }
 0x378   : > { %10033 = vst [vmem:[#allocation54_spill] sm:$0xff] %v6798_v7  ;;  %2146 = vrot.lane.b32.xlu2 %v6798_v7, %s4665_s29 }
 0x379   : > { %vm1664_vm9 = vcmp.ge.f32.partialorder %v1623_v32, 0.0  ;;  %v1688_v17 = vmul.f32 0.1, %v1623_v32 }
 0x37b   : > { %v6803_v46 = vsel %vm1664_vm9, %v1623_v32, %v1688_v17  ;;  %v6819_v32 = vld [vmem:[#allocation3 + $0x140] sm:$0xff]  ;;  %v6821_v17 = vld [vmem:[#allocation3 + $0x148] sm:$0x3] }
 0x37c   : > { %10034 = vst [vmem:[#allocation71_spill] sm:$0xff] %v6803_v46  ;;  %v6805_v45 = vld [vmem:[#allocation3 + $0x110] sm:$0xff]  ;;  %v6807_v3 = vld [vmem:[#allocation3 + $0x118] sm:$0x3]  ;;  %v1974_v44 = vrot.slane %v6819_v32, 1 }
 0x37d   : > { %1799 = vst.msk [vmem:[#allocation3 + $0x121] sm:$0xff] %vm1721_vm13, %v6803_v46  ;;  %v1971_v58 = vrot.slane %v6805_v45, 1  ;;  %v1972_v59 = vrot.slane %v6807_v3, 1  ;;  %v1975_v46 = vrot.slane %v6821_v17, 1 }
 0x37e   : > { %v1625_v35 = vpop.f32.mrf.mxu0 }
 0x37f   : > { %v6814_v24 = vsel %vm511_vm2, %v1971_v58, %v1972_v59  ;;  %v1626_v60 = vadd.f32 %v6424_v56, %v1625_v35  ;;  %v1976_v28 = vsel %vm511_vm2, %v1974_v44, %v1975_v46 }
 0x380   : > { %10035 = vst [vmem:[#allocation29_spill] sm:$0xff] %v6814_v24  ;;  %2148 = vrot.lane.b32.xlu0 %v6814_v24, %s4665_s29  ;;  %2150 = vrot.lane.b32.xlu1 %v1976_v28, %s4665_s29 }
 0x381   : > { %vm1665_vm10 = vcmp.ge.f32.partialorder %v1626_v60, 0.0  ;;  %v1689_v38 = vmul.f32 0.1, %v1626_v60 }
 0x383   : > { %v6826_v9 = vsel %vm1665_vm10, %v1626_v60, %v1689_v38 }
 0x384   : > { %10036 = vst [vmem:[#allocation18_spill] sm:$0xff] %v6826_v9 }
 0x385   : > { %1800 = vst.msk [vmem:[#allocation3 + $0x151] sm:$0xff] %vm1721_vm13, %v6826_v9 }
 0x386   : > { %v1628_v58 = vpop.f32.mrf.mxu0 }
 0x387   : > { %v1629_v59 = vadd.f32 %v6424_v56, %v1628_v58  ;;  %v6848_v58 = vld [vmem:[#allocation3 + $0x180] sm:$0xff] }
 0x389   : > { %vm1666_vm11 = vcmp.ge.f32.partialorder %v1629_v59, 0.0  ;;  %v1690_v35 = vmul.f32 0.1, %v1629_v59 }
 0x38b   : > { %v6832_v55 = vsel %vm1666_vm11, %v1629_v59, %v1690_v35  ;;  %v6850_v59 = vld [vmem:[#allocation3 + $0x188] sm:$0x3] }
 0x38c   : > { %10037 = vst [vmem:[#allocation53_spill] sm:$0xff] %v6832_v55  ;;  %v6834_v50 = vld [vmem:[#allocation3 + $0x150] sm:$0xff]  ;;  %v6836_v15 = vld [vmem:[#allocation3 + $0x158] sm:$0x3]  ;;  %v1987_v9 = vrot.slane %v6850_v59, 1 }
 0x38d   : > { %1801 = vst.msk [vmem:[#allocation3 + $0x161] sm:$0xff] %vm1721_vm13, %v6832_v55  ;;  %v1977_v38 = vrot.slane %v6834_v50, 1  ;;  %v1978_v28 = vrot.slane %v6836_v15, 1  ;;  %v1986_v55 = vrot.slane %v6848_v58, 1 }
 0x38e   : > { %v1631_v44 = vpop.f32.mrf.mxu0 }
 0x38f   : > { %v6843_v60 = vsel %vm511_vm2, %v1977_v38, %v1978_v28  ;;  %v1632_v46 = vadd.f32 %v6424_v56, %v1631_v44  ;;  %v6868_v29 = vsel %vm511_vm2, %v1986_v55, %v1987_v9 }
 0x390   : > { %10038 = vst [vmem:[#allocation41_spill] sm:$0xff] %v6843_v60  ;;  %2152 = vrot.lane.b32.xlu2 %v6843_v60, %s4665_s29  ;;  %v6880_v60 = vld [vmem:[#allocation3 + $0x1b8] sm:$0x3] }
 0x391   : > { %vm1667_vm14 = vcmp.ge.f32.partialorder %v1632_v46, 0.0  ;;  %v1691_v35 = vmul.f32 0.1, %v1632_v46  ;;  %10041 = vst [vmem:[#allocation82_spill] sm:$0xff] %v6868_v29 }
 0x393   : > { %v6854_v52 = vsel %vm1667_vm14, %v1632_v46, %v1691_v35  ;;  %v6874_v46 = vld [vmem:[#allocation3 + $0x190] sm:$0xff]  ;;  %v6876_v35 = vld [vmem:[#allocation3 + $0x198] sm:$0x3] }
 0x394   : > { %10039 = vst [vmem:[#allocation70_spill] sm:$0xff] %v6854_v52  ;;  %v6856_v21 = vld [vmem:[#allocation3 + $0x160] sm:$0xff]  ;;  %v6858_v38 = vld [vmem:[#allocation3 + $0x168] sm:$0x3] }
 0x395   : > { %1802 = vst.msk [vmem:[#allocation3 + $0x171] sm:$0xff] %vm1721_vm13, %v6854_v52  ;;  %v1980_v56 = vrot.slane %v6856_v21, 1  ;;  %v1981_v28 = vrot.slane %v6858_v38, 1  ;;  %v6878_v52 = vld [vmem:[#allocation3 + $0x1b0] sm:$0xff] }
 0x397   : > { %v6865_v44 = vsel %vm511_vm2, %v1980_v56, %v1981_v28  ;;  %v1989_v56 = vrot.slane %v6874_v46, 1  ;;  %v1990_v28 = vrot.slane %v6876_v35, 1 }
 0x398   : > { %10040 = vst [vmem:[#allocation62_spill] sm:$0xff] %v6865_v44  ;;  %2154 = vrot.lane.b32.xlu0 %v6865_v44, %s4665_s29  ;;  %2158 = vrot.lane.b32.xlu2 %v6868_v29, %s4665_s29  ;;  %v1995_v44 = vrot.slane %v6878_v52, 1  ;;  %v1996_v29 = vrot.slane %v6880_v60, 1 }
 0x399   : > { %v6893_v30 = vsel %vm511_vm2, %v1989_v56, %v1990_v28  ;;  %v1998_v56 = vrot.slane %v6458_v16, 2  ;;  %v1993_v28 = vrot.slane %v6907_v19, 1 }
 0x39a   : > { %10042 = vst [vmem:[#allocation43_spill] sm:$0xff] %v6893_v30  ;;  %v6903_v0 = vsel %vm511_vm2, %v1995_v44, %v1996_v29  ;;  %v2005_v29 = vrot.slane %v6589_v63, 2  ;;  %v2008_v63 = vrot.slane %v6596_v10, 2  ;;  %v2023_v10 = vrot.slane %v6666_v49, 2 }
 0x39b   : > { %v2020_v49 = vrot.slane %v6657_v1, 2  ;;  %v2034_v1 = vrot.slane %v6757_v40, 2 }
 0x39c   : > { %v6884_v55 = vld [vmem:[#allocation3 + $0x170] sm:$0xff]  ;;  %v6886_v9 = vld [vmem:[#allocation3 + $0x178] sm:$0x3] }
 0x39d   : > { %v1983_v7 = vrot.slane %v6884_v55, 1  ;;  %v1984_v24 = vrot.slane %v6886_v9, 1 }
 0x39f   : > { %v6896_v20 = vsel %vm511_vm2, %v1983_v7, %v1984_v24  ;;  %v1999_v7 = vrot.slane %v6460_v61, 2  ;;  %v1992_v24 = vrot.slane %v6905_v8, 1  ;;  %v2007_v61 = vrot.slane %v6594_v11, 2 }
 0x3a0   : > { %10043 = vst [vmem:[#allocation31_spill] sm:$0xff] %v6896_v20  ;;  %2160 = vrot.lane.b32.xlu0 %v6893_v30, %s4665_s29  ;;  %2156 = vrot.lane.b32.xlu1 %v6896_v20, %s4665_s29  ;;  %v2004_v30 = vrot.slane %v6587_v37, 2 }
 0x3a1   : > { %2164 = vrot.lane.b32.xlu2 %v6903_v0, %s4665_s29  ;;  %v2000_v44 = vsel %vm584_vm3, %v1998_v56, %v1999_v7  ;;  %v6919_v20 = vsel %vm511_vm2, %v1992_v24, %v1993_v28  ;;  %v2001_v56 = vrot.slane %v6505_v26, 2  ;;  %v2002_v7 = vrot.slane %v6507_v48, 2 }
 0x3a2   : > { %v6923_v16 = vsel %vm584_vm3, %v2004_v30, %v2005_v29  ;;  %v2013_v24 = vrot.slane %v6616_v2, 2  ;;  %v2014_v28 = vrot.slane %v6618_v14, 2  ;;  %v6936_v30 = vsel %vm584_vm3, %v2007_v61, %v2008_v63 }
 0x3a3   : > { %v6939_v29 = vsel %vm584_vm3, %v2001_v56, %v2002_v7  ;;  %v2022_v48 = vrot.slane %v6664_v34, 2  ;;  %v2016_v14 = vrot.slane %v6639_v57, 2  ;;  %v2017_v61 = vrot.slane %v6641_v25, 2 }
 0x3a4   : > { %v2010_v63 = vrot.slane %v6600_v42, 2  ;;  %v2011_v56 = vrot.slane %v6605_v4, 2  ;;  %v2025_v25 = vrot.slane %v6694_v5, 2  ;;  %v2026_v4 = vrot.slane %v6696_v39, 2 }
 0x3a5   : > { %v2024_v7 = vsel %vm584_vm3, %v2022_v48, %v2023_v10  ;;  %v2019_v34 = vrot.slane %v6655_v51, 2  ;;  %v2031_v48 = vrot.slane %v6736_v62, 2  ;;  %v2032_v10 = vrot.slane %v6738_v27, 2 }
 0x3a6   : > { %v2035_v27 = vrot.slane %v6759_v47, 2 }
 0x3a7   : > { %v6985_v39 = vsel %vm584_vm3, %v2031_v48, %v2032_v10  ;;  %v2037_v10 = vrot.slane %v6773_v6, 2 }
 0x3a8   : > { %2190 = vrot.lane.b32.xlu0 %v2000_v44, %s4666_s30  ;;  %2162 = vrot.lane.b32.xlu1 %v6919_v20, %s4665_s29  ;;  %v6944_v44 = vsel %vm584_vm3, %v2013_v24, %v2014_v28  ;;  %v6958_v24 = vsel %vm584_vm3, %v2016_v14, %v2017_v61  ;;  %v6961_v28 = vsel %vm584_vm3, %v2010_v63, %v2011_v56  ;;  %v6980_v63 = vpop.permute.xlu2 %2122  ;;  %v2028_v56 = vrot.slane %v6715_v54, 2 }
 0x3a9   : > { %2194 = vrot.lane.b32.xlu2 %v6923_v16, %s4666_s30  ;;  %v6975_v14 = vsel %vm584_vm3, %v2025_v25, %v2026_v4  ;;  %v6978_v61 = vsel %vm584_vm3, %v2019_v34, %v2020_v49  ;;  %10044 = vst [vmem:[#allocation64_spill] sm:$0xff] %v6980_v63  ;;  %v2040_v25 = vrot.slane %v6789_v31, 2  ;;  %v2041_v4 = vrot.slane %v6791_v18, 2 }
 0x3aa   : > { %v6998_v34 = vsel %vm584_vm3, %v2034_v1, %v2035_v27  ;;  %v2043_v18 = vrot.slane %v6805_v45, 2  ;;  %v2038_v1 = vrot.slane %v6775_v22, 2  ;;  %v2049_v27 = vrot.slane %v6834_v50, 2 }
 0x3ab   : > { %v7008_v47 = vsel %vm584_vm3, %v2040_v25, %v2041_v4  ;;  %v2047_v22 = vrot.slane %v6821_v17, 2 }
 0x3ac   : > { %v7024_v25 = vsel %vm584_vm3, %v2037_v10, %v2038_v1  ;;  %v2058_v10 = vrot.slane %v6848_v58, 2  ;;  %v2059_v1 = vrot.slane %v6850_v59, 2  ;;  %v2061_v59 = vrot.slane %v6874_v46, 2 }
 0x3b0   : > { %2196 = vrot.lane.b32.xlu0 %v6936_v30, %s4666_s30  ;;  %2192 = vrot.lane.b32.xlu1 %v6939_v29, %s4666_s30  ;;  %v7003_v48 = vpop.permute.xlu2 %2128 }
 0x3b1   : > { %2200 = vrot.lane.b32.xlu2 %v6944_v44, %s4666_s30  ;;  %10045 = vst [vmem:[#allocation55_spill] sm:$0xff] %v7003_v48 }
 0x3b8   : > { %2202 = vrot.lane.b32.xlu0 %v6958_v24, %s4666_s30  ;;  %2198 = vrot.lane.b32.xlu1 %v6961_v28, %s4666_s30  ;;  %v7026_v4 = vpop.permute.xlu2 %2134 }
 0x3b9   : > { %2206 = vrot.lane.b32.xlu2 %v2024_v7, %s4666_s30  ;;  %v2029_v7 = vrot.slane %v6717_v53, 2  ;;  %v2044_v53 = vrot.slane %v6807_v3, 2  ;;  %10046 = vst [vmem:[#allocation83_spill] sm:$0xff] %v7026_v4  ;;  %v7047_v4 = vpop.permute.xlu0 %2118 }
 0x3ba   : > { %10047 = vst [vmem:[#allocation72_spill] sm:$0xff] %v7047_v4  ;;  %v10099_v4 = vld [vmem:[#allocation62_spill] sm:$0xff] }
 0x3bb   : > { %v7001_v49 = vsel %vm584_vm3, %v2028_v56, %v2029_v7  ;;  %v2050_v56 = vrot.slane %v6836_v15, 2  ;;  %v7021_v7 = vsel %vm584_vm3, %v2043_v18, %v2044_v53  ;;  %v2046_v15 = vrot.slane %v6819_v32, 2 }
 0x3bc   : > { %v2052_v18 = vrot.slane %v6856_v21, 2  ;;  %v2053_v53 = vrot.slane %v6858_v38, 2  ;;  %v7052_v32 = vsel %vm584_vm3, %v2058_v10, %v2059_v1  ;;  %v2062_v38 = vrot.slane %v6876_v35, 2 }
 0x3bd   : > { %v7031_v3 = vsel %vm584_vm3, %v2049_v27, %v2050_v56  ;;  %v2048_v27 = vsel %vm584_vm3, %v2046_v15, %v2047_v22  ;;  %v2055_v15 = vrot.slane %v6884_v55, 2  ;;  %v2056_v22 = vrot.slane %v6886_v9, 2 }
 0x3be   : > { %v7045_v56 = vsel %vm584_vm3, %v2052_v18, %v2053_v53  ;;  %v2067_v18 = vrot.slane %v6878_v52, 2  ;;  %v2068_v53 = vrot.slane %v6880_v60, 2  ;;  %v7066_v10 = vsel %vm584_vm3, %v2061_v59, %v2062_v38 }
 0x3bf   : > { %v7069_v1 = vsel %vm584_vm3, %v2055_v15, %v2056_v22  ;;  %v2064_v59 = vrot.slane %v6905_v8, 2  ;;  %v2065_v38 = vrot.slane %v6907_v19, 2 }
 0x3c0   : > { %2208 = vrot.lane.b32.xlu0 %v6975_v14, %s4666_s30  ;;  %2204 = vrot.lane.b32.xlu1 %v6978_v61, %s4666_s30  ;;  %v7057_v17 = vpop.permute.xlu2 %2140  ;;  %v7076_v35 = vsel %vm584_vm3, %v2067_v18, %v2068_v53 }
 0x3c1   : > { %2212 = vrot.lane.b32.xlu2 %v6985_v39, %s4666_s30  ;;  %10048 = vst [vmem:[#allocation96_spill] sm:$0xff] %v7057_v17  ;;  %v7082_v60 = vpop.permute.xlu0 %2124  ;;  %v7089_v15 = vsel %vm584_vm3, %v2064_v59, %v2065_v38  ;;  %v7127_v38 = vld [vmem:[#allocation3 + $0x80] sm:$0xff] }
 0x3c2   : > { %10050 = vst [vmem:[#allocation16_spill] sm:$0xff] %v7082_v60  ;;  %v10091_v60 = vld [vmem:[#allocation30_spill] sm:$0xff] }
 0x3c8   : > { %2214 = vrot.lane.b32.xlu0 %v6998_v34, %s4666_s30  ;;  %2210 = vrot.lane.b32.xlu1 %v7001_v49, %s4666_s30 }
 0x3c9   : > { %2218 = vrot.lane.b32.xlu2 %v7008_v47, %s4666_s30  ;;  %v7099_v18 = vpop.permute.xlu0 %2130 }
 0x3ca   : > { %10053 = vst [vmem:[#allocation33_spill] sm:$0xff] %v7099_v18 }
 0x3d0   : > { %2220 = vrot.lane.b32.xlu0 %v7021_v7, %s4666_s30  ;;  %2216 = vrot.lane.b32.xlu1 %v7024_v25, %s4666_s30 }
 0x3d1   : > { %2224 = vrot.lane.b32.xlu2 %v7031_v3, %s4666_s30 }
 0x3d2   : > { %v7084_v9 = vpop.permute.xlu2 %2146 }
 0x3d3   : > { %10051 = vst [vmem:[#allocation101_spill] sm:$0xff] %v7084_v9 }
 0x3d8   : > { %2226 = vrot.lane.b32.xlu0 %v7045_v56, %s4666_s30  ;;  %2222 = vrot.lane.b32.xlu1 %v2048_v27, %s4666_s30  ;;  %v7071_v27 = vpop.permute.xlu1 %2120 }
 0x3d9   : > { %2230 = vrot.lane.b32.xlu2 %v7052_v32, %s4666_s30  ;;  %10049 = vst [vmem:[#allocation88_spill] sm:$0xff] %v7071_v27 }
 0x3e0   : > { %2232 = vrot.lane.b32.xlu0 %v7066_v10, %s4666_s30  ;;  %2228 = vrot.lane.b32.xlu1 %v7069_v1, %s4666_s30  ;;  %v7091_v22 = vpop.permute.xlu1 %2126 }
 0x3e1   : > { %2236 = vrot.lane.b32.xlu2 %v7076_v35, %s4666_s30  ;;  %10052 = vst [vmem:[#allocation45_spill] sm:$0xff] %v7091_v22 }
 0x3e8   : > { %2262 = vrot.lane.b32.xlu0 %v6505_v26, %s4664_s15  ;;  %2234 = vrot.lane.b32.xlu1 %v7089_v15, %s4666_s30  ;;  %v7103_v9 = vpop.permute.xlu1 %2132  ;;  %v7111_v26 = vpop.permute.xlu0 %2136 }
 0x3e9   : > { %2266 = vrot.lane.b32.xlu2 %v6594_v11, %s4664_s15  ;;  %10055 = vst [vmem:[#allocation6_spill] sm:$0xff] %v7103_v9 }
 0x3ea   : > { %v7101_v53 = vpop.permute.xlu2 %2152  ;;  %10056 = vst [vmem:[#allocation85_spill] sm:$0xff] %v7111_v26 }
 0x3eb   : > { %10054 = vst [vmem:[#allocation65_spill] sm:$0xff] %v7101_v53 }
 0x3f0   : > { %2268 = vrot.lane.b32.xlu0 %v6600_v42, %s4664_s15  ;;  %2264 = vrot.lane.b32.xlu1 %v6587_v37, %s4664_s15  ;;  %v7115_v11 = vpop.permute.xlu1 %2138  ;;  %v7123_v59 = vpop.permute.xlu0 %2142 }
 0x3f1   : > { %2272 = vrot.lane.b32.xlu2 %v6639_v57, %s4664_s15  ;;  %10058 = vst [vmem:[#allocation98_spill] sm:$0xff] %v7115_v11  ;;  %v7153_v11 = vld [vmem:[#allocation3 + $0x120] sm:$0xff] }
 0x3f2   : > { %v7113_v19 = vpop.permute.xlu2 %2158  ;;  %10059 = vst [vmem:[#allocation90_spill] sm:$0xff] %v7123_v59 }
 0x3f3   : > { %10057 = vst [vmem:[#allocation74_spill] sm:$0xff] %v7113_v19 }
 0x3f8   : > { %2274 = vrot.lane.b32.xlu0 %v6655_v51, %s4664_s15  ;;  %2270 = vrot.lane.b32.xlu1 %v6616_v2, %s4664_s15  ;;  %v7129_v53 = vpop.permute.xlu1 %2144  ;;  %v7137_v17 = vpop.permute.xlu0 %2148 }
 0x3f9   : > { %2278 = vrot.lane.b32.xlu2 %v6694_v5, %s4664_s15  ;;  %10061 = vst [vmem:[#allocation103_spill] sm:$0xff] %v7129_v53 }
 0x3fa   : > { %10062 = vst [vmem:[#allocation32_spill] sm:$0xff] %v7137_v17 }
 0x3fb   : > { %v7125_v37 = vpop.permute.xlu2 %2164 }
 0x3fc   : > { %10060 = vst [vmem:[#allocation14_spill] sm:$0xff] %v7125_v37 }
 0x400   : > { %2280 = vrot.lane.b32.xlu0 %v6715_v54, %s4664_s15  ;;  %2276 = vrot.lane.b32.xlu1 %v7127_v38, %s4664_s15  ;;  %v7145_v53 = vpop.permute.xlu1 %2150 }
 0x401   : > { %2284 = vrot.lane.b32.xlu2 %v6757_v40, %s4664_s15  ;;  %10064 = vst [vmem:[#allocation4_spill] sm:$0xff] %v7145_v53 }
 0x403   : > { %v7139_v5 = vpop.permute.xlu2 %2194 }
 0x404   : > { %10063 = vst [vmem:[#allocation22_spill] sm:$0xff] %v7139_v5  ;;  %v10093_v5 = vld [vmem:[#allocation29_spill] sm:$0xff] }
 0x408   : > { %2286 = vrot.lane.b32.xlu0 %v6773_v6, %s4664_s15  ;;  %2282 = vrot.lane.b32.xlu1 %v6736_v62, %s4664_s15 }
 0x409   : > { %2290 = vrot.lane.b32.xlu2 %v6805_v45, %s4664_s15 }
 0x40a   : > { %v7149_v59 = vpop.permute.xlu0 %2154 }
 0x40b   : > { %10065 = vst [vmem:[#allocation44_spill] sm:$0xff] %v7149_v59  ;;  %v7151_v37 = vpop.permute.xlu2 %2200 }
 0x40c   : > { %10066 = vst [vmem:[#allocation73_spill] sm:$0xff] %v7151_v37 }
 0x410   : > { %2292 = vrot.lane.b32.xlu0 %v7153_v11, %s4664_s15  ;;  %2288 = vrot.lane.b32.xlu1 %v6789_v31, %s4664_s15 }
 0x411   : > { %2296 = vrot.lane.b32.xlu2 %v6856_v21, %s4664_s15 }
 0x412   : > { %v7161_v17 = vpop.permute.xlu1 %2156  ;;  %v7163_v53 = vpop.permute.xlu0 %2160 }
 0x413   : > { %10067 = vst [vmem:[#allocation10_spill] sm:$0xff] %v7161_v17  ;;  %v7165_v26 = vpop.permute.xlu2 %2206  ;;  %v7179_v17 = vld [vmem:[#allocation3 + $0x1c0] sm:$0xff] }
 0x414   : > { %10068 = vst [vmem:[#allocation89_spill] sm:$0xff] %v7163_v53 }
 0x415   : > { %10069 = vst [vmem:[#allocation84_spill] sm:$0xff] %v7165_v26 }
 0x418   : > { %2298 = vrot.lane.b32.xlu0 %v6884_v55, %s4664_s15  ;;  %2294 = vrot.lane.b32.xlu1 %v6834_v50, %s4664_s15 }
 0x419   : > { %2302 = vrot.lane.b32.xlu2 %v6874_v46, %s4664_s15 }
 0x41a   : > { %v7173_v19 = vpop.permute.xlu1 %2162  ;;  %v7175_v9 = vpop.permute.xlu0 %2190 }
 0x41b   : > { %10070 = vst [vmem:[#allocation102_spill] sm:$0xff] %v7173_v19  ;;  %v7177_v59 = vpop.permute.xlu2 %2212 }
 0x41c   : > { %10071 = vst [vmem:[#allocation97_spill] sm:$0xff] %v7175_v9  ;;  %v10098_v9 = vld [vmem:[#allocation54_spill] sm:$0xff] }
 0x41d   : > { %10072 = vst [vmem:[#allocation12_spill] sm:$0xff] %v7177_v59 }
 0x420   : > { %2304 = vrot.lane.b32.xlu0 %v6905_v8, %s4664_s15  ;;  %2300 = vrot.lane.b32.xlu1 %v6848_v58, %s4664_s15 }
 0x421   : > { %2308 = vrot.lane.b32.xlu2 %v7179_v17, %s4664_s15 }
 0x422   : > { %v7187_v50 = vpop.permute.xlu1 %2192  ;;  %v7189_v53 = vpop.permute.xlu0 %2196 }
 0x423   : > { %10073 = vst [vmem:[#allocation34_spill] sm:$0xff] %v7187_v50  ;;  %v7191_v19 = vpop.permute.xlu2 %2218 }
 0x424   : > { %10074 = vst [vmem:[#allocation56_spill] sm:$0xff] %v7189_v53  ;;  %v10086_v53 = vld [vmem:[#allocation20_spill] sm:$0xff] }
 0x425   : > { %10075 = vst [vmem:[#allocation75_spill] sm:$0xff] %v7191_v19 }
 0x428   : > { %2334 = vrot.lane.b32.xlu0 %v6524_v13, %s4667_s8  ;;  %2306 = vrot.lane.b32.xlu1 %v6878_v52, %s4664_s15 }
 0x429   : > { %2338 = vrot.lane.b32.xlu2 %v6611_v41, %s4667_s8 }
 0x42a   : > { %v7199_v59 = vpop.permute.xlu1 %2198  ;;  %v7201_v26 = vpop.permute.xlu0 %2202 }
 0x42b   : > { %10076 = vst [vmem:[#allocation91_spill] sm:$0xff] %v7199_v59  ;;  %v7203_v18 = vpop.permute.xlu2 %2224 }
 0x42c   : > { %10077 = vst [vmem:[#allocation104_spill] sm:$0xff] %v7201_v26  ;;  %v10082_v26 = vld [vmem:[#allocation19_spill] sm:$0xff] }
 0x42d   : > { %10078 = vst [vmem:[#allocation111_spill] sm:$0xff] %v7203_v18  ;;  %v7221_v18 = vld [vmem:[#allocation3 + $0x88] sm:$0x3] }
 0x430   : > { %2340 = vrot.lane.b32.xlu0 %v6627_v33, %s4667_s8  ;;  %2336 = vrot.lane.b32.xlu1 %v6603_v12, %s4667_s8 }
 0x431   : > { %2344 = vrot.lane.b32.xlu2 %v6648_v36, %s4667_s8 }
 0x432   : > { %v7211_v13 = vpop.permute.xlu1 %2204  ;;  %v7213_v19 = vpop.permute.xlu0 %2208 }
 0x433   : > { %10079 = vst [vmem:[#allocation36_spill] sm:$0xff] %v7211_v13  ;;  %v7215_v37 = vpop.permute.xlu2 %2230 }
 0x434   : > { %10080 = vst [vmem:[#allocation57_spill] sm:$0xff] %v7213_v19  ;;  %v2076_v19 = vrot.slane %v7127_v38, 1 }
 0x435   : > { %10081 = vst [vmem:[#allocation77_spill] sm:$0xff] %v7215_v37  ;;  %v2077_v37 = vrot.slane %v7221_v18, 1 }
 0x437   : > { %v7234_v22 = vsel %vm511_vm2, %v2076_v19, %v2077_v37  ;;  %v10092_v19 = vld [vmem:[#allocation79_spill] sm:$0xff]  ;;  %v7252_v37 = vld [vmem:[#allocation3 + $0x128] sm:$0x3] }
 0x438   : > { %2346 = vrot.lane.b32.xlu0 %v6671_v23, %s4667_s8  ;;  %2342 = vrot.lane.b32.xlu1 %v6633_v43, %s4667_s8 }
 0x439   : > { %2350 = vrot.lane.b32.xlu2 %v10082_v26, %s4667_s8  ;;  %v10087_v26 = vld [vmem:[#allocation69_spill] sm:$0xff] }
 0x43a   : > { %v7225_v48 = vpop.permute.xlu1 %2210  ;;  %v7227_v59 = vpop.permute.xlu0 %2214 }
 0x43b   : > { %10083 = vst [vmem:[#allocation92_spill] sm:$0xff] %v7225_v48  ;;  %v7229_v13 = vpop.permute.xlu2 %2236 }
 0x43c   : > { %10084 = vst [vmem:[#allocation11_spill] sm:$0xff] %v7227_v59 }
 0x43d   : > { %10085 = vst [vmem:[#allocation106_spill] sm:$0xff] %v7229_v13 }
 0x440   : > { %2352 = vrot.lane.b32.xlu0 %v10086_v53, %s4667_s8  ;;  %2348 = vrot.lane.b32.xlu1 %v7234_v22, %s4667_s8 }
 0x441   : > { %2356 = vrot.lane.b32.xlu2 %v10087_v26, %s4667_s8 }
 0x442   : > { %v7242_v48 = vpop.permute.xlu1 %2216  ;;  %v7244_v59 = vpop.permute.xlu0 %2220 }
 0x443   : > { %10088 = vst [vmem:[#allocation113_spill] sm:$0xff] %v7242_v48  ;;  %v7246_v13 = vpop.permute.xlu2 %2266 }
 0x444   : > { %10089 = vst [vmem:[#allocation23_spill] sm:$0xff] %v7244_v59  ;;  %v2079_v59 = vrot.slane %v7153_v11, 1 }
 0x445   : > { %10090 = vst [vmem:[#allocation47_spill] sm:$0xff] %v7246_v13  ;;  %v2080_v13 = vrot.slane %v7252_v37, 1 }
 0x447   : > { %v7265_v27 = vsel %vm511_vm2, %v2079_v59, %v2080_v13  ;;  %v10104_v59 = vld [vmem:[#allocation41_spill] sm:$0xff]  ;;  %v10105_v13 = vld [vmem:[#allocation43_spill] sm:$0xff] }
 0x448   : > { %2358 = vrot.lane.b32.xlu0 %v10091_v60, %s4667_s8  ;;  %2354 = vrot.lane.b32.xlu1 %v10092_v19, %s4667_s8  ;;  %10097 = vst [vmem:[#allocation17_spill] sm:$0xff] %v7265_v27 }
 0x449   : > { %2362 = vrot.lane.b32.xlu2 %v10093_v5, %s4667_s8  ;;  %v10103_v5 = vld [vmem:[#allocation31_spill] sm:$0xff] }
 0x44a   : > { %v7256_v63 = vpop.permute.xlu1 %2222  ;;  %v7258_v50 = vpop.permute.xlu0 %2226 }
 0x44b   : > { %10094 = vst [vmem:[#allocation13_spill] sm:$0xff] %v7256_v63  ;;  %v7260_v48 = vpop.permute.xlu2 %2272 }
 0x44c   : > { %10095 = vst [vmem:[#allocation86_spill] sm:$0xff] %v7258_v50 }
 0x44d   : > { %10096 = vst [vmem:[#allocation99_spill] sm:$0xff] %v7260_v48 }
 0x450   : > { %2364 = vrot.lane.b32.xlu0 %v7265_v27, %s4667_s8  ;;  %2360 = vrot.lane.b32.xlu1 %v10098_v9, %s4667_s8  ;;  %v7285_v27 = vld [vmem:[#allocation3 + $0x1c8] sm:$0x3] }
 0x451   : > { %2368 = vrot.lane.b32.xlu2 %v10099_v4, %s4667_s8 }
 0x452   : > { %v7273_v63 = vpop.permute.xlu1 %2228  ;;  %v7275_v50 = vpop.permute.xlu0 %2232 }
 0x453   : > { %10100 = vst [vmem:[#allocation110_spill] sm:$0xff] %v7273_v63  ;;  %v7277_v48 = vpop.permute.xlu2 %2278 }
 0x454   : > { %10101 = vst [vmem:[#allocation37_spill] sm:$0xff] %v7275_v50  ;;  %v2082_v50 = vrot.slane %v7179_v17, 1 }
 0x455   : > { %10102 = vst [vmem:[#allocation58_spill] sm:$0xff] %v7277_v48  ;;  %v2083_v48 = vrot.slane %v7285_v27, 1 }
 0x458   : > { %2370 = vrot.lane.b32.xlu0 %v10103_v5, %s4667_s8  ;;  %2366 = vrot.lane.b32.xlu1 %v10104_v59, %s4667_s8  ;;  %v7296_v5 = vsel %vm511_vm2, %v2082_v50, %v2083_v48  ;;  %v10110_v59 = vld [vmem:[#allocation82_spill] sm:$0xff] }
 0x459   : > { %2374 = vrot.lane.b32.xlu2 %v10105_v13, %s4667_s8  ;;  %10109 = vst [vmem:[#allocation107_spill] sm:$0xff] %v7296_v5 }
 0x45a   : > { %v7287_v9 = vpop.permute.xlu1 %2234  ;;  %v7289_v4 = vpop.permute.xlu0 %2262 }
 0x45b   : > { %10106 = vst [vmem:[#allocation78_spill] sm:$0xff] %v7287_v9  ;;  %v7291_v63 = vpop.permute.xlu2 %2284 }
 0x45c   : > { %10107 = vst [vmem:[#allocation93_spill] sm:$0xff] %v7289_v4 }
 0x45d   : > { %10108 = vst [vmem:[#allocation5_spill] sm:$0xff] %v7291_v63 }
 0x460   : > { %2376 = vrot.lane.b32.xlu0 %v6919_v20, %s4667_s8  ;;  %2372 = vrot.lane.b32.xlu1 %v10110_v59, %s4667_s8 }
 0x461   : > { %2380 = vrot.lane.b32.xlu2 %v7296_v5, %s4667_s8 }
 0x462   : > { %v7304_v9 = vpop.permute.xlu1 %2264  ;;  %v7306_v4 = vpop.permute.xlu0 %2268 }
 0x463   : > { %10111 = vst [vmem:[#allocation114_spill] sm:$0xff] %v7306_v4  ;;  %v7308_v63 = vpop.permute.xlu2 %2290 }
 0x464   : > { %10112 = vst [vmem:[#allocation39_spill] sm:$0xff] %v7308_v63 }
 0x468   : > { %2406 = vrot.lane.b32.xlu0 %v6939_v29, %s4668_s9  ;;  %2378 = vrot.lane.b32.xlu1 %v6903_v0, %s4667_s8 }
 0x469   : > { %2410 = vrot.lane.b32.xlu2 %v6936_v30, %s4668_s9 }
 0x46a   : > { %v7316_v48 = vpop.permute.xlu1 %2270  ;;  %v7318_v50 = vpop.permute.xlu0 %2274 }
 0x46b   : > { %10113 = vst [vmem:[#allocation60_spill] sm:$0xff] %v7316_v48  ;;  %v7320_v5 = vpop.permute.xlu2 %2296 }
 0x46c   : > { %10114 = vst [vmem:[#allocation80_spill] sm:$0xff] %v7318_v50 }
 0x46d   : > { %10115 = vst [vmem:[#allocation94_spill] sm:$0xff] %v7320_v5 }
 0x470   : > { %2412 = vrot.lane.b32.xlu0 %v6961_v28, %s4668_s9  ;;  %2408 = vrot.lane.b32.xlu1 %v6923_v16, %s4668_s9 }
 0x471   : > { %2416 = vrot.lane.b32.xlu2 %v6958_v24, %s4668_s9 }
 0x472   : > { %v7328_v29 = vpop.permute.xlu1 %2276  ;;  %v7330_v63 = vpop.permute.xlu0 %2280 }
 0x473   : > { %10116 = vst [vmem:[#allocation9_spill] sm:$0xff] %v7328_v29  ;;  %v7332_v4 = vpop.permute.xlu2 %2302  ;;  %v2085_v29 = vrot.slane %v7127_v38, 2 }
 0x474   : > { %10117 = vst [vmem:[#allocation108_spill] sm:$0xff] %v7330_v63  ;;  %v2086_v63 = vrot.slane %v7221_v18, 2 }
 0x475   : > { %10118 = vst [vmem:[#allocation115_spill] sm:$0xff] %v7332_v4 }
 0x476   : > { %v7349_v4 = vsel %vm584_vm3, %v2085_v29, %v2086_v63 }
 0x478   : > { %2418 = vrot.lane.b32.xlu0 %v6978_v61, %s4668_s9  ;;  %2414 = vrot.lane.b32.xlu1 %v6944_v44, %s4668_s9 }
 0x479   : > { %2422 = vrot.lane.b32.xlu2 %v6975_v14, %s4668_s9 }
 0x47a   : > { %v7340_v5 = vpop.permute.xlu1 %2282  ;;  %v7342_v50 = vpop.permute.xlu0 %2286 }
 0x47b   : > { %10119 = vst [vmem:[#allocation26_spill] sm:$0xff] %v7340_v5  ;;  %v7344_v48 = vpop.permute.xlu2 %2308 }
 0x47c   : > { %10120 = vst [vmem:[#allocation50_spill] sm:$0xff] %v7342_v50 }
 0x47d   : > { %10121 = vst [vmem:[#allocation15_spill] sm:$0xff] %v7344_v48 }
 0x480   : > { %2424 = vrot.lane.b32.xlu0 %v7001_v49, %s4668_s9  ;;  %2420 = vrot.lane.b32.xlu1 %v7349_v4, %s4668_s9 }
 0x481   : > { %2428 = vrot.lane.b32.xlu2 %v6998_v34, %s4668_s9 }
 0x482   : > { %v7357_v14 = vpop.permute.xlu1 %2288  ;;  %v7359_v50 = vpop.permute.xlu0 %2292 }
 0x483   : > { %10122 = vst [vmem:[#allocation87_spill] sm:$0xff] %v7357_v14  ;;  %v7361_v48 = vpop.permute.xlu2 %2338  ;;  %v2088_v14 = vrot.slane %v7153_v11, 2 }
 0x484   : > { %10123 = vst [vmem:[#allocation100_spill] sm:$0xff] %v7359_v50  ;;  %v2089_v50 = vrot.slane %v7252_v37, 2 }
 0x485   : > { %10124 = vst [vmem:[#allocation105_spill] sm:$0xff] %v7361_v48  ;;  %v7421_v48 = vld [vmem:[#allocation3 + $0x20] sm:$0xff] }
 0x486   : > { %v7378_v5 = vsel %vm584_vm3, %v2088_v14, %v2089_v50 }
 0x488   : > { %2430 = vrot.lane.b32.xlu0 %v7024_v25, %s4668_s9  ;;  %2426 = vrot.lane.b32.xlu1 %v6985_v39, %s4668_s9 }
 0x489   : > { %2434 = vrot.lane.b32.xlu2 %v7021_v7, %s4668_s9 }
 0x48a   : > { %v7369_v63 = vpop.permute.xlu1 %2294  ;;  %v7371_v18 = vpop.permute.xlu0 %2298 }
 0x48b   : > { %10125 = vst [vmem:[#allocation112_spill] sm:$0xff] %v7369_v63  ;;  %v7373_v29 = vpop.permute.xlu2 %2344 }
 0x48c   : > { %10126 = vst [vmem:[#allocation40_spill] sm:$0xff] %v7371_v18 }
 0x48d   : > { %10127 = vst [vmem:[#allocation61_spill] sm:$0xff] %v7373_v29 }
 0x490   : > { %2436 = vrot.lane.b32.xlu0 %v7378_v5, %s4668_s9  ;;  %2432 = vrot.lane.b32.xlu1 %v7008_v47, %s4668_s9 }
 0x491   : > { %2440 = vrot.lane.b32.xlu2 %v7045_v56, %s4668_s9 }
 0x492   : > { %v7386_v63 = vpop.permute.xlu1 %2300  ;;  %v7388_v18 = vpop.permute.xlu0 %2304 }
 0x493   : > { %10128 = vst [vmem:[#allocation81_spill] sm:$0xff] %v7386_v63  ;;  %v7390_v29 = vpop.permute.xlu2 %2350  ;;  %v2091_v63 = vrot.slane %v7179_v17, 2 }
 0x494   : > { %10129 = vst [vmem:[#allocation95_spill] sm:$0xff] %v7388_v18  ;;  %v2092_v18 = vrot.slane %v7285_v27, 2 }
 0x495   : > { %10130 = vst [vmem:[#allocation7_spill] sm:$0xff] %v7390_v29 }
 0x496   : > { %v7407_v29 = vsel %vm584_vm3, %v2091_v63, %v2092_v18 }
 0x498   : > { %2442 = vrot.lane.b32.xlu0 %v7069_v1, %s4668_s9  ;;  %2438 = vrot.lane.b32.xlu1 %v7031_v3, %s4668_s9 }
 0x499   : > { %2446 = vrot.lane.b32.xlu2 %v7066_v10, %s4668_s9 }
 0x49a   : > { %v7398_v37 = vpop.permute.xlu1 %2306  ;;  %v7400_v50 = vpop.permute.xlu0 %2334 }
 0x49b   : > { %10131 = vst [vmem:[#allocation109_spill] sm:$0xff] %v7398_v37  ;;  %v7402_v14 = vpop.permute.xlu2 %2356 }
 0x49c   : > { %10132 = vst [vmem:[#allocation116_spill] sm:$0xff] %v7402_v14 }
 0x4a0   : > { %2448 = vrot.lane.b32.xlu0 %v7089_v15, %s4668_s9  ;;  %2444 = vrot.lane.b32.xlu1 %v7052_v32, %s4668_s9 }
 0x4a1   : > { %2452 = vrot.lane.b32.xlu2 %v7407_v29, %s4668_s9 }
 0x4a2   : > { %v7415_v3 = vpop.permute.xlu1 %2336  ;;  %v7417_v37 = vpop.permute.xlu0 %2340 }
 0x4a3   : > { %10133 = vst [vmem:[#allocation19_spill] sm:$0xff] %v7417_v37  ;;  %v7419_v14 = vpop.permute.xlu2 %2362 }
 0x4a4   : > { %10134 = vst [vmem:[#allocation20_spill] sm:$0xff] %v7419_v14  ;;  %v7437_v14 = vld [vmem:[#allocation3 + $0x30] sm:$0xff] }
 0x4a8   : > { %2478 = vrot.lane.b32.xlu0 %v7421_v48, %s4669_s10  ;;  %2450 = vrot.lane.b32.xlu1 %v7076_v35, %s4668_s9 }
 0x4a9   : > { %2482 = vrot.lane.b32.xlu2 %v6600_v42, %s4669_s10 }
 0x4aa   : > { %v7429_v27 = vpop.permute.xlu1 %2342  ;;  %v7431_v63 = vpop.permute.xlu0 %2346 }
 0x4ab   : > { %10135 = vst [vmem:[#allocation69_spill] sm:$0xff] %v7429_v27  ;;  %v7433_v18 = vpop.permute.xlu2 %2368 }
 0x4ac   : > { %10136 = vst [vmem:[#allocation30_spill] sm:$0xff] %v7433_v18 }
 0x4b0   : > { %2484 = vrot.lane.b32.xlu0 %v6616_v2, %s4669_s10  ;;  %2480 = vrot.lane.b32.xlu1 %v7437_v14, %s4669_s10 }
 0x4b1   : > { %2488 = vrot.lane.b32.xlu2 %v6655_v51, %s4669_s10 }
 0x4b2   : > { %v7443_v37 = vpop.permute.xlu1 %2348  ;;  %v7445_v42 = vpop.permute.xlu0 %2352 }
 0x4b3   : > { %10137 = vst [vmem:[#allocation79_spill] sm:$0xff] %v7443_v37  ;;  %v7447_v27 = vpop.permute.xlu2 %2374  ;;  %v7461_v37 = vld [vmem:[#allocation3 + $0x90] sm:$0xff] }
 0x4b8   : > { %2490 = vrot.lane.b32.xlu0 %v7127_v38, %s4669_s10  ;;  %2486 = vrot.lane.b32.xlu1 %v6639_v57, %s4669_s10 }
 0x4b9   : > { %2494 = vrot.lane.b32.xlu2 %v6715_v54, %s4669_s10 }
 0x4ba   : > { %v7455_v2 = vpop.permute.xlu1 %2354  ;;  %v7457_v18 = vpop.permute.xlu0 %2358 }
 0x4bb   : > { %10138 = vst [vmem:[#allocation41_spill] sm:$0xff] %v7455_v2  ;;  %v7459_v51 = vpop.permute.xlu2 %2380 }
 0x4bc   : > { %10139 = vst [vmem:[#allocation43_spill] sm:$0xff] %v7457_v18 }
 0x4bd   : > { %10140 = vst [vmem:[#allocation82_spill] sm:$0xff] %v7459_v51 }
 0x4c0   : > { %2496 = vrot.lane.b32.xlu0 %v6736_v62, %s4669_s10  ;;  %2492 = vrot.lane.b32.xlu1 %v7461_v37, %s4669_s10 }
 0x4c1   : > { %2500 = vrot.lane.b32.xlu2 %v6773_v6, %s4669_s10 }
 0x4c2   : > { %v7469_v57 = vpop.permute.xlu1 %2360  ;;  %v7471_v54 = vpop.permute.xlu0 %2364 }
 0x4c3   : > { %10141 = vst [vmem:[#allocation117_spill] sm:$0xff] %v7469_v57  ;;  %v7473_v38 = vpop.permute.xlu2 %2410  ;;  %v7487_v57 = vld [vmem:[#allocation3 + $0x130] sm:$0xff] }
 0x4c4   : > { %10142 = vst [vmem:[#allocation118_spill] sm:$0xff] %v7471_v54  ;;  %v7513_v54 = vld [vmem:[#allocation3 + $0x1d0] sm:$0xff] }
 0x4c8   : > { %2502 = vrot.lane.b32.xlu0 %v6789_v31, %s4669_s10  ;;  %2498 = vrot.lane.b32.xlu1 %v6757_v40, %s4669_s10 }
 0x4c9   : > { %2506 = vrot.lane.b32.xlu2 %v7153_v11, %s4669_s10 }
 0x4ca   : > { %v7481_v62 = vpop.permute.xlu1 %2366  ;;  %v7483_v18 = vpop.permute.xlu0 %2370 }
 0x4cb   : > { %10143 = vst [vmem:[#allocation119_spill] sm:$0xff] %v7481_v62  ;;  %v7485_v6 = vpop.permute.xlu2 %2416 }
 0x4d0   : > { %2508 = vrot.lane.b32.xlu0 %v7487_v57, %s4669_s10  ;;  %2504 = vrot.lane.b32.xlu1 %v6805_v45, %s4669_s10 }
 0x4d1   : > { %2512 = vrot.lane.b32.xlu2 %v6884_v55, %s4669_s10 }
 0x4d2   : > { %v7495_v31 = vpop.permute.xlu1 %2372  ;;  %v7497_v40 = vpop.permute.xlu0 %2376 }
 0x4d3   : > { %10144 = vst [vmem:[#allocation120_spill] sm:$0xff] %v7497_v40  ;;  %v7499_v11 = vpop.permute.xlu2 %2422  ;;  %v2109_v40 = vrot.slane %v7461_v37, 2 }
 0x4d8   : > { %2514 = vrot.lane.b32.xlu0 %v6848_v58, %s4669_s10  ;;  %2510 = vrot.lane.b32.xlu1 %v6856_v21, %s4669_s10 }
 0x4d9   : > { %2518 = vrot.lane.b32.xlu2 %v6905_v8, %s4669_s10 }
 0x4da   : > { %v7507_v62 = vpop.permute.xlu1 %2378  ;;  %v7509_v45 = vpop.permute.xlu0 %2406 }
 0x4db   : > { %10145 = vst [vmem:[#allocation121_spill] sm:$0xff] %v7507_v62  ;;  %v7511_v55 = vpop.permute.xlu2 %2428 }
 0x4dc   : > { %10146 = vst [vmem:[#allocation122_spill] sm:$0xff] %v7511_v55 }
 0x4e0   : > { %2520 = vrot.lane.b32.xlu0 %v6878_v52, %s4669_s10  ;;  %2516 = vrot.lane.b32.xlu1 %v6874_v46, %s4669_s10 }
 0x4e1   : > { %2524 = vrot.lane.b32.xlu2 %v7513_v54, %s4669_s10 }
 0x4e2   : > { %v7521_v21 = vpop.permute.xlu1 %2408  ;;  %v7523_v8 = vpop.permute.xlu0 %2412 }
 0x4e3   : > { %v7525_v58 = vpop.permute.xlu2 %2434 }
 0x4e4   : > { %10147 = vst [vmem:[#allocation123_spill] sm:$0xff] %v7525_v58  ;;  %v1827_v58 = vld [vmem:[#allocation3 + $0x98] sm:$0x3] }
 0x4e8   : > { %2550 = vrot.lane.b32.xlu0 %v6603_v12, %s4670_s11  ;;  %2522 = vrot.lane.b32.xlu1 %v7179_v17, %s4669_s10 }
 0x4e9   : > { %2554 = vrot.lane.b32.xlu2 %v6627_v33, %s4670_s11 }
 0x4ea   : > { %v7533_v52 = vpop.permute.xlu1 %2414  ;;  %v7535_v46 = vpop.permute.xlu0 %2418 }
 0x4eb   : > { %v7537_v55 = vpop.permute.xlu2 %2440 }
 0x4ec   : > { %10148 = vst [vmem:[#allocation124_spill] sm:$0xff] %v7537_v55 }
 0x4f0   : > { %2552 = vrot.lane.b32.xlu1 %v6611_v41, %s4670_s11  ;;  %2556 = vrot.lane.b32.xlu0 %v6633_v43, %s4670_s11  ;;  %v2100_v41 = vrot.slane %v7461_v37, 1  ;;  %v2101_v43 = vrot.slane %v1827_v58, 1 }
 0x4f1   : > { %2560 = vrot.lane.b32.xlu2 %v6671_v23, %s4670_s11 }
 0x4f2   : > { %v7545_v12 = vpop.permute.xlu1 %2420  ;;  %v7547_v17 = vpop.permute.xlu0 %2424  ;;  %v2102_v62 = vsel %vm511_vm2, %v2100_v41, %v2101_v43  ;;  %v10155_v41 = vld [vmem:[#allocation54_spill] sm:$0xff] }
 0x4f3   : > { %10149 = vst [vmem:[#allocation125_spill] sm:$0xff] %v7547_v17  ;;  %v7549_v33 = vpop.permute.xlu2 %2446  ;;  %v10161_v17 = vld [vmem:[#allocation62_spill] sm:$0xff] }
 0x4f8   : > { %2558 = vrot.lane.b32.xlu1 %v6648_v36, %s4670_s11  ;;  %2562 = vrot.lane.b32.xlu0 %v7234_v22, %s4670_s11 }
 0x4f9   : > { %2566 = vrot.lane.b32.xlu2 %v10086_v53, %s4670_s11 }
 0x4fa   : > { %v7558_v23 = vpop.permute.xlu1 %2426  ;;  %v7560_v55 = vpop.permute.xlu0 %2430 }
 0x4fb   : > { %10150 = vst [vmem:[#allocation126_spill] sm:$0xff] %v7558_v23  ;;  %v7562_v51 = vpop.permute.xlu2 %2452  ;;  %v1847_v23 = vld [vmem:[#allocation3 + $0x138] sm:$0x3] }
 0x4fc   : > { %10151 = vst [vmem:[#allocation127_spill] sm:$0xff] %v7560_v55  ;;  %v2104_v43 = vrot.slane %v1847_v23, 1 }
 0x4fd   : > { %10152 = vst [vmem:[#allocation128_spill] sm:$0xff] %v7562_v51  ;;  %v10158_v51 = vld [vmem:[#allocation29_spill] sm:$0xff] }
 0x500   : > { %2564 = vrot.lane.b32.xlu1 %v2102_v62, %s4670_s11  ;;  %2568 = vrot.lane.b32.xlu0 %v10092_v19, %s4670_s11  ;;  %v2103_v62 = vrot.slane %v7487_v57, 1  ;;  %v10156_v19 = vld [vmem:[#allocation17_spill] sm:$0xff] }
 0x501   : > { %2572 = vrot.lane.b32.xlu2 %v10091_v60, %s4670_s11 }
 0x502   : > { %v7570_v36 = vpop.permute.xlu1 %2432  ;;  %v7572_v22 = vpop.permute.xlu0 %2436  ;;  %v2105_v55 = vsel %vm511_vm2, %v2103_v62, %v2104_v43 }
 0x503   : > { %10153 = vst [vmem:[#allocation129_spill] sm:$0xff] %v7570_v36  ;;  %v7574_v53 = vpop.permute.xlu2 %2482 }
 0x504   : > { %10154 = vst [vmem:[#allocation130_spill] sm:$0xff] %v7572_v22 }
 0x508   : > { %2570 = vrot.lane.b32.xlu1 %v10087_v26, %s4670_s11  ;;  %2574 = vrot.lane.b32.xlu0 %v10155_v41, %s4670_s11  ;;  %v10159_v26 = vld [vmem:[#allocation31_spill] sm:$0xff] }
 0x509   : > { %2578 = vrot.lane.b32.xlu2 %v10156_v19, %s4670_s11 }
 0x50a   : > { %v7583_v60 = vpop.permute.xlu1 %2438  ;;  %v7585_v36 = vpop.permute.xlu0 %2442 }
 0x50b   : > { %10157 = vst [vmem:[#allocation54_spill] sm:$0xff] %v7583_v60  ;;  %v7587_v22 = vpop.permute.xlu2 %2488  ;;  %v1867_v60 = vld [vmem:[#allocation3 + $0x1d8] sm:$0x3] }
 0x50c   : > { %v2107_v43 = vrot.slane %v1867_v60, 1 }
 0x510   : > { %2576 = vrot.lane.b32.xlu1 %v10158_v51, %s4670_s11  ;;  %2580 = vrot.lane.b32.xlu0 %v2105_v55, %s4670_s11  ;;  %v2106_v51 = vrot.slane %v7513_v54, 1 }
 0x511   : > { %2584 = vrot.lane.b32.xlu2 %v10159_v26, %s4670_s11 }
 0x512   : > { %v7595_v41 = vpop.permute.xlu1 %2444  ;;  %v7597_v19 = vpop.permute.xlu0 %2448 }
 0x513   : > { %10160 = vst [vmem:[#allocation17_spill] sm:$0xff] %v7597_v19  ;;  %v7599_v2 = vpop.permute.xlu2 %2494  ;;  %v2108_v19 = vsel %vm511_vm2, %v2106_v51, %v2107_v43  ;;  %v10165_v51 = vld [vmem:[#allocation107_spill] sm:$0xff] }
 0x518   : > { %2582 = vrot.lane.b32.xlu1 %v10161_v17, %s4670_s11  ;;  %2586 = vrot.lane.b32.xlu0 %v10110_v59, %s4670_s11 }
 0x519   : > { %2590 = vrot.lane.b32.xlu2 %v6919_v20, %s4670_s11  ;;  %v2110_v20 = vrot.slane %v1827_v58, 2  ;;  %v2112_v58 = vrot.slane %v7487_v57, 2  ;;  %v2116_v57 = vrot.slane %v1867_v60, 2 }
 0x51a   : > { %v7608_v55 = vpop.permute.xlu1 %2450  ;;  %v7610_v62 = vpop.permute.xlu0 %2478 }
 0x51b   : > { %10162 = vst [vmem:[#allocation29_spill] sm:$0xff] %v7608_v55  ;;  %v7612_v26 = vpop.permute.xlu2 %2500 }
 0x51c   : > { %10163 = vst [vmem:[#allocation31_spill] sm:$0xff] %v7612_v26  ;;  %v2111_v26 = vsel %vm584_vm3, %v2109_v40, %v2110_v20 }
 0x520   : > { %2588 = vrot.lane.b32.xlu1 %v10105_v13, %s4670_s11  ;;  %2592 = vrot.lane.b32.xlu0 %v6903_v0, %s4670_s11 }
 0x521   : > { %2596 = vrot.lane.b32.xlu2 %v2108_v19, %s4670_s11 }
 0x522   : > { %v7621_v59 = vpop.permute.xlu1 %2480  ;;  %v7623_v17 = vpop.permute.xlu0 %2484 }
 0x523   : > { %v7625_v55 = vpop.permute.xlu2 %2506 }
 0x524   : > { %10164 = vst [vmem:[#allocation62_spill] sm:$0xff] %v7625_v55 }
 0x528   : > { %2594 = vrot.lane.b32.xlu1 %v10165_v51, %s4670_s11  ;;  %2622 = vrot.lane.b32.xlu0 %v6923_v16, %s4671_s12  ;;  %v2113_v16 = vrot.slane %v1847_v23, 2  ;;  %v1873_v51 = vld [vmem:[%s9605_s3 + $0x28] sm:$0xff] }
 0x529   : > { %2626 = vrot.lane.b32.xlu2 %v6961_v28, %s4671_s12 }
 0x52a   : > { %v7634_v0 = vpop.permute.xlu1 %2486  ;;  %v7636_v13 = vpop.permute.xlu0 %2490  ;;  %v2114_v19 = vsel %vm584_vm3, %v2112_v58, %v2113_v16 }
 0x52b   : > { %v7638_v37 = vpop.permute.xlu2 %2512 }
 0x52c   : > { %10166 = vst [vmem:[#allocation107_spill] sm:$0xff] %v7638_v37 }
 0x530   : > { %2624 = vrot.lane.b32.xlu1 %v6936_v30, %s4671_s12  ;;  %2628 = vrot.lane.b32.xlu0 %v6944_v44, %s4671_s12  ;;  %v2115_v30 = vrot.slane %v7513_v54, 2 }
 0x531   : > { %2632 = vrot.lane.b32.xlu2 %v6978_v61, %s4671_s12 }
 0x532   : > { %v7647_v40 = vpop.permute.xlu1 %2492  ;;  %v7649_v28 = vpop.permute.xlu0 %2496  ;;  %v2117_v23 = vsel %vm584_vm3, %v2115_v30, %v2116_v57  ;;  %v1872_v30 = vld [vmem:[%s9605_s3 + $0x20] sm:$0xff]  ;;  %v1871_v57 = vld [vmem:[%s9605_s3 + $0x18] sm:$0xff] }
 0x533   : > { %v7652_v43 = vpop.permute.xlu2 %2518 }
 0x538   : > { %2630 = vrot.lane.b32.xlu1 %v6958_v24, %s4671_s12  ;;  %2634 = vrot.lane.b32.xlu0 %v7349_v4, %s4671_s12 }
 0x539   : > { %2638 = vrot.lane.b32.xlu2 %v7001_v49, %s4671_s12 }
 0x53a   : > { %v7661_v44 = vpop.permute.xlu1 %2498  ;;  %v7663_v61 = vpop.permute.xlu0 %2502 }
 0x53b   : > { %10167 = vst [vmem:[#allocation131_spill] sm:$0xff] %v7663_v61  ;;  %v7669_v24 = vpop.permute.xlu2 %2524 }
 0x540   : > { %2636 = vrot.lane.b32.xlu1 %v2111_v26, %s4671_s12  ;;  %2640 = vrot.lane.b32.xlu0 %v6985_v39, %s4671_s12 }
 0x541   : > { %2644 = vrot.lane.b32.xlu2 %v7024_v25, %s4671_s12 }
 0x542   : > { %v7673_v49 = vpop.permute.xlu1 %2504  ;;  %v7675_v4 = vpop.permute.xlu0 %2508 }
 0x543   : > { %10168 = vst [vmem:[#allocation132_spill] sm:$0xff] %v7673_v49  ;;  %v7687_v60 = vpop.permute.xlu2 %2554  ;;  %v4614_v49 = vld [vmem:[#allocation3] sm:$0xff] }
 0x544   : > { %10169 = vst [vmem:[#allocation133_spill] sm:$0xff] %v7675_v4 }
 0x548   : > { %2642 = vrot.lane.b32.xlu1 %v6998_v34, %s4671_s12  ;;  %2646 = vrot.lane.b32.xlu0 %v7008_v47, %s4671_s12 }
 0x549   : > { %2650 = vrot.lane.b32.xlu2 %v7378_v5, %s4671_s12 }
 0x54a   : > { %v7683_v54 = vpop.permute.xlu1 %2510  ;;  %v7685_v39 = vpop.permute.xlu0 %2514 }
 0x54b   : > { %10170 = vst [vmem:[#allocation134_spill] sm:$0xff] %v7683_v54  ;;  %v7698_v25 = vpop.permute.xlu2 %2560 }
 0x550   : > { %2648 = vrot.lane.b32.xlu1 %v7021_v7, %s4671_s12  ;;  %2652 = vrot.lane.b32.xlu0 %v2114_v19, %s4671_s12 }
 0x551   : > { %2656 = vrot.lane.b32.xlu2 %v7069_v1, %s4671_s12 }
 0x552   : > { %v7694_v34 = vpop.permute.xlu1 %2516  ;;  %v7696_v47 = vpop.permute.xlu0 %2520 }
 0x553   : > { %v7710_v1 = vpop.permute.xlu2 %2566 }
 0x558   : > { %2654 = vrot.lane.b32.xlu1 %v7045_v56, %s4671_s12  ;;  %2658 = vrot.lane.b32.xlu0 %v7052_v32, %s4671_s12 }
 0x559   : > { %2662 = vrot.lane.b32.xlu2 %v7089_v15, %s4671_s12 }
 0x55a   : > { %v7706_v7 = vpop.permute.xlu1 %2522  ;;  %v7708_v5 = vpop.permute.xlu0 %2550 }
 0x55b   : > { %v7723_v15 = vpop.permute.xlu2 %2572 }
 0x55c   : > { %10171 = vst [vmem:[#allocation135_spill] sm:$0xff] %v7723_v15 }
 0x560   : > { %2660 = vrot.lane.b32.xlu1 %v7066_v10, %s4671_s12  ;;  %2664 = vrot.lane.b32.xlu0 %v7076_v35, %s4671_s12  ;;  %v1876_v10 = vld [vmem:[%s9605_s3 + $0x40] sm:$0xff]  ;;  %v1875_v35 = vld [vmem:[%s9605_s3 + $0x38] sm:$0xff] }
 0x561   : > { %2668 = vrot.lane.b32.xlu2 %v2117_v23, %s4671_s12  ;;  %2975 = vmatpush.msra.mxu1 %v1876_v10  ;;  %v1870_v23 = vld [vmem:[%s9605_s3 + $0x10] sm:$0xff] }
 0x562   : > { %v7717_v56 = vpop.permute.xlu1 %2552  ;;  %v7719_v32 = vpop.permute.xlu0 %2556  ;;  %4543 = vmatpush.msrb.mxu3 %v1876_v10  ;;  %v1869_v10 = vld [vmem:[%s9605_s3 + $0x8] sm:$0xff] }
 0x563   : > { %2976 = vmatpush.msra.mxu1 %v1875_v35  ;;  %v7745_v19 = vpop.permute.xlu2 %2578 }
 0x564   : > { %4544 = vmatpush.msrb.mxu3 %v1875_v35  ;;  %10172 = vst [vmem:[#allocation136_spill] sm:$0xff] %v7745_v19 }
 0x568   : > { %2666 = vrot.lane.b32.xlu1 %v7407_v29, %s4671_s12  ;;  %v1874_v29 = vld [vmem:[%s9605_s3 + $0x30] sm:$0xff] }
 0x569   : > { %2977 = vmatpush.msra.mxu1 %v1874_v29  ;;  %4545 = vmatpush.msrb.mxu3 %v1874_v29 }
 0x56a   : > { %v7725_v26 = vpop.permute.xlu1 %2558  ;;  %v7727_v20 = vpop.permute.xlu0 %2562 }
 0x56b   : > { %2978 = vmatpush.msra.mxu1 %v1873_v51  ;;  %4546 = vmatpush.msrb.mxu3 %v1873_v51  ;;  %v1868_v51 = vld [vmem:[%s9605_s3] sm:$0xff] }
 0x56d   : > { %2979 = vmatpush.msra.mxu1 %v1872_v30  ;;  %4547 = vmatpush.msrb.mxu3 %v1872_v30  ;;  %v7766_v30 = vpop.permute.xlu2 %2584 }
 0x56e   : > { %10174 = vst [vmem:[#allocation138_spill] sm:$0xff] %v7766_v30 }
 0x56f   : > { %2980 = vmatpush.msra.mxu1 %v1871_v57  ;;  %4548 = vmatpush.msrb.mxu3 %v1871_v57 }
 0x571   : > { %2981 = vmatpush.msra.mxu1 %v1870_v23  ;;  %4549 = vmatpush.msrb.mxu3 %v1870_v23 }
 0x572   : > { %v7741_v58 = vpop.permute.xlu1 %2564  ;;  %v7743_v16 = vpop.permute.xlu0 %2568 }
 0x573   : > { %2982 = vmatpush.msra.mxu1 %v1869_v10  ;;  %4550 = vmatpush.msrb.mxu3 %v1869_v10 }
 0x575   : > { %2983 = vmatpush.msra.mxu1 %v1868_v51  ;;  %4551 = vmatpush.msrb.mxu3 %v1868_v51  ;;  %v7772_v54 = vpop.permute.xlu2 %2590  ;;  %v10179_v51 = vld [vmem:[#allocation72_spill] sm:$0xff] }
 0x576   : > { %v2694_v30 = vsel %vm1721_vm13, %v4614_v49, %v10179_v51 }
 0x57a   : > { %v7759_v35 = vpop.permute.xlu1 %2570  ;;  %v7761_v29 = vpop.permute.xlu0 %2574 }
 0x57b   : > { %10173 = vst [vmem:[#allocation137_spill] sm:$0xff] %v7761_v29  ;;  %v10181_v29 = vld [vmem:[#allocation93_spill] sm:$0xff] }
 0x57d   : > { %v7778_v19 = vpop.permute.xlu2 %2596 }
 0x57e   : > { %10178 = vst [vmem:[#allocation142_spill] sm:$0xff] %v7778_v19 }
 0x582   : > { %v7768_v57 = vpop.permute.xlu1 %2576  ;;  %v7770_v37 = vpop.permute.xlu0 %2580 }
 0x583   : > { %10175 = vst [vmem:[#allocation139_spill] sm:$0xff] %v7768_v57  ;;  %v10180_v57 = vld [vmem:[#allocation97_spill] sm:$0xff] }
 0x584   : > { %10176 = vst [vmem:[#allocation140_spill] sm:$0xff] %v7770_v37  ;;  %v2719_v37 = vsel %vm2718_vm15, %v2694_v30, %v10180_v57  ;;  %v10182_v57 = vld [vmem:[#allocation88_spill] sm:$0xff] }
 0x585   : > { %v2743_v61 = vsel %vm1455_vm12, %v2719_v37, %v10181_v29  ;;  %v2627_v29 = vpop.permute.xlu2 %2626 }
 0x58a   : > { %v7774_v23 = vpop.permute.xlu1 %2582  ;;  %v7776_v4 = vpop.permute.xlu0 %2586 }
 0x58b   : > { %10177 = vst [vmem:[#allocation141_spill] sm:$0xff] %v7774_v23  ;;  %v2768_v23 = vsel %vm2767_vm0, %v2743_v61, %v7400_v50  ;;  %v4615_v61 = vld [vmem:[#allocation3 + $0x10] sm:$0xff] }
 0x58c   : > { %v2793_v19 = vsel %vm2792_vm1, %v2768_v23, %v7509_v45  ;;  %v2695_v45 = vsel %vm1721_vm13, %v4615_v61, %v10182_v57  ;;  %v10183_v23 = vld [vmem:[#allocation34_spill] sm:$0xff]  ;;  %v10184_v57 = vld [vmem:[#allocation64_spill] sm:$0xff] }
 0x58d   : > { %v2818_v15 = vsel %vm2817_vm4, %v2793_v19, %v7610_v62  ;;  %v2720_v62 = vsel %vm2718_vm15, %v2695_v45, %v10183_v23  ;;  %v10186_v23 = vld [vmem:[#allocation47_spill] sm:$0xff] }
 0x58e   : > { %v2843_v49 = vsel %vm2842_vm5, %v2818_v15, %v7708_v5  ;;  %v2744_v19 = vsel %vm1455_vm12, %v2720_v62, %v7304_v9  ;;  %v2696_v9 = vsel %vm1721_vm13, %v7421_v48, %v10184_v57  ;;  %v10187_v62 = vld [vmem:[#allocation105_spill] sm:$0xff]  ;;  %v10189_v57 = vld [vmem:[#allocation56_spill] sm:$0xff] }
 0x58f   : > { %v2769_v5 = vsel %vm2767_vm0, %v2744_v19, %v7415_v3  ;;  %v10185_v3 = vld [vmem:[#allocation22_spill] sm:$0xff] }
 0x590   : > { %v2794_v15 = vsel %vm2792_vm1, %v2769_v5, %v7521_v21  ;;  %v2721_v45 = vsel %vm2718_vm15, %v2696_v9, %v10185_v3  ;;  %v2633_v21 = vpop.permute.xlu2 %2632 }
 0x591   : > { %v2819_v51 = vsel %vm2817_vm4, %v2794_v15, %v7621_v59  ;;  %v2745_v59 = vsel %vm1455_vm12, %v2721_v45, %v10186_v23 }
 0x592   : > { %v7780_v10 = vpop.permute.xlu1 %2588  ;;  %v7782_v55 = vpop.permute.xlu0 %2592 }
 0x59a   : > { %v7798_v30 = vpop.permute.xlu1 %2594  ;;  %v2623_v37 = vpop.permute.xlu0 %2622 }
 0x59b   : > { %v2868_v50 = vsel %vm2867_vm7, %v2843_v49, %v2623_v37  ;;  %v2844_v49 = vsel %vm2842_vm5, %v2819_v51, %v7717_v56  ;;  %v2770_v56 = vsel %vm2767_vm0, %v2745_v59, %v10187_v62 }
 0x59c   : > { %4487 = vmatmul.msk.f32.vlgmr.msra.gmra.mxu1 %vm2895_vm6, %v2868_v50  ;;  %v2795_v19 = vsel %vm2792_vm1, %v2770_v56, %v7473_v38  ;;  %v10190_v38 = vld [vmem:[#allocation114_spill] sm:$0xff] }
 0x59d   : > { %v2820_v5 = vsel %vm2817_vm4, %v2795_v19, %v7574_v53  ;;  %v10191_v53 = vld [vmem:[#allocation19_spill] sm:$0xff]  ;;  %v4616_v19 = vld [vmem:[#allocation3 + $0x40] sm:$0xff] }
 0x59e   : > { %v2845_v48 = vsel %vm2842_vm5, %v2820_v5, %v7687_v60  ;;  %v7844_v60 = vpop.permute.xlu2 %2638  ;;  %v10192_v5 = vld [vmem:[#allocation45_spill] sm:$0xff] }
 0x5a2   : > { %v2625_v37 = vpop.permute.xlu1 %2624  ;;  %v2629_v50 = vpop.permute.xlu0 %2628 }
 0x5a3   : > { %v2869_v61 = vsel %vm2867_vm7, %v2844_v49, %v2625_v37  ;;  %v2870_v49 = vsel %vm2867_vm7, %v2845_v48, %v2627_v29  ;;  %v10188_v37 = vld [vmem:[#allocation16_spill] sm:$0xff]  ;;  %v2698_v48 = vsel %vm1721_vm13, %v4616_v19, %v10192_v5  ;;  %v10199_v5 = vld [vmem:[#allocation61_spill] sm:$0xff] }
 0x5a4   : > { %4488 = vmatmul.msk.f32.gmra.mxu1 %vm2895_vm6, %v2869_v61  ;;  %v2697_v61 = vsel %vm1721_vm13, %v7437_v14, %v10188_v37  ;;  %v10194_v37 = vld [vmem:[#allocation60_spill] sm:$0xff] }
 0x5a5   : > { %v2722_v9 = vsel %vm2718_vm15, %v2697_v61, %v10189_v57  ;;  %v10195_v61 = vld [vmem:[#allocation69_spill] sm:$0xff] }
 0x5a6   : > { %v2746_v3 = vsel %vm1455_vm12, %v2722_v9, %v10190_v38  ;;  %v7870_v9 = vpop.permute.xlu2 %2644 }
 0x5a7   : > { %v2771_v45 = vsel %vm2767_vm0, %v2746_v3, %v10191_v53 }
 0x5a8   : > { %v2796_v29 = vsel %vm2792_vm1, %v2771_v45, %v7523_v8 }
 0x5a9   : > { %v2821_v23 = vsel %vm2817_vm4, %v2796_v29, %v7623_v17  ;;  %v4617_v29 = vld [vmem:[#allocation3 + $0x50] sm:$0xff] }
 0x5aa   : > { %v2631_v15 = vpop.permute.xlu1 %2630  ;;  %v2635_v51 = vpop.permute.xlu0 %2634  ;;  %v2846_v14 = vsel %vm2842_vm5, %v2821_v23, %v7719_v32  ;;  %v10196_v23 = vld [vmem:[#allocation55_spill] sm:$0xff] }
 0x5ab   : > { %v2871_v56 = vsel %vm2867_vm7, %v2846_v14, %v2629_v50  ;;  %v2699_v14 = vsel %vm1721_vm13, %v4617_v29, %v10196_v23  ;;  %v10203_v29 = vld [vmem:[#allocation86_spill] sm:$0xff] }
 0x5ac   : > { %4489 = vmatmul.msk.f32.gmra.mxu1 %vm2895_vm6, %v2870_v49  ;;  %v10193_v49 = vld [vmem:[#allocation91_spill] sm:$0xff] }
 0x5ad   : > { %v2723_v8 = vsel %vm2718_vm15, %v2698_v48, %v10193_v49 }
 0x5ae   : > { %v2747_v17 = vsel %vm1455_vm12, %v2723_v8, %v10194_v37 }
 0x5af   : > { %v2772_v32 = vsel %vm2767_vm0, %v2747_v17, %v10195_v61  ;;  %v4618_v61 = vld [vmem:[#allocation3 + $0x60] sm:$0xff] }
 0x5b0   : > { %v2797_v57 = vsel %vm2792_vm1, %v2772_v32, %v7533_v52  ;;  %v10197_v52 = vld [vmem:[#allocation73_spill] sm:$0xff] }
 0x5b1   : > { %v2822_v50 = vsel %vm2817_vm4, %v2797_v57, %v7634_v0  ;;  %v2724_v0 = vsel %vm2718_vm15, %v2699_v14, %v10197_v52  ;;  %v10200_v32 = vld [vmem:[#allocation33_spill] sm:$0xff]  ;;  %v10204_v14 = vld [vmem:[#allocation80_spill] sm:$0xff] }
 0x5b2   : > { %v7852_v59 = vpop.permute.xlu1 %2636  ;;  %v7854_v62 = vpop.permute.xlu0 %2640  ;;  %v2847_v38 = vsel %vm2842_vm5, %v2822_v50, %v7725_v26  ;;  %v2700_v57 = vsel %vm1721_vm13, %v4618_v61, %v10200_v32  ;;  %v4619_v50 = vld [vmem:[#allocation3 + $0x160] sm:$0xff]  ;;  %v10206_v32 = vld [vmem:[#allocation6_spill] sm:$0xff] }
 0x5b3   : > { %v2872_v45 = vsel %vm2867_vm7, %v2847_v38, %v2631_v15  ;;  %v10201_v38 = vld [vmem:[#allocation44_spill] sm:$0xff] }
 0x5b4   : > { %4490 = vmatmul.msk.f32.gmra.mxu1 %vm2895_vm6, %v2871_v56  ;;  %v10198_v56 = vld [vmem:[#allocation99_spill] sm:$0xff]  ;;  %v10205_v52 = vld [vmem:[#allocation40_spill] sm:$0xff] }
 0x5b5   : > { %v2748_v19 = vsel %vm1455_vm12, %v2724_v0, %v10198_v56 }
 0x5b6   : > { %v2773_v26 = vsel %vm2767_vm0, %v2748_v19, %v10199_v5 }
 0x5b7   : > { %v2798_v48 = vsel %vm2792_vm1, %v2773_v26, %v7485_v6  ;;  %v2712_v6 = vsel %vm1721_vm13, %v4619_v50, %v10201_v38  ;;  %v10207_v50 = vld [vmem:[#allocation10_spill] sm:$0xff] }
 0x5b8   : > { %v2823_v15 = vsel %vm2817_vm4, %v2798_v48, %v7587_v22  ;;  %v10202_v22 = vld [vmem:[#allocation104_spill] sm:$0xff]  ;;  %v2737_v23 = vsel %vm2718_vm15, %v2712_v6, %v10203_v29  ;;  %v10209_v38 = vld [vmem:[#allocation110_spill] sm:$0xff] }
 0x5b9   : > { %v2848_v49 = vsel %vm2842_vm5, %v2823_v15, %v7698_v25  ;;  %v2725_v25 = vsel %vm2718_vm15, %v2700_v57, %v10202_v22  ;;  %v2761_v0 = vsel %vm1455_vm12, %v2737_v23, %v10205_v52  ;;  %v4621_v57 = vld [vmem:[#allocation3 + $0x170] sm:$0xff]  ;;  %v10210_v22 = vld [vmem:[#allocation9_spill] sm:$0xff] }
 0x5ba   : > { %v7874_v3 = vpop.permute.xlu1 %2642  ;;  %v7876_v53 = vpop.permute.xlu0 %2646  ;;  %v2873_v17 = vsel %vm2867_vm7, %v2848_v49, %v2633_v21  ;;  %v2749_v21 = vsel %vm1455_vm12, %v2725_v25, %v10204_v14  ;;  %v2786_v19 = vsel %vm2767_vm0, %v2761_v0, %v7483_v18  ;;  %v10211_v25 = vld [vmem:[#allocation81_spill] sm:$0xff]  ;;  %v10212_v14 = vld [vmem:[#allocation79_spill] sm:$0xff] }
 0x5bb   : > { %v2774_v56 = vsel %vm2767_vm0, %v2749_v21, %v7431_v63  ;;  %v2811_v26 = vsel %vm2792_vm1, %v2786_v19, %v7585_v36  ;;  %v4620_v36 = vld [vmem:[#allocation3 + $0x70] sm:$0xff] }
 0x5bc   : > { %4491 = vmatmul.msk.f32.gmra.mxu1 %vm2895_vm6, %v2872_v45  ;;  %v7903_v45 = vpop.permute.xlu2 %2650  ;;  %v2799_v5 = vsel %vm2792_vm1, %v2774_v56, %v7535_v46  ;;  %v2836_v15 = vsel %vm2817_vm4, %v2811_v26, %v7685_v39  ;;  %v2713_v39 = vsel %vm1721_vm13, %v4621_v57, %v10207_v50  ;;  %v10219_v57 = vld [vmem:[#allocation7_spill] sm:$0xff] }
 0x5bd   : > { %v2824_v48 = vsel %vm2817_vm4, %v2799_v5, %v7636_v13  ;;  %v2861_v63 = vsel %vm2842_vm5, %v2836_v15, %v7776_v4  ;;  %v2701_v13 = vsel %vm1721_vm13, %v4620_v36, %v10206_v32  ;;  %v10208_v4 = vld [vmem:[#allocation36_spill] sm:$0xff]  ;;  %v2738_v6 = vsel %vm2718_vm15, %v2713_v39, %v10209_v38  ;;  %v10218_v32 = vld [vmem:[#allocation115_spill] sm:$0xff] }
 0x5be   : > { %v2849_v49 = vsel %vm2842_vm5, %v2824_v48, %v7727_v20  ;;  %v2726_v20 = vsel %vm2718_vm15, %v2701_v13, %v10208_v4  ;;  %v2762_v29 = vsel %vm1455_vm12, %v2738_v6, %v10211_v25 }
 0x5bf   : > { %v2874_v61 = vsel %vm2867_vm7, %v2849_v49, %v2635_v51  ;;  %v2750_v51 = vsel %vm1455_vm12, %v2726_v20, %v10210_v22  ;;  %v2787_v52 = vsel %vm2767_vm0, %v2762_v29, %v7495_v31  ;;  %v4622_v49 = vld [vmem:[#allocation3 + $0xa0] sm:$0xff]  ;;  %v4624_v29 = vld [vmem:[#allocation3 + $0xb0] sm:$0xff] }
 0x5c0   : > { %v2775_v21 = vsel %vm2767_vm0, %v2750_v51, %v10212_v14  ;;  %v2812_v56 = vsel %vm2792_vm1, %v2787_v52, %v7595_v41  ;;  %v10213_v41 = vld [vmem:[#allocation83_spill] sm:$0xff] }
 0x5c1   : > { %v2800_v0 = vsel %vm2792_vm1, %v2775_v21, %v7545_v12  ;;  %v2837_v5 = vsel %vm2817_vm4, %v2812_v56, %v7694_v34  ;;  %v4625_v21 = vld [vmem:[#allocation3 + $0x190] sm:$0xff] }
 0x5c2   : > { %v7894_v8 = vpop.permute.xlu1 %2648  ;;  %v7896_v37 = vpop.permute.xlu0 %2652  ;;  %v2825_v19 = vsel %vm2817_vm4, %v2800_v0, %v7647_v40  ;;  %v2862_v48 = vsel %vm2842_vm5, %v2837_v5, %v7780_v10  ;;  %v4623_v40 = vld [vmem:[#allocation3 + $0x180] sm:$0xff] }
 0x5c3   : > { %v2850_v26 = vsel %vm2842_vm5, %v2825_v19, %v7741_v58  ;;  %v10215_v58 = vld [vmem:[#allocation84_spill] sm:$0xff]  ;;  %v10225_v19 = vld [vmem:[#allocation95_spill] sm:$0xff] }
 0x5c4   : > { %4492 = vmatmul.msk.f32.gmra.mxu1 %vm2895_vm6, %v2873_v17  ;;  %v7948_v23 = vpop.permute.xlu2 %2656  ;;  %v2875_v31 = vsel %vm2867_vm7, %v2850_v26, %v7852_v59  ;;  %v10224_v0 = vld [vmem:[#allocation108_spill] sm:$0xff] }
 0x5ca   : > { %v7930_v17 = vpop.permute.xlu1 %2654  ;;  %v2659_v18 = vpop.permute.xlu0 %2658 }
 0x5cb   : > { %v2886_v46 = vsel %vm2867_vm7, %v2861_v63, %v2659_v18  ;;  %v2702_v63 = vsel %vm1721_vm13, %v4622_v49, %v10213_v41  ;;  %v10214_v18 = vld [vmem:[#allocation74_spill] sm:$0xff]  ;;  %v10228_v49 = vld [vmem:[#allocation17_spill] sm:$0xff] }
 0x5cc   : > { %4493 = vmatmul.msk.f32.gmra.mxu1 %vm2895_vm6, %v2874_v61  ;;  %4505 = vmatmul.msk.f32.vlgmr.msrb.gmra.mxu3 %vm2895_vm6, %v2886_v46  ;;  %v2714_v34 = vsel %vm1721_vm13, %v4623_v40, %v10214_v18  ;;  %v2727_v10 = vsel %vm2718_vm15, %v2702_v63, %v10215_v58  ;;  %v10216_v46 = vld [vmem:[#allocation77_spill] sm:$0xff]  ;;  %v10217_v61 = vld [vmem:[#allocation58_spill] sm:$0xff]  ;;  %v2663_v38 = vpop.permute.xlu2 %2662 }
 0x5cd   : > { %v2739_v59 = vsel %vm2718_vm15, %v2714_v34, %v10216_v46  ;;  %v2751_v36 = vsel %vm1455_vm12, %v2727_v10, %v10217_v61  ;;  %v4626_v46 = vld [vmem:[#allocation3 + $0xc0] sm:$0xff] }
 0x5ce   : > { %v2763_v13 = vsel %vm1455_vm12, %v2739_v59, %v10218_v32  ;;  %v2776_v50 = vsel %vm2767_vm0, %v2751_v36, %v10219_v57  ;;  %v10229_v59 = vld [vmem:[#allocation98_spill] sm:$0xff]  ;;  %v4627_v36 = vld [vmem:[#allocation3 + $0x1a0] sm:$0xff] }
 0x5cf   : > { %v2788_v39 = vsel %vm2767_vm0, %v2763_v13, %v7447_v27  ;;  %v2801_v4 = vsel %vm2792_vm1, %v2776_v50, %v7499_v11  ;;  %v2704_v61 = vsel %vm1721_vm13, %v4626_v46, %v10229_v59  ;;  %v10233_v13 = vld [vmem:[#allocation26_spill] sm:$0xff]  ;;  %v10234_v50 = vld [vmem:[#allocation109_spill] sm:$0xff] }
 0x5d0   : > { %v2813_v20 = vsel %vm2792_vm1, %v2788_v39, %v7549_v33  ;;  %v2826_v6 = vsel %vm2817_vm4, %v2801_v4, %v7599_v2  ;;  %v10220_v33 = vld [vmem:[#allocation85_spill] sm:$0xff]  ;;  %v10251_v59 = vld [vmem:[#allocation142_spill] sm:$0xff] }
 0x5d1   : > { %v2838_v22 = vsel %vm2817_vm4, %v2813_v20, %v7652_v43  ;;  %v2851_v51 = vsel %vm2842_vm5, %v2826_v6, %v7710_v1  ;;  %v2703_v14 = vsel %vm1721_vm13, %v4624_v29, %v10220_v33  ;;  %v10221_v2 = vld [vmem:[#allocation89_spill] sm:$0xff] }
 0x5d2   : > { %v2661_v15 = vpop.permute.xlu1 %2660  ;;  %v2863_v25 = vsel %vm2842_vm5, %v2838_v22, %v7772_v54  ;;  %v2876_v27 = vsel %vm2867_vm7, %v2851_v51, %v7844_v60  ;;  %v2715_v52 = vsel %vm1721_vm13, %v4625_v21, %v10221_v2  ;;  %v10222_v43 = vld [vmem:[#allocation57_spill] sm:$0xff]  ;;  %v2665_v63 = vpop.permute.xlu0 %2664  ;;  %v10237_v22 = vld [vmem:[#allocation126_spill] sm:$0xff] }
 0x5d3   : > { %v2887_v12 = vsel %vm2867_vm7, %v2862_v48, %v2661_v15  ;;  %v2888_v11 = vsel %vm2867_vm7, %v2863_v25, %v2663_v38  ;;  %v2728_v54 = vsel %vm2718_vm15, %v2703_v14, %v10222_v43  ;;  %v10223_v1 = vld [vmem:[#allocation37_spill] sm:$0xff]  ;;  %v10226_v48 = vld [vmem:[#allocation120_spill] sm:$0xff]  ;;  %v4628_v43 = vld [vmem:[#allocation3 + $0xd0] sm:$0xff] }
 0x5d4   : > { %4494 = vmatmul.msk.f32.gmra.mxu1 %vm2895_vm6, %v2875_v31  ;;  %4506 = vmatmul.msk.f32.gmra.mxu3 %vm2895_vm6, %v2887_v12  ;;  %v2740_v60 = vsel %vm2718_vm15, %v2715_v52, %v10223_v1  ;;  %v2752_v56 = vsel %vm1455_vm12, %v2728_v54, %v10224_v0  ;;  %v10227_v31 = vld [vmem:[#allocation125_spill] sm:$0xff]  ;;  %v10239_v54 = vld [vmem:[#allocation96_spill] sm:$0xff] }
 0x5d5   : > { %v2764_v5 = vsel %vm1455_vm12, %v2740_v60, %v10225_v19  ;;  %v2777_v26 = vsel %vm2767_vm0, %v2752_v56, %v7445_v42  ;;  %v10235_v4 = vld [vmem:[#allocation41_spill] sm:$0xff]  ;;  %v2705_v1 = vsel %vm1721_vm13, %v4628_v43, %v10239_v54  ;;  %v4629_v60 = vld [vmem:[#allocation3 + $0x1b0] sm:$0xff]  ;;  %v10264_v54 = vld [vmem:[#allocation132_spill] sm:$0xff] }
 0x5d6   : > { %v2789_v15 = vsel %vm2767_vm0, %v2764_v5, %v10226_v48  ;;  %v2802_v12 = vsel %vm2792_vm1, %v2777_v26, %v10227_v31  ;;  %v10236_v38 = vld [vmem:[#allocation121_spill] sm:$0xff]  ;;  %v10244_v5 = vld [vmem:[#allocation15_spill] sm:$0xff]  ;;  %v10245_v48 = vld [vmem:[#allocation116_spill] sm:$0xff] }
 0x5d7   : > { %v2814_v41 = vsel %vm2792_vm1, %v2789_v15, %v10228_v49  ;;  %v2827_v40 = vsel %vm2817_vm4, %v2802_v12, %v7649_v28  ;;  %v10230_v28 = vld [vmem:[#allocation102_spill] sm:$0xff]  ;;  %v10238_v25 = vld [vmem:[#allocation29_spill] sm:$0xff] }
 0x5d8   : > { %v2839_v18 = vsel %vm2817_vm4, %v2814_v41, %v7696_v47  ;;  %v2852_v34 = vsel %vm2842_vm5, %v2827_v40, %v7743_v16  ;;  %v2716_v32 = vsel %vm1721_vm13, %v4627_v36, %v10230_v28  ;;  %v10231_v47 = vld [vmem:[#allocation92_spill] sm:$0xff]  ;;  %v10232_v16 = vld [vmem:[#allocation78_spill] sm:$0xff]  ;;  %v10243_v56 = vld [vmem:[#allocation5_spill] sm:$0xff] }
 0x5d9   : > { %v2864_v42 = vsel %vm2842_vm5, %v2839_v18, %v7782_v55  ;;  %v2877_v58 = vsel %vm2867_vm7, %v2852_v34, %v7854_v62  ;;  %v2729_v55 = vsel %vm2718_vm15, %v2704_v61, %v10231_v47  ;;  %v2741_v62 = vsel %vm2718_vm15, %v2716_v32, %v10232_v16  ;;  %v10246_v31 = vld [vmem:[#allocation82_spill] sm:$0xff]  ;;  %v2669_v18 = vpop.permute.xlu2 %2668  ;;  %v10249_v34 = vld [vmem:[#allocation31_spill] sm:$0xff]  ;;  %v4630_v32 = vld [vmem:[#allocation3 + $0xe0] sm:$0xff] }
 0x5da   : > { %v2889_v10 = vsel %vm2867_vm7, %v2864_v42, %v2665_v63  ;;  %v2753_v57 = vsel %vm1455_vm12, %v2729_v55, %v10233_v13  ;;  %v2765_v39 = vsel %vm1455_vm12, %v2741_v62, %v10234_v50  ;;  %v10247_v49 = vld [vmem:[#allocation122_spill] sm:$0xff]  ;;  %v10248_v63 = vld [vmem:[#allocation128_spill] sm:$0xff] }
 0x5db   : > { %v2778_v20 = vsel %vm2767_vm0, %v2753_v57, %v10235_v4  ;;  %v2790_v6 = vsel %vm2767_vm0, %v2765_v39, %v10236_v38  ;;  %v10252_v47 = vld [vmem:[#allocation90_spill] sm:$0xff]  ;;  %v10255_v57 = vld [vmem:[#allocation43_spill] sm:$0xff]  ;;  %v10258_v38 = vld [vmem:[#allocation137_spill] sm:$0xff] }
 0x5dc   : > { %4495 = vmatmul.msk.f32.gmra.mxu1 %vm2895_vm6, %v2876_v27  ;;  %4507 = vmatmul.msk.f32.gmra.mxu3 %vm2895_vm6, %v2888_v11  ;;  %v2803_v51 = vsel %vm2792_vm1, %v2778_v20, %v10237_v22  ;;  %v2815_v27 = vsel %vm2792_vm1, %v2790_v6, %v10238_v25  ;;  %v2667_v11 = vpop.permute.xlu1 %2666  ;;  %v2706_v55 = vsel %vm1721_vm13, %v4630_v32, %v10252_v47  ;;  %v10254_v62 = vld [vmem:[#allocation50_spill] sm:$0xff]  ;;  %v10257_v4 = vld [vmem:[#allocation131_spill] sm:$0xff] }
 0x5dd   : > { %v2828_v29 = vsel %vm2817_vm4, %v2803_v51, %v7661_v44  ;;  %v2840_v33 = vsel %vm2817_vm4, %v2815_v27, %v7706_v7  ;;  %v10240_v44 = vld [vmem:[#allocation14_spill] sm:$0xff]  ;;  %v10241_v7 = vld [vmem:[#allocation12_spill] sm:$0xff]  ;;  %v10259_v25 = vld [vmem:[#allocation103_spill] sm:$0xff] }
 0x5de   : > { %v2853_v14 = vsel %vm2842_vm5, %v2828_v29, %v7759_v35  ;;  %v2865_v21 = vsel %vm2842_vm5, %v2840_v33, %v7798_v30  ;;  %v2717_v0 = vsel %vm1721_vm13, %v4629_v60, %v10240_v44  ;;  %v2730_v35 = vsel %vm2718_vm15, %v2705_v1, %v10241_v7  ;;  %v10242_v30 = vld [vmem:[#allocation106_spill] sm:$0xff]  ;;  %v10261_v33 = vld [vmem:[#allocation87_spill] sm:$0xff]  ;;  %v10266_v7 = vld [vmem:[#allocation101_spill] sm:$0xff] }
 0x5df   : > { %v2878_v2 = vsel %vm2867_vm7, %v2853_v14, %v7874_v3  ;;  %v2890_v52 = vsel %vm2867_vm7, %v2865_v21, %v2667_v11  ;;  %v2742_v3 = vsel %vm2718_vm15, %v2717_v0, %v10242_v30  ;;  %v2754_v19 = vsel %vm1455_vm12, %v2730_v35, %v10243_v56  ;;  %v4631_v51 = vld [vmem:[#allocation3 + $0xf0] sm:$0xff]  ;;  %v10260_v11 = vld [vmem:[#allocation113_spill] sm:$0xff]  ;;  %v10265_v1 = vld [vmem:[#allocation139_spill] sm:$0xff] }
 0x5e0   : > { %v2766_v26 = vsel %vm1455_vm12, %v2742_v3, %v10244_v5  ;;  %v2779_v15 = vsel %vm2767_vm0, %v2754_v19, %v10245_v48  ;;  %v2707_v27 = vsel %vm1721_vm13, %v4631_v51, %v10259_v25  ;;  %v10262_v21 = vld [vmem:[#allocation117_spill] sm:$0xff]  ;;  %v4632_v0 = vld [vmem:[#allocation3 + $0x100] sm:$0xff]  ;;  %v10267_v30 = vld [vmem:[#allocation75_spill] sm:$0xff] }
 0x5e1   : > { %v2791_v12 = vsel %vm2767_vm0, %v2766_v26, %v10246_v31  ;;  %v2804_v41 = vsel %vm2792_vm1, %v2779_v15, %v10247_v49  ;;  %v2732_v29 = vsel %vm2718_vm15, %v2707_v27, %v10260_v11  ;;  %v2708_v35 = vsel %vm1721_vm13, %v4632_v0, %v10266_v7  ;;  %v10268_v56 = vld [vmem:[#allocation39_spill] sm:$0xff]  ;;  %v10269_v5 = vld [vmem:[#allocation20_spill] sm:$0xff]  ;;  %v10271_v31 = vld [vmem:[#allocation62_spill] sm:$0xff] }
 0x5e2   : > { %v2816_v40 = vsel %vm2792_vm1, %v2791_v12, %v10248_v63  ;;  %v2829_v42 = vsel %vm2817_vm4, %v2804_v41, %v10249_v34  ;;  %v2756_v14 = vsel %vm1455_vm12, %v2732_v29, %v10261_v33  ;;  %v2733_v3 = vsel %vm2718_vm15, %v2708_v35, %v10267_v30  ;;  %v10270_v48 = vld [vmem:[#allocation123_spill] sm:$0xff]  ;;  %v10272_v12 = vld [vmem:[#allocation136_spill] sm:$0xff]  ;;  %v4633_v63 = vld [vmem:[#allocation3 + $0x110] sm:$0xff] }
 0x5e3   : > { %v2757_v19 = vsel %vm1455_vm12, %v2733_v3, %v10268_v56  ;;  %v10274_v34 = vld [vmem:[#allocation23_spill] sm:$0xff]  ;;  %v10277_v32 = vld [vmem:[#allocation130_spill] sm:$0xff]  ;;  %v10291_v3 = vld [vmem:[#allocation124_spill] sm:$0xff] }
 0x5e4   : > { %4496 = vmatmul.msk.f32.gmra.mxu1 %vm2895_vm6, %v2877_v58  ;;  %4508 = vmatmul.msk.f32.gmra.mxu3 %vm2895_vm6, %v2889_v10  ;;  %v2841_v58 = vsel %vm2817_vm4, %v2816_v40, %v7669_v24  ;;  %v10250_v10 = vld [vmem:[#allocation135_spill] sm:$0xff]  ;;  %v2782_v26 = vsel %vm2767_vm0, %v2757_v19, %v10269_v5  ;;  %v10273_v40 = vld [vmem:[#allocation32_spill] sm:$0xff]  ;;  %v10284_v25 = vld [vmem:[#allocation54_spill] sm:$0xff] }
 0x5e5   : > { %v2854_v46 = vsel %vm2842_vm5, %v2829_v42, %v10250_v10  ;;  %v2866_v61 = vsel %vm2842_vm5, %v2841_v58, %v10251_v59  ;;  %v10253_v24 = vld [vmem:[#allocation11_spill] sm:$0xff]  ;;  %v2807_v15 = vsel %vm2792_vm1, %v2782_v26, %v10270_v48  ;;  %v10275_v58 = vld [vmem:[#allocation100_spill] sm:$0xff]  ;;  %v8162_v59 = vld [vmem:[#allocation3 + $0x8] sm:$0x3] }
 0x5e6   : > { %v2879_v36 = vsel %vm2867_vm7, %v2854_v46, %v7870_v9  ;;  %v2891_v28 = vsel %vm2867_vm7, %v2866_v61, %v2669_v18  ;;  %v2731_v16 = vsel %vm2718_vm15, %v2706_v55, %v10253_v24  ;;  %v10256_v9 = vld [vmem:[#allocation127_spill] sm:$0xff]  ;;  %v2709_v18 = vsel %vm1721_vm13, %v4633_v63, %v10273_v40  ;;  %v8160_v46 = vld [vmem:[#allocation3] sm:$0xff]  ;;  %v10276_v61 = vld [vmem:[#allocation118_spill] sm:$0xff] }
 0x5e7   : > { %v2755_v13 = vsel %vm1455_vm12, %v2731_v16, %v10254_v62  ;;  %v2734_v42 = vsel %vm2718_vm15, %v2709_v18, %v10274_v34  ;;  %v10278_v55 = vld [vmem:[#allocation133_spill] sm:$0xff]  ;;  %v10279_v62 = vld [vmem:[#allocation140_spill] sm:$0xff]  ;;  %v10283_v51 = vld [vmem:[#allocation119_spill] sm:$0xff] }
 0x5e8   : > { %v2780_v50 = vsel %vm2767_vm0, %v2755_v13, %v10255_v57  ;;  %v2758_v10 = vsel %vm1455_vm12, %v2734_v42, %v10275_v58  ;;  %v10285_v11 = vld [vmem:[#allocation134_spill] sm:$0xff]  ;;  %v10292_v56 = vld [vmem:[#allocation107_spill] sm:$0xff] }
 0x5e9   : > { %v2805_v39 = vsel %vm2792_vm1, %v2780_v50, %v10256_v9  ;;  %v4634_v50 = vld [vmem:[#allocation3 + $0x140] sm:$0xff]  ;;  %v10289_v0 = vld [vmem:[#allocation94_spill] sm:$0xff] }
 0x5ea   : > { %v2830_v20 = vsel %vm2817_vm4, %v2805_v39, %v10257_v4  ;;  %v10280_v9 = vld [vmem:[#allocation4_spill] sm:$0xff]  ;;  %v10281_v4 = vld [vmem:[#allocation13_spill] sm:$0xff]  ;;  %v10290_v35 = vld [vmem:[#allocation30_spill] sm:$0xff] }
 0x5eb   : > { %v2855_v6 = vsel %vm2842_vm5, %v2830_v20, %v10258_v38  ;;  %v2710_v39 = vsel %vm1721_vm13, %v4634_v50, %v10280_v9  ;;  %v10282_v38 = vld [vmem:[#allocation112_spill] sm:$0xff]  ;;  %v10293_v26 = vld [vmem:[#allocation138_spill] sm:$0xff] }
 0x5ec   : > { %4497 = vmatmul.msk.f32.gmra.mxu1 %vm2895_vm6, %v2878_v2  ;;  %4509 = vmatmul.msk.f32.gmra.mxu3 %vm2895_vm6, %v2890_v52  ;;  %v2880_v22 = vsel %vm2867_vm7, %v2855_v6, %v7876_v53  ;;  %v2781_v2 = vsel %vm2767_vm0, %v2756_v14, %v10262_v21  ;;  %v10263_v52 = vld [vmem:[#allocation129_spill] sm:$0xff]  ;;  %v2735_v20 = vsel %vm2718_vm15, %v2710_v39, %v10281_v4 }
 0x5ed   : > { %v2806_v43 = vsel %vm2792_vm1, %v2781_v2, %v10263_v52  ;;  %v2759_v6 = vsel %vm1455_vm12, %v2735_v20, %v10282_v38  ;;  %v10286_v14 = vld [vmem:[#allocation141_spill] sm:$0xff] }
 0x5ee   : > { %v2831_v53 = vsel %vm2817_vm4, %v2806_v43, %v10264_v54  ;;  %v4635_v43 = vld [vmem:[#allocation3 + $0x150] sm:$0xff]  ;;  %v10287_v54 = vld [vmem:[#allocation65_spill] sm:$0xff] }
 0x5ef   : > { %v2856_v60 = vsel %vm2842_vm5, %v2831_v53, %v10265_v1  ;;  %v2711_v53 = vsel %vm1721_vm13, %v4635_v43, %v10287_v54 }
 0x5f0   : > { %v2881_v44 = vsel %vm2867_vm7, %v2856_v60, %v7894_v8  ;;  %v2832_v8 = vsel %vm2817_vm4, %v2807_v15, %v10271_v31  ;;  %v10288_v60 = vld [vmem:[#allocation111_spill] sm:$0xff] }
 0x5f1   : > { %v2857_v49 = vsel %vm2842_vm5, %v2832_v8, %v10272_v12 }
 0x5f2   : > { %v2882_v41 = vsel %vm2867_vm7, %v2857_v49, %v7903_v45  ;;  %v3223_v45 = vrot.slane %v8160_v46, 1 }
 0x5f4   : > { %4498 = vmatmul.msk.f32.gmra.mxu1 %vm2895_vm6, %v2879_v36  ;;  %4510 = vmatmul.msk.f32.gmra.mxu3 %vm2895_vm6, %v2891_v28  ;;  %v2783_v36 = vsel %vm2767_vm0, %v2758_v10, %v10276_v61  ;;  %v3224_v28 = vrot.slane %v8162_v59, 1 }
 0x5f5   : > { %v2808_v47 = vsel %vm2792_vm1, %v2783_v36, %v10277_v32 }
 0x5f6   : > { %v2833_v24 = vsel %vm2817_vm4, %v2808_v47, %v10278_v55  ;;  %v3225_v16 = vsel %vm511_vm2, %v3223_v45, %v3224_v28 }
 0x5f7   : > { %v2858_v13 = vsel %vm2842_vm5, %v2833_v24, %v10279_v62  ;;  %3415 = vrot.lane.b32.xlu0 %v3225_v16, %s4665_s29 }
 0x5f8   : > { %v2883_v57 = vsel %vm2867_vm7, %v2858_v13, %v7896_v37  ;;  %v2784_v37 = vsel %vm2767_vm0, %v2759_v6, %v10283_v51 }
 0x5f9   : > { %v2809_v27 = vsel %vm2792_vm1, %v2784_v37, %v10284_v25 }
 0x5fa   : > { %v2834_v29 = vsel %vm2817_vm4, %v2809_v27, %v10285_v11 }
 0x5fb   : > { %v2859_v21 = vsel %vm2842_vm5, %v2834_v29, %v10286_v14 }
 0x5fc   : > { %4499 = vmatmul.msk.f32.gmra.mxu1 %vm2895_vm6, %v2880_v22  ;;  %v8188_v22 = vld [vmem:[%s9606_s4] ss:$0 sm:$0xff]  ;;  %v2884_v52 = vsel %vm2867_vm7, %v2859_v21, %v7930_v17 }
 0x604   : > { %4500 = vmatmul.msk.f32.gmra.mxu1 %vm2895_vm6, %v2881_v44  ;;  %v2736_v44 = vsel %vm2718_vm15, %v2711_v53, %v10288_v60 }
 0x605   : > { %v2760_v7 = vsel %vm1455_vm12, %v2736_v44, %v10289_v0 }
 0x606   : > { %v2785_v30 = vsel %vm2767_vm0, %v2760_v7, %v10290_v35 }
 0x607   : > { %v2810_v17 = vsel %vm2792_vm1, %v2785_v30, %v10291_v3  ;;  %v8301_v3 = vld [vmem:[#allocation3 + $0xa0] sm:$0xff] }
 0x608   : > { %v2835_v19 = vsel %vm2817_vm4, %v2810_v17, %v10292_v56  ;;  %v8303_v17 = vld [vmem:[#allocation3 + $0xa8] sm:$0x3] }
 0x609   : > { %v2860_v48 = vsel %vm2842_vm5, %v2835_v19, %v10293_v26  ;;  %v3248_v26 = vrot.slane %v8303_v17, 1 }
 0x60a   : > { %v2885_v31 = vsel %vm2867_vm7, %v2860_v48, %v7948_v23 }
 0x60c   : > { %4501 = vmatmul.msk.f32.gmra.mxu1 %vm2895_vm6, %v2882_v41 }
 0x614   : > { %4502 = vmatmul.msk.f32.gmra.mxu1 %vm2895_vm6, %v2883_v57 }
 0x619   : > { %v2985_v33 = vpop.f32.mrf.mxu1 }
 0x61a   : > { %v2986_v2 = vadd.f32 %v8188_v22, %v2985_v33 }
 0x61c   : > { %v3057_v1 = vmax.f32 %v2986_v2, 0.0  ;;  %4503 = vmatmul.msk.f32.gmra.mxu1 %vm2895_vm6, %v2884_v52 }
 0x61e   : > { %3081 = vst.msk [vmem:[#allocation3 + $0x11] sm:$0xff] %vm1721_vm13, %v3057_v1 }
 0x621   : > { %v2988_v5 = vpop.f32.mrf.mxu1 }
 0x622   : > { %v2989_v15 = vadd.f32 %v8188_v22, %v2988_v5  ;;  %v3247_v5 = vrot.slane %v8301_v3, 1 }
 0x624   : > { %v3058_v8 = vmax.f32 %v2989_v15, 0.0  ;;  %4504 = vmatmul.msk.f32.gmra.mxu1 %vm2895_vm6, %v2885_v31 }
 0x625   : > { %v8221_v12 = vld [vmem:[#allocation3 + $0x10] sm:$0xff]  ;;  %v8223_v49 = vld [vmem:[#allocation3 + $0x18] sm:$0x3] }
 0x626   : > { %3082 = vst.msk [vmem:[#allocation3 + $0x21] sm:$0xff] %vm1721_vm13, %v3058_v8  ;;  %v3226_v41 = vrot.slane %v8221_v12, 1  ;;  %v3227_v63 = vrot.slane %v8223_v49, 1  ;;  %v3249_v8 = vsel %vm511_vm2, %v3247_v5, %v3248_v26 }
 0x628   : > { %v8229_v40 = vsel %vm511_vm2, %v3226_v41, %v3227_v63 }
 0x629   : > { %v2991_v18 = vpop.f32.mrf.mxu1  ;;  %3417 = vrot.lane.b32.xlu1 %v8229_v40, %s4665_s29 }
 0x62a   : > { %v2992_v23 = vadd.f32 %v8188_v22, %v2991_v18 }
 0x62c   : > { %v3059_v34 = vmax.f32 %v2992_v23, 0.0 }
 0x62d   : > { %v8234_v42 = vld [vmem:[#allocation3 + $0x20] sm:$0xff]  ;;  %v8236_v58 = vld [vmem:[#allocation3 + $0x28] sm:$0x3] }
 0x62e   : > { %3083 = vst.msk [vmem:[#allocation3 + $0x31] sm:$0xff] %vm1721_vm13, %v3059_v34  ;;  %v3229_v10 = vrot.slane %v8234_v42, 1  ;;  %v3230_v61 = vrot.slane %v8236_v58, 1 }
 0x630   : > { %v8242_v36 = vsel %vm511_vm2, %v3229_v10, %v3230_v61 }
 0x631   : > { %3419 = vrot.lane.b32.xlu2 %v8242_v36, %s4665_s29  ;;  %v2994_v45 = vpop.f32.mrf.mxu1 }
 0x632   : > { %v2995_v28 = vadd.f32 %v8188_v22, %v2994_v45 }
 0x634   : > { %v3060_v32 = vmax.f32 %v2995_v28, 0.0 }
 0x635   : > { %v8247_v47 = vld [vmem:[#allocation3 + $0x30] sm:$0xff]  ;;  %v8249_v55 = vld [vmem:[#allocation3 + $0x38] sm:$0x3] }
 0x636   : > { %3084 = vst.msk [vmem:[#allocation3 + $0x41] sm:$0xff] %vm1721_vm13, %v3060_v32  ;;  %v3232_v24 = vrot.slane %v8247_v47, 1  ;;  %v3233_v16 = vrot.slane %v8249_v55, 1 }
 0x638   : > { %v8255_v62 = vsel %vm511_vm2, %v3232_v24, %v3233_v16 }
 0x639   : > { %3421 = vrot.lane.b32.xlu0 %v8255_v62, %s4665_s29  ;;  %v2997_v13 = vpop.f32.mrf.mxu1 }
 0x63a   : > { %v2998_v57 = vadd.f32 %v8188_v22, %v2997_v13 }
 0x63c   : > { %v3061_v50 = vmax.f32 %v2998_v57, 0.0 }
 0x63d   : > { %v8260_v9 = vld [vmem:[#allocation3 + $0x40] sm:$0xff]  ;;  %v8262_v39 = vld [vmem:[#allocation3 + $0x48] sm:$0x3] }
 0x63e   : > { %3085 = vst.msk [vmem:[#allocation3 + $0x51] sm:$0xff] %vm1721_vm13, %v3061_v50  ;;  %v3235_v4 = vrot.slane %v8260_v9, 1  ;;  %v3236_v20 = vrot.slane %v8262_v39, 1 }
 0x640   : > { %v8268_v38 = vsel %vm511_vm2, %v3235_v4, %v3236_v20 }
 0x641   : > { %v3000_v6 = vpop.f32.mrf.mxu1  ;;  %3423 = vrot.lane.b32.xlu1 %v8268_v38, %s4665_s29 }
 0x642   : > { %v3001_v51 = vadd.f32 %v8188_v22, %v3000_v6 }
 0x644   : > { %v3062_v37 = vmax.f32 %v3001_v51, 0.0 }
 0x645   : > { %v8273_v25 = vld [vmem:[#allocation3 + $0x50] sm:$0xff]  ;;  %v8275_v27 = vld [vmem:[#allocation3 + $0x58] sm:$0x3] }
 0x646   : > { %3086 = vst.msk [vmem:[#allocation3 + $0x61] sm:$0xff] %vm1721_vm13, %v3062_v37  ;;  %v3238_v11 = vrot.slane %v8273_v25, 1  ;;  %v3239_v29 = vrot.slane %v8275_v27, 1 }
 0x648   : > { %v8281_v33 = vsel %vm511_vm2, %v3238_v11, %v3239_v29 }
 0x649   : > { %3425 = vrot.lane.b32.xlu2 %v8281_v33, %s4665_s29  ;;  %v3003_v14 = vpop.f32.mrf.mxu1 }
 0x64a   : > { %v3004_v21 = vadd.f32 %v8188_v22, %v3003_v14 }
 0x64c   : > { %v3063_v2 = vmax.f32 %v3004_v21, 0.0 }
 0x64d   : > { %v8286_v52 = vld [vmem:[#allocation3 + $0x60] sm:$0xff]  ;;  %v8288_v43 = vld [vmem:[#allocation3 + $0x68] sm:$0x3] }
 0x64e   : > { %3087 = vst.msk [vmem:[#allocation3 + $0x71] sm:$0xff] %vm1721_vm13, %v3063_v2  ;;  %v3241_v54 = vrot.slane %v8286_v52, 1  ;;  %v3242_v53 = vrot.slane %v8288_v43, 1 }
 0x64f   : > { %v3039_v1 = vpop.f32.mrf.mxu3 }
 0x650   : > { %v3040_v60 = vadd.f32 %v8188_v22, %v3039_v1  ;;  %v8295_v44 = vsel %vm511_vm2, %v3241_v54, %v3242_v53 }
 0x651   : > { %3427 = vrot.lane.b32.xlu0 %v8295_v44, %s4665_s29  ;;  %v3006_v0 = vpop.f32.mrf.mxu1  ;;  %3431 = vrot.lane.b32.xlu2 %v3249_v8, %s4665_s29 }
 0x652   : > { %v3075_v7 = vmax.f32 %v3040_v60, 0.0  ;;  %v3007_v35 = vadd.f32 %v8188_v22, %v3006_v0 }
 0x654   : > { %3099 = vst.msk [vmem:[#allocation3 + $0x171] sm:$0xff] %vm1721_vm13, %v3075_v7  ;;  %v3064_v30 = vmax.f32 %v3007_v35, 0.0 }
 0x655   : > { %v8305_v56 = vld [vmem:[#allocation3 + $0x70] sm:$0xff]  ;;  %v8307_v19 = vld [vmem:[#allocation3 + $0x78] sm:$0x3] }
 0x656   : > { %3088 = vst.msk [vmem:[#allocation3 + $0x81] sm:$0xff] %vm1721_vm13, %v3064_v30  ;;  %v3244_v48 = vrot.slane %v8305_v56, 1  ;;  %v3245_v15 = vrot.slane %v8307_v19, 1 }
 0x657   : > { %v3042_v31 = vpop.f32.mrf.mxu3 }
 0x658   : > { %v3043_v41 = vadd.f32 %v8188_v22, %v3042_v31  ;;  %v8317_v63 = vsel %vm511_vm2, %v3244_v48, %v3245_v15 }
 0x659   : > { %10294 = vst [vmem:[#allocation72_spill] sm:$0xff] %v8317_v63  ;;  %v3009_v18 = vpop.f32.mrf.mxu1  ;;  %3429 = vrot.lane.b32.xlu1 %v8317_v63, %s4665_s29 }
 0x65a   : > { %v3076_v23 = vmax.f32 %v3043_v41, 0.0  ;;  %v3010_v34 = vadd.f32 %v8188_v22, %v3009_v18 }
 0x65c   : > { %3100 = vst.msk [vmem:[#allocation3 + $0x181] sm:$0xff] %vm1721_vm13, %v3076_v23  ;;  %v3065_v10 = vmax.f32 %v3010_v34, 0.0 }
 0x65e   : > { %3089 = vst.msk [vmem:[#allocation3 + $0xb1] sm:$0xff] %vm1721_vm13, %v3065_v10 }
 0x65f   : > { %v3045_v61 = vpop.f32.mrf.mxu3 }
 0x660   : > { %v3046_v45 = vadd.f32 %v8188_v22, %v3045_v61 }
 0x661   : > { %v3012_v28 = vpop.f32.mrf.mxu1 }
 0x662   : > { %v3077_v32 = vmax.f32 %v3046_v45, 0.0  ;;  %v3013_v24 = vadd.f32 %v8188_v22, %v3012_v28 }
 0x664   : > { %3101 = vst.msk [vmem:[#allocation3 + $0x191] sm:$0xff] %vm1721_vm13, %v3077_v32  ;;  %v3066_v16 = vmax.f32 %v3013_v24, 0.0 }
 0x665   : > { %v8328_v13 = vld [vmem:[#allocation3 + $0xb0] sm:$0xff]  ;;  %v8330_v57 = vld [vmem:[#allocation3 + $0xb8] sm:$0x3] }
 0x666   : > { %10295 = vst [vmem:[#allocation97_spill] sm:$0xff] %v8328_v13  ;;  %v3250_v50 = vrot.slane %v8328_v13, 1  ;;  %v3251_v4 = vrot.slane %v8330_v57, 1 }
 0x667   : > { %3090 = vst.msk [vmem:[#allocation3 + $0xc1] sm:$0xff] %vm1721_vm13, %v3066_v16  ;;  %v3048_v20 = vpop.f32.mrf.mxu3 }
 0x668   : > { %v3049_v6 = vadd.f32 %v8188_v22, %v3048_v20  ;;  %v8337_v51 = vsel %vm511_vm2, %v3250_v50, %v3251_v4 }
 0x669   : > { %3433 = vrot.lane.b32.xlu0 %v8337_v51, %s4665_s29  ;;  %v3015_v37 = vpop.f32.mrf.mxu1 }
 0x66a   : > { %v3078_v11 = vmax.f32 %v3049_v6, 0.0  ;;  %v3016_v29 = vadd.f32 %v8188_v22, %v3015_v37 }
 0x66c   : > { %3102 = vst.msk [vmem:[#allocation3 + $0x1a1] sm:$0xff] %vm1721_vm13, %v3078_v11  ;;  %v3067_v14 = vmax.f32 %v3016_v29, 0.0 }
 0x66e   : > { %v8343_v21 = vld [vmem:[#allocation3 + $0xc0] sm:$0xff]  ;;  %v8345_v2 = vld [vmem:[#allocation3 + $0xc8] sm:$0x3]  ;;  %3091 = vst.msk [vmem:[#allocation3 + $0xd1] sm:$0xff] %vm1721_vm13, %v3067_v14 }
 0x66f   : > { %v3253_v54 = vrot.slane %v8343_v21, 1  ;;  %v3254_v53 = vrot.slane %v8345_v2, 1  ;;  %v3051_v1 = vpop.f32.mrf.mxu3  ;;  %v8393_v14 = vld [vmem:[#allocation3 + $0x140] sm:$0xff] }
 0x670   : > { %v3052_v60 = vadd.f32 %v8188_v22, %v3051_v1 }
 0x671   : > { %v8352_v0 = vsel %vm511_vm2, %v3253_v54, %v3254_v53  ;;  %v3018_v7 = vpop.f32.mrf.mxu1  ;;  %v8395_v54 = vld [vmem:[#allocation3 + $0x148] sm:$0x3] }
 0x672   : > { %10296 = vst [vmem:[#allocation93_spill] sm:$0xff] %v8352_v0  ;;  %3435 = vrot.lane.b32.xlu1 %v8352_v0, %s4665_s29  ;;  %v3079_v35 = vmax.f32 %v3052_v60, 0.0  ;;  %v3019_v30 = vadd.f32 %v8188_v22, %v3018_v7  ;;  %v3271_v7 = vrot.slane %v8393_v14, 1  ;;  %v8505_v0 = vld [vmem:[#allocation3 + $0x198] sm:$0x3] }
 0x674   : > { %3103 = vst.msk [vmem:[#allocation3 + $0x1b1] sm:$0xff] %vm1721_vm13, %v3079_v35  ;;  %v3068_v5 = vmax.f32 %v3019_v30, 0.0  ;;  %v3272_v35 = vrot.slane %v8395_v54, 1 }
 0x675   : > { %v8358_v26 = vld [vmem:[#allocation3 + $0xd0] sm:$0xff]  ;;  %v8360_v48 = vld [vmem:[#allocation3 + $0xd8] sm:$0x3] }
 0x676   : > { %3092 = vst.msk [vmem:[#allocation3 + $0xe1] sm:$0xff] %vm1721_vm13, %v3068_v5  ;;  %v3256_v15 = vrot.slane %v8358_v26, 1  ;;  %v3257_v31 = vrot.slane %v8360_v48, 1 }
 0x677   : > { %v3054_v8 = vpop.f32.mrf.mxu3 }
 0x678   : > { %v3055_v41 = vadd.f32 %v8188_v22, %v3054_v8  ;;  %v8367_v18 = vsel %vm511_vm2, %v3256_v15, %v3257_v31 }
 0x679   : > { %10297 = vst [vmem:[#allocation88_spill] sm:$0xff] %v8367_v18  ;;  %3437 = vrot.lane.b32.xlu2 %v8367_v18, %s4665_s29  ;;  %v3021_v23 = vpop.f32.mrf.mxu1 }
 0x67a   : > { %v3080_v34 = vmax.f32 %v3055_v41, 0.0  ;;  %v3022_v10 = vadd.f32 %v8188_v22, %v3021_v23  ;;  %v3273_v41 = vsel %vm511_vm2, %v3271_v7, %v3272_v35 }
 0x67c   : > { %3104 = vst.msk [vmem:[#allocation3 + $0x1c1] sm:$0xff] %vm1721_vm13, %v3080_v34  ;;  %v3069_v61 = vmax.f32 %v3022_v10, 0.0  ;;  %v8419_v10 = vld [vmem:[#allocation3 + $0x170] sm:$0xff] }
 0x67d   : > { %v8373_v45 = vld [vmem:[#allocation3 + $0xe0] sm:$0xff]  ;;  %v8375_v28 = vld [vmem:[#allocation3 + $0xe8] sm:$0x3] }
 0x67e   : > { %10298 = vst [vmem:[#allocation34_spill] sm:$0xff] %v8373_v45  ;;  %v3259_v32 = vrot.slane %v8373_v45, 1  ;;  %v3260_v24 = vrot.slane %v8375_v28, 1 }
 0x67f   : > { %3093 = vst.msk [vmem:[#allocation3 + $0xf1] sm:$0xff] %vm1721_vm13, %v3069_v61  ;;  %v8421_v61 = vld [vmem:[#allocation3 + $0x178] sm:$0x3] }
 0x680   : > { %v8381_v16 = vsel %vm511_vm2, %v3259_v32, %v3260_v24 }
 0x681   : > { %10299 = vst [vmem:[#allocation64_spill] sm:$0xff] %v8381_v16  ;;  %3439 = vrot.lane.b32.xlu0 %v8381_v16, %s4665_s29  ;;  %v3024_v50 = vpop.f32.mrf.mxu1  ;;  %v8507_v16 = vld [vmem:[#allocation3 + $0x1b0] sm:$0xff] }
 0x682   : > { %v3025_v4 = vadd.f32 %v8188_v22, %v3024_v50  ;;  %v3280_v50 = vrot.slane %v8419_v10, 1 }
 0x684   : > { %v3070_v20 = vmax.f32 %v3025_v4, 0.0  ;;  %v3281_v4 = vrot.slane %v8421_v61, 1 }
 0x686   : > { %v8386_v6 = vld [vmem:[#allocation3 + $0xf0] sm:$0xff]  ;;  %v8388_v37 = vld [vmem:[#allocation3 + $0xf8] sm:$0x3]  ;;  %3094 = vst.msk [vmem:[#allocation3 + $0x101] sm:$0xff] %vm1721_vm13, %v3070_v20  ;;  %v8437_v7 = vsel %vm511_vm2, %v3280_v50, %v3281_v4 }
 0x687   : > { %v3262_v11 = vrot.slane %v8386_v6, 1  ;;  %v3263_v29 = vrot.slane %v8388_v37, 1  ;;  %10304 = vst [vmem:[#allocation56_spill] sm:$0xff] %v8437_v7 }
 0x689   : > { %v8398_v53 = vsel %vm511_vm2, %v3262_v11, %v3263_v29  ;;  %v3027_v1 = vpop.f32.mrf.mxu1 }
 0x68a   : > { %10300 = vst [vmem:[#allocation22_spill] sm:$0xff] %v8398_v53  ;;  %3441 = vrot.lane.b32.xlu1 %v8398_v53, %s4665_s29  ;;  %v3028_v60 = vadd.f32 %v8188_v22, %v3027_v1 }
 0x68c   : > { %v3071_v30 = vmax.f32 %v3028_v60, 0.0 }
 0x68d   : > { %v8405_v5 = vld [vmem:[#allocation3 + $0x100] sm:$0xff]  ;;  %v8407_v15 = vld [vmem:[#allocation3 + $0x108] sm:$0x3] }
 0x68e   : > { %3095 = vst.msk [vmem:[#allocation3 + $0x111] sm:$0xff] %vm1721_vm13, %v3071_v30  ;;  %v3265_v31 = vrot.slane %v8405_v5, 1  ;;  %v3266_v8 = vrot.slane %v8407_v15, 1  ;;  %v8443_v30 = vld [vmem:[#allocation3 + $0x1a0] sm:$0xff] }
 0x690   : > { %v8414_v23 = vsel %vm511_vm2, %v3265_v31, %v3266_v8  ;;  %v8445_v31 = vld [vmem:[#allocation3 + $0x1a8] sm:$0x3] }
 0x691   : > { %10301 = vst [vmem:[#allocation47_spill] sm:$0xff] %v8414_v23  ;;  %3443 = vrot.lane.b32.xlu2 %v8414_v23, %s4665_s29  ;;  %v3030_v34 = vpop.f32.mrf.mxu1 }
 0x692   : > { %3447 = vrot.lane.b32.xlu1 %v3273_v41, %s4665_s29  ;;  %v3031_v32 = vadd.f32 %v8188_v22, %v3030_v34  ;;  %v3289_v34 = vrot.slane %v8443_v30, 1 }
 0x694   : > { %v3072_v24 = vmax.f32 %v3031_v32, 0.0  ;;  %v3290_v32 = vrot.slane %v8445_v31, 1 }
 0x695   : > { %v8426_v20 = vld [vmem:[#allocation3 + $0x110] sm:$0xff]  ;;  %v8428_v11 = vld [vmem:[#allocation3 + $0x118] sm:$0x3] }
 0x696   : > { %10302 = vst [vmem:[#allocation105_spill] sm:$0xff] %v8426_v20  ;;  %v3268_v29 = vrot.slane %v8426_v20, 1  ;;  %v3269_v1 = vrot.slane %v8428_v11, 1 }
 0x697   : > { %3096 = vst.msk [vmem:[#allocation3 + $0x121] sm:$0xff] %vm1721_vm13, %v3072_v24  ;;  %v8452_v24 = vsel %vm511_vm2, %v3289_v34, %v3290_v32 }
 0x698   : > { %v8434_v60 = vsel %vm511_vm2, %v3268_v29, %v3269_v1  ;;  %10305 = vst [vmem:[#allocation114_spill] sm:$0xff] %v8452_v24  ;;  %v3298_v1 = vrot.slane %v8221_v12, 2 }
 0x699   : > { %10303 = vst [vmem:[#allocation16_spill] sm:$0xff] %v8434_v60  ;;  %3445 = vrot.lane.b32.xlu0 %v8434_v60, %s4665_s29  ;;  %v3033_v35 = vpop.f32.mrf.mxu1  ;;  %v8496_v60 = vld [vmem:[#allocation3 + $0x190] sm:$0xff] }
 0x69a   : > { %3453 = vrot.lane.b32.xlu1 %v8437_v7, %s4665_s29  ;;  %v3034_v8 = vadd.f32 %v8188_v22, %v3033_v35  ;;  %v3299_v35 = vrot.slane %v8223_v49, 2  ;;  %v8476_v49 = vld [vmem:[#allocation3 + $0x180] sm:$0xff] }
 0x69b   : > { %10308 = vst [vmem:[#allocation91_spill] sm:$0xff] %v8476_v49 }
 0x69c   : > { %v3073_v41 = vmax.f32 %v3034_v8, 0.0 }
 0x69e   : > { %3097 = vst.msk [vmem:[#allocation3 + $0x151] sm:$0xff] %vm1721_vm13, %v3073_v41 }
 0x6a1   : > { %v3036_v50 = vpop.f32.mrf.mxu1 }
 0x6a2   : > { %3459 = vrot.lane.b32.xlu1 %v8452_v24, %s4665_s29  ;;  %v3037_v4 = vadd.f32 %v8188_v22, %v3036_v50  ;;  %v8470_v22 = vsel %vm584_vm3, %v3298_v1, %v3299_v35  ;;  %v8478_v50 = vld [vmem:[#allocation3 + $0x188] sm:$0x3]  ;;  %v3307_v1 = vrot.slane %v8260_v9, 2  ;;  %v3308_v35 = vrot.slane %v8262_v39, 2 }
 0x6a3   : > { %10307 = vst [vmem:[#allocation45_spill] sm:$0xff] %v8470_v22 }
 0x6a4   : > { %v3074_v29 = vmax.f32 %v3037_v4, 0.0  ;;  %v3283_v4 = vrot.slane %v8476_v49, 1  ;;  %v8503_v39 = vsel %vm584_vm3, %v3307_v1, %v3308_v35  ;;  %v3316_v1 = vrot.slane %v8305_v56, 2 }
 0x6a5   : > { %v8459_v8 = vld [vmem:[#allocation3 + $0x150] sm:$0xff]  ;;  %v8461_v7 = vld [vmem:[#allocation3 + $0x158] sm:$0x3]  ;;  %10311 = vst [vmem:[#allocation55_spill] sm:$0xff] %v8503_v39  ;;  %v3317_v35 = vrot.slane %v8307_v19, 2  ;;  %v3295_v19 = vrot.slane %v8160_v46, 2 }
 0x6a6   : > { %3098 = vst.msk [vmem:[#allocation3 + $0x161] sm:$0xff] %vm1721_vm13, %v3074_v29  ;;  %v3274_v41 = vrot.slane %v8459_v8, 1  ;;  %v3275_v34 = vrot.slane %v8461_v7, 1  ;;  %v3284_v29 = vrot.slane %v8478_v50, 1 }
 0x6a8   : > { %v8467_v32 = vsel %vm511_vm2, %v3274_v41, %v3275_v34  ;;  %v8494_v53 = vsel %vm511_vm2, %v3283_v4, %v3284_v29  ;;  %v3286_v4 = vrot.slane %v8496_v60, 1  ;;  %v3287_v29 = vrot.slane %v8505_v0, 1 }
 0x6a9   : > { %10306 = vst [vmem:[#allocation19_spill] sm:$0xff] %v8467_v32  ;;  %3449 = vrot.lane.b32.xlu2 %v8467_v32, %s4665_s29 }
 0x6aa   : > { %3489 = vrot.lane.b32.xlu1 %v8470_v22, %s4666_s30  ;;  %10310 = vst [vmem:[#allocation69_spill] sm:$0xff] %v8494_v53 }
 0x6ad   : > { %v8482_v24 = vld [vmem:[#allocation3 + $0x160] sm:$0xff]  ;;  %v8484_v41 = vld [vmem:[#allocation3 + $0x168] sm:$0x3] }
 0x6ae   : > { %v3277_v34 = vrot.slane %v8482_v24, 1  ;;  %v3278_v32 = vrot.slane %v8484_v41, 1 }
 0x6b0   : > { %v8491_v22 = vsel %vm511_vm2, %v3277_v34, %v3278_v32  ;;  %v8509_v32 = vld [vmem:[#allocation3 + $0x1b8] sm:$0x3]  ;;  %v3292_v34 = vrot.slane %v8507_v16, 1 }
 0x6b1   : > { %10309 = vst [vmem:[#allocation60_spill] sm:$0xff] %v8491_v22  ;;  %3451 = vrot.lane.b32.xlu0 %v8491_v22, %s4665_s29  ;;  %3455 = vrot.lane.b32.xlu2 %v8494_v53, %s4665_s29  ;;  %v3293_v22 = vrot.slane %v8509_v32, 1  ;;  %v8520_v53 = vsel %vm511_vm2, %v3286_v4, %v3287_v29  ;;  %v3296_v4 = vrot.slane %v8162_v59, 2  ;;  %v3301_v29 = vrot.slane %v8234_v42, 2 }
 0x6b2   : > { %3495 = vrot.lane.b32.xlu1 %v8503_v39, %s4666_s30  ;;  %10312 = vst [vmem:[#allocation73_spill] sm:$0xff] %v8520_v53  ;;  %v8530_v39 = vsel %vm584_vm3, %v3316_v1, %v3317_v35  ;;  %v3304_v59 = vrot.slane %v8247_v47, 2  ;;  %v3311_v35 = vrot.slane %v8275_v27, 2  ;;  %v3319_v27 = vrot.slane %v8301_v3, 2 }
 0x6b3   : > { %v8523_v63 = vsel %vm511_vm2, %v3292_v34, %v3293_v22  ;;  %v3302_v22 = vrot.slane %v8236_v58, 2  ;;  %v3325_v34 = vrot.slane %v8343_v21, 2  ;;  %v3305_v58 = vrot.slane %v8249_v55, 2 }
 0x6b4   : > { %10313 = vst [vmem:[#allocation99_spill] sm:$0xff] %v8523_v63 }
 0x6b5   : > { %v8542_v1 = vsel %vm584_vm3, %v3301_v29, %v3302_v22  ;;  %v3343_v29 = vrot.slane %v8393_v14, 2  ;;  %v3344_v22 = vrot.slane %v8395_v54, 2  ;;  %v3323_v14 = vrot.slane %v8330_v57, 2 }
 0x6b6   : > { %v3329_v54 = vrot.slane %v8360_v48, 2  ;;  %v8611_v48 = vpop.permute.xlu1 %3417 }
 0x6b7   : > { %10318 = vst [vmem:[#allocation86_spill] sm:$0xff] %v8611_v48 }
 0x6b9   : > { %3457 = vrot.lane.b32.xlu0 %v8520_v53, %s4665_s29  ;;  %3461 = vrot.lane.b32.xlu2 %v8523_v63, %s4665_s29  ;;  %v3326_v53 = vrot.slane %v8345_v2, 2  ;;  %v3297_v63 = vsel %vm584_vm3, %v3295_v19, %v3296_v4  ;;  %v3310_v2 = vrot.slane %v8273_v25, 2  ;;  %v3334_v19 = vrot.slane %v8386_v6, 2 }
 0x6ba   : > { %3501 = vrot.lane.b32.xlu1 %v8530_v39, %s4666_s30  ;;  %v8559_v4 = vsel %vm584_vm3, %v3304_v59, %v3305_v58  ;;  %v3314_v59 = vrot.slane %v8288_v43, 2  ;;  %v3328_v43 = vrot.slane %v8358_v26, 2 }
 0x6bb   : > { %v8548_v46 = vsel %vm584_vm3, %v3325_v34, %v3326_v53  ;;  %v8562_v53 = vsel %vm584_vm3, %v3310_v2, %v3311_v35  ;;  %v3313_v34 = vrot.slane %v8286_v52, 2  ;;  %v3345_v2 = vsel %vm584_vm3, %v3343_v29, %v3344_v22  ;;  %v8600_v29 = vpop.permute.xlu2 %3419 }
 0x6bc   : > { %10314 = vst [vmem:[#allocation61_spill] sm:$0xff] %v8548_v46  ;;  %v3332_v22 = vrot.slane %v8375_v28, 2 }
 0x6bd   : > { %v8582_v35 = vsel %vm584_vm3, %v3313_v34, %v3314_v59  ;;  %10316 = vst [vmem:[#allocation44_spill] sm:$0xff] %v8600_v29  ;;  %v3337_v34 = vrot.slane %v8405_v5, 2  ;;  %v3338_v59 = vrot.slane %v8407_v15, 2  ;;  %v8764_v29 = vld [vmem:[#allocation3 + $0x120] sm:$0xff] }
 0x6be   : > { %v8636_v15 = vpop.permute.xlu1 %3423  ;;  %10340 = vst [vmem:[#allocation95_spill] sm:$0xff] %v8764_v29 }
 0x6c1   : > { %3487 = vrot.lane.b32.xlu0 %v3297_v63, %s4666_s30  ;;  %3491 = vrot.lane.b32.xlu2 %v8542_v1, %s4666_s30  ;;  %v3335_v63 = vrot.slane %v8388_v37, 2  ;;  %v3320_v37 = vrot.slane %v8303_v17, 2  ;;  %v3322_v17 = vrot.slane %v8328_v13, 2 }
 0x6c2   : > { %3507 = vrot.lane.b32.xlu1 %v8548_v46, %s4666_s30 }
 0x6c3   : > { %v8569_v55 = vsel %vm584_vm3, %v3334_v19, %v3335_v63  ;;  %v3321_v58 = vsel %vm584_vm3, %v3319_v27, %v3320_v37  ;;  %v3352_v19 = vrot.slane %v8419_v10, 2  ;;  %v3353_v63 = vrot.slane %v8421_v61, 2 }
 0x6c4   : > { %10315 = vst [vmem:[#allocation33_spill] sm:$0xff] %v8569_v55  ;;  %v8595_v27 = vsel %vm584_vm3, %v3322_v17, %v3323_v14  ;;  %v8598_v37 = vsel %vm584_vm3, %v3328_v43, %v3329_v54  ;;  %v3331_v61 = vrot.slane %v8373_v45, 2  ;;  %v8623_v14 = vsel %vm584_vm3, %v3337_v34, %v3338_v59  ;;  %v8625_v43 = vpop.permute.xlu2 %3425 }
 0x6c5   : > { %v8607_v57 = vsel %vm584_vm3, %v3352_v19, %v3353_v63  ;;  %10320 = vst [vmem:[#allocation40_spill] sm:$0xff] %v8623_v14  ;;  %v3341_v54 = vrot.slane %v8428_v11, 2  ;;  %v3346_v19 = vrot.slane %v8459_v8, 2  ;;  %v3347_v63 = vrot.slane %v8461_v7, 2 }
 0x6c6   : > { %10317 = vst [vmem:[#allocation104_spill] sm:$0xff] %v8607_v57  ;;  %v8620_v17 = vsel %vm584_vm3, %v3331_v61, %v3332_v22  ;;  %v3349_v7 = vrot.slane %v8482_v24, 2  ;;  %v3350_v59 = vrot.slane %v8484_v41, 2 }
 0x6c7   : > { %10319 = vst [vmem:[#allocation80_spill] sm:$0xff] %v8620_v17  ;;  %v8646_v22 = vsel %vm584_vm3, %v3346_v19, %v3347_v63  ;;  %v3358_v63 = vrot.slane %v8496_v60, 2 }
 0x6c8   : > { %10323 = vst [vmem:[#allocation36_spill] sm:$0xff] %v8646_v22 }
 0x6c9   : > { %3493 = vrot.lane.b32.xlu0 %v8559_v4, %s4666_s30  ;;  %3497 = vrot.lane.b32.xlu2 %v8562_v53, %s4666_s30 }
 0x6ca   : > { %3513 = vrot.lane.b32.xlu1 %v8569_v55, %s4666_s30 }
 0x6cb   : > { %v8656_v11 = vpop.permute.xlu1 %3429 }
 0x6cc   : > { %v8648_v34 = vpop.permute.xlu2 %3431 }
 0x6d1   : > { %3499 = vrot.lane.b32.xlu0 %v8582_v35, %s4666_s30  ;;  %3503 = vrot.lane.b32.xlu2 %v3321_v58, %s4666_s30  ;;  %v3361_v58 = vrot.slane %v8443_v30, 2 }
 0x6d2   : > { %3519 = vrot.lane.b32.xlu1 %v3345_v2, %s4666_s30  ;;  %v3362_v2 = vrot.slane %v8445_v31, 2  ;;  %v3340_v31 = vrot.slane %v8426_v20, 2 }
 0x6d4   : > { %v8632_v28 = vsel %vm584_vm3, %v3361_v58, %v3362_v2  ;;  %v8643_v61 = vsel %vm584_vm3, %v3340_v31, %v3341_v54  ;;  %v3355_v58 = vrot.slane %v8476_v49, 2  ;;  %v3356_v2 = vrot.slane %v8478_v50, 2  ;;  %v8662_v31 = vpop.permute.xlu0 %3415  ;;  %v8676_v41 = vpop.permute.xlu2 %3437 }
 0x6d5   : > { %10321 = vst [vmem:[#allocation6_spill] sm:$0xff] %v8632_v28  ;;  %v8665_v54 = vsel %vm584_vm3, %v3349_v7, %v3350_v59  ;;  %v3359_v7 = vrot.slane %v8505_v0, 2  ;;  %v3364_v59 = vrot.slane %v8507_v16, 2 }
 0x6d6   : > { %10322 = vst [vmem:[#allocation10_spill] sm:$0xff] %v8643_v61  ;;  %v8668_v19 = vsel %vm584_vm3, %v3355_v58, %v3356_v2  ;;  %v3365_v58 = vrot.slane %v8509_v32, 2 }
 0x6d7   : > { %10324 = vst [vmem:[#allocation110_spill] sm:$0xff] %v8662_v31  ;;  %v8685_v2 = vsel %vm584_vm3, %v3358_v63, %v3359_v7 }
 0x6d8   : > { %10325 = vst [vmem:[#allocation9_spill] sm:$0xff] %v8665_v54 }
 0x6d9   : > { %3505 = vrot.lane.b32.xlu0 %v8595_v27, %s4666_s30  ;;  %3509 = vrot.lane.b32.xlu2 %v8598_v37, %s4666_s30  ;;  %10326 = vst [vmem:[#allocation81_spill] sm:$0xff] %v8668_v19 }
 0x6da   : > { %3525 = vrot.lane.b32.xlu1 %v8607_v57, %s4666_s30  ;;  %10327 = vst [vmem:[#allocation79_spill] sm:$0xff] %v8685_v2 }
 0x6e1   : > { %3511 = vrot.lane.b32.xlu0 %v8620_v17, %s4666_s30  ;;  %3515 = vrot.lane.b32.xlu2 %v8623_v14, %s4666_s30 }
 0x6e2   : > { %3531 = vrot.lane.b32.xlu1 %v8632_v28, %s4666_s30  ;;  %v8696_v28 = vpop.permute.xlu0 %3421 }
 0x6e4   : > { %v8678_v50 = vpop.permute.xlu1 %3435 }
 0x6e9   : > { %3517 = vrot.lane.b32.xlu0 %v8643_v61, %s4666_s30  ;;  %3521 = vrot.lane.b32.xlu2 %v8646_v22, %s4666_s30  ;;  %v8694_v22 = vld [vmem:[#allocation3 + $0x80] sm:$0xff] }
 0x6ea   : > { %3561 = vrot.lane.b32.xlu1 %v8234_v42, %s4664_s15  ;;  %v8708_v63 = vpop.permute.xlu0 %3427  ;;  %v3373_v48 = vrot.slane %v8694_v22, 1 }
 0x6eb   : > { %v8700_v0 = vpop.permute.xlu2 %3443  ;;  %10329 = vst [vmem:[#allocation74_spill] sm:$0xff] %v8708_v63 }
 0x6f1   : > { %3523 = vrot.lane.b32.xlu0 %v8665_v54, %s4666_s30  ;;  %3527 = vrot.lane.b32.xlu2 %v8668_v19, %s4666_s30  ;;  %v8688_v54 = vsel %vm584_vm3, %v3364_v59, %v3365_v58 }
 0x6f2   : > { %3567 = vrot.lane.b32.xlu1 %v8273_v25, %s4664_s15  ;;  %10328 = vst [vmem:[#allocation83_spill] sm:$0xff] %v8688_v54  ;;  %v8720_v58 = vpop.permute.xlu0 %3433 }
 0x6f3   : > { %10332 = vst [vmem:[#allocation58_spill] sm:$0xff] %v8720_v58 }
 0x6f9   : > { %3529 = vrot.lane.b32.xlu0 %v8685_v2, %s4666_s30  ;;  %3533 = vrot.lane.b32.xlu2 %v8688_v54, %s4666_s30 }
 0x6fa   : > { %3573 = vrot.lane.b32.xlu1 %v8694_v22, %s4664_s15 }
 0x6fc   : > { %v8702_v32 = vpop.permute.xlu1 %3441 }
 0x701   : > { %3559 = vrot.lane.b32.xlu0 %v8221_v12, %s4664_s15  ;;  %3563 = vrot.lane.b32.xlu2 %v8247_v47, %s4664_s15 }
 0x702   : > { %3579 = vrot.lane.b32.xlu1 %v8358_v26, %s4664_s15 }
 0x703   : > { %v8714_v59 = vpop.permute.xlu2 %3449 }
 0x704   : > { %v8712_v7 = vpop.permute.xlu1 %3447  ;;  %10331 = vst [vmem:[#allocation77_spill] sm:$0xff] %v8714_v59  ;;  %v8732_v59 = vpop.permute.xlu0 %3439 }
 0x705   : > { %10330 = vst [vmem:[#allocation84_spill] sm:$0xff] %v8712_v7 }
 0x706   : > { %10335 = vst [vmem:[#allocation85_spill] sm:$0xff] %v8732_v59 }
 0x709   : > { %3565 = vrot.lane.b32.xlu0 %v8260_v9, %s4664_s15  ;;  %3569 = vrot.lane.b32.xlu2 %v8286_v52, %s4664_s15 }
 0x70a   : > { %3585 = vrot.lane.b32.xlu1 %v8405_v5, %s4664_s15 }
 0x70b   : > { %v8724_v12 = vpop.permute.xlu2 %3455 }
 0x70c   : > { %10333 = vst [vmem:[#allocation115_spill] sm:$0xff] %v8724_v12  ;;  %v8726_v54 = vpop.permute.xlu1 %3453  ;;  %v8744_v12 = vpop.permute.xlu0 %3445 }
 0x70d   : > { %10334 = vst [vmem:[#allocation7_spill] sm:$0xff] %v8726_v54 }
 0x70e   : > { %10336 = vst [vmem:[#allocation89_spill] sm:$0xff] %v8744_v12 }
 0x711   : > { %3571 = vrot.lane.b32.xlu0 %v8305_v56, %s4664_s15  ;;  %3575 = vrot.lane.b32.xlu2 %v8328_v13, %s4664_s15 }
 0x712   : > { %3591 = vrot.lane.b32.xlu1 %v8459_v8, %s4664_s15 }
 0x713   : > { %v8736_v7 = vpop.permute.xlu2 %3461 }
 0x714   : > { %v8738_v2 = vpop.permute.xlu1 %3459 }
 0x719   : > { %3577 = vrot.lane.b32.xlu0 %v8343_v21, %s4664_s15  ;;  %3581 = vrot.lane.b32.xlu2 %v8373_v45, %s4664_s15 }
 0x71a   : > { %3597 = vrot.lane.b32.xlu1 %v8476_v49, %s4664_s15  ;;  %v8794_v49 = vld [vmem:[#allocation3 + $0x1c0] sm:$0xff] }
 0x71b   : > { %v8748_v54 = vpop.permute.xlu2 %3491  ;;  %10342 = vst [vmem:[#allocation125_spill] sm:$0xff] %v8794_v49 }
 0x71c   : > { %10337 = vst [vmem:[#allocation57_spill] sm:$0xff] %v8748_v54  ;;  %v8750_v61 = vpop.permute.xlu1 %3489 }
 0x71d   : > { %10338 = vst [vmem:[#allocation37_spill] sm:$0xff] %v8750_v61 }
 0x721   : > { %3583 = vrot.lane.b32.xlu0 %v8386_v6, %s4664_s15  ;;  %3587 = vrot.lane.b32.xlu2 %v8426_v20, %s4664_s15 }
 0x722   : > { %3603 = vrot.lane.b32.xlu1 %v8507_v16, %s4664_s15 }
 0x723   : > { %v8758_v8 = vpop.permute.xlu2 %3497  ;;  %v8760_v19 = vpop.permute.xlu0 %3451 }
 0x724   : > { %10339 = vst [vmem:[#allocation108_spill] sm:$0xff] %v8760_v19  ;;  %v8762_v12 = vpop.permute.xlu1 %3495  ;;  %v8784_v19 = vld [vmem:[#allocation3 + $0x88] sm:$0x3] }
 0x725   : > { %v3374_v14 = vrot.slane %v8784_v19, 1 }
 0x729   : > { %3589 = vrot.lane.b32.xlu0 %v8764_v29, %s4664_s15  ;;  %3593 = vrot.lane.b32.xlu2 %v8482_v24, %s4664_s15 }
 0x72a   : > { %3633 = vrot.lane.b32.xlu1 %v8242_v36, %s4667_s8 }
 0x72b   : > { %v8772_v20 = vpop.permute.xlu2 %3503  ;;  %v8774_v54 = vpop.permute.xlu0 %3457 }
 0x72c   : > { %v8776_v57 = vpop.permute.xlu1 %3501 }
 0x731   : > { %3595 = vrot.lane.b32.xlu0 %v8419_v10, %s4664_s15  ;;  %3599 = vrot.lane.b32.xlu2 %v8496_v60, %s4664_s15  ;;  %v8801_v10 = vsel %vm511_vm2, %v3373_v48, %v3374_v14 }
 0x732   : > { %3639 = vrot.lane.b32.xlu1 %v8281_v33, %s4667_s8 }
 0x733   : > { %v8786_v24 = vpop.permute.xlu2 %3509  ;;  %v8788_v29 = vpop.permute.xlu0 %3487 }
 0x734   : > { %10341 = vst [vmem:[#allocation120_spill] sm:$0xff] %v8788_v29  ;;  %v8790_v61 = vpop.permute.xlu1 %3507 }
 0x739   : > { %3605 = vrot.lane.b32.xlu2 %v8794_v49, %s4664_s15  ;;  %3601 = vrot.lane.b32.xlu0 %v8443_v30, %s4664_s15 }
 0x73a   : > { %3645 = vrot.lane.b32.xlu1 %v8801_v10, %s4667_s8 }
 0x73b   : > { %v8805_v29 = vpop.permute.xlu2 %3515  ;;  %v8807_v31 = vpop.permute.xlu0 %3493 }
 0x73c   : > { %v8809_v55 = vpop.permute.xlu1 %3513 }
 0x741   : > { %3635 = vrot.lane.b32.xlu2 %v8255_v62, %s4667_s8  ;;  %3631 = vrot.lane.b32.xlu0 %v8229_v40, %s4667_s8 }
 0x742   : > { %3651 = vrot.lane.b32.xlu1 %v8367_v18, %s4667_s8 }
 0x743   : > { %v8817_v48 = vpop.permute.xlu2 %3521  ;;  %v8819_v14 = vpop.permute.xlu0 %3499 }
 0x744   : > { %10343 = vst [vmem:[#allocation17_spill] sm:$0xff] %v8817_v48  ;;  %v8821_v49 = vpop.permute.xlu1 %3519  ;;  %v10349_v48 = vld [vmem:[#allocation72_spill] sm:$0xff] }
 0x745   : > { %10344 = vst [vmem:[#allocation98_spill] sm:$0xff] %v8819_v14 }
 0x746   : > { %10345 = vst [vmem:[#allocation102_spill] sm:$0xff] %v8821_v49 }
 0x749   : > { %3641 = vrot.lane.b32.xlu2 %v8295_v44, %s4667_s8  ;;  %3637 = vrot.lane.b32.xlu0 %v8268_v38, %s4667_s8 }
 0x74a   : > { %3657 = vrot.lane.b32.xlu1 %v8414_v23, %s4667_s8  ;;  %v10351_v23 = vld [vmem:[#allocation64_spill] sm:$0xff] }
 0x74b   : > { %v8829_v45 = vpop.permute.xlu2 %3527  ;;  %v8831_v40 = vpop.permute.xlu0 %3505 }
 0x74c   : > { %10346 = vst [vmem:[#allocation92_spill] sm:$0xff] %v8829_v45  ;;  %v8833_v59 = vpop.permute.xlu1 %3525  ;;  %v10352_v45 = vld [vmem:[#allocation93_spill] sm:$0xff] }
 0x74d   : > { %10347 = vst [vmem:[#allocation78_spill] sm:$0xff] %v8831_v40 }
 0x74e   : > { %10348 = vst [vmem:[#allocation26_spill] sm:$0xff] %v8833_v59 }
 0x751   : > { %3647 = vrot.lane.b32.xlu2 %v8337_v51, %s4667_s8  ;;  %3643 = vrot.lane.b32.xlu0 %v10349_v48, %s4667_s8 }
 0x752   : > { %3775 = vrot.lane.b32.xlu1 %v8234_v42, %s4669_s10  ;;  %v10356_v42 = vld [vmem:[#allocation16_spill] sm:$0xff] }
 0x753   : > { %v3534_v49 = vpop.permute.xlu2 %3533  ;;  %v8841_v18 = vpop.permute.xlu0 %3511 }
 0x754   : > { %10350 = vst [vmem:[#allocation109_spill] sm:$0xff] %v8841_v18  ;;  %v3532_v13 = vpop.permute.xlu1 %3531  ;;  %v10357_v18 = vld [vmem:[#allocation22_spill] sm:$0xff] }
 0x759   : > { %3653 = vrot.lane.b32.xlu2 %v10351_v23, %s4667_s8  ;;  %3649 = vrot.lane.b32.xlu0 %v10352_v45, %s4667_s8 }
 0x75a   : > { %3705 = vrot.lane.b32.xlu1 %v8542_v1, %s4668_s9 }
 0x75b   : > { %v8849_v51 = vpop.permute.xlu2 %3563  ;;  %v8851_v59 = vpop.permute.xlu0 %3517 }
 0x75c   : > { %10353 = vst [vmem:[#allocation41_spill] sm:$0xff] %v8849_v51  ;;  %v8853_v40 = vpop.permute.xlu1 %3561 }
 0x75d   : > { %10354 = vst [vmem:[#allocation121_spill] sm:$0xff] %v8851_v59  ;;  %v10359_v59 = vld [vmem:[#allocation45_spill] sm:$0xff] }
 0x75e   : > { %10355 = vst [vmem:[#allocation126_spill] sm:$0xff] %v8853_v40 }
 0x761   : > { %3659 = vrot.lane.b32.xlu2 %v10356_v42, %s4667_s8  ;;  %3655 = vrot.lane.b32.xlu0 %v10357_v18, %s4667_s8  ;;  %v10361_v18 = vld [vmem:[#allocation55_spill] sm:$0xff] }
 0x762   : > { %3921 = vrot.lane.b32.xlu1 %v8559_v4, %s4671_s12 }
 0x763   : > { %v8861_v23 = vpop.permute.xlu2 %3569  ;;  %v8863_v58 = vpop.permute.xlu0 %3523 }
 0x764   : > { %10358 = vst [vmem:[#allocation29_spill] sm:$0xff] %v8863_v58  ;;  %v8865_v17 = vpop.permute.xlu1 %3567 }
 0x769   : > { %3847 = vrot.lane.b32.xlu2 %v8242_v36, %s4670_s11  ;;  %3703 = vrot.lane.b32.xlu0 %v10359_v59, %s4668_s9 }
 0x76a   : > { %3851 = vrot.lane.b32.xlu1 %v8268_v38, %s4670_s11 }
 0x76b   : > { %v8873_v42 = vpop.permute.xlu2 %3575  ;;  %v8875_v51 = vpop.permute.xlu0 %3529 }
 0x76c   : > { %v8877_v40 = vpop.permute.xlu1 %3573 }
 0x771   : > { %3777 = vrot.lane.b32.xlu2 %v8247_v47, %s4669_s10  ;;  %3919 = vrot.lane.b32.xlu0 %v8542_v1, %s4671_s12 }
 0x772   : > { %3781 = vrot.lane.b32.xlu1 %v8273_v25, %s4669_s10 }
 0x773   : > { %v8885_v36 = vpop.permute.xlu2 %3581  ;;  %v8887_v59 = vpop.permute.xlu0 %3559 }
 0x774   : > { %10360 = vst [vmem:[#allocation96_spill] sm:$0xff] %v8887_v59  ;;  %v8889_v38 = vpop.permute.xlu1 %3579 }
 0x779   : > { %3707 = vrot.lane.b32.xlu2 %v8559_v4, %s4668_s9  ;;  %3849 = vrot.lane.b32.xlu0 %v8255_v62, %s4670_s11 }
 0x77a   : > { %3711 = vrot.lane.b32.xlu1 %v8562_v53, %s4668_s9 }
 0x77b   : > { %v8897_v47 = vpop.permute.xlu2 %3587  ;;  %v8899_v1 = vpop.permute.xlu0 %3565 }
 0x77c   : > { %v8901_v58 = vpop.permute.xlu1 %3585 }
 0x781   : > { %3923 = vrot.lane.b32.xlu2 %v10361_v18, %s4671_s12  ;;  %3779 = vrot.lane.b32.xlu0 %v8260_v9, %s4669_s10 }
 0x782   : > { %3927 = vrot.lane.b32.xlu1 %v8582_v35, %s4671_s12 }
 0x783   : > { %v8909_v4 = vpop.permute.xlu2 %3593  ;;  %v8911_v62 = vpop.permute.xlu0 %3571 }
 0x784   : > { %10362 = vst [vmem:[#allocation14_spill] sm:$0xff] %v8909_v4  ;;  %v8913_v59 = vpop.permute.xlu1 %3591 }
 0x785   : > { %10363 = vst [vmem:[#allocation12_spill] sm:$0xff] %v8913_v59 }
 0x789   : > { %3853 = vrot.lane.b32.xlu2 %v8281_v33, %s4670_s11  ;;  %3709 = vrot.lane.b32.xlu0 %v10361_v18, %s4668_s9  ;;  %v4014_v33 = vsel %vm1721_vm13, %v8507_v16, %v8736_v7  ;;  %v4013_v18 = vsel %vm1721_vm13, %v8443_v30, %v8738_v2  ;;  %v3382_v16 = vrot.slane %v8694_v22, 2  ;;  %v8953_v2 = vld [vmem:[#allocation3 + $0x98] sm:$0x3] }
 0x78a   : > { %3857 = vrot.lane.b32.xlu1 %v10349_v48, %s4670_s11  ;;  %v4038_v48 = vsel %vm2718_vm15, %v4014_v33, %v3534_v49 }
 0x78b   : > { %v8921_v14 = vpop.permute.xlu2 %3599  ;;  %v8923_v46 = vpop.permute.xlu0 %3577 }
 0x78c   : > { %10364 = vst [vmem:[#allocation106_spill] sm:$0xff] %v8921_v14  ;;  %v8925_v63 = vpop.permute.xlu1 %3597 }
 0x78d   : > { %10365 = vst [vmem:[#allocation5_spill] sm:$0xff] %v8923_v46  ;;  %v8951_v46 = vld [vmem:[#allocation3 + $0x90] sm:$0xff] }
 0x78e   : > { %10366 = vst [vmem:[#allocation15_spill] sm:$0xff] %v8925_v63  ;;  %v3383_v63 = vrot.slane %v8784_v19, 2  ;;  %v3406_v19 = vrot.slane %v8951_v46, 2 }
 0x791   : > { %3783 = vrot.lane.b32.xlu2 %v8286_v52, %s4669_s10  ;;  %3925 = vrot.lane.b32.xlu0 %v8562_v53, %s4671_s12  ;;  %v4037_v52 = vsel %vm2718_vm15, %v4013_v18, %v3532_v13  ;;  %v3384_v13 = vsel %vm584_vm3, %v3382_v16, %v3383_v63 }
 0x792   : > { %3787 = vrot.lane.b32.xlu1 %v8694_v22, %s4669_s10 }
 0x793   : > { %v3606_v4 = vpop.permute.xlu2 %3605  ;;  %v8940_v59 = vpop.permute.xlu0 %3583 }
 0x794   : > { %v8944_v53 = vsel %vm1455_vm12, %v4038_v48, %v3606_v4  ;;  %v3604_v14 = vpop.permute.xlu1 %3603 }
 0x795   : > { %v8948_v7 = vsel %vm1455_vm12, %v4037_v52, %v3604_v14  ;;  %v3407_v14 = vrot.slane %v8953_v2, 2 }
 0x797   : > { %v3408_v33 = vsel %vm584_vm3, %v3406_v19, %v3407_v14  ;;  %v3397_v19 = vrot.slane %v8951_v46, 1  ;;  %v3398_v14 = vrot.slane %v8953_v2, 1 }
 0x799   : > { %3713 = vrot.lane.b32.xlu2 %v8582_v35, %s4668_s9  ;;  %3855 = vrot.lane.b32.xlu0 %v8295_v44, %s4670_s11  ;;  %v3996_v44 = vsel %vm1721_vm13, %v8273_v25, %v8625_v43  ;;  %v3995_v35 = vsel %vm1721_vm13, %v8260_v9, %v8636_v15  ;;  %v3399_v2 = vsel %vm511_vm2, %v3397_v19, %v3398_v14  ;;  %v3165_v14 = vld [vmem:[%s9607_s5] sm:$0xff] }
 0x79a   : > { %3717 = vrot.lane.b32.xlu1 %v3384_v13, %s4668_s9  ;;  %v4020_v63 = vsel %vm2718_vm15, %v3996_v44, %v8758_v8  ;;  %v4019_v18 = vsel %vm2718_vm15, %v3995_v35, %v8762_v12  ;;  %v3999_v12 = vsel %vm1721_vm13, %v8301_v3, %v8648_v34  ;;  %v4012_v8 = vsel %vm1721_vm13, %v8496_v60, %v8774_v54  ;;  %v4636_v35 = vld [vmem:[#allocation3 + $0x30] sm:$0xff] }
 0x79b   : > { %v8961_v49 = vpop.permute.xlu2 %3635  ;;  %v8963_v22 = vpop.permute.xlu0 %3589  ;;  %v4044_v25 = vsel %vm1455_vm12, %v4020_v63, %v8861_v23  ;;  %v4043_v52 = vsel %vm1455_vm12, %v4019_v18, %v8865_v17  ;;  %v3998_v23 = vsel %vm1721_vm13, %v8305_v56, %v8656_v11  ;;  %v4023_v17 = vsel %vm2718_vm15, %v3999_v12, %v8772_v20 }
 0x79c   : > { %v8967_v4 = vpop.permute.xlu1 %3633  ;;  %v4022_v3 = vsel %vm2718_vm15, %v3998_v23, %v8776_v57  ;;  %v4036_v34 = vsel %vm2718_vm15, %v4012_v8, %v8875_v51  ;;  %v3994_v63 = vsel %vm1721_vm13, %v4636_v35, %v8696_v28  ;;  %v4005_v18 = vsel %vm1721_vm13, %v8405_v5, %v8700_v0  ;;  %v4637_v8 = vld [vmem:[#allocation3 + $0x60] sm:$0xff] }
 0x79d   : > { %v4046_v20 = vsel %vm1455_vm12, %v4022_v3, %v8877_v40  ;;  %v4001_v40 = vsel %vm1721_vm13, %v8343_v21, %v8678_v50  ;;  %v10367_v3 = vld [vmem:[#allocation74_spill] sm:$0xff] }
 0x7a1   : > { %3929 = vrot.lane.b32.xlu2 %v8530_v39, %s4671_s12  ;;  %3785 = vrot.lane.b32.xlu0 %v8305_v56, %s4669_s10 }
 0x7a2   : > { %3933 = vrot.lane.b32.xlu1 %v3408_v33, %s4671_s12 }
 0x7a3   : > { %v3642_v43 = vpop.permute.xlu2 %3641  ;;  %v8987_v48 = vpop.permute.xlu0 %3595 }
 0x7a4   : > { %v8992_v16 = vsel %vm2767_vm0, %v4044_v25, %v3642_v43  ;;  %v3640_v9 = vpop.permute.xlu1 %3639  ;;  %v4004_v25 = vsel %vm1721_vm13, %v8386_v6, %v8702_v32  ;;  %v4029_v43 = vsel %vm2718_vm15, %v4005_v18, %v8805_v29 }
 0x7a5   : > { %v8995_v15 = vsel %vm2767_vm0, %v4043_v52, %v3640_v9  ;;  %v4018_v52 = vsel %vm2718_vm15, %v3994_v63, %v8807_v31  ;;  %v4028_v28 = vsel %vm2718_vm15, %v4004_v25, %v8809_v55  ;;  %v4053_v0 = vsel %vm1455_vm12, %v4029_v43, %v8897_v47  ;;  %v3169_v47 = vld [vmem:[%s9607_s5 + $0x20] sm:$0xff]  ;;  %v10377_v25 = vld [vmem:[#allocation85_spill] sm:$0xff]  ;;  %v10378_v43 = vld [vmem:[#allocation34_spill] sm:$0xff] }
 0x7a6   : > { %v4042_v29 = vsel %vm1455_vm12, %v4018_v52, %v8899_v1  ;;  %v4052_v31 = vsel %vm1455_vm12, %v4028_v28, %v8901_v58  ;;  %v3168_v1 = vld [vmem:[%s9607_s5 + $0x18] sm:$0xff]  ;;  %v3167_v58 = vld [vmem:[%s9607_s5 + $0x10] sm:$0xff]  ;;  %v4003_v52 = vsel %vm1721_vm13, %v10378_v43, %v10377_v25  ;;  %v10390_v25 = vld [vmem:[#allocation104_spill] sm:$0xff] }
 0x7a9   : > { %3859 = vrot.lane.b32.xlu2 %v8801_v10, %s4670_s11  ;;  %3715 = vrot.lane.b32.xlu0 %v8530_v39, %s4668_s9  ;;  %v4047_v39 = vsel %vm1455_vm12, %v4023_v17, %v8873_v42  ;;  %v4002_v42 = vsel %vm1721_vm13, %v8358_v26, %v8676_v41  ;;  %v4025_v41 = vsel %vm2718_vm15, %v4001_v40, %v8790_v61  ;;  %v3172_v61 = vld [vmem:[%s9607_s5 + $0x38] sm:$0xff] }
 0x7aa   : > { %3863 = vrot.lane.b32.xlu1 %v10352_v45, %s4670_s11  ;;  %v4026_v51 = vsel %vm2718_vm15, %v4002_v42, %v8786_v24  ;;  %v4049_v50 = vsel %vm1455_vm12, %v4025_v41, %v8889_v38  ;;  %v3171_v38 = vld [vmem:[%s9607_s5 + $0x30] sm:$0xff] }
 0x7ab   : > { %v3648_v56 = vpop.permute.xlu2 %3647  ;;  %v3602_v11 = vpop.permute.xlu0 %3601  ;;  %v10371_v41 = vld [vmem:[#allocation58_spill] sm:$0xff] }
 0x7ac   : > { %v9023_v10 = vsel %vm2767_vm0, %v4047_v39, %v3648_v56  ;;  %v3646_v54 = vpop.permute.xlu1 %3645  ;;  %v9026_v45 = vsel %vm1455_vm12, %v4036_v34, %v3602_v11  ;;  %v3997_v39 = vsel %vm1721_vm13, %v4637_v8, %v10367_v3  ;;  %v10368_v34 = vld [vmem:[#allocation61_spill] sm:$0xff]  ;;  %v10369_v56 = vld [vmem:[#allocation98_spill] sm:$0xff]  ;;  %v10383_v8 = vld [vmem:[#allocation120_spill] sm:$0xff] }
 0x7ad   : > { %v9029_v57 = vsel %vm2767_vm0, %v4046_v20, %v3646_v54  ;;  %v4021_v11 = vsel %vm2718_vm15, %v3997_v39, %v10369_v56  ;;  %v10370_v20 = vld [vmem:[#allocation80_spill] sm:$0xff]  ;;  %v3166_v54 = vld [vmem:[%s9607_s5 + $0x8] sm:$0xff] }
 0x7ae   : > { %v4045_v42 = vsel %vm1455_vm12, %v4021_v11, %v8911_v62  ;;  %v10373_v62 = vld [vmem:[#allocation88_spill] sm:$0xff] }
 0x7af   : > { %v10385_v39 = vld [vmem:[#allocation96_spill] sm:$0xff] }
 0x7b1   : > { %3789 = vrot.lane.b32.xlu2 %v8951_v46, %s4669_s10  ;;  %3931 = vrot.lane.b32.xlu0 %v3384_v13, %s4671_s12  ;;  %v4050_v13 = vsel %vm1455_vm12, %v4026_v51, %v8885_v36  ;;  %v3173_v46 = vld [vmem:[%s9607_s5 + $0x40] sm:$0xff] }
 0x7b2   : > { %3793 = vrot.lane.b32.xlu1 %v8358_v26, %s4669_s10  ;;  %4265 = vmatpush.msra.mxu2 %v3173_v46 }
 0x7b3   : > { %v3654_v33 = vpop.permute.xlu2 %3653  ;;  %v9050_v44 = vpop.permute.xlu0 %3631  ;;  %4552 = vmatpush.msra.mxu3 %v3173_v46  ;;  %v10375_v46 = vld [vmem:[#allocation22_spill] sm:$0xff] }
 0x7b4   : > { %v9055_v24 = vsel %vm2767_vm0, %v4050_v13, %v3654_v33  ;;  %v3652_v26 = vpop.permute.xlu1 %3651  ;;  %4266 = vmatpush.msra.mxu2 %v3172_v61  ;;  %v10372_v13 = vld [vmem:[#allocation97_spill] sm:$0xff] }
 0x7b5   : > { %v9064_v36 = vsel %vm2767_vm0, %v4049_v50, %v3652_v26  ;;  %4553 = vmatpush.msra.mxu3 %v3172_v61  ;;  %v4000_v33 = vsel %vm1721_vm13, %v10372_v13, %v10371_v41  ;;  %v10374_v50 = vld [vmem:[#allocation78_spill] sm:$0xff]  ;;  %v10376_v61 = vld [vmem:[#allocation5_spill] sm:$0xff] }
 0x7b6   : > { %4267 = vmatpush.msra.mxu2 %v3171_v38  ;;  %v4024_v26 = vsel %vm2718_vm15, %v4000_v33, %v10374_v50 }
 0x7b7   : > { %4554 = vmatpush.msra.mxu3 %v3171_v38 }
 0x7b9   : > { %3719 = vrot.lane.b32.xlu2 %v8595_v27, %s4668_s9  ;;  %3861 = vrot.lane.b32.xlu0 %v3399_v2, %s4670_s11  ;;  %v3170_v27 = vld [vmem:[%s9607_s5 + $0x28] sm:$0xff]  ;;  %v4048_v2 = vsel %vm1455_vm12, %v4024_v26, %v10376_v61 }
 0x7ba   : > { %3723 = vrot.lane.b32.xlu1 %v8598_v37, %s4668_s9  ;;  %4268 = vmatpush.msra.mxu2 %v3170_v27 }
 0x7bb   : > { %v3660_v32 = vpop.permute.xlu2 %3659  ;;  %v3638_v9 = vpop.permute.xlu0 %3637  ;;  %4555 = vmatpush.msra.mxu3 %v3170_v27  ;;  %v10379_v27 = vld [vmem:[#allocation109_spill] sm:$0xff] }
 0x7bc   : > { %v9099_v12 = vsel %vm2767_vm0, %v4053_v0, %v3660_v32  ;;  %v3658_v23 = vpop.permute.xlu1 %3657  ;;  %v9102_v17 = vsel %vm2767_vm0, %v4042_v29, %v3638_v9  ;;  %4269 = vmatpush.msra.mxu2 %v3169_v47  ;;  %v4027_v28 = vsel %vm2718_vm15, %v4003_v52, %v10379_v27  ;;  %v10380_v0 = vld [vmem:[#allocation33_spill] sm:$0xff] }
 0x7bd   : > { %v9105_v55 = vsel %vm2767_vm0, %v4052_v31, %v3658_v23  ;;  %4556 = vmatpush.msra.mxu3 %v3169_v47  ;;  %v4051_v29 = vsel %vm1455_vm12, %v4027_v28, %v8940_v59  ;;  %v4638_v47 = vld [vmem:[#allocation3] sm:$0xff]  ;;  %v10384_v59 = vld [vmem:[#allocation91_spill] sm:$0xff] }
 0x7be   : > { %4270 = vmatpush.msra.mxu2 %v3168_v1 }
 0x7bf   : > { %4557 = vmatpush.msra.mxu3 %v3168_v1  ;;  %v10381_v1 = vld [vmem:[#allocation110_spill] sm:$0xff] }
 0x7c0   : > { %4271 = vmatpush.msra.mxu2 %v3167_v58 }
 0x7c1   : > { %3935 = vrot.lane.b32.xlu2 %v10368_v34, %s4671_s12  ;;  %3791 = vrot.lane.b32.xlu0 %v8343_v21, %s4669_s10 }
 0x7c2   : > { %3939 = vrot.lane.b32.xlu1 %v10370_v20, %s4671_s12  ;;  %4272 = vmatpush.msra.mxu2 %v3166_v54 }
 0x7c3   : > { %v3848_v40 = vpop.permute.xlu2 %3847  ;;  %v3644_v51 = vpop.permute.xlu0 %3643  ;;  %4558 = vmatpush.msra.mxu3 %v3167_v58  ;;  %v3991_v58 = vsel %vm1721_vm13, %v4638_v47, %v10381_v1  ;;  %v10393_v1 = vld [vmem:[#allocation57_spill] sm:$0xff] }
 0x7c4   : > { %v3776_v19 = vpop.permute.xlu1 %3775  ;;  %v9132_v21 = vsel %vm2767_vm0, %v4045_v42, %v3644_v51  ;;  %4273 = vmatpush.msra.mxu2 %v3165_v14  ;;  %v4015_v3 = vsel %vm2718_vm15, %v3991_v58, %v10383_v8 }
 0x7c5   : > { %4559 = vmatpush.msra.mxu3 %v3166_v54 }
 0x7c7   : > { %4560 = vmatpush.msra.mxu3 %v3165_v14  ;;  %v10386_v14 = vld [vmem:[#allocation40_spill] sm:$0xff] }
 0x7c9   : > { %3865 = vrot.lane.b32.xlu2 %v10373_v62, %s4670_s11  ;;  %3721 = vrot.lane.b32.xlu0 %v10368_v34, %s4668_s9  ;;  %v4039_v34 = vsel %vm1455_vm12, %v4015_v3, %v10385_v39  ;;  %v4639_v62 = vld [vmem:[#allocation3 + $0x10] sm:$0xff] }
 0x7ca   : > { %3869 = vrot.lane.b32.xlu1 %v10375_v46, %s4670_s11  ;;  %v4063_v54 = vsel %vm2767_vm0, %v4039_v34, %v9050_v44  ;;  %v10387_v44 = vld [vmem:[#allocation86_spill] sm:$0xff]  ;;  %v10388_v46 = vld [vmem:[#allocation37_spill] sm:$0xff] }
 0x7cb   : > { %v3778_v38 = vpop.permute.xlu2 %3777  ;;  %v3650_v35 = vpop.permute.xlu0 %3649  ;;  %v3992_v50 = vsel %vm1721_vm13, %v4639_v62, %v10387_v44 }
 0x7cc   : > { %v3706_v63 = vpop.permute.xlu1 %3705  ;;  %v9151_v18 = vsel %vm2767_vm0, %v4048_v2, %v3650_v35  ;;  %v4016_v61 = vsel %vm2718_vm15, %v3992_v50, %v10388_v46  ;;  %v3142_v46 = vld [vmem:[#allocation3 + $0x128] sm:$0x3] }
 0x7d1   : > { %3795 = vrot.lane.b32.xlu2 %v10378_v43, %s4669_s10  ;;  %3937 = vrot.lane.b32.xlu0 %v8598_v37, %s4671_s12  ;;  %v10382_v37 = vld [vmem:[#allocation64_spill] sm:$0xff] }
 0x7d2   : > { %3727 = vrot.lane.b32.xlu1 %v10380_v0, %s4668_s9  ;;  %v10391_v43 = vld [vmem:[#allocation56_spill] sm:$0xff] }
 0x7d3   : > { %v3708_v32 = vpop.permute.xlu2 %3707  ;;  %v3656_v9 = vpop.permute.xlu0 %3655 }
 0x7d4   : > { %v3922_v31 = vpop.permute.xlu1 %3921  ;;  %v9167_v23 = vsel %vm2767_vm0, %v4051_v29, %v3656_v9  ;;  %v10392_v9 = vld [vmem:[#allocation44_spill] sm:$0xff] }
 0x7d9   : > { %3725 = vrot.lane.b32.xlu2 %v10370_v20, %s4668_s9  ;;  %3867 = vrot.lane.b32.xlu0 %v10382_v37, %s4670_s11  ;;  %v10394_v37 = vld [vmem:[#allocation41_spill] sm:$0xff] }
 0x7da   : > { %3811 = vrot.lane.b32.xlu1 %v10384_v59, %s4669_s10 }
 0x7db   : > { %v3924_v56 = vpop.permute.xlu2 %3923  ;;  %v3704_v11 = vpop.permute.xlu0 %3703 }
 0x7dc   : > { %v3852_v42 = vpop.permute.xlu1 %3851  ;;  %v4087_v20 = vsel %vm2792_vm1, %v4063_v54, %v3704_v11 }
 0x7dd   : > { %v4111_v51 = vsel %vm2817_vm4, %v4087_v20, %v3776_v19 }
 0x7de   : > { %v4135_v33 = vsel %vm2842_vm5, %v4111_v51, %v3848_v40 }
 0x7e1   : > { %3941 = vrot.lane.b32.xlu2 %v10380_v0, %s4671_s12  ;;  %3797 = vrot.lane.b32.xlu0 %v8386_v6, %s4669_s10  ;;  %v10389_v6 = vld [vmem:[#allocation126_spill] sm:$0xff] }
 0x7e2   : > { %3943 = vrot.lane.b32.xlu1 %v10386_v14, %s4671_s12  ;;  %v4040_v2 = vsel %vm1455_vm12, %v4016_v61, %v10389_v6 }
 0x7e3   : > { %v3854_v41 = vpop.permute.xlu2 %3853  ;;  %v3920_v13 = vpop.permute.xlu0 %3919  ;;  %v4064_v35 = vsel %vm2767_vm0, %v4040_v2, %v8967_v4 }
 0x7e4   : > { %v3782_v26 = vpop.permute.xlu1 %3781  ;;  %v4159_v19 = vsel %vm2867_vm7, %v4135_v33, %v3920_v13  ;;  %v4088_v40 = vsel %vm2792_vm1, %v4064_v35, %v3706_v63  ;;  %v4640_v63 = vld [vmem:[#allocation3 + $0x20] sm:$0xff] }
 0x7e5   : > { %4511 = vmatmul.msk.f32.vlgmr.msra.gmra.mxu2 %vm2895_vm6, %v4159_v19  ;;  %v4112_v27 = vsel %vm2817_vm4, %v4088_v40, %v3778_v38  ;;  %v3993_v47 = vsel %vm1721_vm13, %v4640_v63, %v10392_v9  ;;  %v10395_v38 = vld [vmem:[#allocation47_spill] sm:$0xff]  ;;  %v10400_v19 = vld [vmem:[#allocation105_spill] sm:$0xff] }
 0x7e6   : > { %v4017_v58 = vsel %vm2718_vm15, %v3993_v47, %v10393_v1  ;;  %v10401_v40 = vld [vmem:[#allocation95_spill] sm:$0xff] }
 0x7e7   : > { %v4041_v8 = vsel %vm1455_vm12, %v4017_v58, %v10394_v37  ;;  %v10404_v37 = vld [vmem:[#allocation114_spill] sm:$0xff] }
 0x7e9   : > { %3739 = vrot.lane.b32.xlu2 %v10390_v25, %s4668_s9  ;;  %3667 = vrot.lane.b32.xlu0 %v10391_v43, %s4667_s8 }
 0x7ea   : > { %3729 = vrot.lane.b32.xlu1 %v10386_v14, %s4668_s9 }
 0x7eb   : > { %v3784_v52 = vpop.permute.xlu2 %3783  ;;  %v3850_v28 = vpop.permute.xlu0 %3849 }
 0x7ec   : > { %v3712_v0 = vpop.permute.xlu1 %3711  ;;  %v4136_v29 = vsel %vm2842_vm5, %v4112_v27, %v3850_v28  ;;  %v3385_v27 = vrot.slane %v10401_v40, 2  ;;  %v3386_v28 = vrot.slane %v3142_v46, 2 }
 0x7ed   : > { %v4160_v4 = vsel %vm2867_vm7, %v4136_v29, %v3922_v31  ;;  %v4065_v31 = vsel %vm2767_vm0, %v4041_v8, %v8961_v49  ;;  %v10397_v49 = vld [vmem:[#allocation69_spill] sm:$0xff] }
 0x7ee   : > { %4512 = vmatmul.msk.f32.gmra.mxu2 %vm2895_vm6, %v4160_v4  ;;  %v4089_v3 = vsel %vm2792_vm1, %v4065_v31, %v3708_v32  ;;  %v10403_v29 = vld [vmem:[#allocation73_spill] sm:$0xff] }
 0x7f1   : > { %3871 = vrot.lane.b32.xlu2 %v10395_v38, %s4670_s11  ;;  %3799 = vrot.lane.b32.xlu0 %v8405_v5, %s4669_s10  ;;  %v10396_v5 = vld [vmem:[#allocation81_spill] sm:$0xff]  ;;  %v3376_v38 = vrot.slane %v10401_v40, 1 }
 0x7f2   : > { %3813 = vrot.lane.b32.xlu1 %v8496_v60, %s4669_s10  ;;  %v10398_v60 = vld [vmem:[#allocation10_spill] sm:$0xff] }
 0x7f3   : > { %v3714_v59 = vpop.permute.xlu2 %3713  ;;  %v3780_v39 = vpop.permute.xlu0 %3779 }
 0x7f4   : > { %v3928_v34 = vpop.permute.xlu1 %3927  ;;  %v4113_v11 = vsel %vm2817_vm4, %v4089_v3, %v3780_v39  ;;  %v3377_v3 = vrot.slane %v3142_v46, 1  ;;  %v3143_v39 = vld [vmem:[#allocation3 + $0x130] sm:$0xff] }
 0x7f5   : > { %v4137_v54 = vsel %vm2842_vm5, %v4113_v11, %v3852_v42 }
 0x7f6   : > { %v4161_v20 = vsel %vm2867_vm7, %v4137_v54, %v3924_v56  ;;  %v3378_v11 = vsel %vm511_vm2, %v3376_v38, %v3377_v3 }
 0x7f7   : > { %4513 = vmatmul.msk.f32.gmra.mxu2 %vm2895_vm6, %v4161_v20 }
 0x7f9   : > { %3955 = vrot.lane.b32.xlu2 %v10396_v5, %s4671_s12  ;;  %3883 = vrot.lane.b32.xlu0 %v10397_v49, %s4670_s11 }
 0x7fa   : > { %3945 = vrot.lane.b32.xlu1 %v10398_v60, %s4671_s12 }
 0x7fb   : > { %v3930_v32 = vpop.permute.xlu2 %3929  ;;  %v3710_v51 = vpop.permute.xlu0 %3709 }
 0x7fc   : > { %v3858_v14 = vpop.permute.xlu1 %3857  ;;  %v4090_v13 = vsel %vm2792_vm1, %v9102_v17, %v3710_v51  ;;  %v4091_v17 = vsel %vm2792_vm1, %v8995_v15, %v3712_v0  ;;  %v10402_v0 = vld [vmem:[#allocation79_spill] sm:$0xff] }
 0x7fd   : > { %v4114_v42 = vsel %vm2817_vm4, %v4090_v13, %v3782_v26  ;;  %v10399_v26 = vld [vmem:[#allocation16_spill] sm:$0xff]  ;;  %v10406_v51 = vld [vmem:[#allocation99_spill] sm:$0xff] }
 0x7fe   : > { %v4138_v62 = vsel %vm2842_vm5, %v4114_v42, %v3854_v41  ;;  %v4115_v41 = vsel %vm2817_vm4, %v4091_v17, %v3784_v52  ;;  %v4092_v52 = vsel %vm2792_vm1, %v8992_v16, %v3714_v59 }
 0x801   : > { %3741 = vrot.lane.b32.xlu2 %v10396_v5, %s4668_s9  ;;  %3669 = vrot.lane.b32.xlu0 %v10397_v49, %s4667_s8 }
 0x802   : > { %3731 = vrot.lane.b32.xlu1 %v10398_v60, %s4668_s9 }
 0x803   : > { %v3860_v56 = vpop.permute.xlu2 %3859  ;;  %v3926_v33 = vpop.permute.xlu0 %3925 }
 0x804   : > { %v3788_v44 = vpop.permute.xlu1 %3787  ;;  %v4162_v50 = vsel %vm2867_vm7, %v4138_v62, %v3926_v33 }
 0x805   : > { %4514 = vmatmul.msk.f32.gmra.mxu2 %vm2895_vm6, %v4162_v50 }
 0x809   : > { %3873 = vrot.lane.b32.xlu2 %v10399_v26, %s4670_s11  ;;  %3801 = vrot.lane.b32.xlu0 %v10400_v19, %s4669_s10 }
 0x80a   : > { %3815 = vrot.lane.b32.xlu1 %v8443_v30, %s4669_s10  ;;  %v3387_v30 = vsel %vm584_vm3, %v3385_v27, %v3386_v28 }
 0x80b   : > { %v3790_v61 = vpop.permute.xlu2 %3789  ;;  %v3856_v6 = vpop.permute.xlu0 %3855 }
 0x80c   : > { %v3718_v2 = vpop.permute.xlu1 %3717  ;;  %v4139_v35 = vsel %vm2842_vm5, %v4115_v41, %v3856_v6  ;;  %v3144_v41 = vld [vmem:[#allocation3 + $0x138] sm:$0x3]  ;;  %v4641_v6 = vld [vmem:[#allocation3 + $0x1b0] sm:$0xff] }
 0x80d   : > { %v4163_v15 = vsel %vm2867_vm7, %v4139_v35, %v3928_v34  ;;  %v10408_v35 = vld [vmem:[#allocation83_spill] sm:$0xff]  ;;  %v3401_v27 = vrot.slane %v3144_v41, 1 }
 0x80e   : > { %4515 = vmatmul.msk.f32.gmra.mxu2 %vm2895_vm6, %v4163_v15 }
 0x811   : > { %3957 = vrot.lane.b32.xlu2 %v10402_v0, %s4671_s12  ;;  %3885 = vrot.lane.b32.xlu0 %v10403_v29, %s4670_s11 }
 0x812   : > { %3947 = vrot.lane.b32.xlu1 %v3387_v30, %s4671_s12 }
 0x813   : > { %v3720_v4 = vpop.permute.xlu2 %3719  ;;  %v3786_v63 = vpop.permute.xlu0 %3785 }
 0x814   : > { %v3934_v9 = vpop.permute.xlu1 %3933  ;;  %v4116_v47 = vsel %vm2817_vm4, %v4092_v52, %v3786_v63  ;;  %v10409_v63 = vld [vmem:[#allocation60_spill] sm:$0xff] }
 0x815   : > { %v4140_v1 = vsel %vm2842_vm5, %v4116_v47, %v3858_v14 }
 0x816   : > { %v4164_v58 = vsel %vm2867_vm7, %v4140_v1, %v3930_v32  ;;  %v10405_v32 = vld [vmem:[#allocation6_spill] sm:$0xff] }
 0x817   : > { %4516 = vmatmul.msk.f32.gmra.mxu2 %vm2895_vm6, %v4164_v58 }
 0x819   : > { %3743 = vrot.lane.b32.xlu2 %v10402_v0, %s4668_s9  ;;  %3671 = vrot.lane.b32.xlu0 %v10403_v29, %s4667_s8 }
 0x81a   : > { %3673 = vrot.lane.b32.xlu1 %v10404_v37, %s4667_s8 }
 0x81b   : > { %v3936_v16 = vpop.permute.xlu2 %3935  ;;  %v3716_v8 = vpop.permute.xlu0 %3715 }
 0x81c   : > { %v3864_v31 = vpop.permute.xlu1 %3863  ;;  %v4093_v59 = vsel %vm2792_vm1, %v9132_v21, %v3716_v8  ;;  %v4094_v21 = vsel %vm2792_vm1, %v9029_v57, %v3718_v2  ;;  %v10407_v57 = vld [vmem:[#allocation19_spill] sm:$0xff]  ;;  %v3400_v2 = vrot.slane %v3143_v39, 1 }
 0x81d   : > { %v4117_v34 = vsel %vm2817_vm4, %v4093_v59, %v3788_v44  ;;  %v4118_v13 = vsel %vm2817_vm4, %v4094_v21, %v3790_v61  ;;  %v4095_v44 = vsel %vm2792_vm1, %v9023_v10, %v3720_v4  ;;  %v3409_v10 = vrot.slane %v3143_v39, 2 }
 0x81e   : > { %v4141_v5 = vsel %vm2842_vm5, %v4117_v34, %v3860_v56  ;;  %v3402_v52 = vsel %vm511_vm2, %v3400_v2, %v3401_v27 }
 0x821   : > { %3875 = vrot.lane.b32.xlu2 %v3378_v11, %s4670_s11  ;;  %3803 = vrot.lane.b32.xlu0 %v10401_v40, %s4669_s10  ;;  %v3410_v40 = vrot.slane %v3144_v41, 2 }
 0x822   : > { %3805 = vrot.lane.b32.xlu1 %v3143_v39, %s4669_s10 }
 0x823   : > { %v3866_v54 = vpop.permute.xlu2 %3865  ;;  %v3932_v20 = vpop.permute.xlu0 %3931  ;;  %v3411_v29 = vsel %vm584_vm3, %v3409_v10, %v3410_v40 }
 0x824   : > { %v3794_v49 = vpop.permute.xlu1 %3793  ;;  %v4165_v60 = vsel %vm2867_vm7, %v4141_v5, %v3932_v20  ;;  %v10411_v5 = vld [vmem:[#allocation36_spill] sm:$0xff] }
 0x825   : > { %4517 = vmatmul.msk.f32.gmra.mxu2 %vm2895_vm6, %v4165_v60 }
 0x829   : > { %3959 = vrot.lane.b32.xlu2 %v10405_v32, %s4671_s12  ;;  %3887 = vrot.lane.b32.xlu0 %v10404_v37, %s4670_s11 }
 0x82a   : > { %3889 = vrot.lane.b32.xlu1 %v10406_v51, %s4670_s11 }
 0x82b   : > { %v3796_v14 = vpop.permute.xlu2 %3795  ;;  %v3862_v42 = vpop.permute.xlu0 %3861 }
 0x82c   : > { %v3724_v56 = vpop.permute.xlu1 %3723  ;;  %v4142_v33 = vsel %vm2842_vm5, %v4118_v13, %v3862_v42 }
 0x82d   : > { %v4166_v62 = vsel %vm2867_vm7, %v4142_v33, %v3934_v9  ;;  %v3162_v9 = vld [vmem:[#allocation3 + $0x1c8] sm:$0x3] }
 0x82e   : > { %4518 = vmatmul.msk.f32.gmra.mxu2 %vm2895_vm6, %v4166_v62  ;;  %v3389_v38 = vrot.slane %v3162_v9, 2  ;;  %v3380_v42 = vrot.slane %v3162_v9, 1  ;;  %v3163_v62 = vld [vmem:[#allocation3 + $0x1d0] sm:$0xff] }
 0x831   : > { %3733 = vrot.lane.b32.xlu2 %v3387_v30, %s4668_s9  ;;  %3661 = vrot.lane.b32.xlu0 %v3378_v11, %s4667_s8 }
 0x832   : > { %3663 = vrot.lane.b32.xlu1 %v10407_v57, %s4667_s8 }
 0x833   : > { %v3726_v50 = vpop.permute.xlu2 %3725  ;;  %v3792_v17 = vpop.permute.xlu0 %3791 }
 0x834   : > { %v3940_v26 = vpop.permute.xlu1 %3939  ;;  %v4119_v19 = vsel %vm2817_vm4, %v4095_v44, %v3792_v17  ;;  %v4098_v60 = vsel %vm2792_vm1, %v9055_v24, %v3726_v50  ;;  %v10413_v17 = vld [vmem:[#allocation108_spill] sm:$0xff] }
 0x835   : > { %v4143_v46 = vsel %vm2842_vm5, %v4119_v19, %v3864_v31  ;;  %v4097_v31 = vsel %vm2792_vm1, %v9064_v36, %v3724_v56  ;;  %v4642_v36 = vld [vmem:[#allocation3 + $0x160] sm:$0xff]  ;;  %v10414_v19 = vld [vmem:[#allocation29_spill] sm:$0xff] }
 0x836   : > { %v4167_v61 = vsel %vm2867_vm7, %v4143_v46, %v3936_v16  ;;  %v10410_v16 = vld [vmem:[#allocation125_spill] sm:$0xff]  ;;  %v4121_v39 = vsel %vm2817_vm4, %v4097_v31, %v3796_v14  ;;  %v3412_v31 = vrot.slane %v3163_v62, 2 }
 0x837   : > { %4519 = vmatmul.msk.f32.gmra.mxu2 %vm2895_vm6, %v4167_v61  ;;  %v3388_v8 = vrot.slane %v10410_v16, 2 }
 0x839   : > { %3817 = vrot.lane.b32.xlu2 %v4641_v6, %s4669_s10  ;;  %3745 = vrot.lane.b32.xlu0 %v10405_v32, %s4668_s9  ;;  %v3390_v3 = vsel %vm584_vm3, %v3388_v8, %v3389_v38 }
 0x83a   : > { %3747 = vrot.lane.b32.xlu1 %v10408_v35, %s4668_s9 }
 0x83b   : > { %v3942_v15 = vpop.permute.xlu2 %3941  ;;  %v3722_v28 = vpop.permute.xlu0 %3721 }
 0x83c   : > { %v3870_v0 = vpop.permute.xlu1 %3869  ;;  %v4096_v30 = vsel %vm2792_vm1, %v9151_v18, %v3722_v28 }
 0x83d   : > { %v4120_v4 = vsel %vm2817_vm4, %v4096_v30, %v3794_v49  ;;  %v10412_v49 = vld [vmem:[#allocation9_spill] sm:$0xff] }
 0x83e   : > { %v4144_v58 = vsel %vm2842_vm5, %v4120_v4, %v3866_v54 }
 0x841   : > { %3949 = vrot.lane.b32.xlu2 %v3411_v29, %s4671_s12  ;;  %3877 = vrot.lane.b32.xlu0 %v3402_v52, %s4670_s11 }
 0x842   : > { %3879 = vrot.lane.b32.xlu1 %v10409_v63, %s4670_s11 }
 0x843   : > { %v3740_v47 = vpop.permute.xlu2 %3739  ;;  %v3938_v1 = vpop.permute.xlu0 %3937 }
 0x844   : > { %v3728_v37 = vpop.permute.xlu1 %3727  ;;  %v4168_v18 = vsel %vm2867_vm7, %v4144_v58, %v3938_v1  ;;  %v3164_v1 = vld [vmem:[#allocation3 + $0x1d8] sm:$0x3]  ;;  %v4643_v58 = vld [vmem:[#allocation3 + $0x170] sm:$0xff] }
 0x845   : > { %4520 = vmatmul.msk.f32.gmra.mxu2 %vm2895_vm6, %v4168_v18  ;;  %v4099_v61 = vsel %vm2792_vm1, %v9167_v23, %v3728_v37  ;;  %v3403_v18 = vrot.slane %v3163_v62, 1  ;;  %v3404_v8 = vrot.slane %v3164_v1, 1 }
 0x849   : > { %3675 = vrot.lane.b32.xlu2 %v10406_v51, %s4667_s8  ;;  %3961 = vrot.lane.b32.xlu0 %v10408_v35, %s4671_s12  ;;  %v3379_v51 = vrot.slane %v10410_v16, 1 }
 0x84a   : > { %3963 = vrot.lane.b32.xlu1 %v3390_v3, %s4671_s12 }
 0x84b   : > { %v3872_v59 = vpop.permute.xlu2 %3871  ;;  %v3868_v34 = vpop.permute.xlu0 %3867  ;;  %v3381_v57 = vsel %vm511_vm2, %v3379_v51, %v3380_v42 }
 0x84c   : > { %v3812_v11 = vpop.permute.xlu1 %3811  ;;  %v4145_v54 = vsel %vm2842_vm5, %v4121_v39, %v3868_v34 }
 0x84d   : > { %v4169_v20 = vsel %vm2867_vm7, %v4145_v54, %v3940_v26  ;;  %v4009_v26 = vsel %vm1721_vm13, %v4642_v36, %v10413_v17  ;;  %v3413_v54 = vrot.slane %v3164_v1, 2  ;;  %v10425_v1 = vld [vmem:[#allocation48_spill] sm:$0xff] }
 0x84e   : > { %4521 = vmatmul.msk.f32.gmra.mxu2 %vm2895_vm6, %v4169_v20  ;;  %v4033_v46 = vsel %vm2718_vm15, %v4009_v26, %v10414_v19  ;;  %v10417_v20 = vld [vmem:[#allocation7_spill] sm:$0xff] }
 0x84f   : > { %v4057_v2 = vsel %vm1455_vm12, %v4033_v46, %v8987_v48 }
 0x851   : > { %3807 = vrot.lane.b32.xlu2 %v4642_v36, %s4669_s10  ;;  %3735 = vrot.lane.b32.xlu0 %v10411_v5, %s4668_s9  ;;  %v4010_v36 = vsel %vm1721_vm13, %v4643_v58, %v10417_v20 }
 0x852   : > { %3737 = vrot.lane.b32.xlu1 %v10412_v49, %s4668_s9 }
 0x853   : > { %v3956_v21 = vpop.permute.xlu2 %3955  ;;  %v3798_v32 = vpop.permute.xlu0 %3797 }
 0x854   : > { %v3944_v14 = vpop.permute.xlu1 %3943  ;;  %v4122_v13 = vsel %vm2817_vm4, %v4098_v60, %v3798_v32 }
 0x855   : > { %v4146_v56 = vsel %vm2842_vm5, %v4122_v13, %v3870_v0  ;;  %v10415_v0 = vld [vmem:[#allocation21_spill] sm:$0xff] }
 0x856   : > { %v4170_v33 = vsel %vm2867_vm7, %v4146_v56, %v3942_v15 }
 0x857   : > { %4522 = vmatmul.msk.f32.gmra.mxu2 %vm2895_vm6, %v4170_v33 }
 0x859   : > { %3891 = vrot.lane.b32.xlu2 %v3381_v57, %s4670_s11  ;;  %3819 = vrot.lane.b32.xlu0 %v10410_v16, %s4669_s10 }
 0x85a   : > { %3821 = vrot.lane.b32.xlu1 %v3163_v62, %s4669_s10  ;;  %v10420_v62 = vld [vmem:[#allocation66_spill] sm:$0xff] }
 0x85b   : > { %v9362_v24 = vpop.permute.xlu2 %3741  ;;  %v3668_v44 = vpop.permute.xlu0 %3667 }
 0x85c   : > { %v3730_v50 = vpop.permute.xlu1 %3729  ;;  %v4081_v40 = vsel %vm2767_vm0, %v4057_v2, %v3668_v44 }
 0x85d   : > { %v4105_v15 = vsel %vm2792_vm1, %v4081_v40, %v3740_v47  ;;  %v10421_v40 = vld [vmem:[#allocation25_spill] sm:$0xff] }
 0x85e   : > { %v4129_v52 = vsel %vm2817_vm4, %v4105_v15, %v3812_v11  ;;  %v3405_v11 = vsel %vm511_vm2, %v3403_v18, %v3404_v8 }
 0x861   : > { %3665 = vrot.lane.b32.xlu2 %v10409_v63, %s4667_s8  ;;  %3951 = vrot.lane.b32.xlu0 %v10412_v49, %s4671_s12  ;;  %v10418_v49 = vld [vmem:[#allocation26_spill] sm:$0xff] }
 0x862   : > { %3953 = vrot.lane.b32.xlu1 %v10390_v25, %s4671_s12  ;;  %v9384_v25 = vld [vmem:[%s9608_s6] ss:$0 sm:$0xff]  ;;  %v4034_v60 = vsel %vm2718_vm15, %v4010_v36, %v10418_v49 }
 0x863   : > { %v3874_v41 = vpop.permute.xlu2 %3873  ;;  %v3800_v6 = vpop.permute.xlu0 %3799 }
 0x864   : > { %v3814_v10 = vpop.permute.xlu1 %3813  ;;  %v4123_v35 = vsel %vm2817_vm4, %v4099_v61, %v3800_v6 }
 0x865   : > { %v4147_v27 = vsel %vm2842_vm5, %v4123_v35, %v3872_v59 }
 0x866   : > { %v4171_v23 = vsel %vm2867_vm7, %v4147_v27, %v3944_v14  ;;  %v10419_v14 = vld [vmem:[#allocation15_spill] sm:$0xff] }
 0x867   : > { %4523 = vmatmul.msk.f32.gmra.mxu2 %vm2895_vm6, %v4171_v23  ;;  %v4058_v13 = vsel %vm1455_vm12, %v4034_v60, %v10419_v14  ;;  %v10427_v14 = vld [vmem:[#allocation89_spill] sm:$0xff] }
 0x868   : > { %v4275_v28 = vpop.f32.mrf.mxu2 }
 0x869   : > { %v4276_v48 = vadd.f32 %v9384_v25, %v4275_v28  ;;  %3749 = vrot.lane.b32.xlu2 %v3390_v3, %s4668_s9  ;;  %3677 = vrot.lane.b32.xlu0 %v3381_v57, %s4667_s8  ;;  %v10416_v3 = vld [vmem:[#allocation46_spill] sm:$0xff]  ;;  %v10422_v28 = vld [vmem:[#allocation115_spill] sm:$0xff] }
 0x86b   : > { %v4347_v30 = vadd.f32 %v4276_v48, %v10415_v0  ;;  %v3958_v29 = vpop.permute.xlu2 %3957  ;;  %v3884_v4 = vpop.permute.xlu0 %3883 }
 0x86c   : > { %v3946_v63 = vpop.permute.xlu1 %3945  ;;  %v4153_v9 = vsel %vm2842_vm5, %v4129_v52, %v3884_v4 }
 0x86d   : > { %4371 = vst.msk [vmem:[%s9397_s13] sm:$0xff] %vm1721_vm13, %v4347_v30  ;;  %v4177_v47 = vsel %vm2867_vm7, %v4153_v9, %v3956_v21  ;;  %v4100_v21 = vsel %vm2792_vm1, %v9105_v55, %v3730_v50  ;;  %v10424_v9 = vld [vmem:[#allocation106_spill] sm:$0xff] }
 0x86e   : > { %4529 = vmatmul.msk.f32.vlgmr.msra.gmra.mxu3 %vm2895_vm6, %v4177_v47 }
 0x871   : > { %3881 = vrot.lane.b32.xlu2 %v10391_v43, %s4670_s11  ;;  %3809 = vrot.lane.b32.xlu0 %v4643_v58, %s4669_s10  ;;  %v4278_v37 = vpop.f32.mrf.mxu2  ;;  %v3414_v43 = vsel %vm584_vm3, %v3412_v31, %v3413_v54 }
 0x872   : > { %v4279_v16 = vadd.f32 %v9384_v25, %v4278_v37 }
 0x873   : > { %v3670_v38 = vpop.permute.xlu0 %3669  ;;  %v3744_v39 = vpop.permute.xlu2 %3743 }
 0x874   : > { %v4348_v59 = vadd.f32 %v4279_v16, %v10416_v3  ;;  %v3732_v34 = vpop.permute.xlu1 %3731  ;;  %v4082_v33 = vsel %vm2767_vm0, %v4058_v13, %v3670_v38 }
 0x875   : > { %v4106_v55 = vsel %vm2792_vm1, %v4082_v33, %v9362_v24  ;;  %v4101_v4 = vsel %vm2792_vm1, %v9099_v12, %v3732_v34  ;;  %v10429_v33 = vld [vmem:[#allocation35_spill] sm:$0xff] }
 0x876   : > { %4372 = vst.msk [vmem:[%s9397_s13 + $0x8] sm:$0xff] %vm1721_vm13, %v4348_v59  ;;  %v4130_v50 = vsel %vm2817_vm4, %v4106_v55, %v3814_v10  ;;  %v4644_v10 = vld [vmem:[#allocation3 + $0x180] sm:$0xff] }
 0x877   : > { %v4011_v48 = vsel %vm1721_vm13, %v4644_v10, %v10422_v28 }
 0x879   : > { %3893 = vrot.lane.b32.xlu0 %v3405_v11, %s4670_s11  ;;  %3965 = vrot.lane.b32.xlu2 %v3414_v43, %s4671_s12  ;;  %v10426_v43 = vld [vmem:[#allocation24_spill] sm:$0xff] }
 0x87a   : > { %v4281_v5 = vpop.f32.mrf.mxu2 }
 0x87b   : > { %v4282_v32 = vadd.f32 %v9384_v25, %v4281_v5  ;;  %v3802_v51 = vpop.permute.xlu0 %3801  ;;  %v3876_v17 = vpop.permute.xlu2 %3875 }
 0x87c   : > { %v3816_v42 = vpop.permute.xlu1 %3815  ;;  %v4124_v56 = vsel %vm2817_vm4, %v4100_v21, %v3802_v51  ;;  %v4645_v51 = vld [vmem:[#allocation3 + $0x110] sm:$0xff] }
 0x87d   : > { %v4349_v57 = vadd.f32 %v4282_v32, %v10420_v62  ;;  %v4148_v44 = vsel %vm2842_vm5, %v4124_v56, %v3874_v41  ;;  %v4006_v13 = vsel %vm1721_vm13, %v4645_v51, %v10427_v14  ;;  %v10436_v51 = vld [vmem:[#allocation68_spill] sm:$0xff] }
 0x87e   : > { %v4172_v26 = vsel %vm2867_vm7, %v4148_v44, %v3946_v63 }
 0x87f   : > { %4373 = vst.msk [vmem:[%s9397_s13 + $0x10] sm:$0xff] %vm1721_vm13, %v4349_v57  ;;  %4524 = vmatmul.msk.f32.gmra.mxu2 %vm2895_vm6, %v4172_v26 }
 0x883   : > { %v3886_v19 = vpop.permute.xlu0 %3885  ;;  %v3960_v41 = vpop.permute.xlu2 %3959 }
 0x884   : > { %v3948_v46 = vpop.permute.xlu1 %3947  ;;  %v4154_v61 = vsel %vm2842_vm5, %v4130_v50, %v3886_v19 }
 0x885   : > { %v4178_v6 = vsel %vm2867_vm7, %v4154_v61, %v3958_v29  ;;  %v10423_v29 = vld [vmem:[#allocation92_spill] sm:$0xff] }
 0x886   : > { %4530 = vmatmul.msk.f32.gmra.mxu3 %vm2895_vm6, %v4178_v6  ;;  %v4035_v52 = vsel %vm2718_vm15, %v4011_v48, %v10423_v29 }
 0x887   : > { %v4059_v47 = vsel %vm1455_vm12, %v4035_v52, %v10424_v9 }
 0x888   : > { %v4284_v2 = vpop.f32.mrf.mxu2 }
 0x889   : > { %v4285_v35 = vadd.f32 %v9384_v25, %v4284_v2  ;;  %v10430_v2 = vld [vmem:[#allocation8_spill] sm:$0xff] }
 0x88b   : > { %v4350_v27 = vadd.f32 %v4285_v35, %v10421_v40  ;;  %v3672_v23 = vpop.permute.xlu0 %3671  ;;  %v3734_v0 = vpop.permute.xlu2 %3733 }
 0x88c   : > { %v3674_v15 = vpop.permute.xlu1 %3673  ;;  %v4083_v18 = vsel %vm2767_vm0, %v4059_v47, %v3672_v23  ;;  %v4646_v47 = vld [vmem:[#allocation3 + $0x140] sm:$0xff] }
 0x88d   : > { %4374 = vst.msk [vmem:[%s9397_s13 + $0x18] sm:$0xff] %vm1721_vm13, %v4350_v27  ;;  %v4107_v12 = vsel %vm2792_vm1, %v4083_v18, %v3744_v39  ;;  %v10433_v18 = vld [vmem:[#allocation102_spill] sm:$0xff] }
 0x88e   : > { %v4131_v59 = vsel %vm2817_vm4, %v4107_v12, %v3816_v42  ;;  %v10428_v42 = vld [vmem:[#allocation121_spill] sm:$0xff] }
 0x88f   : > { %v4030_v56 = vsel %vm2718_vm15, %v4006_v13, %v10428_v42 }
 0x890   : > { %v4054_v44 = vsel %vm1455_vm12, %v4030_v56, %v8963_v22 }
 0x891   : > { %v4287_v24 = vpop.f32.mrf.mxu2 }
 0x892   : > { %v4288_v30 = vadd.f32 %v9384_v25, %v4287_v24 }
 0x893   : > { %v3804_v63 = vpop.permute.xlu0 %3803  ;;  %v3818_v11 = vpop.permute.xlu2 %3817 }
 0x894   : > { %v4351_v58 = vadd.f32 %v4288_v30, %v10425_v1  ;;  %v4125_v37 = vsel %vm2817_vm4, %v4101_v4, %v3804_v63  ;;  %v3806_v16 = vpop.permute.xlu1 %3805  ;;  %v10431_v30 = vld [vmem:[#allocation27_spill] sm:$0xff]  ;;  %v10432_v1 = vld [vmem:[#allocation84_spill] sm:$0xff] }
 0x895   : > { %v4149_v8 = vsel %vm2842_vm5, %v4125_v37, %v3876_v17 }
 0x896   : > { %4375 = vst.msk [vmem:[%s9397_s13 + $0x20] sm:$0xff] %vm1721_vm13, %v4351_v58  ;;  %v4173_v38 = vsel %vm2867_vm7, %v4149_v8, %v3948_v46  ;;  %v4007_v58 = vsel %vm1721_vm13, %v4646_v47, %v10432_v1  ;;  %v10442_v47 = vld [vmem:[#allocation70_spill] sm:$0xff] }
 0x897   : > { %4525 = vmatmul.msk.f32.gmra.mxu2 %vm2895_vm6, %v4173_v38  ;;  %v10434_v38 = vld [vmem:[#allocation12_spill] sm:$0xff] }
 0x89a   : > { %v4290_v31 = vpop.f32.mrf.mxu2 }
 0x89b   : > { %v4291_v3 = vadd.f32 %v9384_v25, %v4290_v31  ;;  %v3888_v34 = vpop.permute.xlu0 %3887  ;;  %v3950_v49 = vpop.permute.xlu2 %3949 }
 0x89c   : > { %v4155_v54 = vsel %vm2842_vm5, %v4131_v59, %v3888_v34  ;;  %v3890_v5 = vpop.permute.xlu1 %3889 }
 0x89d   : > { %v4352_v20 = vadd.f32 %v4291_v3, %v10426_v43  ;;  %v4179_v36 = vsel %vm2867_vm7, %v4155_v54, %v3960_v41  ;;  %v4084_v41 = vsel %vm2767_vm0, %v9026_v45, %v3674_v15  ;;  %v10435_v3 = vld [vmem:[#allocation67_spill] sm:$0xff] }
 0x89e   : > { %4531 = vmatmul.msk.f32.gmra.mxu3 %vm2895_vm6, %v4179_v36 }
 0x89f   : > { %4376 = vst.msk [vmem:[%s9397_s13 + $0x28] sm:$0xff] %vm1721_vm13, %v4352_v20 }
 0x8a3   : > { %v3662_v39 = vpop.permute.xlu0 %3661  ;;  %v3676_v26 = vpop.permute.xlu2 %3675 }
 0x8a4   : > { %v3664_v21 = vpop.permute.xlu1 %3663  ;;  %v4078_v17 = vsel %vm2767_vm0, %v4054_v44, %v3662_v39  ;;  %v4085_v8 = vsel %vm2767_vm0, %v8948_v7, %v3676_v26  ;;  %v10437_v44 = vld [vmem:[#allocation59_spill] sm:$0xff]  ;;  %v4647_v26 = vld [vmem:[#allocation3 + $0x150] sm:$0xff] }
 0x8a5   : > { %v4102_v55 = vsel %vm2792_vm1, %v4078_v17, %v3734_v0 }
 0x8a6   : > { %v4126_v61 = vsel %vm2817_vm4, %v4102_v55, %v3806_v16  ;;  %v4031_v16 = vsel %vm2718_vm15, %v4007_v58, %v10433_v18  ;;  %v10438_v55 = vld [vmem:[#allocation77_spill] sm:$0xff]  ;;  %v10443_v18 = vld [vmem:[#allocation42_spill] sm:$0xff] }
 0x8a7   : > { %v4055_v12 = vsel %vm1455_vm12, %v4031_v16, %v10434_v38 }
 0x8a8   : > { %v4293_v60 = vpop.f32.mrf.mxu2 }
 0x8a9   : > { %v4294_v32 = vadd.f32 %v9384_v25, %v4293_v60 }
 0x8ab   : > { %v4353_v62 = vadd.f32 %v4294_v32, %v10429_v33  ;;  %v3746_v57 = vpop.permute.xlu0 %3745  ;;  %v3808_v24 = vpop.permute.xlu2 %3807 }
 0x8ac   : > { %v3748_v46 = vpop.permute.xlu1 %3747  ;;  %v4108_v40 = vsel %vm2792_vm1, %v4084_v41, %v3746_v57 }
 0x8ad   : > { %4377 = vst.msk [vmem:[%s9397_s13 + $0x30] sm:$0xff] %vm1721_vm13, %v4353_v62  ;;  %v4132_v23 = vsel %vm2817_vm4, %v4108_v40, %v3818_v11  ;;  %v4109_v31 = vsel %vm2792_vm1, %v4085_v8, %v3748_v46  ;;  %v4079_v11 = vsel %vm2767_vm0, %v4055_v12, %v3664_v21  ;;  %v10444_v12 = vld [vmem:[#allocation76_spill] sm:$0xff] }
 0x8ae   : > { %v4156_v15 = vsel %vm2842_vm5, %v4132_v23, %v3890_v5 }
 0x8b1   : > { %v4296_v50 = vpop.f32.mrf.mxu2 }
 0x8b2   : > { %v4297_v19 = vadd.f32 %v9384_v25, %v4296_v50  ;;  %v4008_v50 = vsel %vm1721_vm13, %v4647_v26, %v10438_v55  ;;  %v10451_v55 = vld [vmem:[#allocation53_spill] sm:$0xff] }
 0x8b3   : > { %v3878_v6 = vpop.permute.xlu0 %3877  ;;  %v3892_v4 = vpop.permute.xlu2 %3891 }
 0x8b4   : > { %v4354_v35 = vadd.f32 %v4297_v19, %v10430_v2  ;;  %v4150_v22 = vsel %vm2842_vm5, %v4126_v61, %v3878_v6  ;;  %v3880_v0 = vpop.permute.xlu1 %3879  ;;  %v10439_v19 = vld [vmem:[#allocation17_spill] sm:$0xff]  ;;  %v10440_v61 = vld [vmem:[#allocation14_spill] sm:$0xff] }
 0x8b5   : > { %v4174_v27 = vsel %vm2867_vm7, %v4150_v22, %v3950_v49  ;;  %v4032_v46 = vsel %vm2718_vm15, %v4008_v50, %v10439_v19 }
 0x8b6   : > { %4378 = vst.msk [vmem:[%s9397_s13 + $0x38] sm:$0xff] %vm1721_vm13, %v4354_v35  ;;  %4526 = vmatmul.msk.f32.gmra.mxu2 %vm2895_vm6, %v4174_v27  ;;  %v4056_v6 = vsel %vm1455_vm12, %v4032_v46, %v10440_v61  ;;  %v10452_v61 = vld [vmem:[#allocation28_spill] sm:$0xff] }
 0x8ba   : > { %v4299_v10 = vpop.f32.mrf.mxu2 }
 0x8bb   : > { %v4300_v28 = vadd.f32 %v9384_v25, %v4299_v10  ;;  %v3962_v45 = vpop.permute.xlu0 %3961  ;;  %v3666_v7 = vpop.permute.xlu2 %3665 }
 0x8bc   : > { %v4180_v48 = vsel %vm2867_vm7, %v4156_v15, %v3962_v45  ;;  %v3964_v63 = vpop.permute.xlu1 %3963  ;;  %v4080_v41 = vsel %vm2767_vm0, %v4056_v6, %v3666_v7 }
 0x8bd   : > { %v4355_v29 = vadd.f32 %v4300_v28, %v10431_v30  ;;  %4532 = vmatmul.msk.f32.gmra.mxu3 %vm2895_vm6, %v4180_v48 }
 0x8bf   : > { %4379 = vst.msk [vmem:[%s9397_s13 + $0x40] sm:$0xff] %vm1721_vm13, %v4355_v29 }
 0x8c3   : > { %v3736_v52 = vpop.permute.xlu0 %3735  ;;  %v3750_v42 = vpop.permute.xlu2 %3749 }
 0x8c4   : > { %v4103_v43 = vsel %vm2792_vm1, %v4079_v11, %v3736_v52  ;;  %v3738_v39 = vpop.permute.xlu1 %3737 }
 0x8c5   : > { %v4127_v5 = vsel %vm2817_vm4, %v4103_v43, %v3808_v24  ;;  %v4104_v35 = vsel %vm2792_vm1, %v4080_v41, %v3738_v39  ;;  %v10447_v39 = vld [vmem:[#allocation71_spill] sm:$0xff] }
 0x8c6   : > { %v4151_v32 = vsel %vm2842_vm5, %v4127_v5, %v3880_v0 }
 0x8c8   : > { %v4302_v9 = vpop.f32.mrf.mxu2 }
 0x8c9   : > { %v4303_v37 = vadd.f32 %v9384_v25, %v4302_v9 }
 0x8cb   : > { %v4356_v59 = vadd.f32 %v4303_v37, %v10435_v3  ;;  %v3820_v34 = vpop.permute.xlu0 %3819  ;;  %v3882_v2 = vpop.permute.xlu2 %3881 }
 0x8cc   : > { %v4133_v54 = vsel %vm2817_vm4, %v4109_v31, %v3820_v34  ;;  %v3822_v33 = vpop.permute.xlu1 %3821  ;;  %v10445_v34 = vld [vmem:[#allocation63_spill] sm:$0xff] }
 0x8cd   : > { %4380 = vst.msk [vmem:[%s9397_s13 + $0x48] sm:$0xff] %vm1721_vm13, %v4356_v59  ;;  %v4157_v20 = vsel %vm2842_vm5, %v4133_v54, %v3892_v4 }
 0x8ce   : > { %v4181_v36 = vsel %vm2867_vm7, %v4157_v20, %v3964_v63  ;;  %v10446_v20 = vld [vmem:[#allocation49_spill] sm:$0xff] }
 0x8cf   : > { %4533 = vmatmul.msk.f32.gmra.mxu3 %vm2895_vm6, %v4181_v36 }
 0x8d1   : > { %v4305_v49 = vpop.f32.mrf.mxu2 }
 0x8d2   : > { %v4306_v60 = vadd.f32 %v9384_v25, %v4305_v49 }
 0x8d3   : > { %v3952_v21 = vpop.permute.xlu0 %3951  ;;  %v3966_v15 = vpop.permute.xlu2 %3965 }
 0x8d4   : > { %v4357_v14 = vadd.f32 %v4306_v60, %v10436_v51  ;;  %v4175_v13 = vsel %vm2867_vm7, %v4151_v32, %v3952_v21  ;;  %v3954_v27 = vpop.permute.xlu1 %3953  ;;  %v10448_v32 = vld [vmem:[#allocation51_spill] sm:$0xff] }
 0x8d5   : > { %4527 = vmatmul.msk.f32.gmra.mxu2 %vm2895_vm6, %v4175_v13 }
 0x8d6   : > { %4381 = vst.msk [vmem:[%s9397_s13 + $0x50] sm:$0xff] %vm1721_vm13, %v4357_v14 }
 0x8da   : > { %v4308_v56 = vpop.f32.mrf.mxu2 }
 0x8db   : > { %v4309_v62 = vadd.f32 %v9384_v25, %v4308_v56  ;;  %v3678_v57 = vpop.permute.xlu0 %3677 }
 0x8dc   : > { %v4086_v23 = vsel %vm2767_vm0, %v8944_v53, %v3678_v57  ;;  %v10441_v53 = vld [vmem:[#allocation52_spill] sm:$0xff]  ;;  %v10450_v57 = vld [vmem:[#allocation18_spill] sm:$0xff] }
 0x8dd   : > { %v4358_v17 = vadd.f32 %v4309_v62, %v10437_v44  ;;  %v4110_v28 = vsel %vm2792_vm1, %v4086_v23, %v3750_v42  ;;  %v10449_v42 = vld [vmem:[#allocation38_spill] sm:$0xff] }
 0x8de   : > { %v4134_v0 = vsel %vm2817_vm4, %v4110_v28, %v3822_v33 }
 0x8df   : > { %4382 = vst.msk [vmem:[%s9397_s13 + $0x58] sm:$0xff] %vm1721_vm13, %v4358_v17 }
 0x8e3   : > { %v3810_v22 = vpop.permute.xlu0 %3809 }
 0x8e4   : > { %v4128_v40 = vsel %vm2817_vm4, %v4104_v35, %v3810_v22 }
 0x8e5   : > { %v4152_v24 = vsel %vm2842_vm5, %v4128_v40, %v3882_v2 }
 0x8e6   : > { %v4176_v10 = vsel %vm2867_vm7, %v4152_v24, %v3954_v27 }
 0x8e7   : > { %4528 = vmatmul.msk.f32.gmra.mxu2 %vm2895_vm6, %v4176_v10 }
 0x8ea   : > { %v4311_v45 = vpop.f32.mrf.mxu2 }
 0x8eb   : > { %v4312_v48 = vadd.f32 %v9384_v25, %v4311_v45  ;;  %v3894_v30 = vpop.permute.xlu0 %3893 }
 0x8ec   : > { %v4158_v29 = vsel %vm2842_vm5, %v4134_v0, %v3894_v30 }
 0x8ed   : > { %v4359_v52 = vadd.f32 %v4312_v48, %v10441_v53  ;;  %v4182_v4 = vsel %vm2867_vm7, %v4158_v29, %v3966_v15 }
 0x8ee   : > { %4534 = vmatmul.msk.f32.gmra.mxu3 %vm2895_vm6, %v4182_v4 }
 0x8ef   : > { %4383 = vst.msk [vmem:[%s9397_s13 + $0x60] sm:$0xff] %vm1721_vm13, %v4359_v52 }
 0x8f1   : > { %v4329_v63 = vpop.f32.mrf.mxu3 }
 0x8f2   : > { %v4330_v9 = vadd.f32 %v9384_v25, %v4329_v63 }
 0x8f4   : > { %v4365_v1 = vadd.f32 %v4330_v9, %v10442_v47 }
 0x8f6   : > { %4389 = vst.msk [vmem:[%s9397_s13 + $0x90] sm:$0xff] %vm1721_vm13, %v4365_v1 }
 0x902   : > { %v4314_v58 = vpop.f32.mrf.mxu2 }
 0x903   : > { %v4315_v37 = vadd.f32 %v9384_v25, %v4314_v58 }
 0x905   : > { %v4360_v16 = vadd.f32 %v4315_v37, %v10443_v18 }
 0x907   : > { %4384 = vst.msk [vmem:[%s9397_s13 + $0x68] sm:$0xff] %vm1721_vm13, %v4360_v16 }
 0x909   : > { %v4332_v8 = vpop.f32.mrf.mxu3 }
 0x90a   : > { %v4333_v38 = vadd.f32 %v9384_v25, %v4332_v8 }
 0x90c   : > { %v4366_v31 = vadd.f32 %v4333_v38, %v10444_v12 }
 0x90e   : > { %4390 = vst.msk [vmem:[%s9397_s13 + $0x98] sm:$0xff] %vm1721_vm13, %v4366_v31 }
 0x91a   : > { %v4317_v3 = vpop.f32.mrf.mxu2 }
 0x91b   : > { %v4318_v59 = vadd.f32 %v9384_v25, %v4317_v3 }
 0x91d   : > { %v4361_v11 = vadd.f32 %v4318_v59, %v10445_v34 }
 0x91f   : > { %4385 = vst.msk [vmem:[%s9397_s13 + $0x70] sm:$0xff] %vm1721_vm13, %v4361_v11 }
 0x921   : > { %v4335_v54 = vpop.f32.mrf.mxu3 }
 0x922   : > { %v4336_v43 = vadd.f32 %v9384_v25, %v4335_v54 }
 0x924   : > { %v4367_v7 = vadd.f32 %v4336_v43, %v10446_v20 }
 0x926   : > { %4391 = vst.msk [vmem:[%s9397_s13 + $0xa0] sm:$0xff] %vm1721_vm13, %v4367_v7 }
 0x939   : > { %v4320_v36 = vpop.f32.mrf.mxu2 }
 0x93a   : > { %v4321_v5 = vadd.f32 %v9384_v25, %v4320_v36 }
 0x93c   : > { %v4362_v49 = vadd.f32 %v4321_v5, %v10447_v39 }
 0x93e   : > { %4386 = vst.msk [vmem:[%s9397_s13 + $0x78] sm:$0xff] %vm1721_vm13, %v4362_v49 }
 0x940   : > { %v4338_v60 = vpop.f32.mrf.mxu3 }
 0x941   : > { %v4339_v21 = vadd.f32 %v9384_v25, %v4338_v60 }
 0x943   : > { %v4368_v51 = vadd.f32 %v4339_v21, %v10448_v32 }
 0x945   : > { %4392 = vst.msk [vmem:[%s9397_s13 + $0xa8] sm:$0xff] %vm1721_vm13, %v4368_v51 }
 0x952   : > { %v4341_v14 = vpop.f32.mrf.mxu3 }
 0x953   : > { %v4342_v13 = vadd.f32 %v9384_v25, %v4341_v14 }
 0x955   : > { %v4369_v56 = vadd.f32 %v4342_v13, %v10449_v42 }
 0x957   : > { %4393 = vst.msk [vmem:[%s9397_s13 + $0xb0] sm:$0xff] %vm1721_vm13, %v4369_v56 }
 0x958   : > { %v4323_v33 = vpop.f32.mrf.mxu2 }
 0x959   : > { %v4324_v62 = vadd.f32 %v9384_v25, %v4323_v33 }
 0x95b   : > { %v4363_v44 = vadd.f32 %v4324_v62, %v10450_v57 }
 0x95d   : > { %4387 = vst.msk [vmem:[%s9397_s13 + $0x80] sm:$0xff] %vm1721_vm13, %v4363_v44 }
 0x96a   : > { %v4326_v17 = vpop.f32.mrf.mxu2 }
 0x96b   : > { %v4327_v26 = vadd.f32 %v9384_v25, %v4326_v17 }
 0x96d   : > { %v4364_v50 = vadd.f32 %v4327_v26, %v10451_v55 }
 0x96f   : > { %4388 = vst.msk [vmem:[%s9397_s13 + $0x88] sm:$0xff] %vm1721_vm13, %v4364_v50 }
 0x971   : > { %v4344_v19 = vpop.f32.mrf.mxu3 }
 0x972   : > { %v4345_v46 = vadd.f32 %v9384_v25, %v4344_v19 }
 0x974   : > { %v4370_v6 = vadd.f32 %v4345_v46, %v10452_v61 }
 0x976   : > { %4394 = vst.msk [vmem:[%s9397_s13 + $0xb8] sm:$0xff] %vm1721_vm13, %v4370_v6 }
 0x977 PF: > { %s17_s24 = sadd.s32 1, %s4654_s24  }
 0x978   : > { %p14_p4 = scmp.ge.s32.totalorder %s17_s24, 4  }
 0x97a   :  { %16 = sbr.rel (!%p14_p4) target bundleno = 1 (0x1), region = 80 }

</bundles_post_ra>
